<compile_context>
chip_gen: v7x
topology: tpu7x:2x2x1
jax: 0.10.0
libtpu: 0.0.40
codegen_flags: <defaults>
</compile_context>

<pallas_src>
import functools
import numpy as np
import jax
import jax.numpy as jnp
from jax.experimental import pallas as pl
from jax.experimental.pallas import tpu as pltpu

BN_EPS = 1e-5
LAYER_CFG = ((64, 1), (128, 2), (256, 2), (512, 2))   # ResNet18 (planes, stride)
VMEM_LIMIT = 32 * 1024 * 1024                          # safe on v5e/v6e/v7x


def _round_up(x, m):
    return -(-x // m) * m


# ----------------------------- Pallas kernels ------------------------------

def _conv_mm_kernel(*refs, relu, has_res):
    """Tiled matmul with fused BN-shift (+optional residual add) (+optional ReLU)."""
    if has_res:
        x_ref, w_ref, shift_ref, res_ref, o_ref, acc_ref = refs
    else:
        x_ref, w_ref, shift_ref, o_ref, acc_ref = refs

    k = pl.program_id(2)

    @pl.when(k == 0)
    def _():
        acc_ref[...] = jnp.zeros_like(acc_ref)

    acc_ref[...] += jnp.dot(x_ref[...], w_ref[...],
                            preferred_element_type=jnp.float32)

    @pl.when(k == pl.num_programs(2) - 1)
    def _():
        y = acc_ref[...] + shift_ref[...]           # folded-BN shift (f32 epilogue)
        if has_res:
            y = y + res_ref[...]                    # fused residual add
        if relu:
            y = jnp.maximum(y, 0.0)
        o_ref[...] = y


def _choose_k_tiling(K):
    Kp = _round_up(K, 128)
    if Kp <= 512:
        return Kp, Kp
    Kp = _round_up(K, 256)
    tk = 512 if Kp % 512 == 0 else 256
    return Kp, tk


def matmul_affine(x, w, shift, relu, residual=None):
    """x:(M,K) @ w:(K,N) + shift:(1,N) [+ residual:(M,N)] [-> relu], f32 out."""
    M, K = x.shape
    _, N = w.shape
    Kp, tk = _choose_k_tiling(K)
    tm = min(256, _round_up(M, 8))
    Mp = _round_up(M, tm)
    tn = min(256, _round_up(N, 128))
    Np = _round_up(N, tn)

    xb = jnp.pad(x, ((0, Mp - M), (0, Kp - K))).astype(jnp.bfloat16)
    wb = jnp.pad(w, ((0, Kp - K), (0, Np - N))).astype(jnp.bfloat16)
    sp = jnp.pad(shift, ((0, 0), (0, Np - N)))

    in_specs = [
        pl.BlockSpec((tm, tk), lambda i, j, k: (i, k)),
        pl.BlockSpec((tk, tn), lambda i, j, k: (k, j)),
        pl.BlockSpec((1, tn), lambda i, j, k: (0, j)),
    ]
    args = [xb, wb, sp]
    has_res = residual is not None
    if has_res:
        rp = jnp.pad(residual, ((0, Mp - M), (0, Np - N)))
        in_specs.append(pl.BlockSpec((tm, tn), lambda i, j, k: (i, j)))
        args.append(rp)

    out = pl.pallas_call(
        functools.partial(_conv_mm_kernel, relu=relu, has_res=has_res),
        out_shape=jax.ShapeDtypeStruct((Mp, Np), jnp.float32),
        grid=(Mp // tm, Np // tn, Kp // tk),
        in_specs=in_specs,
        out_specs=pl.BlockSpec((tm, tn), lambda i, j, k: (i, j)),
        scratch_shapes=[pltpu.VMEM((tm, tn), jnp.float32)],
        compiler_params=pltpu.CompilerParams(
            dimension_semantics=("parallel", "parallel", "arbitrary"),
            vmem_limit_bytes=VMEM_LIMIT),
    )(*args)
    return out[:M, :N]


def _head_kernel(x_ref, w1_ref, b1_ref, w2_ref, b2_ref, w3_ref, b3_ref, o_ref,
                 *, num_classes):
    x = x_ref[...]
    h = jnp.dot(x, w1_ref[...], preferred_element_type=jnp.float32) + b1_ref[...]
    h = jnp.maximum(h, 0.0)                                           # fc1 + relu
    h = jnp.dot(h.astype(jnp.bfloat16), w2_ref[...],
                preferred_element_type=jnp.float32) + b2_ref[...]
    h = jnp.maximum(h, 0.0)                                           # fc2 + relu
    logits = jnp.dot(h.astype(jnp.bfloat16), w3_ref[...],
                     preferred_element_type=jnp.float32) + b3_ref[...]
    # mask padded class columns so the softmax normalizer only sees real classes
    col = jax.lax.broadcasted_iota(jnp.int32, logits.shape, 1)
    logits = jnp.where(col < num_classes, logits, -1e30)
    m = jnp.max(logits, axis=1, keepdims=True)                        # softmax(dim=1)
    e = jnp.exp(logits - m)
    o_ref[...] = e / jnp.sum(e, axis=1, keepdims=True)


def classifier_head(feats, w1, b1, w2, b2, w3, b3):
    B, D = feats.shape
    H1, H2, C = w1.shape[1], w2.shape[1], w3.shape[1]
    Bp = _round_up(B, 8)
    Dp = _round_up(D, 128)
    H1p = _round_up(H1, 128)
    H2p = _round_up(H2, 128)
    Cp = _round_up(C, 128)

    f = jnp.pad(feats, ((0, Bp - B), (0, Dp - D))).astype(jnp.bfloat16)
    w1p = jnp.pad(w1, ((0, Dp - D), (0, H1p - H1))).astype(jnp.bfloat16)
    b1p = jnp.pad(b1, ((0, 0), (0, H1p - H1)))
    w2p = jnp.pad(w2, ((0, H1p - H1), (0, H2p - H2))).astype(jnp.bfloat16)
    b2p = jnp.pad(b2, ((0, 0), (0, H2p - H2)))
    w3p = jnp.pad(w3, ((0, H2p - H2), (0, Cp - C))).astype(jnp.bfloat16)
    b3p = jnp.pad(b3, ((0, 0), (0, Cp - C)))

    args = (f, w1p, b1p, w2p, b2p, w3p, b3p)
    in_specs = [pl.BlockSpec(a.shape, lambda i: (0, 0)) for a in args]
    out = pl.pallas_call(
        functools.partial(_head_kernel, num_classes=C),
        out_shape=jax.ShapeDtypeStruct((Bp, Cp), jnp.float32),
        grid=(1,),
        in_specs=in_specs,
        out_specs=pl.BlockSpec((Bp, Cp), lambda i: (0, 0)),
        compiler_params=pltpu.CompilerParams(
            dimension_semantics=("arbitrary",),
            vmem_limit_bytes=VMEM_LIMIT),
    )(*args)
    return out[:B, :C]


# ------------------------------- JAX glue -----------------------------------

def fold_bn(bn):
    scale = bn['gamma'] / jnp.sqrt(bn['var'] + BN_EPS)      # (C,)
    shift = bn['beta'] - bn['mean'] * scale                 # (C,)
    return scale, shift.reshape(1, -1)


def im2col_nhwc(x, kh, kw, stride, padding):
    # TODO(synk): im2col patch extraction kept in plain JAX; an implicit-GEMM
    # conv kernel (in-kernel window gather) would avoid materializing patches.
    n, h, w, c = x.shape
    xp = jnp.pad(x, ((0, 0), (padding, padding), (padding, padding), (0, 0)))
    ho = (h + 2 * padding - kh) // stride + 1
    wo = (w + 2 * padding - kw) // stride + 1
    cols = []
    for i in range(kh):
        for j in range(kw):
            cols.append(xp[:, i:i + stride * (ho - 1) + 1:stride,
                               j:j + stride * (wo - 1) + 1:stride, :])
    patches = jnp.stack(cols, axis=3)                        # (n, ho, wo, kh*kw, c)
    return patches.reshape(n * ho * wo, kh * kw * c), ho, wo


def conv_bn(x, w, bn, stride, padding, relu, residual=None):
    """x NHWC, w PyTorch (Cout, Cin, kh, kw). Fused conv+BN(+residual)(+ReLU)."""
    cout, cin, kh, kw = w.shape
    scale, shift = fold_bn(bn)
    # (kh, kw, cin, cout) matches the (kh, kw, c) ordering of im2col patches;
    # BN scale is pre-multiplied into the weight columns.
    w_mat = w.transpose(2, 3, 1, 0).reshape(kh * kw * cin, cout) * scale
    patches, ho, wo = im2col_nhwc(x, kh, kw, stride, padding)
    res2 = None if residual is None else residual.reshape(-1, cout)
    y = matmul_affine(patches, w_mat, shift, relu, res2)     # Pallas tiled matmul
    return y.reshape(x.shape[0], ho, wo, cout)


def maxpool_3x3_s2_p1(x):
    # TODO(synk): small 3x3 max-pool kept in plain JAX (reduce_window glue).
    return jax.lax.reduce_window(
        x, -jnp.inf, jax.lax.max,
        window_dimensions=(1, 3, 3, 1),
        window_strides=(1, 2, 2, 1),
        padding=((0, 0), (1, 1), (1, 1), (0, 0)))


def basic_block(x, blk, stride):
    out = conv_bn(x, blk['conv1_w'], blk['bn1'], stride, 1, relu=True)
    if 'down_w' in blk:
        identity = conv_bn(x, blk['down_w'], blk['down_bn'], stride, 0, relu=False)
    else:
        identity = x
    # conv2 + bn2 + residual add + ReLU fused into a single Pallas matmul epilogue
    return conv_bn(out, blk['conv2_w'], blk['bn2'], 1, 1, relu=True,
                   residual=identity)


def st_classifier_forward(params, x):
    x = jnp.transpose(x, (0, 2, 3, 1))                       # NCHW -> NHWC, once
    # --- ResNet18 encoder (fc = Identity) ---
    x = conv_bn(x, params['conv1_w'], params['bn1'], 2, 3, relu=True)
    x = maxpool_3x3_s2_p1(x)
    for li, (_, stride) in enumerate(LAYER_CFG):
        for bi in range(2):
            s = stride if bi == 0 else 1
            x = basic_block(x, params['layers'][li][bi], s)
    feats = jnp.mean(x, axis=(1, 2))                         # adaptive avg pool -> (N, 512)
    # --- fc1 -> relu -> fc2 -> relu -> out -> softmax (single fused Pallas kernel) ---
    w1, b1 = params['fc1']
    w2, b2 = params['fc2']
    w3, b3 = params['out']
    return classifier_head(feats, w1, b1, w2, b2, w3, b3)


# --------------------------- parameter creation ------------------------------

def init_params(key, num_classes):
    keys = iter(jax.random.split(key, 128))

    def conv_w(cout, cin, kh, kw):
        std = 1.0 / np.sqrt(cin * kh * kw)
        return jax.random.normal(next(keys), (cout, cin, kh, kw), jnp.float32) * std

    def bn(c):
        return dict(
            gamma=jax.random.uniform(next(keys), (c,), jnp.float32, 0.5, 1.5),
            beta=jax.random.normal(next(keys), (c,), jnp.float32) * 0.1,
            mean=jax.random.normal(next(keys), (c,), jnp.float32) * 0.1,
            var=jax.random.uniform(next(keys), (c,), jnp.float32, 0.5, 1.5),
        )

    def linear(din, dout):
        std = 1.0 / np.sqrt(din)
        w = jax.random.normal(next(keys), (din, dout), jnp.float32) * std   # (in, out)
        b = jax.random.normal(next(keys), (1, dout), jnp.float32) * std
        return w, b

    params = dict(conv1_w=conv_w(64, 3, 7, 7), bn1=bn(64), layers=[])
    in_c = 64
    for planes, stride in LAYER_CFG:
        blocks = []
        for b_idx in range(2):
            s = stride if b_idx == 0 else 1
            blk = dict(
                conv1_w=conv_w(planes, in_c, 3, 3), bn1=bn(planes),
                conv2_w=conv_w(planes, planes, 3, 3), bn2=bn(planes),
            )
            if s != 1 or in_c != planes:
                blk['down_w'] = conv_w(planes, in_c, 1, 1)
                blk['down_bn'] = bn(planes)
            blocks.append(blk)
            in_c = planes
        params['layers'].append(blocks)
    params['fc1'] = linear(512, 128)
    params['fc2'] = linear(128, 64)
    params['out'] = linear(64, num_classes)
    return params


# ----------------------------------- main ------------------------------------

if __name__ == "__main__":
    num_classes = 10
    key = jax.random.PRNGKey(0)
    pkey, xkey = jax.random.split(key)
    params = init_params(pkey, num_classes)

    # Small 3-channel image; 32x32 keeps ResNet18's stride pattern valid (ends at 1x1).
    x = jax.random.normal(xkey, (2, 3, 32, 32), jnp.float32)

    forward = jax.jit(st_classifier_forward)
    probs = forward(params, x)
    probs = jax.block_until_ready(probs)

    assert probs.shape == (2, num_classes), probs.shape
    row_sums = np.asarray(jnp.sum(probs, axis=1))
    assert np.allclose(row_sums, 1.0, atol=1e-4), row_sums
    assert np.all(np.asarray(probs) >= 0.0)
    print("KERNEL_OK")
</pallas_src>

<mosaic_0001>
module attributes {stable_mosaic.version = 11 : i64} {
  func.func @_conv_mm_kernel(%arg0: i32, %arg1: i32, %arg2: i32, %arg3: memref<256x256xbf16, #tpu.memory_space<vmem>>, %arg4: memref<256x128xbf16, #tpu.memory_space<vmem>>, %arg5: memref<1x128xf32, #tpu.memory_space<vmem>>, %arg6: memref<256x128xf32, #tpu.memory_space<vmem>>, %arg7: memref<256x128xf32, #tpu.memory_space<vmem>>) attributes {dimension_semantics = [#tpu.dimension_semantics<parallel>, #tpu.dimension_semantics<parallel>, #tpu.dimension_semantics<arbitrary>], iteration_bounds = array<i64: 2, 1, 1>, scalar_prefetch = 0 : i64, scratch_operands = 1 : i64, tpu.core_type = #tpu.core_type<tc>, window_params = [{transform_indices = @transform_0, window_bounds = array<i64: 256, 256>}, {transform_indices = @transform_1, window_bounds = array<i64: 256, 128>}, {transform_indices = @transform_2, window_bounds = array<i64: 1, 128>}, {transform_indices = @transform_3, window_bounds = array<i64: 256, 128>}]} {
    %c0_i32 = arith.constant 0 : i32
    %0 = arith.cmpi eq, %arg2, %c0_i32 : i32
    %1 = arith.extui %0 : i1 to i32
    %c0_i32_0 = arith.constant 0 : i32
    %2 = arith.cmpi ne, %1, %c0_i32_0 : i32
    scf.if %2 {
      %cst_10 = arith.constant 0.000000e+00 : f32
      %12 = vector.broadcast %cst_10 : f32 to vector<256x128xf32>
      %c0_11 = arith.constant 0 : index
      %c0_12 = arith.constant 0 : index
      %13 = vector.load %arg7[%c0_11, %c0_12] : memref<256x128xf32, #tpu.memory_space<vmem>>, vector<256x128xf32>
      tpu.vector_store %arg7[%c0_11, %c0_12], %12 {strides = array<i32>} : memref<256x128xf32, #tpu.memory_space<vmem>>, vector<256x128xf32>,
    } else {
    }
    %c0 = arith.constant 0 : index
    %c0_1 = arith.constant 0 : index
    %3 = vector.load %arg7[%c0, %c0_1] : memref<256x128xf32, #tpu.memory_space<vmem>>, vector<256x128xf32>
    %c0_2 = arith.constant 0 : index
    %c0_3 = arith.constant 0 : index
    %4 = vector.load %arg3[%c0_2, %c0_3] : memref<256x256xbf16, #tpu.memory_space<vmem>>, vector<256x256xbf16>
    %c0_4 = arith.constant 0 : index
    %c0_5 = arith.constant 0 : index
    %5 = vector.load %arg4[%c0_4, %c0_5] : memref<256x128xbf16, #tpu.memory_space<vmem>>, vector<256x128xbf16>
    %cst = arith.constant dense<0.000000e+00> : vector<256x128xf32>
    %6 = tpu.matmul %4, %5, %cst {dimension_numbers = #tpu.dot_dimension_numbers<[1], [0], [0], [1], [0, 0, 1, 1], [], []>} : vector<256x256xbf16>, vector<256x128xbf16>, vector<256x128xf32> -> vector<256x128xf32>
    %7 = arith.addf %3, %6 : vector<256x128xf32>
    %c0_6 = arith.constant 0 : index
    %c0_7 = arith.constant 0 : index
    %8 = vector.load %arg7[%c0_6, %c0_7] : memref<256x128xf32, #tpu.memory_space<vmem>>, vector<256x128xf32>
    tpu.vector_store %arg7[%c0_6, %c0_7], %7 {strides = array<i32>} : memref<256x128xf32, #tpu.memory_space<vmem>>, vector<256x128xf32>,
    %c0_i32_8 = arith.constant 0 : i32
    %9 = arith.cmpi eq, %arg2, %c0_i32_8 : i32
    %10 = arith.extui %9 : i1 to i32
    %c0_i32_9 = arith.constant 0 : i32
    %11 = arith.cmpi ne, %10, %c0_i32_9 : i32
    scf.if %11 {
      %c0_10 = arith.constant 0 : index
      %c0_11 = arith.constant 0 : index
      %12 = vector.load %arg7[%c0_10, %c0_11] : memref<256x128xf32, #tpu.memory_space<vmem>>, vector<256x128xf32>
      %c0_12 = arith.constant 0 : index
      %c0_13 = arith.constant 0 : index
      %13 = vector.load %arg5[%c0_12, %c0_13] : memref<1x128xf32, #tpu.memory_space<vmem>>, vector<1x128xf32>
      %14 = vector.broadcast %13 : vector<1x128xf32> to vector<256x128xf32>
      %15 = arith.addf %12, %14 : vector<256x128xf32>
      %cst_14 = arith.constant 0.000000e+00 : f32
      %16 = vector.broadcast %cst_14 : f32 to vector<256x128xf32>
      %17 = arith.maximumf %15, %16 : vector<256x128xf32>
      %c0_15 = arith.constant 0 : index
      %c0_16 = arith.constant 0 : index
      %18 = vector.load %arg6[%c0_15, %c0_16] : memref<256x128xf32, #tpu.memory_space<vmem>>, vector<256x128xf32>
      tpu.vector_store %arg6[%c0_15, %c0_16], %17 {strides = array<i32>} : memref<256x128xf32, #tpu.memory_space<vmem>>, vector<256x128xf32>,
    } else {
    }
    return
  }
  func.func @transform_0(%arg0: i32, %arg1: i32, %arg2: i32) -> (i32, i32) {
    %c0_i32 = arith.constant 0 : i32
    return %arg0, %arg2 : i32, i32
  }
  func.func @transform_1(%arg0: i32, %arg1: i32, %arg2: i32) -> (i32, i32) {
    %c0_i32 = arith.constant 0 : i32
    return %arg2, %arg1 : i32, i32
  }
  func.func @transform_2(%arg0: i32, %arg1: i32, %arg2: i32) -> (i32, i32) {
    %c0_i32 = arith.constant 0 : i32
    %c0_i32_0 = arith.constant 0 : i32
    return %c0_i32, %arg1 : i32, i32
  }
  func.func @transform_3(%arg0: i32, %arg1: i32, %arg2: i32) -> (i32, i32) {
    %c0_i32 = arith.constant 0 : i32
    return %arg0, %arg1 : i32, i32
  }
}

module attributes {stable_mosaic.version = 11 : i64} {
  func.func @_conv_mm_kernel(%arg0: i32, %arg1: i32, %arg2: i32, %arg3: memref<128x256xbf16, #tpu.memory_space<vmem>>, %arg4: memref<256x128xbf16, #tpu.memory_space<vmem>>, %arg5: memref<1x128xf32, #tpu.memory_space<vmem>>, %arg6: memref<128x128xf32, #tpu.memory_space<vmem>>, %arg7: memref<128x128xf32, #tpu.memory_space<vmem>>) attributes {dimension_semantics = [#tpu.dimension_semantics<parallel>, #tpu.dimension_semantics<parallel>, #tpu.dimension_semantics<arbitrary>], iteration_bounds = array<i64: 1, 1, 3>, scalar_prefetch = 0 : i64, scratch_operands = 1 : i64, tpu.core_type = #tpu.core_type<tc>, window_params = [{transform_indices = @transform_0, window_bounds = array<i64: 128, 256>}, {transform_indices = @transform_1, window_bounds = array<i64: 256, 128>}, {transform_indices = @transform_2, window_bounds = array<i64: 1, 128>}, {transform_indices = @transform_3, window_bounds = array<i64: 128, 128>}]} {
    %c0_i32 = arith.constant 0 : i32
    %0 = arith.cmpi eq, %arg2, %c0_i32 : i32
    %1 = arith.extui %0 : i1 to i32
    %c0_i32_0 = arith.constant 0 : i32
    %2 = arith.cmpi ne, %1, %c0_i32_0 : i32
    scf.if %2 {
      %cst_9 = arith.constant 0.000000e+00 : f32
      %12 = vector.broadcast %cst_9 : f32 to vector<128x128xf32>
      %c0_10 = arith.constant 0 : index
      %c0_11 = arith.constant 0 : index
      %13 = vector.load %arg7[%c0_10, %c0_11] : memref<128x128xf32, #tpu.memory_space<vmem>>, vector<128x128xf32>
      tpu.vector_store %arg7[%c0_10, %c0_11], %12 {strides = array<i32>} : memref<128x128xf32, #tpu.memory_space<vmem>>, vector<128x128xf32>,
    } else {
    }
    %c0 = arith.constant 0 : index
    %c0_1 = arith.constant 0 : index
    %3 = vector.load %arg7[%c0, %c0_1] : memref<128x128xf32, #tpu.memory_space<vmem>>, vector<128x128xf32>
    %c0_2 = arith.constant 0 : index
    %c0_3 = arith.constant 0 : index
    %4 = vector.load %arg3[%c0_2, %c0_3] : memref<128x256xbf16, #tpu.memory_space<vmem>>, vector<128x256xbf16>
    %c0_4 = arith.constant 0 : index
    %c0_5 = arith.constant 0 : index
    %5 = vector.load %arg4[%c0_4, %c0_5] : memref<256x128xbf16, #tpu.memory_space<vmem>>, vector<256x128xbf16>
    %cst = arith.constant dense<0.000000e+00> : vector<128x128xf32>
    %6 = tpu.matmul %4, %5, %cst {dimension_numbers = #tpu.dot_dimension_numbers<[1], [0], [0], [1], [0, 0, 1, 1], [], []>} : vector<128x256xbf16>, vector<256x128xbf16>, vector<128x128xf32> -> vector<128x128xf32>
    %7 = arith.addf %3, %6 : vector<128x128xf32>
    %c0_6 = arith.constant 0 : index
    %c0_7 = arith.constant 0 : index
    %8 = vector.load %arg7[%c0_6, %c0_7] : memref<128x128xf32, #tpu.memory_space<vmem>>, vector<128x128xf32>
    tpu.vector_store %arg7[%c0_6, %c0_7], %7 {strides = array<i32>} : memref<128x128xf32, #tpu.memory_space<vmem>>, vector<128x128xf32>,
    %c2_i32 = arith.constant 2 : i32
    %9 = arith.cmpi eq, %arg2, %c2_i32 : i32
    %10 = arith.extui %9 : i1 to i32
    %c0_i32_8 = arith.constant 0 : i32
    %11 = arith.cmpi ne, %10, %c0_i32_8 : i32
    scf.if %11 {
      %c0_9 = arith.constant 0 : index
      %c0_10 = arith.constant 0 : index
      %12 = vector.load %arg7[%c0_9, %c0_10] : memref<128x128xf32, #tpu.memory_space<vmem>>, vector<128x128xf32>
      %c0_11 = arith.constant 0 : index
      %c0_12 = arith.constant 0 : index
      %13 = vector.load %arg5[%c0_11, %c0_12] : memref<1x128xf32, #tpu.memory_space<vmem>>, vector<1x128xf32>
      %14 = vector.broadcast %13 : vector<1x128xf32> to vector<128x128xf32>
      %15 = arith.addf %12, %14 : vector<128x128xf32>
      %cst_13 = arith.constant 0.000000e+00 : f32
      %16 = vector.broadcast %cst_13 : f32 to vector<128x128xf32>
      %17 = arith.maximumf %15, %16 : vector<128x128xf32>
      %c0_14 = arith.constant 0 : index
      %c0_15 = arith.constant 0 : index
      %18 = vector.load %arg6[%c0_14, %c0_15] : memref<128x128xf32, #tpu.memory_space<vmem>>, vector<128x128xf32>
      tpu.vector_store %arg6[%c0_14, %c0_15], %17 {strides = array<i32>} : memref<128x128xf32, #tpu.memory_space<vmem>>, vector<128x128xf32>,
    } else {
    }
    return
  }
  func.func @transform_0(%arg0: i32, %arg1: i32, %arg2: i32) -> (i32, i32) {
    %c0_i32 = arith.constant 0 : i32
    return %arg0, %arg2 : i32, i32
  }
  func.func @transform_1(%arg0: i32, %arg1: i32, %arg2: i32) -> (i32, i32) {
    %c0_i32 = arith.constant 0 : i32
    return %arg2, %arg1 : i32, i32
  }
  func.func @transform_2(%arg0: i32, %arg1: i32, %arg2: i32) -> (i32, i32) {
    %c0_i32 = arith.constant 0 : i32
    %c0_i32_0 = arith.constant 0 : i32
    return %c0_i32, %arg1 : i32, i32
  }
  func.func @transform_3(%arg0: i32, %arg1: i32, %arg2: i32) -> (i32, i32) {
    %c0_i32 = arith.constant 0 : i32
    return %arg0, %arg1 : i32, i32
  }
}

module attributes {stable_mosaic.version = 11 : i64} {
  func.func @_conv_mm_kernel(%arg0: i32, %arg1: i32, %arg2: i32, %arg3: memref<128x256xbf16, #tpu.memory_space<vmem>>, %arg4: memref<256x128xbf16, #tpu.memory_space<vmem>>, %arg5: memref<1x128xf32, #tpu.memory_space<vmem>>, %arg6: memref<128x128xf32, #tpu.memory_space<vmem>>, %arg7: memref<128x128xf32, #tpu.memory_space<vmem>>, %arg8: memref<128x128xf32, #tpu.memory_space<vmem>>) attributes {dimension_semantics = [#tpu.dimension_semantics<parallel>, #tpu.dimension_semantics<parallel>, #tpu.dimension_semantics<arbitrary>], iteration_bounds = array<i64: 1, 1, 3>, scalar_prefetch = 0 : i64, scratch_operands = 1 : i64, tpu.core_type = #tpu.core_type<tc>, window_params = [{transform_indices = @transform_0, window_bounds = array<i64: 128, 256>}, {transform_indices = @transform_1, window_bounds = array<i64: 256, 128>}, {transform_indices = @transform_2, window_bounds = array<i64: 1, 128>}, {transform_indices = @transform_3, window_bounds = array<i64: 128, 128>}, {transform_indices = @transform_4, window_bounds = array<i64: 128, 128>}]} {
    %c0_i32 = arith.constant 0 : i32
    %0 = arith.cmpi eq, %arg2, %c0_i32 : i32
    %1 = arith.extui %0 : i1 to i32
    %c0_i32_0 = arith.constant 0 : i32
    %2 = arith.cmpi ne, %1, %c0_i32_0 : i32
    scf.if %2 {
      %cst_9 = arith.constant 0.000000e+00 : f32
      %12 = vector.broadcast %cst_9 : f32 to vector<128x128xf32>
      %c0_10 = arith.constant 0 : index
      %c0_11 = arith.constant 0 : index
      %13 = vector.load %arg8[%c0_10, %c0_11] : memref<128x128xf32, #tpu.memory_space<vmem>>, vector<128x128xf32>
      tpu.vector_store %arg8[%c0_10, %c0_11], %12 {strides = array<i32>} : memref<128x128xf32, #tpu.memory_space<vmem>>, vector<128x128xf32>,
    } else {
    }
    %c0 = arith.constant 0 : index
    %c0_1 = arith.constant 0 : index
    %3 = vector.load %arg8[%c0, %c0_1] : memref<128x128xf32, #tpu.memory_space<vmem>>, vector<128x128xf32>
    %c0_2 = arith.constant 0 : index
    %c0_3 = arith.constant 0 : index
    %4 = vector.load %arg3[%c0_2, %c0_3] : memref<128x256xbf16, #tpu.memory_space<vmem>>, vector<128x256xbf16>
    %c0_4 = arith.constant 0 : index
    %c0_5 = arith.constant 0 : index
    %5 = vector.load %arg4[%c0_4, %c0_5] : memref<256x128xbf16, #tpu.memory_space<vmem>>, vector<256x128xbf16>
    %cst = arith.constant dense<0.000000e+00> : vector<128x128xf32>
    %6 = tpu.matmul %4, %5, %cst {dimension_numbers = #tpu.dot_dimension_numbers<[1], [0], [0], [1], [0, 0, 1, 1], [], []>} : vector<128x256xbf16>, vector<256x128xbf16>, vector<128x128xf32> -> vector<128x128xf32>
    %7 = arith.addf %3, %6 : vector<128x128xf32>
    %c0_6 = arith.constant 0 : index
    %c0_7 = arith.constant 0 : index
    %8 = vector.load %arg8[%c0_6, %c0_7] : memref<128x128xf32, #tpu.memory_space<vmem>>, vector<128x128xf32>
    tpu.vector_store %arg8[%c0_6, %c0_7], %7 {strides = array<i32>} : memref<128x128xf32, #tpu.memory_space<vmem>>, vector<128x128xf32>,
    %c2_i32 = arith.constant 2 : i32
    %9 = arith.cmpi eq, %arg2, %c2_i32 : i32
    %10 = arith.extui %9 : i1 to i32
    %c0_i32_8 = arith.constant 0 : i32
    %11 = arith.cmpi ne, %10, %c0_i32_8 : i32
    scf.if %11 {
      %c0_9 = arith.constant 0 : index
      %c0_10 = arith.constant 0 : index
      %12 = vector.load %arg8[%c0_9, %c0_10] : memref<128x128xf32, #tpu.memory_space<vmem>>, vector<128x128xf32>
      %c0_11 = arith.constant 0 : index
      %c0_12 = arith.constant 0 : index
      %13 = vector.load %arg5[%c0_11, %c0_12] : memref<1x128xf32, #tpu.memory_space<vmem>>, vector<1x128xf32>
      %14 = vector.broadcast %13 : vector<1x128xf32> to vector<128x128xf32>
      %15 = arith.addf %12, %14 : vector<128x128xf32>
      %c0_13 = arith.constant 0 : index
      %c0_14 = arith.constant 0 : index
      %16 = vector.load %arg6[%c0_13, %c0_14] : memref<128x128xf32, #tpu.memory_space<vmem>>, vector<128x128xf32>
      %17 = arith.addf %15, %16 : vector<128x128xf32>
      %cst_15 = arith.constant 0.000000e+00 : f32
      %18 = vector.broadcast %cst_15 : f32 to vector<128x128xf32>
      %19 = arith.maximumf %17, %18 : vector<128x128xf32>
      %c0_16 = arith.constant 0 : index
      %c0_17 = arith.constant 0 : index
      %20 = vector.load %arg7[%c0_16, %c0_17] : memref<128x128xf32, #tpu.memory_space<vmem>>, vector<128x128xf32>
      tpu.vector_store %arg7[%c0_16, %c0_17], %19 {strides = array<i32>} : memref<128x128xf32, #tpu.memory_space<vmem>>, vector<128x128xf32>,
    } else {
    }
    return
  }
  func.func @transform_0(%arg0: i32, %arg1: i32, %arg2: i32) -> (i32, i32) {
    %c0_i32 = arith.constant 0 : i32
    return %arg0, %arg2 : i32, i32
  }
  func.func @transform_1(%arg0: i32, %arg1: i32, %arg2: i32) -> (i32, i32) {
    %c0_i32 = arith.constant 0 : i32
    return %arg2, %arg1 : i32, i32
  }
  func.func @transform_2(%arg0: i32, %arg1: i32, %arg2: i32) -> (i32, i32) {
    %c0_i32 = arith.constant 0 : i32
    %c0_i32_0 = arith.constant 0 : i32
    return %c0_i32, %arg1 : i32, i32
  }
  func.func @transform_3(%arg0: i32, %arg1: i32, %arg2: i32) -> (i32, i32) {
    %c0_i32 = arith.constant 0 : i32
    return %arg0, %arg1 : i32, i32
  }
  func.func @transform_4(%arg0: i32, %arg1: i32, %arg2: i32) -> (i32, i32) {
    %c0_i32 = arith.constant 0 : i32
    return %arg0, %arg1 : i32, i32
  }
}

module attributes {stable_mosaic.version = 11 : i64} {
  func.func @_conv_mm_kernel(%arg0: i32, %arg1: i32, %arg2: i32, %arg3: memref<32x256xbf16, #tpu.memory_space<vmem>>, %arg4: memref<256x128xbf16, #tpu.memory_space<vmem>>, %arg5: memref<1x128xf32, #tpu.memory_space<vmem>>, %arg6: memref<32x128xf32, #tpu.memory_space<vmem>>, %arg7: memref<32x128xf32, #tpu.memory_space<vmem>>) attributes {dimension_semantics = [#tpu.dimension_semantics<parallel>, #tpu.dimension_semantics<parallel>, #tpu.dimension_semantics<arbitrary>], iteration_bounds = array<i64: 1, 1, 3>, scalar_prefetch = 0 : i64, scratch_operands = 1 : i64, tpu.core_type = #tpu.core_type<tc>, window_params = [{transform_indices = @transform_0, window_bounds = array<i64: 32, 256>}, {transform_indices = @transform_1, window_bounds = array<i64: 256, 128>}, {transform_indices = @transform_2, window_bounds = array<i64: 1, 128>}, {transform_indices = @transform_3, window_bounds = array<i64: 32, 128>}]} {
    %c0_i32 = arith.constant 0 : i32
    %0 = arith.cmpi eq, %arg2, %c0_i32 : i32
    %1 = arith.extui %0 : i1 to i32
    %c0_i32_0 = arith.constant 0 : i32
    %2 = arith.cmpi ne, %1, %c0_i32_0 : i32
    scf.if %2 {
      %cst_9 = arith.constant 0.000000e+00 : f32
      %12 = vector.broadcast %cst_9 : f32 to vector<32x128xf32>
      %c0_10 = arith.constant 0 : index
      %c0_11 = arith.constant 0 : index
      %13 = vector.load %arg7[%c0_10, %c0_11] : memref<32x128xf32, #tpu.memory_space<vmem>>, vector<32x128xf32>
      tpu.vector_store %arg7[%c0_10, %c0_11], %12 {strides = array<i32>} : memref<32x128xf32, #tpu.memory_space<vmem>>, vector<32x128xf32>,
    } else {
    }
    %c0 = arith.constant 0 : index
    %c0_1 = arith.constant 0 : index
    %3 = vector.load %arg7[%c0, %c0_1] : memref<32x128xf32, #tpu.memory_space<vmem>>, vector<32x128xf32>
    %c0_2 = arith.constant 0 : index
    %c0_3 = arith.constant 0 : index
    %4 = vector.load %arg3[%c0_2, %c0_3] : memref<32x256xbf16, #tpu.memory_space<vmem>>, vector<32x256xbf16>
    %c0_4 = arith.constant 0 : index
    %c0_5 = arith.constant 0 : index
    %5 = vector.load %arg4[%c0_4, %c0_5] : memref<256x128xbf16, #tpu.memory_space<vmem>>, vector<256x128xbf16>
    %cst = arith.constant dense<0.000000e+00> : vector<32x128xf32>
    %6 = tpu.matmul %4, %5, %cst {dimension_numbers = #tpu.dot_dimension_numbers<[1], [0], [0], [1], [0, 0, 1, 1], [], []>} : vector<32x256xbf16>, vector<256x128xbf16>, vector<32x128xf32> -> vector<32x128xf32>
    %7 = arith.addf %3, %6 : vector<32x128xf32>
    %c0_6 = arith.constant 0 : index
    %c0_7 = arith.constant 0 : index
    %8 = vector.load %arg7[%c0_6, %c0_7] : memref<32x128xf32, #tpu.memory_space<vmem>>, vector<32x128xf32>
    tpu.vector_store %arg7[%c0_6, %c0_7], %7 {strides = array<i32>} : memref<32x128xf32, #tpu.memory_space<vmem>>, vector<32x128xf32>,
    %c2_i32 = arith.constant 2 : i32
    %9 = arith.cmpi eq, %arg2, %c2_i32 : i32
    %10 = arith.extui %9 : i1 to i32
    %c0_i32_8 = arith.constant 0 : i32
    %11 = arith.cmpi ne, %10, %c0_i32_8 : i32
    scf.if %11 {
      %c0_9 = arith.constant 0 : index
      %c0_10 = arith.constant 0 : index
      %12 = vector.load %arg7[%c0_9, %c0_10] : memref<32x128xf32, #tpu.memory_space<vmem>>, vector<32x128xf32>
      %c0_11 = arith.constant 0 : index
      %c0_12 = arith.constant 0 : index
      %13 = vector.load %arg5[%c0_11, %c0_12] : memref<1x128xf32, #tpu.memory_space<vmem>>, vector<1x128xf32>
      %14 = vector.broadcast %13 : vector<1x128xf32> to vector<32x128xf32>
      %15 = arith.addf %12, %14 : vector<32x128xf32>
      %cst_13 = arith.constant 0.000000e+00 : f32
      %16 = vector.broadcast %cst_13 : f32 to vector<32x128xf32>
      %17 = arith.maximumf %15, %16 : vector<32x128xf32>
      %c0_14 = arith.constant 0 : index
      %c0_15 = arith.constant 0 : index
      %18 = vector.load %arg6[%c0_14, %c0_15] : memref<32x128xf32, #tpu.memory_space<vmem>>, vector<32x128xf32>
      tpu.vector_store %arg6[%c0_14, %c0_15], %17 {strides = array<i32>} : memref<32x128xf32, #tpu.memory_space<vmem>>, vector<32x128xf32>,
    } else {
    }
    return
  }
  func.func @transform_0(%arg0: i32, %arg1: i32, %arg2: i32) -> (i32, i32) {
    %c0_i32 = arith.constant 0 : i32
    return %arg0, %arg2 : i32, i32
  }
  func.func @transform_1(%arg0: i32, %arg1: i32, %arg2: i32) -> (i32, i32) {
    %c0_i32 = arith.constant 0 : i32
    return %arg2, %arg1 : i32, i32
  }
  func.func @transform_2(%arg0: i32, %arg1: i32, %arg2: i32) -> (i32, i32) {
    %c0_i32 = arith.constant 0 : i32
    %c0_i32_0 = arith.constant 0 : i32
    return %c0_i32, %arg1 : i32, i32
  }
  func.func @transform_3(%arg0: i32, %arg1: i32, %arg2: i32) -> (i32, i32) {
    %c0_i32 = arith.constant 0 : i32
    return %arg0, %arg1 : i32, i32
  }
}

module attributes {stable_mosaic.version = 11 : i64} {
  func.func @_conv_mm_kernel(%arg0: i32, %arg1: i32, %arg2: i32, %arg3: memref<32x128xbf16, #tpu.memory_space<vmem>>, %arg4: memref<128x128xbf16, #tpu.memory_space<vmem>>, %arg5: memref<1x128xf32, #tpu.memory_space<vmem>>, %arg6: memref<32x128xf32, #tpu.memory_space<vmem>>, %arg7: memref<32x128xf32, #tpu.memory_space<vmem>>) attributes {dimension_semantics = [#tpu.dimension_semantics<parallel>, #tpu.dimension_semantics<parallel>, #tpu.dimension_semantics<arbitrary>], iteration_bounds = array<i64: 1, 1, 1>, scalar_prefetch = 0 : i64, scratch_operands = 1 : i64, tpu.core_type = #tpu.core_type<tc>, window_params = [{transform_indices = @transform_0, window_bounds = array<i64: 32, 128>}, {transform_indices = @transform_1, window_bounds = array<i64: 128, 128>}, {transform_indices = @transform_2, window_bounds = array<i64: 1, 128>}, {transform_indices = @transform_3, window_bounds = array<i64: 32, 128>}]} {
    %c0_i32 = arith.constant 0 : i32
    %0 = arith.cmpi eq, %arg2, %c0_i32 : i32
    %1 = arith.extui %0 : i1 to i32
    %c0_i32_0 = arith.constant 0 : i32
    %2 = arith.cmpi ne, %1, %c0_i32_0 : i32
    scf.if %2 {
      %cst_10 = arith.constant 0.000000e+00 : f32
      %12 = vector.broadcast %cst_10 : f32 to vector<32x128xf32>
      %c0_11 = arith.constant 0 : index
      %c0_12 = arith.constant 0 : index
      %13 = vector.load %arg7[%c0_11, %c0_12] : memref<32x128xf32, #tpu.memory_space<vmem>>, vector<32x128xf32>
      tpu.vector_store %arg7[%c0_11, %c0_12], %12 {strides = array<i32>} : memref<32x128xf32, #tpu.memory_space<vmem>>, vector<32x128xf32>,
    } else {
    }
    %c0 = arith.constant 0 : index
    %c0_1 = arith.constant 0 : index
    %3 = vector.load %arg7[%c0, %c0_1] : memref<32x128xf32, #tpu.memory_space<vmem>>, vector<32x128xf32>
    %c0_2 = arith.constant 0 : index
    %c0_3 = arith.constant 0 : index
    %4 = vector.load %arg3[%c0_2, %c0_3] : memref<32x128xbf16, #tpu.memory_space<vmem>>, vector<32x128xbf16>
    %c0_4 = arith.constant 0 : index
    %c0_5 = arith.constant 0 : index
    %5 = vector.load %arg4[%c0_4, %c0_5] : memref<128x128xbf16, #tpu.memory_space<vmem>>, vector<128x128xbf16>
    %cst = arith.constant dense<0.000000e+00> : vector<32x128xf32>
    %6 = tpu.matmul %4, %5, %cst {dimension_numbers = #tpu.dot_dimension_numbers<[1], [0], [0], [1], [0, 0, 1, 1], [], []>} : vector<32x128xbf16>, vector<128x128xbf16>, vector<32x128xf32> -> vector<32x128xf32>
    %7 = arith.addf %3, %6 : vector<32x128xf32>
    %c0_6 = arith.constant 0 : index
    %c0_7 = arith.constant 0 : index
    %8 = vector.load %arg7[%c0_6, %c0_7] : memref<32x128xf32, #tpu.memory_space<vmem>>, vector<32x128xf32>
    tpu.vector_store %arg7[%c0_6, %c0_7], %7 {strides = array<i32>} : memref<32x128xf32, #tpu.memory_space<vmem>>, vector<32x128xf32>,
    %c0_i32_8 = arith.constant 0 : i32
    %9 = arith.cmpi eq, %arg2, %c0_i32_8 : i32
    %10 = arith.extui %9 : i1 to i32
    %c0_i32_9 = arith.constant 0 : i32
    %11 = arith.cmpi ne, %10, %c0_i32_9 : i32
    scf.if %11 {
      %c0_10 = arith.constant 0 : index
      %c0_11 = arith.constant 0 : index
      %12 = vector.load %arg7[%c0_10, %c0_11] : memref<32x128xf32, #tpu.memory_space<vmem>>, vector<32x128xf32>
      %c0_12 = arith.constant 0 : index
      %c0_13 = arith.constant 0 : index
      %13 = vector.load %arg5[%c0_12, %c0_13] : memref<1x128xf32, #tpu.memory_space<vmem>>, vector<1x128xf32>
      %14 = vector.broadcast %13 : vector<1x128xf32> to vector<32x128xf32>
      %15 = arith.addf %12, %14 : vector<32x128xf32>
      %c0_14 = arith.constant 0 : index
      %c0_15 = arith.constant 0 : index
      %16 = vector.load %arg6[%c0_14, %c0_15] : memref<32x128xf32, #tpu.memory_space<vmem>>, vector<32x128xf32>
      tpu.vector_store %arg6[%c0_14, %c0_15], %15 {strides = array<i32>} : memref<32x128xf32, #tpu.memory_space<vmem>>, vector<32x128xf32>,
    } else {
    }
    return
  }
  func.func @transform_0(%arg0: i32, %arg1: i32, %arg2: i32) -> (i32, i32) {
    %c0_i32 = arith.constant 0 : i32
    return %arg0, %arg2 : i32, i32
  }
  func.func @transform_1(%arg0: i32, %arg1: i32, %arg2: i32) -> (i32, i32) {
    %c0_i32 = arith.constant 0 : i32
    return %arg2, %arg1 : i32, i32
  }
  func.func @transform_2(%arg0: i32, %arg1: i32, %arg2: i32) -> (i32, i32) {
    %c0_i32 = arith.constant 0 : i32
    %c0_i32_0 = arith.constant 0 : i32
    return %c0_i32, %arg1 : i32, i32
  }
  func.func @transform_3(%arg0: i32, %arg1: i32, %arg2: i32) -> (i32, i32) {
    %c0_i32 = arith.constant 0 : i32
    return %arg0, %arg1 : i32, i32
  }
}

module attributes {stable_mosaic.version = 11 : i64} {
  func.func @_conv_mm_kernel(%arg0: i32, %arg1: i32, %arg2: i32, %arg3: memref<32x256xbf16, #tpu.memory_space<vmem>>, %arg4: memref<256x128xbf16, #tpu.memory_space<vmem>>, %arg5: memref<1x128xf32, #tpu.memory_space<vmem>>, %arg6: memref<32x128xf32, #tpu.memory_space<vmem>>, %arg7: memref<32x128xf32, #tpu.memory_space<vmem>>) attributes {dimension_semantics = [#tpu.dimension_semantics<parallel>, #tpu.dimension_semantics<parallel>, #tpu.dimension_semantics<arbitrary>], iteration_bounds = array<i64: 1, 1, 5>, scalar_prefetch = 0 : i64, scratch_operands = 1 : i64, tpu.core_type = #tpu.core_type<tc>, window_params = [{transform_indices = @transform_0, window_bounds = array<i64: 32, 256>}, {transform_indices = @transform_1, window_bounds = array<i64: 256, 128>}, {transform_indices = @transform_2, window_bounds = array<i64: 1, 128>}, {transform_indices = @transform_3, window_bounds = array<i64: 32, 128>}]} {
    %c0_i32 = arith.constant 0 : i32
    %0 = arith.cmpi eq, %arg2, %c0_i32 : i32
    %1 = arith.extui %0 : i1 to i32
    %c0_i32_0 = arith.constant 0 : i32
    %2 = arith.cmpi ne, %1, %c0_i32_0 : i32
    scf.if %2 {
      %cst_9 = arith.constant 0.000000e+00 : f32
      %12 = vector.broadcast %cst_9 : f32 to vector<32x128xf32>
      %c0_10 = arith.constant 0 : index
      %c0_11 = arith.constant 0 : index
      %13 = vector.load %arg7[%c0_10, %c0_11] : memref<32x128xf32, #tpu.memory_space<vmem>>, vector<32x128xf32>
      tpu.vector_store %arg7[%c0_10, %c0_11], %12 {strides = array<i32>} : memref<32x128xf32, #tpu.memory_space<vmem>>, vector<32x128xf32>,
    } else {
    }
    %c0 = arith.constant 0 : index
    %c0_1 = arith.constant 0 : index
    %3 = vector.load %arg7[%c0, %c0_1] : memref<32x128xf32, #tpu.memory_space<vmem>>, vector<32x128xf32>
    %c0_2 = arith.constant 0 : index
    %c0_3 = arith.constant 0 : index
    %4 = vector.load %arg3[%c0_2, %c0_3] : memref<32x256xbf16, #tpu.memory_space<vmem>>, vector<32x256xbf16>
    %c0_4 = arith.constant 0 : index
    %c0_5 = arith.constant 0 : index
    %5 = vector.load %arg4[%c0_4, %c0_5] : memref<256x128xbf16, #tpu.memory_space<vmem>>, vector<256x128xbf16>
    %cst = arith.constant dense<0.000000e+00> : vector<32x128xf32>
    %6 = tpu.matmul %4, %5, %cst {dimension_numbers = #tpu.dot_dimension_numbers<[1], [0], [0], [1], [0, 0, 1, 1], [], []>} : vector<32x256xbf16>, vector<256x128xbf16>, vector<32x128xf32> -> vector<32x128xf32>
    %7 = arith.addf %3, %6 : vector<32x128xf32>
    %c0_6 = arith.constant 0 : index
    %c0_7 = arith.constant 0 : index
    %8 = vector.load %arg7[%c0_6, %c0_7] : memref<32x128xf32, #tpu.memory_space<vmem>>, vector<32x128xf32>
    tpu.vector_store %arg7[%c0_6, %c0_7], %7 {strides = array<i32>} : memref<32x128xf32, #tpu.memory_space<vmem>>, vector<32x128xf32>,
    %c4_i32 = arith.constant 4 : i32
    %9 = arith.cmpi eq, %arg2, %c4_i32 : i32
    %10 = arith.extui %9 : i1 to i32
    %c0_i32_8 = arith.constant 0 : i32
    %11 = arith.cmpi ne, %10, %c0_i32_8 : i32
    scf.if %11 {
      %c0_9 = arith.constant 0 : index
      %c0_10 = arith.constant 0 : index
      %12 = vector.load %arg7[%c0_9, %c0_10] : memref<32x128xf32, #tpu.memory_space<vmem>>, vector<32x128xf32>
      %c0_11 = arith.constant 0 : index
      %c0_12 = arith.constant 0 : index
      %13 = vector.load %arg5[%c0_11, %c0_12] : memref<1x128xf32, #tpu.memory_space<vmem>>, vector<1x128xf32>
      %14 = vector.broadcast %13 : vector<1x128xf32> to vector<32x128xf32>
      %15 = arith.addf %12, %14 : vector<32x128xf32>
      %cst_13 = arith.constant 0.000000e+00 : f32
      %16 = vector.broadcast %cst_13 : f32 to vector<32x128xf32>
      %17 = arith.maximumf %15, %16 : vector<32x128xf32>
      %c0_14 = arith.constant 0 : index
      %c0_15 = arith.constant 0 : index
      %18 = vector.load %arg6[%c0_14, %c0_15] : memref<32x128xf32, #tpu.memory_space<vmem>>, vector<32x128xf32>
      tpu.vector_store %arg6[%c0_14, %c0_15], %17 {strides = array<i32>} : memref<32x128xf32, #tpu.memory_space<vmem>>, vector<32x128xf32>,
    } else {
    }
    return
  }
  func.func @transform_0(%arg0: i32, %arg1: i32, %arg2: i32) -> (i32, i32) {
    %c0_i32 = arith.constant 0 : i32
    return %arg0, %arg2 : i32, i32
  }
  func.func @transform_1(%arg0: i32, %arg1: i32, %arg2: i32) -> (i32, i32) {
    %c0_i32 = arith.constant 0 : i32
    return %arg2, %arg1 : i32, i32
  }
  func.func @transform_2(%arg0: i32, %arg1: i32, %arg2: i32) -> (i32, i32) {
    %c0_i32 = arith.constant 0 : i32
    %c0_i32_0 = arith.constant 0 : i32
    return %c0_i32, %arg1 : i32, i32
  }
  func.func @transform_3(%arg0: i32, %arg1: i32, %arg2: i32) -> (i32, i32) {
    %c0_i32 = arith.constant 0 : i32
    return %arg0, %arg1 : i32, i32
  }
}

module attributes {stable_mosaic.version = 11 : i64} {
  func.func @_conv_mm_kernel(%arg0: i32, %arg1: i32, %arg2: i32, %arg3: memref<32x256xbf16, #tpu.memory_space<vmem>>, %arg4: memref<256x128xbf16, #tpu.memory_space<vmem>>, %arg5: memref<1x128xf32, #tpu.memory_space<vmem>>, %arg6: memref<32x128xf32, #tpu.memory_space<vmem>>, %arg7: memref<32x128xf32, #tpu.memory_space<vmem>>, %arg8: memref<32x128xf32, #tpu.memory_space<vmem>>) attributes {dimension_semantics = [#tpu.dimension_semantics<parallel>, #tpu.dimension_semantics<parallel>, #tpu.dimension_semantics<arbitrary>], iteration_bounds = array<i64: 1, 1, 5>, scalar_prefetch = 0 : i64, scratch_operands = 1 : i64, tpu.core_type = #tpu.core_type<tc>, window_params = [{transform_indices = @transform_0, window_bounds = array<i64: 32, 256>}, {transform_indices = @transform_1, window_bounds = array<i64: 256, 128>}, {transform_indices = @transform_2, window_bounds = array<i64: 1, 128>}, {transform_indices = @transform_3, window_bounds = array<i64: 32, 128>}, {transform_indices = @transform_4, window_bounds = array<i64: 32, 128>}]} {
    %c0_i32 = arith.constant 0 : i32
    %0 = arith.cmpi eq, %arg2, %c0_i32 : i32
    %1 = arith.extui %0 : i1 to i32
    %c0_i32_0 = arith.constant 0 : i32
    %2 = arith.cmpi ne, %1, %c0_i32_0 : i32
    scf.if %2 {
      %cst_9 = arith.constant 0.000000e+00 : f32
      %12 = vector.broadcast %cst_9 : f32 to vector<32x128xf32>
      %c0_10 = arith.constant 0 : index
      %c0_11 = arith.constant 0 : index
      %13 = vector.load %arg8[%c0_10, %c0_11] : memref<32x128xf32, #tpu.memory_space<vmem>>, vector<32x128xf32>
      tpu.vector_store %arg8[%c0_10, %c0_11], %12 {strides = array<i32>} : memref<32x128xf32, #tpu.memory_space<vmem>>, vector<32x128xf32>,
    } else {
    }
    %c0 = arith.constant 0 : index
    %c0_1 = arith.constant 0 : index
    %3 = vector.load %arg8[%c0, %c0_1] : memref<32x128xf32, #tpu.memory_space<vmem>>, vector<32x128xf32>
    %c0_2 = arith.constant 0 : index
    %c0_3 = arith.constant 0 : index
    %4 = vector.load %arg3[%c0_2, %c0_3] : memref<32x256xbf16, #tpu.memory_space<vmem>>, vector<32x256xbf16>
    %c0_4 = arith.constant 0 : index
    %c0_5 = arith.constant 0 : index
    %5 = vector.load %arg4[%c0_4, %c0_5] : memref<256x128xbf16, #tpu.memory_space<vmem>>, vector<256x128xbf16>
    %cst = arith.constant dense<0.000000e+00> : vector<32x128xf32>
    %6 = tpu.matmul %4, %5, %cst {dimension_numbers = #tpu.dot_dimension_numbers<[1], [0], [0], [1], [0, 0, 1, 1], [], []>} : vector<32x256xbf16>, vector<256x128xbf16>, vector<32x128xf32> -> vector<32x128xf32>
    %7 = arith.addf %3, %6 : vector<32x128xf32>
    %c0_6 = arith.constant 0 : index
    %c0_7 = arith.constant 0 : index
    %8 = vector.load %arg8[%c0_6, %c0_7] : memref<32x128xf32, #tpu.memory_space<vmem>>, vector<32x128xf32>
    tpu.vector_store %arg8[%c0_6, %c0_7], %7 {strides = array<i32>} : memref<32x128xf32, #tpu.memory_space<vmem>>, vector<32x128xf32>,
    %c4_i32 = arith.constant 4 : i32
    %9 = arith.cmpi eq, %arg2, %c4_i32 : i32
    %10 = arith.extui %9 : i1 to i32
    %c0_i32_8 = arith.constant 0 : i32
    %11 = arith.cmpi ne, %10, %c0_i32_8 : i32
    scf.if %11 {
      %c0_9 = arith.constant 0 : index
      %c0_10 = arith.constant 0 : index
      %12 = vector.load %arg8[%c0_9, %c0_10] : memref<32x128xf32, #tpu.memory_space<vmem>>, vector<32x128xf32>
      %c0_11 = arith.constant 0 : index
      %c0_12 = arith.constant 0 : index
      %13 = vector.load %arg5[%c0_11, %c0_12] : memref<1x128xf32, #tpu.memory_space<vmem>>, vector<1x128xf32>
      %14 = vector.broadcast %13 : vector<1x128xf32> to vector<32x128xf32>
      %15 = arith.addf %12, %14 : vector<32x128xf32>
      %c0_13 = arith.constant 0 : index
      %c0_14 = arith.constant 0 : index
      %16 = vector.load %arg6[%c0_13, %c0_14] : memref<32x128xf32, #tpu.memory_space<vmem>>, vector<32x128xf32>
      %17 = arith.addf %15, %16 : vector<32x128xf32>
      %cst_15 = arith.constant 0.000000e+00 : f32
      %18 = vector.broadcast %cst_15 : f32 to vector<32x128xf32>
      %19 = arith.maximumf %17, %18 : vector<32x128xf32>
      %c0_16 = arith.constant 0 : index
      %c0_17 = arith.constant 0 : index
      %20 = vector.load %arg7[%c0_16, %c0_17] : memref<32x128xf32, #tpu.memory_space<vmem>>, vector<32x128xf32>
      tpu.vector_store %arg7[%c0_16, %c0_17], %19 {strides = array<i32>} : memref<32x128xf32, #tpu.memory_space<vmem>>, vector<32x128xf32>,
    } else {
    }
    return
  }
  func.func @transform_0(%arg0: i32, %arg1: i32, %arg2: i32) -> (i32, i32) {
    %c0_i32 = arith.constant 0 : i32
    return %arg0, %arg2 : i32, i32
  }
  func.func @transform_1(%arg0: i32, %arg1: i32, %arg2: i32) -> (i32, i32) {
    %c0_i32 = arith.constant 0 : i32
    return %arg2, %arg1 : i32, i32
  }
  func.func @transform_2(%arg0: i32, %arg1: i32, %arg2: i32) -> (i32, i32) {
    %c0_i32 = arith.constant 0 : i32
    %c0_i32_0 = arith.constant 0 : i32
    return %c0_i32, %arg1 : i32, i32
  }
  func.func @transform_3(%arg0: i32, %arg1: i32, %arg2: i32) -> (i32, i32) {
    %c0_i32 = arith.constant 0 : i32
    return %arg0, %arg1 : i32, i32
  }
  func.func @transform_4(%arg0: i32, %arg1: i32, %arg2: i32) -> (i32, i32) {
    %c0_i32 = arith.constant 0 : i32
    return %arg0, %arg1 : i32, i32
  }
}

module attributes {stable_mosaic.version = 11 : i64} {
  func.func @_conv_mm_kernel(%arg0: i32, %arg1: i32, %arg2: i32, %arg3: memref<8x256xbf16, #tpu.memory_space<vmem>>, %arg4: memref<256x256xbf16, #tpu.memory_space<vmem>>, %arg5: memref<1x256xf32, #tpu.memory_space<vmem>>, %arg6: memref<8x256xf32, #tpu.memory_space<vmem>>, %arg7: memref<8x256xf32, #tpu.memory_space<vmem>>) attributes {dimension_semantics = [#tpu.dimension_semantics<parallel>, #tpu.dimension_semantics<parallel>, #tpu.dimension_semantics<arbitrary>], iteration_bounds = array<i64: 1, 1, 5>, scalar_prefetch = 0 : i64, scratch_operands = 1 : i64, tpu.core_type = #tpu.core_type<tc>, window_params = [{transform_indices = @transform_0, window_bounds = array<i64: 8, 256>}, {transform_indices = @transform_1, window_bounds = array<i64: 256, 256>}, {transform_indices = @transform_2, window_bounds = array<i64: 1, 256>}, {transform_indices = @transform_3, window_bounds = array<i64: 8, 256>}]} {
    %c0_i32 = arith.constant 0 : i32
    %0 = arith.cmpi eq, %arg2, %c0_i32 : i32
    %1 = arith.extui %0 : i1 to i32
    %c0_i32_0 = arith.constant 0 : i32
    %2 = arith.cmpi ne, %1, %c0_i32_0 : i32
    scf.if %2 {
      %cst_9 = arith.constant 0.000000e+00 : f32
      %12 = vector.broadcast %cst_9 : f32 to vector<8x256xf32>
      %c0_10 = arith.constant 0 : index
      %c0_11 = arith.constant 0 : index
      %13 = vector.load %arg7[%c0_10, %c0_11] : memref<8x256xf32, #tpu.memory_space<vmem>>, vector<8x256xf32>
      tpu.vector_store %arg7[%c0_10, %c0_11], %12 {strides = array<i32>} : memref<8x256xf32, #tpu.memory_space<vmem>>, vector<8x256xf32>,
    } else {
    }
    %c0 = arith.constant 0 : index
    %c0_1 = arith.constant 0 : index
    %3 = vector.load %arg7[%c0, %c0_1] : memref<8x256xf32, #tpu.memory_space<vmem>>, vector<8x256xf32>
    %c0_2 = arith.constant 0 : index
    %c0_3 = arith.constant 0 : index
    %4 = vector.load %arg3[%c0_2, %c0_3] : memref<8x256xbf16, #tpu.memory_space<vmem>>, vector<8x256xbf16>
    %c0_4 = arith.constant 0 : index
    %c0_5 = arith.constant 0 : index
    %5 = vector.load %arg4[%c0_4, %c0_5] : memref<256x256xbf16, #tpu.memory_space<vmem>>, vector<256x256xbf16>
    %cst = arith.constant dense<0.000000e+00> : vector<8x256xf32>
    %6 = tpu.matmul %4, %5, %cst {dimension_numbers = #tpu.dot_dimension_numbers<[1], [0], [0], [1], [0, 0, 1, 1], [], []>} : vector<8x256xbf16>, vector<256x256xbf16>, vector<8x256xf32> -> vector<8x256xf32>
    %7 = arith.addf %3, %6 : vector<8x256xf32>
    %c0_6 = arith.constant 0 : index
    %c0_7 = arith.constant 0 : index
    %8 = vector.load %arg7[%c0_6, %c0_7] : memref<8x256xf32, #tpu.memory_space<vmem>>, vector<8x256xf32>
    tpu.vector_store %arg7[%c0_6, %c0_7], %7 {strides = array<i32>} : memref<8x256xf32, #tpu.memory_space<vmem>>, vector<8x256xf32>,
    %c4_i32 = arith.constant 4 : i32
    %9 = arith.cmpi eq, %arg2, %c4_i32 : i32
    %10 = arith.extui %9 : i1 to i32
    %c0_i32_8 = arith.constant 0 : i32
    %11 = arith.cmpi ne, %10, %c0_i32_8 : i32
    scf.if %11 {
      %c0_9 = arith.constant 0 : index
      %c0_10 = arith.constant 0 : index
      %12 = vector.load %arg7[%c0_9, %c0_10] : memref<8x256xf32, #tpu.memory_space<vmem>>, vector<8x256xf32>
      %c0_11 = arith.constant 0 : index
      %c0_12 = arith.constant 0 : index
      %13 = vector.load %arg5[%c0_11, %c0_12] : memref<1x256xf32, #tpu.memory_space<vmem>>, vector<1x256xf32>
      %14 = vector.broadcast %13 : vector<1x256xf32> to vector<8x256xf32>
      %15 = arith.addf %12, %14 : vector<8x256xf32>
      %cst_13 = arith.constant 0.000000e+00 : f32
      %16 = vector.broadcast %cst_13 : f32 to vector<8x256xf32>
      %17 = arith.maximumf %15, %16 : vector<8x256xf32>
      %c0_14 = arith.constant 0 : index
      %c0_15 = arith.constant 0 : index
      %18 = vector.load %arg6[%c0_14, %c0_15] : memref<8x256xf32, #tpu.memory_space<vmem>>, vector<8x256xf32>
      tpu.vector_store %arg6[%c0_14, %c0_15], %17 {strides = array<i32>} : memref<8x256xf32, #tpu.memory_space<vmem>>, vector<8x256xf32>,
    } else {
    }
    return
  }
  func.func @transform_0(%arg0: i32, %arg1: i32, %arg2: i32) -> (i32, i32) {
    %c0_i32 = arith.constant 0 : i32
    return %arg0, %arg2 : i32, i32
  }
  func.func @transform_1(%arg0: i32, %arg1: i32, %arg2: i32) -> (i32, i32) {
    %c0_i32 = arith.constant 0 : i32
    return %arg2, %arg1 : i32, i32
  }
  func.func @transform_2(%arg0: i32, %arg1: i32, %arg2: i32) -> (i32, i32) {
    %c0_i32 = arith.constant 0 : i32
    %c0_i32_0 = arith.constant 0 : i32
    return %c0_i32, %arg1 : i32, i32
  }
  func.func @transform_3(%arg0: i32, %arg1: i32, %arg2: i32) -> (i32, i32) {
    %c0_i32 = arith.constant 0 : i32
    return %arg0, %arg1 : i32, i32
  }
}

module attributes {stable_mosaic.version = 11 : i64} {
  func.func @_conv_mm_kernel(%arg0: i32, %arg1: i32, %arg2: i32, %arg3: memref<8x128xbf16, #tpu.memory_space<vmem>>, %arg4: memref<128x256xbf16, #tpu.memory_space<vmem>>, %arg5: memref<1x256xf32, #tpu.memory_space<vmem>>, %arg6: memref<8x256xf32, #tpu.memory_space<vmem>>, %arg7: memref<8x256xf32, #tpu.memory_space<vmem>>) attributes {dimension_semantics = [#tpu.dimension_semantics<parallel>, #tpu.dimension_semantics<parallel>, #tpu.dimension_semantics<arbitrary>], iteration_bounds = array<i64: 1, 1, 1>, scalar_prefetch = 0 : i64, scratch_operands = 1 : i64, tpu.core_type = #tpu.core_type<tc>, window_params = [{transform_indices = @transform_0, window_bounds = array<i64: 8, 128>}, {transform_indices = @transform_1, window_bounds = array<i64: 128, 256>}, {transform_indices = @transform_2, window_bounds = array<i64: 1, 256>}, {transform_indices = @transform_3, window_bounds = array<i64: 8, 256>}]} {
    %c0_i32 = arith.constant 0 : i32
    %0 = arith.cmpi eq, %arg2, %c0_i32 : i32
    %1 = arith.extui %0 : i1 to i32
    %c0_i32_0 = arith.constant 0 : i32
    %2 = arith.cmpi ne, %1, %c0_i32_0 : i32
    scf.if %2 {
      %cst_10 = arith.constant 0.000000e+00 : f32
      %12 = vector.broadcast %cst_10 : f32 to vector<8x256xf32>
      %c0_11 = arith.constant 0 : index
      %c0_12 = arith.constant 0 : index
      %13 = vector.load %arg7[%c0_11, %c0_12] : memref<8x256xf32, #tpu.memory_space<vmem>>, vector<8x256xf32>
      tpu.vector_store %arg7[%c0_11, %c0_12], %12 {strides = array<i32>} : memref<8x256xf32, #tpu.memory_space<vmem>>, vector<8x256xf32>,
    } else {
    }
    %c0 = arith.constant 0 : index
    %c0_1 = arith.constant 0 : index
    %3 = vector.load %arg7[%c0, %c0_1] : memref<8x256xf32, #tpu.memory_space<vmem>>, vector<8x256xf32>
    %c0_2 = arith.constant 0 : index
    %c0_3 = arith.constant 0 : index
    %4 = vector.load %arg3[%c0_2, %c0_3] : memref<8x128xbf16, #tpu.memory_space<vmem>>, vector<8x128xbf16>
    %c0_4 = arith.constant 0 : index
    %c0_5 = arith.constant 0 : index
    %5 = vector.load %arg4[%c0_4, %c0_5] : memref<128x256xbf16, #tpu.memory_space<vmem>>, vector<128x256xbf16>
    %cst = arith.constant dense<0.000000e+00> : vector<8x256xf32>
    %6 = tpu.matmul %4, %5, %cst {dimension_numbers = #tpu.dot_dimension_numbers<[1], [0], [0], [1], [0, 0, 1, 1], [], []>} : vector<8x128xbf16>, vector<128x256xbf16>, vector<8x256xf32> -> vector<8x256xf32>
    %7 = arith.addf %3, %6 : vector<8x256xf32>
    %c0_6 = arith.constant 0 : index
    %c0_7 = arith.constant 0 : index
    %8 = vector.load %arg7[%c0_6, %c0_7] : memref<8x256xf32, #tpu.memory_space<vmem>>, vector<8x256xf32>
    tpu.vector_store %arg7[%c0_6, %c0_7], %7 {strides = array<i32>} : memref<8x256xf32, #tpu.memory_space<vmem>>, vector<8x256xf32>,
    %c0_i32_8 = arith.constant 0 : i32
    %9 = arith.cmpi eq, %arg2, %c0_i32_8 : i32
    %10 = arith.extui %9 : i1 to i32
    %c0_i32_9 = arith.constant 0 : i32
    %11 = arith.cmpi ne, %10, %c0_i32_9 : i32
    scf.if %11 {
      %c0_10 = arith.constant 0 : index
      %c0_11 = arith.constant 0 : index
      %12 = vector.load %arg7[%c0_10, %c0_11] : memref<8x256xf32, #tpu.memory_space<vmem>>, vector<8x256xf32>
      %c0_12 = arith.constant 0 : index
      %c0_13 = arith.constant 0 : index
      %13 = vector.load %arg5[%c0_12, %c0_13] : memref<1x256xf32, #tpu.memory_space<vmem>>, vector<1x256xf32>
      %14 = vector.broadcast %13 : vector<1x256xf32> to vector<8x256xf32>
      %15 = arith.addf %12, %14 : vector<8x256xf32>
      %c0_14 = arith.constant 0 : index
      %c0_15 = arith.constant 0 : index
      %16 = vector.load %arg6[%c0_14, %c0_15] : memref<8x256xf32, #tpu.memory_space<vmem>>, vector<8x256xf32>
      tpu.vector_store %arg6[%c0_14, %c0_15], %15 {strides = array<i32>} : memref<8x256xf32, #tpu.memory_space<vmem>>, vector<8x256xf32>,
    } else {
    }
    return
  }
  func.func @transform_0(%arg0: i32, %arg1: i32, %arg2: i32) -> (i32, i32) {
    %c0_i32 = arith.constant 0 : i32
    return %arg0, %arg2 : i32, i32
  }
  func.func @transform_1(%arg0: i32, %arg1: i32, %arg2: i32) -> (i32, i32) {
    %c0_i32 = arith.constant 0 : i32
    return %arg2, %arg1 : i32, i32
  }
  func.func @transform_2(%arg0: i32, %arg1: i32, %arg2: i32) -> (i32, i32) {
    %c0_i32 = arith.constant 0 : i32
    %c0_i32_0 = arith.constant 0 : i32
    return %c0_i32, %arg1 : i32, i32
  }
  func.func @transform_3(%arg0: i32, %arg1: i32, %arg2: i32) -> (i32, i32) {
    %c0_i32 = arith.constant 0 : i32
    return %arg0, %arg1 : i32, i32
  }
}

module attributes {stable_mosaic.version = 11 : i64} {
  func.func @_conv_mm_kernel(%arg0: i32, %arg1: i32, %arg2: i32, %arg3: memref<8x256xbf16, #tpu.memory_space<vmem>>, %arg4: memref<256x256xbf16, #tpu.memory_space<vmem>>, %arg5: memref<1x256xf32, #tpu.memory_space<vmem>>, %arg6: memref<8x256xf32, #tpu.memory_space<vmem>>, %arg7: memref<8x256xf32, #tpu.memory_space<vmem>>, %arg8: memref<8x256xf32, #tpu.memory_space<vmem>>) attributes {dimension_semantics = [#tpu.dimension_semantics<parallel>, #tpu.dimension_semantics<parallel>, #tpu.dimension_semantics<arbitrary>], iteration_bounds = array<i64: 1, 1, 9>, scalar_prefetch = 0 : i64, scratch_operands = 1 : i64, tpu.core_type = #tpu.core_type<tc>, window_params = [{transform_indices = @transform_0, window_bounds = array<i64: 8, 256>}, {transform_indices = @transform_1, window_bounds = array<i64: 256, 256>}, {transform_indices = @transform_2, window_bounds = array<i64: 1, 256>}, {transform_indices = @transform_3, window_bounds = array<i64: 8, 256>}, {transform_indices = @transform_4, window_bounds = array<i64: 8, 256>}]} {
    %c0_i32 = arith.constant 0 : i32
    %0 = arith.cmpi eq, %arg2, %c0_i32 : i32
    %1 = arith.extui %0 : i1 to i32
    %c0_i32_0 = arith.constant 0 : i32
    %2 = arith.cmpi ne, %1, %c0_i32_0 : i32
    scf.if %2 {
      %cst_9 = arith.constant 0.000000e+00 : f32
      %12 = vector.broadcast %cst_9 : f32 to vector<8x256xf32>
      %c0_10 = arith.constant 0 : index
      %c0_11 = arith.constant 0 : index
      %13 = vector.load %arg8[%c0_10, %c0_11] : memref<8x256xf32, #tpu.memory_space<vmem>>, vector<8x256xf32>
      tpu.vector_store %arg8[%c0_10, %c0_11], %12 {strides = array<i32>} : memref<8x256xf32, #tpu.memory_space<vmem>>, vector<8x256xf32>,
    } else {
    }
    %c0 = arith.constant 0 : index
    %c0_1 = arith.constant 0 : index
    %3 = vector.load %arg8[%c0, %c0_1] : memref<8x256xf32, #tpu.memory_space<vmem>>, vector<8x256xf32>
    %c0_2 = arith.constant 0 : index
    %c0_3 = arith.constant 0 : index
    %4 = vector.load %arg3[%c0_2, %c0_3] : memref<8x256xbf16, #tpu.memory_space<vmem>>, vector<8x256xbf16>
    %c0_4 = arith.constant 0 : index
    %c0_5 = arith.constant 0 : index
    %5 = vector.load %arg4[%c0_4, %c0_5] : memref<256x256xbf16, #tpu.memory_space<vmem>>, vector<256x256xbf16>
    %cst = arith.constant dense<0.000000e+00> : vector<8x256xf32>
    %6 = tpu.matmul %4, %5, %cst {dimension_numbers = #tpu.dot_dimension_numbers<[1], [0], [0], [1], [0, 0, 1, 1], [], []>} : vector<8x256xbf16>, vector<256x256xbf16>, vector<8x256xf32> -> vector<8x256xf32>
    %7 = arith.addf %3, %6 : vector<8x256xf32>
    %c0_6 = arith.constant 0 : index
    %c0_7 = arith.constant 0 : index
    %8 = vector.load %arg8[%c0_6, %c0_7] : memref<8x256xf32, #tpu.memory_space<vmem>>, vector<8x256xf32>
    tpu.vector_store %arg8[%c0_6, %c0_7], %7 {strides = array<i32>} : memref<8x256xf32, #tpu.memory_space<vmem>>, vector<8x256xf32>,
    %c8_i32 = arith.constant 8 : i32
    %9 = arith.cmpi eq, %arg2, %c8_i32 : i32
    %10 = arith.extui %9 : i1 to i32
    %c0_i32_8 = arith.constant 0 : i32
    %11 = arith.cmpi ne, %10, %c0_i32_8 : i32
    scf.if %11 {
      %c0_9 = arith.constant 0 : index
      %c0_10 = arith.constant 0 : index
      %12 = vector.load %arg8[%c0_9, %c0_10] : memref<8x256xf32, #tpu.memory_space<vmem>>, vector<8x256xf32>
      %c0_11 = arith.constant 0 : index
      %c0_12 = arith.constant 0 : index
      %13 = vector.load %arg5[%c0_11, %c0_12] : memref<1x256xf32, #tpu.memory_space<vmem>>, vector<1x256xf32>
      %14 = vector.broadcast %13 : vector<1x256xf32> to vector<8x256xf32>
      %15 = arith.addf %12, %14 : vector<8x256xf32>
      %c0_13 = arith.constant 0 : index
      %c0_14 = arith.constant 0 : index
      %16 = vector.load %arg6[%c0_13, %c0_14] : memref<8x256xf32, #tpu.memory_space<vmem>>, vector<8x256xf32>
      %17 = arith.addf %15, %16 : vector<8x256xf32>
      %cst_15 = arith.constant 0.000000e+00 : f32
      %18 = vector.broadcast %cst_15 : f32 to vector<8x256xf32>
      %19 = arith.maximumf %17, %18 : vector<8x256xf32>
      %c0_16 = arith.constant 0 : index
      %c0_17 = arith.constant 0 : index
      %20 = vector.load %arg7[%c0_16, %c0_17] : memref<8x256xf32, #tpu.memory_space<vmem>>, vector<8x256xf32>
      tpu.vector_store %arg7[%c0_16, %c0_17], %19 {strides = array<i32>} : memref<8x256xf32, #tpu.memory_space<vmem>>, vector<8x256xf32>,
    } else {
    }
    return
  }
  func.func @transform_0(%arg0: i32, %arg1: i32, %arg2: i32) -> (i32, i32) {
    %c0_i32 = arith.constant 0 : i32
    return %arg0, %arg2 : i32, i32
  }
  func.func @transform_1(%arg0: i32, %arg1: i32, %arg2: i32) -> (i32, i32) {
    %c0_i32 = arith.constant 0 : i32
    return %arg2, %arg1 : i32, i32
  }
  func.func @transform_2(%arg0: i32, %arg1: i32, %arg2: i32) -> (i32, i32) {
    %c0_i32 = arith.constant 0 : i32
    %c0_i32_0 = arith.constant 0 : i32
    return %c0_i32, %arg1 : i32, i32
  }
  func.func @transform_3(%arg0: i32, %arg1: i32, %arg2: i32) -> (i32, i32) {
    %c0_i32 = arith.constant 0 : i32
    return %arg0, %arg1 : i32, i32
  }
  func.func @transform_4(%arg0: i32, %arg1: i32, %arg2: i32) -> (i32, i32) {
    %c0_i32 = arith.constant 0 : i32
    return %arg0, %arg1 : i32, i32
  }
}

module attributes {stable_mosaic.version = 11 : i64} {
  func.func @_conv_mm_kernel(%arg0: i32, %arg1: i32, %arg2: i32, %arg3: memref<8x256xbf16, #tpu.memory_space<vmem>>, %arg4: memref<256x256xbf16, #tpu.memory_space<vmem>>, %arg5: memref<1x256xf32, #tpu.memory_space<vmem>>, %arg6: memref<8x256xf32, #tpu.memory_space<vmem>>, %arg7: memref<8x256xf32, #tpu.memory_space<vmem>>) attributes {dimension_semantics = [#tpu.dimension_semantics<parallel>, #tpu.dimension_semantics<parallel>, #tpu.dimension_semantics<arbitrary>], iteration_bounds = array<i64: 1, 1, 9>, scalar_prefetch = 0 : i64, scratch_operands = 1 : i64, tpu.core_type = #tpu.core_type<tc>, window_params = [{transform_indices = @transform_0, window_bounds = array<i64: 8, 256>}, {transform_indices = @transform_1, window_bounds = array<i64: 256, 256>}, {transform_indices = @transform_2, window_bounds = array<i64: 1, 256>}, {transform_indices = @transform_3, window_bounds = array<i64: 8, 256>}]} {
    %c0_i32 = arith.constant 0 : i32
    %0 = arith.cmpi eq, %arg2, %c0_i32 : i32
    %1 = arith.extui %0 : i1 to i32
    %c0_i32_0 = arith.constant 0 : i32
    %2 = arith.cmpi ne, %1, %c0_i32_0 : i32
    scf.if %2 {
      %cst_9 = arith.constant 0.000000e+00 : f32
      %12 = vector.broadcast %cst_9 : f32 to vector<8x256xf32>
      %c0_10 = arith.constant 0 : index
      %c0_11 = arith.constant 0 : index
      %13 = vector.load %arg7[%c0_10, %c0_11] : memref<8x256xf32, #tpu.memory_space<vmem>>, vector<8x256xf32>
      tpu.vector_store %arg7[%c0_10, %c0_11], %12 {strides = array<i32>} : memref<8x256xf32, #tpu.memory_space<vmem>>, vector<8x256xf32>,
    } else {
    }
    %c0 = arith.constant 0 : index
    %c0_1 = arith.constant 0 : index
    %3 = vector.load %arg7[%c0, %c0_1] : memref<8x256xf32, #tpu.memory_space<vmem>>, vector<8x256xf32>
    %c0_2 = arith.constant 0 : index
    %c0_3 = arith.constant 0 : index
    %4 = vector.load %arg3[%c0_2, %c0_3] : memref<8x256xbf16, #tpu.memory_space<vmem>>, vector<8x256xbf16>
    %c0_4 = arith.constant 0 : index
    %c0_5 = arith.constant 0 : index
    %5 = vector.load %arg4[%c0_4, %c0_5] : memref<256x256xbf16, #tpu.memory_space<vmem>>, vector<256x256xbf16>
    %cst = arith.constant dense<0.000000e+00> : vector<8x256xf32>
    %6 = tpu.matmul %4, %5, %cst {dimension_numbers = #tpu.dot_dimension_numbers<[1], [0], [0], [1], [0, 0, 1, 1], [], []>} : vector<8x256xbf16>, vector<256x256xbf16>, vector<8x256xf32> -> vector<8x256xf32>
    %7 = arith.addf %3, %6 : vector<8x256xf32>
    %c0_6 = arith.constant 0 : index
    %c0_7 = arith.constant 0 : index
    %8 = vector.load %arg7[%c0_6, %c0_7] : memref<8x256xf32, #tpu.memory_space<vmem>>, vector<8x256xf32>
    tpu.vector_store %arg7[%c0_6, %c0_7], %7 {strides = array<i32>} : memref<8x256xf32, #tpu.memory_space<vmem>>, vector<8x256xf32>,
    %c8_i32 = arith.constant 8 : i32
    %9 = arith.cmpi eq, %arg2, %c8_i32 : i32
    %10 = arith.extui %9 : i1 to i32
    %c0_i32_8 = arith.constant 0 : i32
    %11 = arith.cmpi ne, %10, %c0_i32_8 : i32
    scf.if %11 {
      %c0_9 = arith.constant 0 : index
      %c0_10 = arith.constant 0 : index
      %12 = vector.load %arg7[%c0_9, %c0_10] : memref<8x256xf32, #tpu.memory_space<vmem>>, vector<8x256xf32>
      %c0_11 = arith.constant 0 : index
      %c0_12 = arith.constant 0 : index
      %13 = vector.load %arg5[%c0_11, %c0_12] : memref<1x256xf32, #tpu.memory_space<vmem>>, vector<1x256xf32>
      %14 = vector.broadcast %13 : vector<1x256xf32> to vector<8x256xf32>
      %15 = arith.addf %12, %14 : vector<8x256xf32>
      %cst_13 = arith.constant 0.000000e+00 : f32
      %16 = vector.broadcast %cst_13 : f32 to vector<8x256xf32>
      %17 = arith.maximumf %15, %16 : vector<8x256xf32>
      %c0_14 = arith.constant 0 : index
      %c0_15 = arith.constant 0 : index
      %18 = vector.load %arg6[%c0_14, %c0_15] : memref<8x256xf32, #tpu.memory_space<vmem>>, vector<8x256xf32>
      tpu.vector_store %arg6[%c0_14, %c0_15], %17 {strides = array<i32>} : memref<8x256xf32, #tpu.memory_space<vmem>>, vector<8x256xf32>,
    } else {
    }
    return
  }
  func.func @transform_0(%arg0: i32, %arg1: i32, %arg2: i32) -> (i32, i32) {
    %c0_i32 = arith.constant 0 : i32
    return %arg0, %arg2 : i32, i32
  }
  func.func @transform_1(%arg0: i32, %arg1: i32, %arg2: i32) -> (i32, i32) {
    %c0_i32 = arith.constant 0 : i32
    return %arg2, %arg1 : i32, i32
  }
  func.func @transform_2(%arg0: i32, %arg1: i32, %arg2: i32) -> (i32, i32) {
    %c0_i32 = arith.constant 0 : i32
    %c0_i32_0 = arith.constant 0 : i32
    return %c0_i32, %arg1 : i32, i32
  }
  func.func @transform_3(%arg0: i32, %arg1: i32, %arg2: i32) -> (i32, i32) {
    %c0_i32 = arith.constant 0 : i32
    return %arg0, %arg1 : i32, i32
  }
}

module attributes {stable_mosaic.version = 11 : i64} {
  func.func @_conv_mm_kernel(%arg0: i32, %arg1: i32, %arg2: i32, %arg3: memref<8x256xbf16, #tpu.memory_space<vmem>>, %arg4: memref<256x256xbf16, #tpu.memory_space<vmem>>, %arg5: memref<1x256xf32, #tpu.memory_space<vmem>>, %arg6: memref<8x256xf32, #tpu.memory_space<vmem>>, %arg7: memref<8x256xf32, #tpu.memory_space<vmem>>) attributes {dimension_semantics = [#tpu.dimension_semantics<parallel>, #tpu.dimension_semantics<parallel>, #tpu.dimension_semantics<arbitrary>], iteration_bounds = array<i64: 1, 2, 9>, scalar_prefetch = 0 : i64, scratch_operands = 1 : i64, tpu.core_type = #tpu.core_type<tc>, window_params = [{transform_indices = @transform_0, window_bounds = array<i64: 8, 256>}, {transform_indices = @transform_1, window_bounds = array<i64: 256, 256>}, {transform_indices = @transform_2, window_bounds = array<i64: 1, 256>}, {transform_indices = @transform_3, window_bounds = array<i64: 8, 256>}]} {
    %c0_i32 = arith.constant 0 : i32
    %0 = arith.cmpi eq, %arg2, %c0_i32 : i32
    %1 = arith.extui %0 : i1 to i32
    %c0_i32_0 = arith.constant 0 : i32
    %2 = arith.cmpi ne, %1, %c0_i32_0 : i32
    scf.if %2 {
      %cst_9 = arith.constant 0.000000e+00 : f32
      %12 = vector.broadcast %cst_9 : f32 to vector<8x256xf32>
      %c0_10 = arith.constant 0 : index
      %c0_11 = arith.constant 0 : index
      %13 = vector.load %arg7[%c0_10, %c0_11] : memref<8x256xf32, #tpu.memory_space<vmem>>, vector<8x256xf32>
      tpu.vector_store %arg7[%c0_10, %c0_11], %12 {strides = array<i32>} : memref<8x256xf32, #tpu.memory_space<vmem>>, vector<8x256xf32>,
    } else {
    }
    %c0 = arith.constant 0 : index
    %c0_1 = arith.constant 0 : index
    %3 = vector.load %arg7[%c0, %c0_1] : memref<8x256xf32, #tpu.memory_space<vmem>>, vector<8x256xf32>
    %c0_2 = arith.constant 0 : index
    %c0_3 = arith.constant 0 : index
    %4 = vector.load %arg3[%c0_2, %c0_3] : memref<8x256xbf16, #tpu.memory_space<vmem>>, vector<8x256xbf16>
    %c0_4 = arith.constant 0 : index
    %c0_5 = arith.constant 0 : index
    %5 = vector.load %arg4[%c0_4, %c0_5] : memref<256x256xbf16, #tpu.memory_space<vmem>>, vector<256x256xbf16>
    %cst = arith.constant dense<0.000000e+00> : vector<8x256xf32>
    %6 = tpu.matmul %4, %5, %cst {dimension_numbers = #tpu.dot_dimension_numbers<[1], [0], [0], [1], [0, 0, 1, 1], [], []>} : vector<8x256xbf16>, vector<256x256xbf16>, vector<8x256xf32> -> vector<8x256xf32>
    %7 = arith.addf %3, %6 : vector<8x256xf32>
    %c0_6 = arith.constant 0 : index
    %c0_7 = arith.constant 0 : index
    %8 = vector.load %arg7[%c0_6, %c0_7] : memref<8x256xf32, #tpu.memory_space<vmem>>, vector<8x256xf32>
    tpu.vector_store %arg7[%c0_6, %c0_7], %7 {strides = array<i32>} : memref<8x256xf32, #tpu.memory_space<vmem>>, vector<8x256xf32>,
    %c8_i32 = arith.constant 8 : i32
    %9 = arith.cmpi eq, %arg2, %c8_i32 : i32
    %10 = arith.extui %9 : i1 to i32
    %c0_i32_8 = arith.constant 0 : i32
    %11 = arith.cmpi ne, %10, %c0_i32_8 : i32
    scf.if %11 {
      %c0_9 = arith.constant 0 : index
      %c0_10 = arith.constant 0 : index
      %12 = vector.load %arg7[%c0_9, %c0_10] : memref<8x256xf32, #tpu.memory_space<vmem>>, vector<8x256xf32>
      %c0_11 = arith.constant 0 : index
      %c0_12 = arith.constant 0 : index
      %13 = vector.load %arg5[%c0_11, %c0_12] : memref<1x256xf32, #tpu.memory_space<vmem>>, vector<1x256xf32>
      %14 = vector.broadcast %13 : vector<1x256xf32> to vector<8x256xf32>
      %15 = arith.addf %12, %14 : vector<8x256xf32>
      %cst_13 = arith.constant 0.000000e+00 : f32
      %16 = vector.broadcast %cst_13 : f32 to vector<8x256xf32>
      %17 = arith.maximumf %15, %16 : vector<8x256xf32>
      %c0_14 = arith.constant 0 : index
      %c0_15 = arith.constant 0 : index
      %18 = vector.load %arg6[%c0_14, %c0_15] : memref<8x256xf32, #tpu.memory_space<vmem>>, vector<8x256xf32>
      tpu.vector_store %arg6[%c0_14, %c0_15], %17 {strides = array<i32>} : memref<8x256xf32, #tpu.memory_space<vmem>>, vector<8x256xf32>,
    } else {
    }
    return
  }
  func.func @transform_0(%arg0: i32, %arg1: i32, %arg2: i32) -> (i32, i32) {
    %c0_i32 = arith.constant 0 : i32
    return %arg0, %arg2 : i32, i32
  }
  func.func @transform_1(%arg0: i32, %arg1: i32, %arg2: i32) -> (i32, i32) {
    %c0_i32 = arith.constant 0 : i32
    return %arg2, %arg1 : i32, i32
  }
  func.func @transform_2(%arg0: i32, %arg1: i32, %arg2: i32) -> (i32, i32) {
    %c0_i32 = arith.constant 0 : i32
    %c0_i32_0 = arith.constant 0 : i32
    return %c0_i32, %arg1 : i32, i32
  }
  func.func @transform_3(%arg0: i32, %arg1: i32, %arg2: i32) -> (i32, i32) {
    %c0_i32 = arith.constant 0 : i32
    return %arg0, %arg1 : i32, i32
  }
}

module attributes {stable_mosaic.version = 11 : i64} {
  func.func @_conv_mm_kernel(%arg0: i32, %arg1: i32, %arg2: i32, %arg3: memref<8x256xbf16, #tpu.memory_space<vmem>>, %arg4: memref<256x256xbf16, #tpu.memory_space<vmem>>, %arg5: memref<1x256xf32, #tpu.memory_space<vmem>>, %arg6: memref<8x256xf32, #tpu.memory_space<vmem>>, %arg7: memref<8x256xf32, #tpu.memory_space<vmem>>) attributes {dimension_semantics = [#tpu.dimension_semantics<parallel>, #tpu.dimension_semantics<parallel>, #tpu.dimension_semantics<arbitrary>], iteration_bounds = array<i64: 1, 2, 1>, scalar_prefetch = 0 : i64, scratch_operands = 1 : i64, tpu.core_type = #tpu.core_type<tc>, window_params = [{transform_indices = @transform_0, window_bounds = array<i64: 8, 256>}, {transform_indices = @transform_1, window_bounds = array<i64: 256, 256>}, {transform_indices = @transform_2, window_bounds = array<i64: 1, 256>}, {transform_indices = @transform_3, window_bounds = array<i64: 8, 256>}]} {
    %c0_i32 = arith.constant 0 : i32
    %0 = arith.cmpi eq, %arg2, %c0_i32 : i32
    %1 = arith.extui %0 : i1 to i32
    %c0_i32_0 = arith.constant 0 : i32
    %2 = arith.cmpi ne, %1, %c0_i32_0 : i32
    scf.if %2 {
      %cst_10 = arith.constant 0.000000e+00 : f32
      %12 = vector.broadcast %cst_10 : f32 to vector<8x256xf32>
      %c0_11 = arith.constant 0 : index
      %c0_12 = arith.constant 0 : index
      %13 = vector.load %arg7[%c0_11, %c0_12] : memref<8x256xf32, #tpu.memory_space<vmem>>, vector<8x256xf32>
      tpu.vector_store %arg7[%c0_11, %c0_12], %12 {strides = array<i32>} : memref<8x256xf32, #tpu.memory_space<vmem>>, vector<8x256xf32>,
    } else {
    }
    %c0 = arith.constant 0 : index
    %c0_1 = arith.constant 0 : index
    %3 = vector.load %arg7[%c0, %c0_1] : memref<8x256xf32, #tpu.memory_space<vmem>>, vector<8x256xf32>
    %c0_2 = arith.constant 0 : index
    %c0_3 = arith.constant 0 : index
    %4 = vector.load %arg3[%c0_2, %c0_3] : memref<8x256xbf16, #tpu.memory_space<vmem>>, vector<8x256xbf16>
    %c0_4 = arith.constant 0 : index
    %c0_5 = arith.constant 0 : index
    %5 = vector.load %arg4[%c0_4, %c0_5] : memref<256x256xbf16, #tpu.memory_space<vmem>>, vector<256x256xbf16>
    %cst = arith.constant dense<0.000000e+00> : vector<8x256xf32>
    %6 = tpu.matmul %4, %5, %cst {dimension_numbers = #tpu.dot_dimension_numbers<[1], [0], [0], [1], [0, 0, 1, 1], [], []>} : vector<8x256xbf16>, vector<256x256xbf16>, vector<8x256xf32> -> vector<8x256xf32>
    %7 = arith.addf %3, %6 : vector<8x256xf32>
    %c0_6 = arith.constant 0 : index
    %c0_7 = arith.constant 0 : index
    %8 = vector.load %arg7[%c0_6, %c0_7] : memref<8x256xf32, #tpu.memory_space<vmem>>, vector<8x256xf32>
    tpu.vector_store %arg7[%c0_6, %c0_7], %7 {strides = array<i32>} : memref<8x256xf32, #tpu.memory_space<vmem>>, vector<8x256xf32>,
    %c0_i32_8 = arith.constant 0 : i32
    %9 = arith.cmpi eq, %arg2, %c0_i32_8 : i32
    %10 = arith.extui %9 : i1 to i32
    %c0_i32_9 = arith.constant 0 : i32
    %11 = arith.cmpi ne, %10, %c0_i32_9 : i32
    scf.if %11 {
      %c0_10 = arith.constant 0 : index
      %c0_11 = arith.constant 0 : index
      %12 = vector.load %arg7[%c0_10, %c0_11] : memref<8x256xf32, #tpu.memory_space<vmem>>, vector<8x256xf32>
      %c0_12 = arith.constant 0 : index
      %c0_13 = arith.constant 0 : index
      %13 = vector.load %arg5[%c0_12, %c0_13] : memref<1x256xf32, #tpu.memory_space<vmem>>, vector<1x256xf32>
      %14 = vector.broadcast %13 : vector<1x256xf32> to vector<8x256xf32>
      %15 = arith.addf %12, %14 : vector<8x256xf32>
      %c0_14 = arith.constant 0 : index
      %c0_15 = arith.constant 0 : index
      %16 = vector.load %arg6[%c0_14, %c0_15] : memref<8x256xf32, #tpu.memory_space<vmem>>, vector<8x256xf32>
      tpu.vector_store %arg6[%c0_14, %c0_15], %15 {strides = array<i32>} : memref<8x256xf32, #tpu.memory_space<vmem>>, vector<8x256xf32>,
    } else {
    }
    return
  }
  func.func @transform_0(%arg0: i32, %arg1: i32, %arg2: i32) -> (i32, i32) {
    %c0_i32 = arith.constant 0 : i32
    return %arg0, %arg2 : i32, i32
  }
  func.func @transform_1(%arg0: i32, %arg1: i32, %arg2: i32) -> (i32, i32) {
    %c0_i32 = arith.constant 0 : i32
    return %arg2, %arg1 : i32, i32
  }
  func.func @transform_2(%arg0: i32, %arg1: i32, %arg2: i32) -> (i32, i32) {
    %c0_i32 = arith.constant 0 : i32
    %c0_i32_0 = arith.constant 0 : i32
    return %c0_i32, %arg1 : i32, i32
  }
  func.func @transform_3(%arg0: i32, %arg1: i32, %arg2: i32) -> (i32, i32) {
    %c0_i32 = arith.constant 0 : i32
    return %arg0, %arg1 : i32, i32
  }
}

module attributes {stable_mosaic.version = 11 : i64} {
  func.func @_conv_mm_kernel(%arg0: i32, %arg1: i32, %arg2: i32, %arg3: memref<8x512xbf16, #tpu.memory_space<vmem>>, %arg4: memref<512x256xbf16, #tpu.memory_space<vmem>>, %arg5: memref<1x256xf32, #tpu.memory_space<vmem>>, %arg6: memref<8x256xf32, #tpu.memory_space<vmem>>, %arg7: memref<8x256xf32, #tpu.memory_space<vmem>>, %arg8: memref<8x256xf32, #tpu.memory_space<vmem>>) attributes {dimension_semantics = [#tpu.dimension_semantics<parallel>, #tpu.dimension_semantics<parallel>, #tpu.dimension_semantics<arbitrary>], iteration_bounds = array<i64: 1, 2, 9>, scalar_prefetch = 0 : i64, scratch_operands = 1 : i64, tpu.core_type = #tpu.core_type<tc>, window_params = [{transform_indices = @transform_0, window_bounds = array<i64: 8, 512>}, {transform_indices = @transform_1, window_bounds = array<i64: 512, 256>}, {transform_indices = @transform_2, window_bounds = array<i64: 1, 256>}, {transform_indices = @transform_3, window_bounds = array<i64: 8, 256>}, {transform_indices = @transform_4, window_bounds = array<i64: 8, 256>}]} {
    %c0_i32 = arith.constant 0 : i32
    %0 = arith.cmpi eq, %arg2, %c0_i32 : i32
    %1 = arith.extui %0 : i1 to i32
    %c0_i32_0 = arith.constant 0 : i32
    %2 = arith.cmpi ne, %1, %c0_i32_0 : i32
    scf.if %2 {
      %cst_9 = arith.constant 0.000000e+00 : f32
      %12 = vector.broadcast %cst_9 : f32 to vector<8x256xf32>
      %c0_10 = arith.constant 0 : index
      %c0_11 = arith.constant 0 : index
      %13 = vector.load %arg8[%c0_10, %c0_11] : memref<8x256xf32, #tpu.memory_space<vmem>>, vector<8x256xf32>
      tpu.vector_store %arg8[%c0_10, %c0_11], %12 {strides = array<i32>} : memref<8x256xf32, #tpu.memory_space<vmem>>, vector<8x256xf32>,
    } else {
    }
    %c0 = arith.constant 0 : index
    %c0_1 = arith.constant 0 : index
    %3 = vector.load %arg8[%c0, %c0_1] : memref<8x256xf32, #tpu.memory_space<vmem>>, vector<8x256xf32>
    %c0_2 = arith.constant 0 : index
    %c0_3 = arith.constant 0 : index
    %4 = vector.load %arg3[%c0_2, %c0_3] : memref<8x512xbf16, #tpu.memory_space<vmem>>, vector<8x512xbf16>
    %c0_4 = arith.constant 0 : index
    %c0_5 = arith.constant 0 : index
    %5 = vector.load %arg4[%c0_4, %c0_5] : memref<512x256xbf16, #tpu.memory_space<vmem>>, vector<512x256xbf16>
    %cst = arith.constant dense<0.000000e+00> : vector<8x256xf32>
    %6 = tpu.matmul %4, %5, %cst {dimension_numbers = #tpu.dot_dimension_numbers<[1], [0], [0], [1], [0, 0, 1, 1], [], []>} : vector<8x512xbf16>, vector<512x256xbf16>, vector<8x256xf32> -> vector<8x256xf32>
    %7 = arith.addf %3, %6 : vector<8x256xf32>
    %c0_6 = arith.constant 0 : index
    %c0_7 = arith.constant 0 : index
    %8 = vector.load %arg8[%c0_6, %c0_7] : memref<8x256xf32, #tpu.memory_space<vmem>>, vector<8x256xf32>
    tpu.vector_store %arg8[%c0_6, %c0_7], %7 {strides = array<i32>} : memref<8x256xf32, #tpu.memory_space<vmem>>, vector<8x256xf32>,
    %c8_i32 = arith.constant 8 : i32
    %9 = arith.cmpi eq, %arg2, %c8_i32 : i32
    %10 = arith.extui %9 : i1 to i32
    %c0_i32_8 = arith.constant 0 : i32
    %11 = arith.cmpi ne, %10, %c0_i32_8 : i32
    scf.if %11 {
      %c0_9 = arith.constant 0 : index
      %c0_10 = arith.constant 0 : index
      %12 = vector.load %arg8[%c0_9, %c0_10] : memref<8x256xf32, #tpu.memory_space<vmem>>, vector<8x256xf32>
      %c0_11 = arith.constant 0 : index
      %c0_12 = arith.constant 0 : index
      %13 = vector.load %arg5[%c0_11, %c0_12] : memref<1x256xf32, #tpu.memory_space<vmem>>, vector<1x256xf32>
      %14 = vector.broadcast %13 : vector<1x256xf32> to vector<8x256xf32>
      %15 = arith.addf %12, %14 : vector<8x256xf32>
      %c0_13 = arith.constant 0 : index
      %c0_14 = arith.constant 0 : index
      %16 = vector.load %arg6[%c0_13, %c0_14] : memref<8x256xf32, #tpu.memory_space<vmem>>, vector<8x256xf32>
      %17 = arith.addf %15, %16 : vector<8x256xf32>
      %cst_15 = arith.constant 0.000000e+00 : f32
      %18 = vector.broadcast %cst_15 : f32 to vector<8x256xf32>
      %19 = arith.maximumf %17, %18 : vector<8x256xf32>
      %c0_16 = arith.constant 0 : index
      %c0_17 = arith.constant 0 : index
      %20 = vector.load %arg7[%c0_16, %c0_17] : memref<8x256xf32, #tpu.memory_space<vmem>>, vector<8x256xf32>
      tpu.vector_store %arg7[%c0_16, %c0_17], %19 {strides = array<i32>} : memref<8x256xf32, #tpu.memory_space<vmem>>, vector<8x256xf32>,
    } else {
    }
    return
  }
  func.func @transform_0(%arg0: i32, %arg1: i32, %arg2: i32) -> (i32, i32) {
    %c0_i32 = arith.constant 0 : i32
    return %arg0, %arg2 : i32, i32
  }
  func.func @transform_1(%arg0: i32, %arg1: i32, %arg2: i32) -> (i32, i32) {
    %c0_i32 = arith.constant 0 : i32
    return %arg2, %arg1 : i32, i32
  }
  func.func @transform_2(%arg0: i32, %arg1: i32, %arg2: i32) -> (i32, i32) {
    %c0_i32 = arith.constant 0 : i32
    %c0_i32_0 = arith.constant 0 : i32
    return %c0_i32, %arg1 : i32, i32
  }
  func.func @transform_3(%arg0: i32, %arg1: i32, %arg2: i32) -> (i32, i32) {
    %c0_i32 = arith.constant 0 : i32
    return %arg0, %arg1 : i32, i32
  }
  func.func @transform_4(%arg0: i32, %arg1: i32, %arg2: i32) -> (i32, i32) {
    %c0_i32 = arith.constant 0 : i32
    return %arg0, %arg1 : i32, i32
  }
}

module attributes {stable_mosaic.version = 11 : i64} {
  func.func @_conv_mm_kernel(%arg0: i32, %arg1: i32, %arg2: i32, %arg3: memref<8x512xbf16, #tpu.memory_space<vmem>>, %arg4: memref<512x256xbf16, #tpu.memory_space<vmem>>, %arg5: memref<1x256xf32, #tpu.memory_space<vmem>>, %arg6: memref<8x256xf32, #tpu.memory_space<vmem>>, %arg7: memref<8x256xf32, #tpu.memory_space<vmem>>) attributes {dimension_semantics = [#tpu.dimension_semantics<parallel>, #tpu.dimension_semantics<parallel>, #tpu.dimension_semantics<arbitrary>], iteration_bounds = array<i64: 1, 2, 9>, scalar_prefetch = 0 : i64, scratch_operands = 1 : i64, tpu.core_type = #tpu.core_type<tc>, window_params = [{transform_indices = @transform_0, window_bounds = array<i64: 8, 512>}, {transform_indices = @transform_1, window_bounds = array<i64: 512, 256>}, {transform_indices = @transform_2, window_bounds = array<i64: 1, 256>}, {transform_indices = @transform_3, window_bounds = array<i64: 8, 256>}]} {
    %c0_i32 = arith.constant 0 : i32
    %0 = arith.cmpi eq, %arg2, %c0_i32 : i32
    %1 = arith.extui %0 : i1 to i32
    %c0_i32_0 = arith.constant 0 : i32
    %2 = arith.cmpi ne, %1, %c0_i32_0 : i32
    scf.if %2 {
      %cst_9 = arith.constant 0.000000e+00 : f32
      %12 = vector.broadcast %cst_9 : f32 to vector<8x256xf32>
      %c0_10 = arith.constant 0 : index
      %c0_11 = arith.constant 0 : index
      %13 = vector.load %arg7[%c0_10, %c0_11] : memref<8x256xf32, #tpu.memory_space<vmem>>, vector<8x256xf32>
      tpu.vector_store %arg7[%c0_10, %c0_11], %12 {strides = array<i32>} : memref<8x256xf32, #tpu.memory_space<vmem>>, vector<8x256xf32>,
    } else {
    }
    %c0 = arith.constant 0 : index
    %c0_1 = arith.constant 0 : index
    %3 = vector.load %arg7[%c0, %c0_1] : memref<8x256xf32, #tpu.memory_space<vmem>>, vector<8x256xf32>
    %c0_2 = arith.constant 0 : index
    %c0_3 = arith.constant 0 : index
    %4 = vector.load %arg3[%c0_2, %c0_3] : memref<8x512xbf16, #tpu.memory_space<vmem>>, vector<8x512xbf16>
    %c0_4 = arith.constant 0 : index
    %c0_5 = arith.constant 0 : index
    %5 = vector.load %arg4[%c0_4, %c0_5] : memref<512x256xbf16, #tpu.memory_space<vmem>>, vector<512x256xbf16>
    %cst = arith.constant dense<0.000000e+00> : vector<8x256xf32>
    %6 = tpu.matmul %4, %5, %cst {dimension_numbers = #tpu.dot_dimension_numbers<[1], [0], [0], [1], [0, 0, 1, 1], [], []>} : vector<8x512xbf16>, vector<512x256xbf16>, vector<8x256xf32> -> vector<8x256xf32>
    %7 = arith.addf %3, %6 : vector<8x256xf32>
    %c0_6 = arith.constant 0 : index
    %c0_7 = arith.constant 0 : index
    %8 = vector.load %arg7[%c0_6, %c0_7] : memref<8x256xf32, #tpu.memory_space<vmem>>, vector<8x256xf32>
    tpu.vector_store %arg7[%c0_6, %c0_7], %7 {strides = array<i32>} : memref<8x256xf32, #tpu.memory_space<vmem>>, vector<8x256xf32>,
    %c8_i32 = arith.constant 8 : i32
    %9 = arith.cmpi eq, %arg2, %c8_i32 : i32
    %10 = arith.extui %9 : i1 to i32
    %c0_i32_8 = arith.constant 0 : i32
    %11 = arith.cmpi ne, %10, %c0_i32_8 : i32
    scf.if %11 {
      %c0_9 = arith.constant 0 : index
      %c0_10 = arith.constant 0 : index
      %12 = vector.load %arg7[%c0_9, %c0_10] : memref<8x256xf32, #tpu.memory_space<vmem>>, vector<8x256xf32>
      %c0_11 = arith.constant 0 : index
      %c0_12 = arith.constant 0 : index
      %13 = vector.load %arg5[%c0_11, %c0_12] : memref<1x256xf32, #tpu.memory_space<vmem>>, vector<1x256xf32>
      %14 = vector.broadcast %13 : vector<1x256xf32> to vector<8x256xf32>
      %15 = arith.addf %12, %14 : vector<8x256xf32>
      %cst_13 = arith.constant 0.000000e+00 : f32
      %16 = vector.broadcast %cst_13 : f32 to vector<8x256xf32>
      %17 = arith.maximumf %15, %16 : vector<8x256xf32>
      %c0_14 = arith.constant 0 : index
      %c0_15 = arith.constant 0 : index
      %18 = vector.load %arg6[%c0_14, %c0_15] : memref<8x256xf32, #tpu.memory_space<vmem>>, vector<8x256xf32>
      tpu.vector_store %arg6[%c0_14, %c0_15], %17 {strides = array<i32>} : memref<8x256xf32, #tpu.memory_space<vmem>>, vector<8x256xf32>,
    } else {
    }
    return
  }
  func.func @transform_0(%arg0: i32, %arg1: i32, %arg2: i32) -> (i32, i32) {
    %c0_i32 = arith.constant 0 : i32
    return %arg0, %arg2 : i32, i32
  }
  func.func @transform_1(%arg0: i32, %arg1: i32, %arg2: i32) -> (i32, i32) {
    %c0_i32 = arith.constant 0 : i32
    return %arg2, %arg1 : i32, i32
  }
  func.func @transform_2(%arg0: i32, %arg1: i32, %arg2: i32) -> (i32, i32) {
    %c0_i32 = arith.constant 0 : i32
    %c0_i32_0 = arith.constant 0 : i32
    return %c0_i32, %arg1 : i32, i32
  }
  func.func @transform_3(%arg0: i32, %arg1: i32, %arg2: i32) -> (i32, i32) {
    %c0_i32 = arith.constant 0 : i32
    return %arg0, %arg1 : i32, i32
  }
}

module attributes {stable_mosaic.version = 11 : i64} {
  func.func @_head_kernel(%arg0: i32, %arg1: memref<8x512xbf16, #tpu.memory_space<vmem>>, %arg2: memref<512x128xbf16, #tpu.memory_space<vmem>>, %arg3: memref<1x128xf32, #tpu.memory_space<vmem>>, %arg4: memref<128x128xbf16, #tpu.memory_space<vmem>>, %arg5: memref<1x128xf32, #tpu.memory_space<vmem>>, %arg6: memref<128x128xbf16, #tpu.memory_space<vmem>>, %arg7: memref<1x128xf32, #tpu.memory_space<vmem>>, %arg8: memref<8x128xf32, #tpu.memory_space<vmem>>) attributes {dimension_semantics = [#tpu.dimension_semantics<arbitrary>], iteration_bounds = array<i64: 1>, scalar_prefetch = 0 : i64, scratch_operands = 0 : i64, tpu.core_type = #tpu.core_type<tc>, window_params = [{pipeline_mode = #tpu.pipeline_mode<synchronous>, transform_indices = @transform_0, window_bounds = array<i64: 8, 512>}, {pipeline_mode = #tpu.pipeline_mode<synchronous>, transform_indices = @transform_1, window_bounds = array<i64: 512, 128>}, {pipeline_mode = #tpu.pipeline_mode<synchronous>, transform_indices = @transform_2, window_bounds = array<i64: 1, 128>}, {pipeline_mode = #tpu.pipeline_mode<synchronous>, transform_indices = @transform_3, window_bounds = array<i64: 128, 128>}, {pipeline_mode = #tpu.pipeline_mode<synchronous>, transform_indices = @transform_4, window_bounds = array<i64: 1, 128>}, {pipeline_mode = #tpu.pipeline_mode<synchronous>, transform_indices = @transform_5, window_bounds = array<i64: 128, 128>}, {pipeline_mode = #tpu.pipeline_mode<synchronous>, transform_indices = @transform_6, window_bounds = array<i64: 1, 128>}, {pipeline_mode = #tpu.pipeline_mode<synchronous>, transform_indices = @transform_7, window_bounds = array<i64: 8, 128>}]} {
    %c0 = arith.constant 0 : index
    %c0_0 = arith.constant 0 : index
    %0 = vector.load %arg1[%c0, %c0_0] : memref<8x512xbf16, #tpu.memory_space<vmem>>, vector<8x512xbf16>
    %c0_1 = arith.constant 0 : index
    %c0_2 = arith.constant 0 : index
    %1 = vector.load %arg2[%c0_1, %c0_2] : memref<512x128xbf16, #tpu.memory_space<vmem>>, vector<512x128xbf16>
    %cst = arith.constant dense<0.000000e+00> : vector<8x128xf32>
    %2 = tpu.matmul %0, %1, %cst {dimension_numbers = #tpu.dot_dimension_numbers<[1], [0], [0], [1], [0, 0, 1, 1], [], []>} : vector<8x512xbf16>, vector<512x128xbf16>, vector<8x128xf32> -> vector<8x128xf32>
    %c0_3 = arith.constant 0 : index
    %c0_4 = arith.constant 0 : index
    %3 = vector.load %arg3[%c0_3, %c0_4] : memref<1x128xf32, #tpu.memory_space<vmem>>, vector<1x128xf32>
    %4 = vector.broadcast %3 : vector<1x128xf32> to vector<8x128xf32>
    %5 = arith.addf %2, %4 : vector<8x128xf32>
    %cst_5 = arith.constant 0.000000e+00 : f32
    %6 = vector.broadcast %cst_5 : f32 to vector<8x128xf32>
    %7 = arith.maximumf %5, %6 : vector<8x128xf32>
    %8 = arith.truncf %7 : vector<8x128xf32> to vector<8x128xbf16>
    %c0_6 = arith.constant 0 : index
    %c0_7 = arith.constant 0 : index
    %9 = vector.load %arg4[%c0_6, %c0_7] : memref<128x128xbf16, #tpu.memory_space<vmem>>, vector<128x128xbf16>
    %cst_8 = arith.constant dense<0.000000e+00> : vector<8x128xf32>
    %10 = tpu.matmul %8, %9, %cst_8 {dimension_numbers = #tpu.dot_dimension_numbers<[1], [0], [0], [1], [0, 0, 1, 1], [], []>} : vector<8x128xbf16>, vector<128x128xbf16>, vector<8x128xf32> -> vector<8x128xf32>
    %c0_9 = arith.constant 0 : index
    %c0_10 = arith.constant 0 : index
    %11 = vector.load %arg5[%c0_9, %c0_10] : memref<1x128xf32, #tpu.memory_space<vmem>>, vector<1x128xf32>
    %12 = vector.broadcast %11 : vector<1x128xf32> to vector<8x128xf32>
    %13 = arith.addf %10, %12 : vector<8x128xf32>
    %cst_11 = arith.constant 0.000000e+00 : f32
    %14 = vector.broadcast %cst_11 : f32 to vector<8x128xf32>
    %15 = arith.maximumf %13, %14 : vector<8x128xf32>
    %16 = arith.truncf %15 : vector<8x128xf32> to vector<8x128xbf16>
    %c0_12 = arith.constant 0 : index
    %c0_13 = arith.constant 0 : index
    %17 = vector.load %arg6[%c0_12, %c0_13] : memref<128x128xbf16, #tpu.memory_space<vmem>>, vector<128x128xbf16>
    %cst_14 = arith.constant dense<0.000000e+00> : vector<8x128xf32>
    %18 = tpu.matmul %16, %17, %cst_14 {dimension_numbers = #tpu.dot_dimension_numbers<[1], [0], [0], [1], [0, 0, 1, 1], [], []>} : vector<8x128xbf16>, vector<128x128xbf16>, vector<8x128xf32> -> vector<8x128xf32>
    %c0_15 = arith.constant 0 : index
    %c0_16 = arith.constant 0 : index
    %19 = vector.load %arg7[%c0_15, %c0_16] : memref<1x128xf32, #tpu.memory_space<vmem>>, vector<1x128xf32>
    %20 = vector.broadcast %19 : vector<1x128xf32> to vector<8x128xf32>
    %21 = arith.addf %18, %20 : vector<8x128xf32>
    %22 = tpu.iota {dimensions = array<i32: 1>} : vector<8x128xi32>
    %c10_i32 = arith.constant 10 : i32
    %23 = vector.broadcast %c10_i32 : i32 to vector<8x128xi32>
    %24 = arith.cmpi slt, %22, %23 : vector<8x128xi32>
    %cst_17 = arith.constant -1.000000e+30 : f32
    %25 = vector.broadcast %cst_17 : f32 to vector<8x128xf32>
    %26 = arith.select %24, %21, %25 : vector<8x128xi1>, vector<8x128xf32>
    %cst_18 = arith.constant dense<0xFF800000> : vector<8xf32>
    %27 = vector.multi_reduction <maximumf>, %26, %cst_18 [1] : vector<8x128xf32> to vector<8xf32>
    %28 = vector.shape_cast %27 : vector<8xf32> to vector<8x1xf32>
    %29 = vector.broadcast %28 : vector<8x1xf32> to vector<8x128xf32>
    %30 = arith.subf %26, %29 : vector<8x128xf32>
    %31 = math.exp %30 : vector<8x128xf32>
    %cst_19 = arith.constant dense<0.000000e+00> : vector<8xf32>
    %32 = vector.multi_reduction <add>, %31, %cst_19 [1] : vector<8x128xf32> to vector<8xf32>
    %33 = vector.shape_cast %32 : vector<8xf32> to vector<8x1xf32>
    %34 = vector.broadcast %33 : vector<8x1xf32> to vector<8x128xf32>
    %35 = arith.divf %31, %34 : vector<8x128xf32>
    %c0_20 = arith.constant 0 : index
    %c0_21 = arith.constant 0 : index
    %36 = vector.load %arg8[%c0_20, %c0_21] : memref<8x128xf32, #tpu.memory_space<vmem>>, vector<8x128xf32>
    tpu.vector_store %arg8[%c0_20, %c0_21], %35 {strides = array<i32>} : memref<8x128xf32, #tpu.memory_space<vmem>>, vector<8x128xf32>,
    return
  }
  func.func @transform_0(%arg0: i32) -> (i32, i32) {
    %c0_i32 = arith.constant 0 : i32
    %c0_i32_0 = arith.constant 0 : i32
    %c0_i32_1 = arith.constant 0 : i32
    return %c0_i32, %c0_i32_0 : i32, i32
  }
  func.func @transform_1(%arg0: i32) -> (i32, i32) {
    %c0_i32 = arith.constant 0 : i32
    %c0_i32_0 = arith.constant 0 : i32
    %c0_i32_1 = arith.constant 0 : i32
    return %c0_i32, %c0_i32_0 : i32, i32
  }
  func.func @transform_2(%arg0: i32) -> (i32, i32) {
    %c0_i32 = arith.constant 0 : i32
    %c0_i32_0 = arith.constant 0 : i32
    %c0_i32_1 = arith.constant 0 : i32
    return %c0_i32, %c0_i32_0 : i32, i32
  }
  func.func @transform_3(%arg0: i32) -> (i32, i32) {
    %c0_i32 = arith.constant 0 : i32
    %c0_i32_0 = arith.constant 0 : i32
    %c0_i32_1 = arith.constant 0 : i32
    return %c0_i32, %c0_i32_0 : i32, i32
  }
  func.func @transform_4(%arg0: i32) -> (i32, i32) {
    %c0_i32 = arith.constant 0 : i32
    %c0_i32_0 = arith.constant 0 : i32
    %c0_i32_1 = arith.constant 0 : i32
    return %c0_i32, %c0_i32_0 : i32, i32
  }
  func.func @transform_5(%arg0: i32) -> (i32, i32) {
    %c0_i32 = arith.constant 0 : i32
    %c0_i32_0 = arith.constant 0 : i32
    %c0_i32_1 = arith.constant 0 : i32
    return %c0_i32, %c0_i32_0 : i32, i32
  }
  func.func @transform_6(%arg0: i32) -> (i32, i32) {
    %c0_i32 = arith.constant 0 : i32
    %c0_i32_0 = arith.constant 0 : i32
    %c0_i32_1 = arith.constant 0 : i32
    return %c0_i32, %c0_i32_0 : i32, i32
  }
  func.func @transform_7(%arg0: i32) -> (i32, i32) {
    %c0_i32 = arith.constant 0 : i32
    %c0_i32_0 = arith.constant 0 : i32
    %c0_i32_1 = arith.constant 0 : i32
    return %c0_i32, %c0_i32_0 : i32, i32
  }
}

</mosaic_0001>

<bundles_post_ra>
// kernel: st_classifier_forward.21
= control target key start
LH: loop header
LB: loop body
LE: loop exit
PB: predicated region body
PF: predicated region fallthrough
CT: control target
= control target key end

     0   :  { %s1457_s12 = smov 0   ;;  %s1459_s13 = smov 0   ;;  %s1650_s0 = inlined_call_operand.vmem [shape: bf16[512,256], index: 0, kind: input, shape index: {}]   ;;  %s1651_s1 = inlined_call_operand.vmem [shape: bf16[256,128], index: 1, kind: input, shape index: {}]   ;;  %s1652_s2 = inlined_call_operand.vmem [shape: f32[1,128], index: 2, kind: input, shape index: {}]   ;;  %s1653_s3 = inlined_call_operand.vmem [shape: f32[512,128], index: 3, kind: output, shape index: {}]  }
   0x1   :  { %s1461_s14 = smov 0  }
   0x2 LB: > { %s32_s15 = sadd.s32 1, %s1431_s13  ;;  %p1139_p0 = scmp.ge.s32.totalorder %s1435_s14, 1  ;;  %s1435_s14 = sphi %s1461_s14, %s13_s14   ;;  %s1431_s13 = sphi %s1459_s13, %s1655_s13   ;;  %s1427_s12 = sphi %s1457_s12, %s1654_s12  }
   0x3   : > { %p34_p1 = scmp.ge.s32.totalorder %s32_s15, 2  ;;  %p191_p2 = scmp.lt.s32.totalorder %s1435_s14, 3 }
   0x5   : > { %s1657_s15 = smov (%p34_p1, %s32_s15), 0  ;;  %p192_p3 = pnand %p1139_p0, %p191_p2 }
   0x6   : > { %v1349_v0 = vld [vmem:[%s1651_s1 + $0x40] sm:$0xff] (!%p192_p3)   ;;  %s1140_s18 = sshll.u32 (!%p192_p3), %s1427_s12, 5  ;;  %v1351_v2 = vld [vmem:[%s1651_s1 + $0x48] sm:$0xff] (!%p192_p3)   ;;  %v1353_v4 = vld [vmem:[%s1651_s1 + $0x50] sm:$0xff] (!%p192_p3)  }
   0x7   : > { %195 = sbr.rel (%p192_p3) target bundleno = 317 (0x13d), region = 32  ;;  %v1350_v1 = vld [vmem:[%s1651_s1] sm:$0xff] (!%p192_p3)   ;;  %1197 = vmatprep.subr.bf16.mxu0 (!%p192_p3), %v1349_v0  ;;  %1309 = vmatprep.subr.bf16.mxu1 (!%p192_p3), %v1349_v0  ;;  %v1352_v3 = vld [vmem:[%s1651_s1 + $0x8] sm:$0xff] (!%p192_p3)   ;;  %p236_p4 = scmp.lt.s32.totalorder (!%p192_p3), %s1140_s18, 63  ;;  %v1354_v5 = vld [vmem:[%s1651_s1 + $0x10] sm:$0xff] (!%p192_p3)  }
   0x8   : > { %1198 = vmatpush3.bf16.msra.mxu0 (!%p192_p3), %v1350_v1  ;;  %1317 = vmatpush3.bf16.msra.mxu1 (!%p192_p3), %v1350_v1  ;;  %v1355_v6 = vld [vmem:[%s1651_s1 + $0x58] sm:$0xff] (!%p192_p3)   ;;  %v1357_v8 = vld [vmem:[%s1651_s1 + $0x60] sm:$0xff] (!%p192_p3)   ;;  %v1359_v10 = vld [vmem:[%s1651_s1 + $0x68] sm:$0xff] (!%p192_p3)  }
   0x9   : > { %1199 = vmatprep.subr.bf16.mxu0 (!%p192_p3), %v1351_v2  ;;  %1310 = vmatprep.subr.bf16.mxu1 (!%p192_p3), %v1351_v2  ;;  %v1356_v7 = vld [vmem:[%s1651_s1 + $0x18] sm:$0xff] (!%p192_p3)   ;;  %v1358_v9 = vld [vmem:[%s1651_s1 + $0x20] sm:$0xff] (!%p192_p3)   ;;  %v1360_v13 = vld [vmem:[%s1651_s1 + $0x28] sm:$0xff] (!%p192_p3)  }
   0xa   : > { %v1361_v14 = vld [vmem:[%s1651_s1 + $0x70] sm:$0xff] (!%p192_p3)   ;;  %v1363_v16 = vld [vmem:[%s1651_s1 + $0x78] sm:$0xff] (!%p192_p3)   ;;  %v1568_v51 = vld [vmem:[%s1652_s2] ss:$0 sm:$0xff] (!%p192_p3) }
   0xb   : > { %v1362_v15 = vld [vmem:[%s1651_s1 + $0x30] sm:$0xff] (!%p192_p3)   ;;  %v1364_v17 = vld [vmem:[%s1651_s1 + $0x38] sm:$0xff] (!%p192_p3)  }
   0xc   : > { %1200 = vmatpush3.bf16.msra.mxu0 (!%p192_p3), %v1352_v3  ;;  %1318 = vmatpush3.bf16.msra.mxu1 (!%p192_p3), %v1352_v3 }
   0xd   : > { %1201 = vmatprep.subr.bf16.mxu0 (!%p192_p3), %v1353_v4  ;;  %1311 = vmatprep.subr.bf16.mxu1 (!%p192_p3), %v1353_v4 }
   0xe   : > { %s1659_s18 = smov (!%p236_p4, %s1140_s18), 63 }
   0xf   : > { %s1196_s6 = sshll.u32 %s1659_s18, 3 }
  0x10   : > { %1202 = vmatpush3.bf16.msra.mxu0 %v1354_v5  ;;  %1319 = vmatpush3.bf16.msra.mxu1 %v1354_v5  ;;  %s1510_s11 = scalar_lea.vmem %s1650_s0, %s1196_s6  ;;  %s1577_s8 = scalar_lea.vmem %s1653_s3, %s1196_s6 }
  0x11   : > { %1203 = vmatprep.subr.bf16.mxu0 %v1355_v6  ;;  %1312 = vmatprep.subr.bf16.mxu1 %v1355_v6  ;;  %v1367_v11 = vld [vmem:[%s1510_s11 + $0x4] ss:$8 sps:$4 sm:$0xff]   ;;  %v1365_v18 = vld [vmem:[%s1510_s11] ss:$8 sps:$4 sm:$0xff]   ;;  %v1371_v20 = vld [vmem:[%s1510_s11 + $0x14] ss:$8 sps:$4 sm:$0xff]  }
  0x12   : > { %v1370_v12 = vld [vmem:[%s1510_s11 + $0x84] ss:$8 sps:$4 sm:$0xff]   ;;  %688 = vmatprep.mubr.bf16.mxu0 %v1367_v11  ;;  %v1368_v19 = vld [vmem:[%s1510_s11 + $0x80] ss:$8 sps:$4 sm:$0xff]   ;;  %v1373_v21 = vld [vmem:[%s1510_s11 + $0x94] ss:$8 sps:$4 sm:$0xff]  }
  0x13   : > { %752 = vmatprep.mubr.bf16.mxu1 %v1370_v12  ;;  %v1375_v22 = vld [vmem:[%s1510_s11 + $0x10] ss:$8 sps:$4 sm:$0xff]   ;;  %v1377_v24 = vld [vmem:[%s1510_s11 + $0x24] ss:$8 sps:$4 sm:$0xff]   ;;  %v1381_v26 = vld [vmem:[%s1510_s11 + $0x20] ss:$8 sps:$4 sm:$0xff]  }
  0x14   : > { %1204 = vmatpush3.bf16.msra.mxu0 %v1356_v7  ;;  %1320 = vmatpush3.bf16.msra.mxu1 %v1356_v7  ;;  %v1376_v23 = vld [vmem:[%s1510_s11 + $0x90] ss:$8 sps:$4 sm:$0xff]   ;;  %v1379_v25 = vld [vmem:[%s1510_s11 + $0xa4] ss:$8 sps:$4 sm:$0xff]   ;;  %v1382_v27 = vld [vmem:[%s1510_s11 + $0xa0] ss:$8 sps:$4 sm:$0xff]  }
  0x15   : > { %1205 = vmatprep.subr.bf16.mxu0 %v1357_v8  ;;  %1313 = vmatprep.subr.bf16.mxu1 %v1357_v8  ;;  %v1383_v28 = vld [vmem:[%s1510_s11 + $0x34] ss:$8 sps:$4 sm:$0xff]   ;;  %v1387_v30 = vld [vmem:[%s1510_s11 + $0x30] ss:$8 sps:$4 sm:$0xff]   ;;  %v1389_v32 = vld [vmem:[%s1510_s11 + $0x44] ss:$8 sps:$4 sm:$0xff]  }
  0x16   : > { %v1385_v29 = vld [vmem:[%s1510_s11 + $0xb4] ss:$8 sps:$4 sm:$0xff]   ;;  %v1388_v31 = vld [vmem:[%s1510_s11 + $0xb0] ss:$8 sps:$4 sm:$0xff]   ;;  %v1391_v33 = vld [vmem:[%s1510_s11 + $0xc4] ss:$8 sps:$4 sm:$0xff]  }
  0x17   : > { %v1393_v34 = vld [vmem:[%s1510_s11 + $0x40] ss:$8 sps:$4 sm:$0xff]   ;;  %v1395_v36 = vld [vmem:[%s1510_s11 + $0x54] ss:$8 sps:$4 sm:$0xff]   ;;  %v1399_v38 = vld [vmem:[%s1510_s11 + $0x50] ss:$8 sps:$4 sm:$0xff]  }
  0x18   : > { %1206 = vmatpush3.bf16.msra.mxu0 %v1358_v9  ;;  %1321 = vmatpush3.bf16.msra.mxu1 %v1358_v9  ;;  %v1394_v35 = vld [vmem:[%s1510_s11 + $0xc0] ss:$8 sps:$4 sm:$0xff]   ;;  %v1397_v37 = vld [vmem:[%s1510_s11 + $0xd4] ss:$8 sps:$4 sm:$0xff]   ;;  %v1400_v39 = vld [vmem:[%s1510_s11 + $0xd0] ss:$8 sps:$4 sm:$0xff]  }
  0x19   : > { %1207 = vmatprep.subr.bf16.mxu0 %v1359_v10  ;;  %1314 = vmatprep.subr.bf16.mxu1 %v1359_v10  ;;  %v1401_v40 = vld [vmem:[%s1510_s11 + $0x64] ss:$8 sps:$4 sm:$0xff]   ;;  %v1405_v42 = vld [vmem:[%s1510_s11 + $0x60] ss:$8 sps:$4 sm:$0xff]   ;;  %v1407_v44 = vld [vmem:[%s1510_s11 + $0x74] ss:$8 sps:$4 sm:$0xff]  }
  0x1a   : > { %v1403_v41 = vld [vmem:[%s1510_s11 + $0xe4] ss:$8 sps:$4 sm:$0xff]   ;;  %v1406_v43 = vld [vmem:[%s1510_s11 + $0xe0] ss:$8 sps:$4 sm:$0xff]   ;;  %v1409_v45 = vld [vmem:[%s1510_s11 + $0xf4] ss:$8 sps:$4 sm:$0xff]  }
  0x1b   : > { %v1411_v46 = vld [vmem:[%s1510_s11 + $0x70] ss:$8 sps:$4 sm:$0xff]  }
  0x1c   : > { %1208 = vmatpush3.bf16.msra.mxu0 %v1360_v13  ;;  %1322 = vmatpush3.bf16.msra.mxu1 %v1360_v13  ;;  %v1412_v47 = vld [vmem:[%s1510_s11 + $0xf0] ss:$8 sps:$4 sm:$0xff]  }
  0x1d   : > { %1209 = vmatprep.subr.bf16.mxu0 %v1361_v14  ;;  %1315 = vmatprep.subr.bf16.mxu1 %v1361_v14 }
  0x20   : > { %1210 = vmatpush3.bf16.msra.mxu0 %v1362_v15  ;;  %1323 = vmatpush3.bf16.msra.mxu1 %v1362_v15 }
  0x21   : > { %1211 = vmatprep.subr.bf16.mxu0 %v1363_v16  ;;  %1316 = vmatprep.subr.bf16.mxu1 %v1363_v16 }
  0x24   : > { %1212 = vmatpush3.bf16.msra.mxu0 %v1364_v17  ;;  %1324 = vmatpush3.bf16.msra.mxu1 %v1364_v17 }
  0x27   : > { %689 = vmatmul.mubr.bf16.vlgmr.msra.gmra.mrb[0].mxu0 %v1365_v18  ;;  %753 = vmatmul.mubr.bf16.vlgmr.msra.gmra.mrb[0].mxu1 %v1368_v19 }
  0x28   : > { %696 = vmatprep.mubr.bf16.mxu0 %v1371_v20  ;;  %760 = vmatprep.mubr.bf16.mxu1 %v1373_v21 }
  0x2f   : > { %697 = vmatmul.mubr.bf16.gmra.mrb[4].mxu0 %v1375_v22  ;;  %761 = vmatmul.mubr.bf16.gmra.mrb[4].mxu1 %v1376_v23 }
  0x30   : > { %704 = vmatprep.mubr.bf16.mxu0 %v1377_v24  ;;  %768 = vmatprep.mubr.bf16.mxu1 %v1379_v25 }
  0x37   : > { %705 = vmatmul.mubr.bf16.gmra.mrb[8].mxu0 %v1381_v26  ;;  %769 = vmatmul.mubr.bf16.gmra.mrb[8].mxu1 %v1382_v27 }
  0x38   : > { %712 = vmatprep.mubr.bf16.mxu0 %v1383_v28  ;;  %776 = vmatprep.mubr.bf16.mxu1 %v1385_v29 }
  0x3f   : > { %713 = vmatmul.mubr.bf16.gmra.mrb[12].mxu0 %v1387_v30  ;;  %777 = vmatmul.mubr.bf16.gmra.mrb[12].mxu1 %v1388_v31 }
  0x40   : > { %720 = vmatprep.mubr.bf16.mxu0 %v1389_v32  ;;  %784 = vmatprep.mubr.bf16.mxu1 %v1391_v33 }
  0x47   : > { %721 = vmatmul.mubr.bf16.gmra.mrb[16].mxu0 %v1393_v34  ;;  %785 = vmatmul.mubr.bf16.gmra.mrb[16].mxu1 %v1394_v35 }
  0x48   : > { %728 = vmatprep.mubr.bf16.mxu0 %v1395_v36  ;;  %792 = vmatprep.mubr.bf16.mxu1 %v1397_v37 }
  0x4f   : > { %729 = vmatmul.mubr.bf16.gmra.mrb[20].mxu0 %v1399_v38  ;;  %793 = vmatmul.mubr.bf16.gmra.mrb[20].mxu1 %v1400_v39 }
  0x50   : > { %736 = vmatprep.mubr.bf16.mxu0 %v1401_v40  ;;  %800 = vmatprep.mubr.bf16.mxu1 %v1403_v41 }
  0x57   : > { %737 = vmatmul.mubr.bf16.gmra.mrb[24].mxu0 %v1405_v42  ;;  %801 = vmatmul.mubr.bf16.gmra.mrb[24].mxu1 %v1406_v43 }
  0x58   : > { %744 = vmatprep.mubr.bf16.mxu0 %v1407_v44  ;;  %808 = vmatprep.mubr.bf16.mxu1 %v1409_v45 }
  0x5f   : > { %745 = vmatmul.mubr.bf16.gmra.mrb[28].mxu0 %v1411_v46  ;;  %809 = vmatmul.mubr.bf16.gmra.mrb[28].mxu1 %v1412_v47 }
  0xfa   : > { %v1213_v48 = vpop.f32.mrb[0].mxu0  ;;  %v1261_v49 = vpop.f32.mrb[0].mxu1 }
  0xfb   : > { %v1214_v50 = vpop.f32.mrb[1].mxu0  ;;  %v1262_v52 = vpop.f32.mrb[1].mxu1 }
  0xfc   : > { %v1215_v53 = vadd.f32 %v1214_v50, %v1213_v48  ;;  %v1263_v54 = vadd.f32 %v1262_v52, %v1261_v49  ;;  %v1216_v55 = vpop.f32.mrb[2].mxu0  ;;  %v1264_v56 = vpop.f32.mrb[2].mxu1 }
  0xfd   : > { %v1217_v57 = vpop.f32.mrb[3].mxu0  ;;  %v1265_v58 = vpop.f32.mrb[3].mxu1 }
  0xfe   : > { %v923_v59 = vadd.f32 %v1215_v53, %v1568_v51  ;;  %v939_v60 = vadd.f32 %v1263_v54, %v1568_v51  ;;  %v1218_v61 = vadd.f32 %v1217_v57, %v1216_v55  ;;  %v1266_v62 = vadd.f32 %v1265_v58, %v1264_v56 }
 0x100   : > { %v955_v63 = vmax.f32 %v923_v59, 0.0  ;;  %v971_v0 = vmax.f32 %v939_v60, 0.0  ;;  %v924_v1 = vadd.f32 %v1218_v61, %v1568_v51  ;;  %v940_v2 = vadd.f32 %v1266_v62, %v1568_v51 }
 0x102   : > { %987 = vst [vmem:[%s1577_s8] sm:$0xff] %v955_v63  ;;  %1003 = vst [vmem:[%s1577_s8 + $0x80] sm:$0xff] %v971_v0  ;;  %v956_v3 = vmax.f32 %v924_v1, 0.0  ;;  %v972_v4 = vmax.f32 %v940_v2, 0.0  ;;  %v1219_v5 = vpop.f32.mrb[4].mxu0  ;;  %v1267_v6 = vpop.f32.mrb[4].mxu1 }
 0x103   : > { %v1220_v7 = vpop.f32.mrb[5].mxu0  ;;  %v1268_v8 = vpop.f32.mrb[5].mxu1 }
 0x104   : > { %988 = vst [vmem:[%s1577_s8 + $0x8] sm:$0xff] %v956_v3  ;;  %1004 = vst [vmem:[%s1577_s8 + $0x88] sm:$0xff] %v972_v4  ;;  %v1221_v9 = vadd.f32 %v1220_v7, %v1219_v5  ;;  %v1269_v10 = vadd.f32 %v1268_v8, %v1267_v6  ;;  %v1222_v11 = vpop.f32.mrb[6].mxu0  ;;  %v1270_v12 = vpop.f32.mrb[6].mxu1 }
 0x105   : > { %v1223_v13 = vpop.f32.mrb[7].mxu0  ;;  %v1271_v14 = vpop.f32.mrb[7].mxu1 }
 0x106   : > { %v925_v15 = vadd.f32 %v1221_v9, %v1568_v51  ;;  %v941_v16 = vadd.f32 %v1269_v10, %v1568_v51  ;;  %v1224_v17 = vadd.f32 %v1223_v13, %v1222_v11  ;;  %v1272_v18 = vadd.f32 %v1271_v14, %v1270_v12 }
 0x108   : > { %v957_v19 = vmax.f32 %v925_v15, 0.0  ;;  %v973_v20 = vmax.f32 %v941_v16, 0.0  ;;  %v926_v21 = vadd.f32 %v1224_v17, %v1568_v51  ;;  %v942_v22 = vadd.f32 %v1272_v18, %v1568_v51 }
 0x10a   : > { %989 = vst [vmem:[%s1577_s8 + $0x10] sm:$0xff] %v957_v19  ;;  %1005 = vst [vmem:[%s1577_s8 + $0x90] sm:$0xff] %v973_v20  ;;  %v958_v23 = vmax.f32 %v926_v21, 0.0  ;;  %v974_v24 = vmax.f32 %v942_v22, 0.0  ;;  %v1225_v25 = vpop.f32.mrb[8].mxu0  ;;  %v1273_v26 = vpop.f32.mrb[8].mxu1 }
 0x10b   : > { %v1226_v27 = vpop.f32.mrb[9].mxu0  ;;  %v1274_v28 = vpop.f32.mrb[9].mxu1 }
 0x10c   : > { %990 = vst [vmem:[%s1577_s8 + $0x18] sm:$0xff] %v958_v23  ;;  %1006 = vst [vmem:[%s1577_s8 + $0x98] sm:$0xff] %v974_v24  ;;  %v1227_v29 = vadd.f32 %v1226_v27, %v1225_v25  ;;  %v1275_v30 = vadd.f32 %v1274_v28, %v1273_v26  ;;  %v1228_v31 = vpop.f32.mrb[10].mxu0  ;;  %v1276_v32 = vpop.f32.mrb[10].mxu1 }
 0x10d   : > { %v1229_v33 = vpop.f32.mrb[11].mxu0  ;;  %v1277_v34 = vpop.f32.mrb[11].mxu1 }
 0x10e   : > { %v927_v35 = vadd.f32 %v1227_v29, %v1568_v51  ;;  %v943_v36 = vadd.f32 %v1275_v30, %v1568_v51  ;;  %v1230_v37 = vadd.f32 %v1229_v33, %v1228_v31  ;;  %v1278_v38 = vadd.f32 %v1277_v34, %v1276_v32 }
 0x110   : > { %v959_v39 = vmax.f32 %v927_v35, 0.0  ;;  %v975_v40 = vmax.f32 %v943_v36, 0.0  ;;  %v928_v41 = vadd.f32 %v1230_v37, %v1568_v51  ;;  %v944_v42 = vadd.f32 %v1278_v38, %v1568_v51 }
 0x112   : > { %991 = vst [vmem:[%s1577_s8 + $0x20] sm:$0xff] %v959_v39  ;;  %1007 = vst [vmem:[%s1577_s8 + $0xa0] sm:$0xff] %v975_v40  ;;  %v960_v43 = vmax.f32 %v928_v41, 0.0  ;;  %v976_v44 = vmax.f32 %v944_v42, 0.0  ;;  %v1231_v45 = vpop.f32.mrb[12].mxu0  ;;  %v1279_v46 = vpop.f32.mrb[12].mxu1 }
 0x113   : > { %v1232_v47 = vpop.f32.mrb[13].mxu0  ;;  %v1280_v48 = vpop.f32.mrb[13].mxu1 }
 0x114   : > { %992 = vst [vmem:[%s1577_s8 + $0x28] sm:$0xff] %v960_v43  ;;  %1008 = vst [vmem:[%s1577_s8 + $0xa8] sm:$0xff] %v976_v44  ;;  %v1233_v49 = vadd.f32 %v1232_v47, %v1231_v45  ;;  %v1281_v50 = vadd.f32 %v1280_v48, %v1279_v46  ;;  %v1234_v52 = vpop.f32.mrb[14].mxu0  ;;  %v1282_v53 = vpop.f32.mrb[14].mxu1 }
 0x115   : > { %v1235_v54 = vpop.f32.mrb[15].mxu0  ;;  %v1283_v55 = vpop.f32.mrb[15].mxu1 }
 0x116   : > { %v929_v56 = vadd.f32 %v1233_v49, %v1568_v51  ;;  %v945_v57 = vadd.f32 %v1281_v50, %v1568_v51  ;;  %v1236_v58 = vadd.f32 %v1235_v54, %v1234_v52  ;;  %v1284_v59 = vadd.f32 %v1283_v55, %v1282_v53 }
 0x118   : > { %v961_v60 = vmax.f32 %v929_v56, 0.0  ;;  %v977_v61 = vmax.f32 %v945_v57, 0.0  ;;  %v930_v62 = vadd.f32 %v1236_v58, %v1568_v51  ;;  %v946_v63 = vadd.f32 %v1284_v59, %v1568_v51 }
 0x11a   : > { %993 = vst [vmem:[%s1577_s8 + $0x30] sm:$0xff] %v961_v60  ;;  %1009 = vst [vmem:[%s1577_s8 + $0xb0] sm:$0xff] %v977_v61  ;;  %v962_v0 = vmax.f32 %v930_v62, 0.0  ;;  %v978_v1 = vmax.f32 %v946_v63, 0.0  ;;  %v1237_v2 = vpop.f32.mrb[16].mxu0  ;;  %v1285_v3 = vpop.f32.mrb[16].mxu1 }
 0x11b   : > { %v1238_v4 = vpop.f32.mrb[17].mxu0  ;;  %v1286_v5 = vpop.f32.mrb[17].mxu1 }
 0x11c   : > { %994 = vst [vmem:[%s1577_s8 + $0x38] sm:$0xff] %v962_v0  ;;  %1010 = vst [vmem:[%s1577_s8 + $0xb8] sm:$0xff] %v978_v1  ;;  %v1239_v6 = vadd.f32 %v1238_v4, %v1237_v2  ;;  %v1287_v7 = vadd.f32 %v1286_v5, %v1285_v3  ;;  %v1240_v8 = vpop.f32.mrb[18].mxu0  ;;  %v1288_v9 = vpop.f32.mrb[18].mxu1 }
 0x11d   : > { %v1241_v10 = vpop.f32.mrb[19].mxu0  ;;  %v1289_v11 = vpop.f32.mrb[19].mxu1 }
 0x11e   : > { %v931_v12 = vadd.f32 %v1239_v6, %v1568_v51  ;;  %v947_v13 = vadd.f32 %v1287_v7, %v1568_v51  ;;  %v1242_v14 = vadd.f32 %v1241_v10, %v1240_v8  ;;  %v1290_v15 = vadd.f32 %v1289_v11, %v1288_v9 }
 0x120   : > { %v963_v16 = vmax.f32 %v931_v12, 0.0  ;;  %v979_v17 = vmax.f32 %v947_v13, 0.0  ;;  %v932_v18 = vadd.f32 %v1242_v14, %v1568_v51  ;;  %v948_v19 = vadd.f32 %v1290_v15, %v1568_v51 }
 0x122   : > { %995 = vst [vmem:[%s1577_s8 + $0x40] sm:$0xff] %v963_v16  ;;  %1011 = vst [vmem:[%s1577_s8 + $0xc0] sm:$0xff] %v979_v17  ;;  %v964_v20 = vmax.f32 %v932_v18, 0.0  ;;  %v980_v21 = vmax.f32 %v948_v19, 0.0  ;;  %v1243_v22 = vpop.f32.mrb[20].mxu0  ;;  %v1291_v23 = vpop.f32.mrb[20].mxu1 }
 0x123   : > { %v1244_v24 = vpop.f32.mrb[21].mxu0  ;;  %v1292_v25 = vpop.f32.mrb[21].mxu1 }
 0x124   : > { %996 = vst [vmem:[%s1577_s8 + $0x48] sm:$0xff] %v964_v20  ;;  %1012 = vst [vmem:[%s1577_s8 + $0xc8] sm:$0xff] %v980_v21  ;;  %v1245_v26 = vadd.f32 %v1244_v24, %v1243_v22  ;;  %v1293_v27 = vadd.f32 %v1292_v25, %v1291_v23  ;;  %v1246_v28 = vpop.f32.mrb[22].mxu0  ;;  %v1294_v29 = vpop.f32.mrb[22].mxu1 }
 0x125   : > { %v1247_v30 = vpop.f32.mrb[23].mxu0  ;;  %v1295_v31 = vpop.f32.mrb[23].mxu1 }
 0x126   : > { %v933_v32 = vadd.f32 %v1245_v26, %v1568_v51  ;;  %v949_v33 = vadd.f32 %v1293_v27, %v1568_v51  ;;  %v1248_v34 = vadd.f32 %v1247_v30, %v1246_v28  ;;  %v1296_v35 = vadd.f32 %v1295_v31, %v1294_v29 }
 0x128   : > { %v965_v36 = vmax.f32 %v933_v32, 0.0  ;;  %v981_v37 = vmax.f32 %v949_v33, 0.0  ;;  %v934_v38 = vadd.f32 %v1248_v34, %v1568_v51  ;;  %v950_v39 = vadd.f32 %v1296_v35, %v1568_v51 }
 0x12a   : > { %997 = vst [vmem:[%s1577_s8 + $0x50] sm:$0xff] %v965_v36  ;;  %1013 = vst [vmem:[%s1577_s8 + $0xd0] sm:$0xff] %v981_v37  ;;  %v966_v40 = vmax.f32 %v934_v38, 0.0  ;;  %v982_v41 = vmax.f32 %v950_v39, 0.0  ;;  %v1249_v42 = vpop.f32.mrb[24].mxu0  ;;  %v1297_v43 = vpop.f32.mrb[24].mxu1 }
 0x12b   : > { %v1250_v44 = vpop.f32.mrb[25].mxu0  ;;  %v1298_v45 = vpop.f32.mrb[25].mxu1 }
 0x12c   : > { %998 = vst [vmem:[%s1577_s8 + $0x58] sm:$0xff] %v966_v40  ;;  %1014 = vst [vmem:[%s1577_s8 + $0xd8] sm:$0xff] %v982_v41  ;;  %v1251_v46 = vadd.f32 %v1250_v44, %v1249_v42  ;;  %v1299_v47 = vadd.f32 %v1298_v45, %v1297_v43  ;;  %v1252_v48 = vpop.f32.mrb[26].mxu0  ;;  %v1300_v49 = vpop.f32.mrb[26].mxu1 }
 0x12d   : > { %v1253_v50 = vpop.f32.mrb[27].mxu0  ;;  %v1301_v52 = vpop.f32.mrb[27].mxu1 }
 0x12e   : > { %v935_v53 = vadd.f32 %v1251_v46, %v1568_v51  ;;  %v951_v54 = vadd.f32 %v1299_v47, %v1568_v51  ;;  %v1254_v55 = vadd.f32 %v1253_v50, %v1252_v48  ;;  %v1302_v56 = vadd.f32 %v1301_v52, %v1300_v49 }
 0x130   : > { %v967_v57 = vmax.f32 %v935_v53, 0.0  ;;  %v983_v58 = vmax.f32 %v951_v54, 0.0  ;;  %v936_v59 = vadd.f32 %v1254_v55, %v1568_v51  ;;  %v952_v60 = vadd.f32 %v1302_v56, %v1568_v51 }
 0x132   : > { %999 = vst [vmem:[%s1577_s8 + $0x60] sm:$0xff] %v967_v57  ;;  %1015 = vst [vmem:[%s1577_s8 + $0xe0] sm:$0xff] %v983_v58  ;;  %v968_v61 = vmax.f32 %v936_v59, 0.0  ;;  %v984_v62 = vmax.f32 %v952_v60, 0.0  ;;  %v1255_v63 = vpop.f32.mrb[28].mxu0  ;;  %v1303_v0 = vpop.f32.mrb[28].mxu1 }
 0x133   : > { %v1256_v1 = vpop.f32.mrb[29].mxu0  ;;  %v1304_v2 = vpop.f32.mrb[29].mxu1 }
 0x134   : > { %1000 = vst [vmem:[%s1577_s8 + $0x68] sm:$0xff] %v968_v61  ;;  %1016 = vst [vmem:[%s1577_s8 + $0xe8] sm:$0xff] %v984_v62  ;;  %v1257_v3 = vadd.f32 %v1256_v1, %v1255_v63  ;;  %v1305_v4 = vadd.f32 %v1304_v2, %v1303_v0  ;;  %v1258_v5 = vpop.f32.mrb[30].mxu0  ;;  %v1306_v6 = vpop.f32.mrb[30].mxu1 }
 0x135   : > { %v1259_v7 = vpop.f32.mrb[31].mxu0  ;;  %v1307_v8 = vpop.f32.mrb[31].mxu1 }
 0x136   : > { %v937_v9 = vadd.f32 %v1257_v3, %v1568_v51  ;;  %v953_v10 = vadd.f32 %v1305_v4, %v1568_v51  ;;  %v1260_v11 = vadd.f32 %v1259_v7, %v1258_v5  ;;  %v1308_v12 = vadd.f32 %v1307_v8, %v1306_v6 }
 0x138   : > { %v969_v13 = vmax.f32 %v937_v9, 0.0  ;;  %v985_v14 = vmax.f32 %v953_v10, 0.0  ;;  %v938_v15 = vadd.f32 %v1260_v11, %v1568_v51  ;;  %v954_v16 = vadd.f32 %v1308_v12, %v1568_v51 }
 0x13a   : > { %1001 = vst [vmem:[%s1577_s8 + $0x70] sm:$0xff] %v969_v13  ;;  %1017 = vst [vmem:[%s1577_s8 + $0xf0] sm:$0xff] %v985_v14  ;;  %v970_v17 = vmax.f32 %v938_v15, 0.0  ;;  %v986_v18 = vmax.f32 %v954_v16, 0.0 }
 0x13c   : > { %1002 = vst [vmem:[%s1577_s8 + $0x78] sm:$0xff] %v970_v17  ;;  %1018 = vst [vmem:[%s1577_s8 + $0xf8] sm:$0xff] %v986_v18 }
 0x13d PF: > { %s13_s14 = sadd.s32 1, %s1435_s14   ;;  %s1654_s12 = smov %s1431_s13 }
 0x13e   : > { %p10_p5 = scmp.ge.s32.totalorder %s13_s14, 4   ;;  %s1655_s13 = smov %s1657_s15 }
 0x140   :  { %12 = sbr.rel (!%p10_p5) target bundleno = 2 (0x2), region = 76 }

// kernel: st_classifier_forward.22
= control target key start
LH: loop header
LB: loop body
LE: loop exit
PB: predicated region body
PF: predicated region fallthrough
CT: control target
= control target key end

     0   :  { %s1197_s12 = smov 0   ;;  %s1199_s13 = smov 0   ;;  %s1369_s0 = inlined_call_operand.vmem [shape: bf16[128,768], index: 0, kind: input, shape index: {}]   ;;  %s1370_s1 = inlined_call_operand.vmem [shape: bf16[768,128], index: 1, kind: input, shape index: {}]   ;;  %s1371_s2 = inlined_call_operand.vmem [shape: f32[1,128], index: 2, kind: input, shape index: {}]   ;;  %s1372_s3 = inlined_call_operand.vmem [shape: f32[128,128], index: 3, kind: output, shape index: {}]  }
   0x1   :  { %s1201_s14 = smov 0   ;;  %s1203_s15 = smov 0  }
   0x2   :  { %s1205_s16 = smov 0  }
   0x3 LB: > { %s25_s17 = sadd.s32 1, %s1170_s15  ;;  %p48_p1 = scmp.ne.s32.totalorder %s1162_s13, %s1158_s12  ;;  %s1174_s16 = sphi %s1205_s16, %s13_s16   ;;  %s1170_s15 = sphi %s1203_s15, %s1376_s15   ;;  %s1166_s14 = sphi %s1201_s14, %s1375_s14   ;;  %s1162_s13 = sphi %s1199_s13, %s1374_s13   ;;  %s1158_s12 = sphi %s1197_s12, %s1373_s12  }
   0x4   : > { %p26_p0 = scmp.ge.s32.totalorder %s25_s17, 3  ;;  %p49_p2 = scmp.eq.s32.totalorder %s1174_s16, 0 }
   0x5   : > { %s41_s19 = sadd.s32 1, %s1162_s13  ;;  %p927_p5 = scmp.ge.s32.totalorder %s1174_s16, 3 }
   0x6   : > { %s1378_s17 = smov (%p26_p0, %s25_s17), 0  ;;  %p50_p3 = por %p49_p2, %p48_p1 }
   0x7   : > { %s37_s18 = ssub.s32 %s1170_s15, %s1378_s17  ;;  %162 = sbr.rel (%p927_p5) target bundleno = 26 (0x1a), region = 20 }
   0x8   : > { %p39_p4 = scmp.eq.s32.totalorder %s37_s18, 0 }
   0xa   : > { %s1232_s20 = scalar_select %p39_p4, %s1162_s13, %s41_s19  }
   0xe   : > { %165 = sbr.rel (!%p50_p3) target bundleno = 26 (0x1a), region = 24  ;;  %s167_s21 = sand.u32 (%p50_p3), 1, %s1162_s13  }
   0xf   : > { %s974_s22 = sshll.u32 (%p50_p3), %s1170_s15, 3  ;;  %s928_s23 = sshll.u32 (%p50_p3), %s167_s21, 7 }
  0x10   : > { %s1240_s26 = scalar_lea.vmem (%p50_p3), %s1369_s0, %s974_s22  ;;  %s169_s27 = scalar_lea.vmem (%p50_p3), [#allocation3], %s928_s23 }
  0x11   : > { %v233_v0 = vld [vmem:[%s1240_s26] sm:$0xff] (%p50_p3)  ;;  %v235_v1 = vld [vmem:[%s1240_s26 + $0x18] sm:$0xff] (%p50_p3)  ;;  %v237_v2 = vld [vmem:[%s1240_s26 + $0x30] sm:$0xff] (%p50_p3) }
  0x12   : > { %234 = vst [vmem:[%s169_s27] sm:$0xff] (%p50_p3), %v233_v0  ;;  %236 = vst [vmem:[%s169_s27 + $0x8] sm:$0xff] (%p50_p3), %v235_v1  ;;  %v239_v3 = vld [vmem:[%s1240_s26 + $0x48] sm:$0xff] (%p50_p3)  ;;  %v241_v4 = vld [vmem:[%s1240_s26 + $0x60] sm:$0xff] (%p50_p3) }
  0x13   : > { %238 = vst [vmem:[%s169_s27 + $0x10] sm:$0xff] (%p50_p3), %v237_v2  ;;  %v243_v5 = vld [vmem:[%s1240_s26 + $0x78] sm:$0xff] (%p50_p3)  ;;  %240 = vst [vmem:[%s169_s27 + $0x18] sm:$0xff] (%p50_p3), %v239_v3  ;;  %v245_v6 = vld [vmem:[%s1240_s26 + $0x90] sm:$0xff] (%p50_p3) }
  0x14   : > { %242 = vst [vmem:[%s169_s27 + $0x20] sm:$0xff] (%p50_p3), %v241_v4  ;;  %244 = vst [vmem:[%s169_s27 + $0x28] sm:$0xff] (%p50_p3), %v243_v5  ;;  %v247_v7 = vld [vmem:[%s1240_s26 + $0xa8] sm:$0xff] (%p50_p3)  ;;  %v249_v8 = vld [vmem:[%s1240_s26 + $0xc0] sm:$0xff] (%p50_p3) }
  0x15   : > { %246 = vst [vmem:[%s169_s27 + $0x30] sm:$0xff] %v245_v6  ;;  %248 = vst [vmem:[%s169_s27 + $0x38] sm:$0xff] %v247_v7  ;;  %v251_v9 = vld [vmem:[%s1240_s26 + $0xd8] sm:$0xff]  ;;  %v253_v10 = vld [vmem:[%s1240_s26 + $0xf0] sm:$0xff] }
  0x16   : > { %250 = vst [vmem:[%s169_s27 + $0x40] sm:$0xff] %v249_v8  ;;  %v255_v11 = vld [vmem:[%s1240_s26 + $0x108] sm:$0xff]  ;;  %252 = vst [vmem:[%s169_s27 + $0x48] sm:$0xff] %v251_v9  ;;  %v257_v12 = vld [vmem:[%s1240_s26 + $0x120] sm:$0xff] }
  0x17   : > { %254 = vst [vmem:[%s169_s27 + $0x50] sm:$0xff] %v253_v10  ;;  %256 = vst [vmem:[%s169_s27 + $0x58] sm:$0xff] %v255_v11  ;;  %v259_v13 = vld [vmem:[%s1240_s26 + $0x138] sm:$0xff]  ;;  %v261_v14 = vld [vmem:[%s1240_s26 + $0x150] sm:$0xff] }
  0x18   : > { %258 = vst [vmem:[%s169_s27 + $0x60] sm:$0xff] %v257_v12  ;;  %260 = vst [vmem:[%s169_s27 + $0x68] sm:$0xff] %v259_v13  ;;  %v263_v15 = vld [vmem:[%s1240_s26 + $0x168] sm:$0xff] }
  0x19   : > { %262 = vst [vmem:[%s169_s27 + $0x70] sm:$0xff] %v261_v14  ;;  %264 = vst [vmem:[%s169_s27 + $0x78] sm:$0xff] %v263_v15 }
  0x1a PF: > { %p931_p6 = scmp.ge.s32.totalorder %s1174_s16, 1  ;;  %p281_p7 = scmp.lt.s32.totalorder %s1174_s16, 4 }
  0x1c   : > { %p282_p8 = pnand %p931_p6, %p281_p7 }
  0x1d   : > { %s288_s28 = sand.u32 (!%p282_p8), 1, %s1158_s12   ;;  %s933_s29 = sshll.u32 (!%p282_p8), %s1166_s14, 5 }
  0x1e   : > { %285 = sbr.rel (%p282_p8) target bundleno = 337 (0x151), region = 66  ;;  %s932_s30 = sshll.u32 (!%p282_p8), %s288_s28, 7 }
  0x1f   : > { %p328_p9 = scmp.lt.s32.totalorder (!%p282_p8), %s933_s29, 95  ;;  %s1267_s8 = scalar_lea.vmem (!%p282_p8), [#allocation3], %s932_s30 }
  0x20   : > { %p935_p10 = scmp.ne.s32.totalorder (!%p282_p8), %s1166_s14, 0 }
  0x25   : > { %s1380_s29 = smov (!%p328_p9, %s933_s29), 95  ;;  %352 = sbr.rel (%p935_p10) target bundleno = 47 (0x2f), region = 74 }
  0x26   : > { %s934_s4 = sshll.u32 %s1380_s29, 2  ;;  %v1176_v16 = vmov (!%p935_p10), 0.0  }
  0x27   : > { %s1265_s7 = scalar_lea.vmem %s1370_s1, %s934_s4  ;;  %353 = vst [vmem:[#allocation2] sm:$0xff] (!%p935_p10), %v1176_v16  ;;  %354 = vst [vmem:[#allocation2 + $0x8] sm:$0xff] (!%p935_p10), %v1176_v16 }
  0x28   : > { %355 = vst [vmem:[#allocation2 + $0x10] sm:$0xff] (!%p935_p10), %v1176_v16  ;;  %356 = vst [vmem:[#allocation2 + $0x18] sm:$0xff] (!%p935_p10), %v1176_v16 }
  0x29   : > { %357 = vst [vmem:[#allocation2 + $0x20] sm:$0xff] (!%p935_p10), %v1176_v16  ;;  %358 = vst [vmem:[#allocation2 + $0x28] sm:$0xff] (!%p935_p10), %v1176_v16 }
  0x2a   : > { %359 = vst [vmem:[#allocation2 + $0x30] sm:$0xff] (!%p935_p10), %v1176_v16  ;;  %360 = vst [vmem:[#allocation2 + $0x38] sm:$0xff] (!%p935_p10), %v1176_v16 }
  0x2b   : > { %361 = vst [vmem:[#allocation2 + $0x40] sm:$0xff] (!%p935_p10), %v1176_v16  ;;  %362 = vst [vmem:[#allocation2 + $0x48] sm:$0xff] (!%p935_p10), %v1176_v16 }
  0x2c   : > { %363 = vst [vmem:[#allocation2 + $0x50] sm:$0xff] %v1176_v16  ;;  %364 = vst [vmem:[#allocation2 + $0x58] sm:$0xff] %v1176_v16 }
  0x2d   : > { %365 = vst [vmem:[#allocation2 + $0x60] sm:$0xff] %v1176_v16  ;;  %366 = vst [vmem:[#allocation2 + $0x68] sm:$0xff] %v1176_v16 }
  0x2e   : > { %367 = vst [vmem:[#allocation2 + $0x70] sm:$0xff] %v1176_v16  ;;  %368 = vst [vmem:[#allocation2 + $0x78] sm:$0xff] %v1176_v16 }
  0x2f PF: > { %v1096_v17 = vld [vmem:[%s1265_s7 + $0x40] sm:$0xff]   ;;  %v1098_v19 = vld [vmem:[%s1265_s7 + $0x48] sm:$0xff]   ;;  %v1100_v21 = vld [vmem:[%s1265_s7 + $0x50] sm:$0xff]   ;;  %p968_p11 = scmp.ne.s32.totalorder %s1166_s14, 2 }
  0x30   : > { %v1097_v18 = vld [vmem:[%s1265_s7] sm:$0xff]   ;;  %975 = vmatprep.subr.bf16.mxu0 %v1096_v17  ;;  %1039 = vmatprep.subr.bf16.mxu1 %v1096_v17  ;;  %v1099_v20 = vld [vmem:[%s1265_s7 + $0x8] sm:$0xff]   ;;  %v1101_v22 = vld [vmem:[%s1265_s7 + $0x10] sm:$0xff]  }
  0x31   : > { %976 = vmatpush3.bf16.msra.mxu0 %v1097_v18  ;;  %1047 = vmatpush3.bf16.msra.mxu1 %v1097_v18  ;;  %v1102_v23 = vld [vmem:[%s1265_s7 + $0x58] sm:$0xff]   ;;  %v1104_v25 = vld [vmem:[%s1265_s7 + $0x60] sm:$0xff]   ;;  %v1106_v27 = vld [vmem:[%s1265_s7 + $0x68] sm:$0xff]  }
  0x32   : > { %977 = vmatprep.subr.bf16.mxu0 %v1098_v19  ;;  %1040 = vmatprep.subr.bf16.mxu1 %v1098_v19  ;;  %v1103_v24 = vld [vmem:[%s1265_s7 + $0x18] sm:$0xff]   ;;  %v1105_v26 = vld [vmem:[%s1265_s7 + $0x20] sm:$0xff]   ;;  %v1107_v30 = vld [vmem:[%s1265_s7 + $0x28] sm:$0xff]  }
  0x33   : > { %v1114_v28 = vld [vmem:[%s1267_s8 + $0x4] ss:$8 sps:$4 sm:$0xff]   ;;  %v1108_v31 = vld [vmem:[%s1265_s7 + $0x70] sm:$0xff]   ;;  %v1110_v33 = vld [vmem:[%s1265_s7 + $0x78] sm:$0xff]  }
  0x34   : > { %v1117_v29 = vld [vmem:[%s1267_s8 + $0x44] ss:$8 sps:$4 sm:$0xff]   ;;  %641 = vmatprep.mubr.bf16.mxu0 %v1114_v28  ;;  %v1109_v32 = vld [vmem:[%s1265_s7 + $0x30] sm:$0xff]   ;;  %v1111_v34 = vld [vmem:[%s1265_s7 + $0x38] sm:$0xff]  }
  0x35   : > { %978 = vmatpush3.bf16.msra.mxu0 %v1099_v20  ;;  %1048 = vmatpush3.bf16.msra.mxu1 %v1099_v20  ;;  %v1112_v35 = vld [vmem:[%s1267_s8] ss:$8 sps:$4 sm:$0xff]   ;;  %v1118_v37 = vld [vmem:[%s1267_s8 + $0x14] ss:$8 sps:$4 sm:$0xff]   ;;  %v1122_v39 = vld [vmem:[%s1267_s8 + $0x10] ss:$8 sps:$4 sm:$0xff]  }
  0x36   : > { %979 = vmatprep.subr.bf16.mxu0 %v1100_v21  ;;  %1041 = vmatprep.subr.bf16.mxu1 %v1100_v21  ;;  %v1115_v36 = vld [vmem:[%s1267_s8 + $0x40] ss:$8 sps:$4 sm:$0xff]   ;;  %v1120_v38 = vld [vmem:[%s1267_s8 + $0x54] ss:$8 sps:$4 sm:$0xff]   ;;  %v1123_v40 = vld [vmem:[%s1267_s8 + $0x50] ss:$8 sps:$4 sm:$0xff]  }
  0x37   : > { %673 = vmatprep.mubr.bf16.mxu1 %v1117_v29  ;;  %v1124_v41 = vld [vmem:[%s1267_s8 + $0x24] ss:$8 sps:$4 sm:$0xff]   ;;  %v1128_v43 = vld [vmem:[%s1267_s8 + $0x20] ss:$8 sps:$4 sm:$0xff]   ;;  %v1130_v45 = vld [vmem:[%s1267_s8 + $0x34] ss:$8 sps:$4 sm:$0xff]  }
  0x38   : > { %v1126_v42 = vld [vmem:[%s1267_s8 + $0x64] ss:$8 sps:$4 sm:$0xff]   ;;  %v1129_v44 = vld [vmem:[%s1267_s8 + $0x60] ss:$8 sps:$4 sm:$0xff]   ;;  %v1132_v46 = vld [vmem:[%s1267_s8 + $0x74] ss:$8 sps:$4 sm:$0xff]  }
  0x39   : > { %980 = vmatpush3.bf16.msra.mxu0 %v1101_v22  ;;  %1049 = vmatpush3.bf16.msra.mxu1 %v1101_v22  ;;  %v1134_v47 = vld [vmem:[%s1267_s8 + $0x30] ss:$8 sps:$4 sm:$0xff]   ;;  %v369_v51 = vld [vmem:[#allocation2] sm:$0xff]  ;;  %v370_v59 = vld [vmem:[#allocation2 + $0x8] sm:$0xff] }
  0x3a   : > { %981 = vmatprep.subr.bf16.mxu0 %v1102_v23  ;;  %1042 = vmatprep.subr.bf16.mxu1 %v1102_v23  ;;  %v1135_v48 = vld [vmem:[%s1267_s8 + $0x70] ss:$8 sps:$4 sm:$0xff]   ;;  %v377_v53 = vld [vmem:[#allocation2 + $0x40] sm:$0xff]  ;;  %v378_v61 = vld [vmem:[#allocation2 + $0x48] sm:$0xff] }
  0x3b   : > { %v371_v7 = vld [vmem:[#allocation2 + $0x10] sm:$0xff]  ;;  %v372_v15 = vld [vmem:[#allocation2 + $0x18] sm:$0xff]  ;;  %v381_v29 = vld [vmem:[#allocation2 + $0x60] sm:$0xff] }
  0x3c   : > { %v379_v9 = vld [vmem:[#allocation2 + $0x50] sm:$0xff]  ;;  %v380_v17 = vld [vmem:[#allocation2 + $0x58] sm:$0xff] }
  0x3d   : > { %982 = vmatpush3.bf16.msra.mxu0 %v1103_v24  ;;  %1050 = vmatpush3.bf16.msra.mxu1 %v1103_v24 }
  0x3e   : > { %983 = vmatprep.subr.bf16.mxu0 %v1104_v25  ;;  %1043 = vmatprep.subr.bf16.mxu1 %v1104_v25 }
  0x41   : > { %984 = vmatpush3.bf16.msra.mxu0 %v1105_v26  ;;  %1051 = vmatpush3.bf16.msra.mxu1 %v1105_v26 }
  0x42   : > { %985 = vmatprep.subr.bf16.mxu0 %v1106_v27  ;;  %1044 = vmatprep.subr.bf16.mxu1 %v1106_v27  ;;  %v373_v27 = vld [vmem:[#allocation2 + $0x20] sm:$0xff] }
  0x45   : > { %986 = vmatpush3.bf16.msra.mxu0 %v1107_v30  ;;  %1052 = vmatpush3.bf16.msra.mxu1 %v1107_v30 }
  0x46   : > { %987 = vmatprep.subr.bf16.mxu0 %v1108_v31  ;;  %1045 = vmatprep.subr.bf16.mxu1 %v1108_v31 }
  0x49   : > { %988 = vmatpush3.bf16.msra.mxu0 %v1109_v32  ;;  %1053 = vmatpush3.bf16.msra.mxu1 %v1109_v32 }
  0x4a   : > { %989 = vmatprep.subr.bf16.mxu0 %v1110_v33  ;;  %1046 = vmatprep.subr.bf16.mxu1 %v1110_v33 }
  0x4d   : > { %990 = vmatpush3.bf16.msra.mxu0 %v1111_v34  ;;  %1054 = vmatpush3.bf16.msra.mxu1 %v1111_v34 }
  0x50   : > { %642 = vmatmul.mubr.bf16.vlgmr.msra.gmra.mrb[0].mxu0 %v1112_v35  ;;  %674 = vmatmul.mubr.bf16.vlgmr.msra.gmra.mrb[0].mxu1 %v1115_v36  ;;  %v374_v35 = vld [vmem:[#allocation2 + $0x28] sm:$0xff] }
  0x51   : > { %649 = vmatprep.mubr.bf16.mxu0 %v1118_v37  ;;  %681 = vmatprep.mubr.bf16.mxu1 %v1120_v38  ;;  %v382_v37 = vld [vmem:[#allocation2 + $0x68] sm:$0xff] }
  0x58   : > { %650 = vmatmul.mubr.bf16.gmra.mrb[4].mxu0 %v1122_v39  ;;  %682 = vmatmul.mubr.bf16.gmra.mrb[4].mxu1 %v1123_v40 }
  0x59   : > { %657 = vmatprep.mubr.bf16.mxu0 %v1124_v41  ;;  %689 = vmatprep.mubr.bf16.mxu1 %v1126_v42 }
  0x60   : > { %658 = vmatmul.mubr.bf16.gmra.mrb[8].mxu0 %v1128_v43  ;;  %690 = vmatmul.mubr.bf16.gmra.mrb[8].mxu1 %v1129_v44 }
  0x61   : > { %665 = vmatprep.mubr.bf16.mxu0 %v1130_v45  ;;  %697 = vmatprep.mubr.bf16.mxu1 %v1132_v46 }
  0x68   : > { %666 = vmatmul.mubr.bf16.gmra.mrb[12].mxu0 %v1134_v47  ;;  %698 = vmatmul.mubr.bf16.gmra.mrb[12].mxu1 %v1135_v48  ;;  %v375_v47 = vld [vmem:[#allocation2 + $0x30] sm:$0xff] }
 0x123   : > { %v991_v49 = vpop.f32.mrb[0].mxu0  ;;  %v1015_v50 = vpop.f32.mrb[0].mxu1 }
 0x124   : > { %v992_v52 = vpop.f32.mrb[1].mxu0  ;;  %v1016_v54 = vpop.f32.mrb[1].mxu1 }
 0x125   : > { %v993_v55 = vadd.f32 %v992_v52, %v991_v49  ;;  %v1017_v56 = vadd.f32 %v1016_v54, %v1015_v50  ;;  %v994_v57 = vpop.f32.mrb[2].mxu0  ;;  %v1018_v58 = vpop.f32.mrb[2].mxu1  ;;  %v383_v49 = vld [vmem:[#allocation2 + $0x70] sm:$0xff] }
 0x126   : > { %v995_v60 = vpop.f32.mrb[3].mxu0  ;;  %v1019_v62 = vpop.f32.mrb[3].mxu1 }
 0x127   : > { %v706_v63 = vadd.f32 %v993_v55, %v369_v51  ;;  %v714_v0 = vadd.f32 %v1017_v56, %v377_v53  ;;  %v996_v1 = vadd.f32 %v995_v60, %v994_v57  ;;  %v1020_v2 = vadd.f32 %v1019_v62, %v1018_v58  ;;  %v376_v55 = vld [vmem:[#allocation2 + $0x38] sm:$0xff] }
 0x128   : > { %v384_v57 = vld [vmem:[#allocation2 + $0x78] sm:$0xff] }
 0x129   : > { %722 = vst [vmem:[#allocation2] sm:$0xff] %v706_v63  ;;  %730 = vst [vmem:[#allocation2 + $0x40] sm:$0xff] %v714_v0  ;;  %v707_v3 = vadd.f32 %v996_v1, %v370_v59  ;;  %v715_v4 = vadd.f32 %v1020_v2, %v378_v61  ;;  %v969_v2 = vld [vmem:[%s1371_s2] ss:$0 sm:$0xff] (!%p968_p11) }
 0x12b   : > { %723 = vst [vmem:[#allocation2 + $0x8] sm:$0xff] %v707_v3  ;;  %731 = vst [vmem:[#allocation2 + $0x48] sm:$0xff] %v715_v4  ;;  %v997_v5 = vpop.f32.mrb[4].mxu0  ;;  %v1021_v6 = vpop.f32.mrb[4].mxu1 }
 0x12c   : > { %v998_v8 = vpop.f32.mrb[5].mxu0  ;;  %v1022_v10 = vpop.f32.mrb[5].mxu1 }
 0x12d   : > { %v999_v11 = vadd.f32 %v998_v8, %v997_v5  ;;  %v1023_v12 = vadd.f32 %v1022_v10, %v1021_v6  ;;  %v1000_v13 = vpop.f32.mrb[6].mxu0  ;;  %v1024_v14 = vpop.f32.mrb[6].mxu1 }
 0x12e   : > { %v1001_v16 = vpop.f32.mrb[7].mxu0  ;;  %v1025_v18 = vpop.f32.mrb[7].mxu1 }
 0x12f   : > { %v708_v19 = vadd.f32 %v999_v11, %v371_v7  ;;  %v716_v20 = vadd.f32 %v1023_v12, %v379_v9  ;;  %v1002_v21 = vadd.f32 %v1001_v16, %v1000_v13  ;;  %v1026_v22 = vadd.f32 %v1025_v18, %v1024_v14 }
 0x130   : > { %v742_v1 = vld [vmem:[#allocation2] sm:$0xff] (!%p968_p11) }
 0x131   : > { %724 = vst [vmem:[#allocation2 + $0x10] sm:$0xff] %v708_v19  ;;  %732 = vst [vmem:[#allocation2 + $0x50] sm:$0xff] %v716_v20  ;;  %v709_v23 = vadd.f32 %v1002_v21, %v372_v15  ;;  %v717_v24 = vadd.f32 %v1026_v22, %v380_v17  ;;  %v765_v4 = vadd.f32 (!%p968_p11), %v969_v2, %v742_v1  ;;  %v750_v19 = vld [vmem:[#allocation2 + $0x40] sm:$0xff] (!%p968_p11) }
 0x132   : > { %v743_v3 = vld [vmem:[#allocation2 + $0x8] sm:$0xff] (!%p968_p11) }
 0x133   : > { %725 = vst [vmem:[#allocation2 + $0x18] sm:$0xff] %v709_v23  ;;  %733 = vst [vmem:[#allocation2 + $0x58] sm:$0xff] %v717_v24  ;;  %v1003_v25 = vpop.f32.mrb[8].mxu0  ;;  %v1027_v26 = vpop.f32.mrb[8].mxu1  ;;  %v766_v5 = vadd.f32 (!%p968_p11), %v969_v2, %v743_v3  ;;  %v781_v15 = vmax.f32 (!%p968_p11), %v765_v4, 0.0  ;;  %v751_v20 = vld [vmem:[#allocation2 + $0x48] sm:$0xff] (!%p968_p11) }
 0x134   : > { %v1004_v28 = vpop.f32.mrb[9].mxu0  ;;  %v1028_v30 = vpop.f32.mrb[9].mxu1 }
 0x135   : > { %v1005_v31 = vadd.f32 %v1004_v28, %v1003_v25  ;;  %v1029_v32 = vadd.f32 %v1028_v30, %v1027_v26  ;;  %v1006_v33 = vpop.f32.mrb[10].mxu0  ;;  %v1030_v34 = vpop.f32.mrb[10].mxu1  ;;  %v782_v16 = vmax.f32 (!%p968_p11), %v766_v5, 0.0  ;;  %797 = vst [vmem:[%s1372_s3] sm:$0xff] (!%p968_p11), %v781_v15 }
 0x136   : > { %v1007_v36 = vpop.f32.mrb[11].mxu0  ;;  %v1031_v38 = vpop.f32.mrb[11].mxu1 }
 0x137   : > { %v710_v39 = vadd.f32 %v1005_v31, %v373_v27  ;;  %v718_v40 = vadd.f32 %v1029_v32, %v381_v29  ;;  %v1008_v41 = vadd.f32 %v1007_v36, %v1006_v33  ;;  %v1032_v42 = vadd.f32 %v1031_v38, %v1030_v34  ;;  %798 = vst [vmem:[%s1372_s3 + $0x8] sm:$0xff] (!%p968_p11), %v782_v16 }
 0x138   : > { %v744_v6 = vld [vmem:[#allocation2 + $0x10] sm:$0xff] (!%p968_p11)  ;;  %v773_v31 = vadd.f32 (!%p968_p11), %v969_v2, %v750_v19  ;;  %v774_v32 = vadd.f32 (!%p968_p11), %v969_v2, %v751_v20 }
 0x139   : > { %726 = vst [vmem:[#allocation2 + $0x20] sm:$0xff] %v710_v39  ;;  %734 = vst [vmem:[#allocation2 + $0x60] sm:$0xff] %v718_v40  ;;  %v711_v43 = vadd.f32 %v1008_v41, %v374_v35  ;;  %v719_v44 = vadd.f32 %v1032_v42, %v382_v37  ;;  %v767_v9 = vadd.f32 (!%p968_p11), %v969_v2, %v744_v6  ;;  %v752_v21 = vld [vmem:[#allocation2 + $0x50] sm:$0xff] (!%p968_p11) }
 0x13a   : > { %v745_v7 = vld [vmem:[#allocation2 + $0x18] sm:$0xff] (!%p968_p11)  ;;  %v775_v36 = vadd.f32 (!%p968_p11), %v969_v2, %v752_v21  ;;  %v789_v39 = vmax.f32 (!%p968_p11), %v773_v31, 0.0  ;;  %v790_v40 = vmax.f32 (!%p968_p11), %v774_v32, 0.0 }
 0x13b   : > { %727 = vst [vmem:[#allocation2 + $0x28] sm:$0xff] %v711_v43  ;;  %735 = vst [vmem:[#allocation2 + $0x68] sm:$0xff] %v719_v44  ;;  %v1009_v45 = vpop.f32.mrb[12].mxu0  ;;  %v1033_v46 = vpop.f32.mrb[12].mxu1  ;;  %v768_v10 = vadd.f32 (!%p968_p11), %v969_v2, %v745_v7  ;;  %v783_v22 = vmax.f32 (!%p968_p11), %v767_v9, 0.0  ;;  %v753_v26 = vld [vmem:[#allocation2 + $0x58] sm:$0xff] (!%p968_p11) }
 0x13c   : > { %v1010_v48 = vpop.f32.mrb[13].mxu0  ;;  %v1034_v50 = vpop.f32.mrb[13].mxu1  ;;  %v776_v37 = vadd.f32 (!%p968_p11), %v969_v2, %v753_v26  ;;  %v791_v43 = vmax.f32 (!%p968_p11), %v775_v36, 0.0  ;;  %805 = vst [vmem:[%s1372_s3 + $0x40] sm:$0xff] (!%p968_p11), %v789_v39  ;;  %806 = vst [vmem:[%s1372_s3 + $0x48] sm:$0xff] (!%p968_p11), %v790_v40 }
 0x13d   : > { %v1011_v51 = vadd.f32 %v1010_v48, %v1009_v45  ;;  %v1035_v52 = vadd.f32 %v1034_v50, %v1033_v46  ;;  %v1012_v53 = vpop.f32.mrb[14].mxu0  ;;  %v1036_v54 = vpop.f32.mrb[14].mxu1  ;;  %741 = sbr.rel (%p968_p11) target bundleno = 337 (0x151), region = 78  ;;  %v784_v23 = vmax.f32 (!%p968_p11), %v768_v10, 0.0  ;;  %799 = vst [vmem:[%s1372_s3 + $0x10] sm:$0xff] (!%p968_p11), %v783_v22 }
 0x13e   : > { %v1013_v56 = vpop.f32.mrb[15].mxu0  ;;  %v1037_v58 = vpop.f32.mrb[15].mxu1  ;;  %v792_v44 = vmax.f32 (!%p968_p11), %v776_v37, 0.0  ;;  %807 = vst [vmem:[%s1372_s3 + $0x50] sm:$0xff] (!%p968_p11), %v791_v43 }
 0x13f   : > { %v712_v59 = vadd.f32 %v1011_v51, %v375_v47  ;;  %v720_v60 = vadd.f32 %v1035_v52, %v383_v49  ;;  %v1014_v61 = vadd.f32 %v1013_v56, %v1012_v53  ;;  %v1038_v62 = vadd.f32 %v1037_v58, %v1036_v54  ;;  %800 = vst [vmem:[%s1372_s3 + $0x18] sm:$0xff] (!%p968_p11), %v784_v23 }
 0x140   : > { %v746_v8 = vld [vmem:[#allocation2 + $0x20] sm:$0xff] (!%p968_p11)  ;;  %808 = vst [vmem:[%s1372_s3 + $0x58] sm:$0xff] (!%p968_p11), %v792_v44 }
 0x141   : > { %728 = vst [vmem:[#allocation2 + $0x30] sm:$0xff] %v712_v59  ;;  %736 = vst [vmem:[#allocation2 + $0x70] sm:$0xff] %v720_v60  ;;  %v713_v63 = vadd.f32 %v1014_v61, %v376_v55  ;;  %v721_v0 = vadd.f32 %v1038_v62, %v384_v57  ;;  %v769_v11 = vadd.f32 (!%p968_p11), %v969_v2, %v746_v8  ;;  %v754_v27 = vld [vmem:[#allocation2 + $0x60] sm:$0xff] (!%p968_p11) }
 0x142   : > { %v747_v12 = vld [vmem:[#allocation2 + $0x28] sm:$0xff] (!%p968_p11)  ;;  %v777_v38 = vadd.f32 (!%p968_p11), %v969_v2, %v754_v27 }
 0x143   : > { %729 = vst [vmem:[#allocation2 + $0x38] sm:$0xff] %v713_v63  ;;  %737 = vst [vmem:[#allocation2 + $0x78] sm:$0xff] %v721_v0  ;;  %v770_v17 = vadd.f32 (!%p968_p11), %v969_v2, %v747_v12  ;;  %v785_v24 = vmax.f32 (!%p968_p11), %v769_v11, 0.0  ;;  %v755_v28 = vld [vmem:[#allocation2 + $0x68] sm:$0xff] (!%p968_p11) }
 0x144   : > { %v778_v41 = vadd.f32 %v969_v2, %v755_v28  ;;  %v793_v45 = vmax.f32 %v777_v38, 0.0 }
 0x145   : > { %v786_v29 = vmax.f32 %v770_v17, 0.0  ;;  %801 = vst [vmem:[%s1372_s3 + $0x20] sm:$0xff] %v785_v24 }
 0x146   : > { %v794_v47 = vmax.f32 %v778_v41, 0.0  ;;  %809 = vst [vmem:[%s1372_s3 + $0x60] sm:$0xff] %v793_v45 }
 0x147   : > { %802 = vst [vmem:[%s1372_s3 + $0x28] sm:$0xff] %v786_v29 }
 0x148   : > { %v748_v13 = vld [vmem:[#allocation2 + $0x30] sm:$0xff]  ;;  %810 = vst [vmem:[%s1372_s3 + $0x68] sm:$0xff] %v794_v47 }
 0x149   : > { %v771_v18 = vadd.f32 %v969_v2, %v748_v13  ;;  %v756_v33 = vld [vmem:[#allocation2 + $0x70] sm:$0xff] }
 0x14a   : > { %v749_v14 = vld [vmem:[#allocation2 + $0x38] sm:$0xff]  ;;  %v779_v42 = vadd.f32 %v969_v2, %v756_v33 }
 0x14b   : > { %v772_v25 = vadd.f32 %v969_v2, %v749_v14  ;;  %v787_v30 = vmax.f32 %v771_v18, 0.0  ;;  %v757_v34 = vld [vmem:[#allocation2 + $0x78] sm:$0xff] }
 0x14c   : > { %v780_v46 = vadd.f32 %v969_v2, %v757_v34  ;;  %v795_v48 = vmax.f32 %v779_v42, 0.0 }
 0x14d   : > { %v788_v35 = vmax.f32 %v772_v25, 0.0  ;;  %803 = vst [vmem:[%s1372_s3 + $0x30] sm:$0xff] %v787_v30 }
 0x14e   : > { %v796_v49 = vmax.f32 %v780_v46, 0.0  ;;  %811 = vst [vmem:[%s1372_s3 + $0x70] sm:$0xff] %v795_v48 }
 0x14f   : > { %804 = vst [vmem:[%s1372_s3 + $0x38] sm:$0xff] %v788_v35 }
 0x150   : > { %812 = vst [vmem:[%s1372_s3 + $0x78] sm:$0xff] %v796_v49 }
 0x151 PF: > { %s13_s16 = sadd.s32 1, %s1174_s16   ;;  %s1373_s12 = smov %s1162_s13 }
 0x152   : > { %p10_p12 = scmp.ge.s32.totalorder %s13_s16, 5   ;;  %s1374_s13 = smov %s1232_s20 }
 0x153   : > { %s1375_s14 = smov %s1170_s15  ;;  %s1376_s15 = smov %s1378_s17 }
 0x154   :  { %12 = sbr.rel (!%p10_p12) target bundleno = 3 (0x3), region = 119 }

// kernel: st_classifier_forward.23
= control target key start
LH: loop header
LB: loop body
LE: loop exit
PB: predicated region body
PF: predicated region fallthrough
CT: control target
= control target key end

     0   :  { %s1313_s15 = smov 0   ;;  %s1315_s16 = smov 0   ;;  %s1551_s0 = inlined_call_operand.vmem [shape: bf16[128,768], index: 0, kind: input, shape index: {}]   ;;  %s1552_s1 = inlined_call_operand.vmem [shape: bf16[768,128], index: 1, kind: input, shape index: {}]   ;;  %s1553_s2 = inlined_call_operand.vmem [shape: f32[1,128], index: 2, kind: input, shape index: {}]   ;;  %s1554_s3 = inlined_call_operand.vmem [shape: f32[128,128], index: 3, kind: input, shape index: {}]   ;;  %s1555_s4 = inlined_call_operand.vmem [shape: f32[128,128], index: 4, kind: output, shape index: {}]  }
   0x1   :  { %s1317_s17 = smov 0   ;;  %s1319_s18 = smov 0  }
   0x2   :  { %s1321_s19 = smov 0  }
   0x3 LB: > { %s26_s20 = sadd.s32 1, %s1281_s18  ;;  %p49_p1 = scmp.ne.s32.totalorder %s1273_s16, %s1269_s15  ;;  %s1285_s19 = sphi %s1321_s19, %s14_s19   ;;  %s1281_s18 = sphi %s1319_s18, %s1559_s18   ;;  %s1277_s17 = sphi %s1317_s17, %s1558_s17   ;;  %s1273_s16 = sphi %s1315_s16, %s1557_s16   ;;  %s1269_s15 = sphi %s1313_s15, %s1556_s15  }
   0x4   : > { %p27_p0 = scmp.ge.s32.totalorder %s26_s20, 3  ;;  %p50_p2 = scmp.eq.s32.totalorder %s1285_s19, 0 }
   0x5   : > { %s42_s22 = sadd.s32 1, %s1273_s16  ;;  %p1038_p5 = scmp.ge.s32.totalorder %s1285_s19, 3 }
   0x6   : > { %s1561_s20 = smov (%p27_p0, %s26_s20), 0  ;;  %p51_p3 = por %p50_p2, %p49_p1 }
   0x7   : > { %s38_s21 = ssub.s32 %s1281_s18, %s1561_s20  ;;  %203 = sbr.rel (%p1038_p5) target bundleno = 26 (0x1a), region = 24 }
   0x8   : > { %p40_p4 = scmp.eq.s32.totalorder %s38_s21, 0 }
   0xa   : > { %s1348_s23 = scalar_select %p40_p4, %s1273_s16, %s42_s22  }
   0xe   : > { %206 = sbr.rel (!%p51_p3) target bundleno = 26 (0x1a), region = 28  ;;  %s208_s24 = sand.u32 (%p51_p3), 1, %s1273_s16  }
   0xf   : > { %s1085_s25 = sshll.u32 (%p51_p3), %s1281_s18, 3  ;;  %s1039_s26 = sshll.u32 (%p51_p3), %s208_s24, 7 }
  0x10   : > { %s1356_s29 = scalar_lea.vmem (%p51_p3), %s1551_s0, %s1085_s25  ;;  %s210_s30 = scalar_lea.vmem (%p51_p3), [#allocation3], %s1039_s26 }
  0x11   : > { %v274_v0 = vld [vmem:[%s1356_s29] sm:$0xff] (%p51_p3)  ;;  %v276_v1 = vld [vmem:[%s1356_s29 + $0x18] sm:$0xff] (%p51_p3)  ;;  %v278_v2 = vld [vmem:[%s1356_s29 + $0x30] sm:$0xff] (%p51_p3) }
  0x12   : > { %275 = vst [vmem:[%s210_s30] sm:$0xff] (%p51_p3), %v274_v0  ;;  %277 = vst [vmem:[%s210_s30 + $0x8] sm:$0xff] (%p51_p3), %v276_v1  ;;  %v280_v3 = vld [vmem:[%s1356_s29 + $0x48] sm:$0xff] (%p51_p3)  ;;  %v282_v4 = vld [vmem:[%s1356_s29 + $0x60] sm:$0xff] (%p51_p3) }
  0x13   : > { %279 = vst [vmem:[%s210_s30 + $0x10] sm:$0xff] (%p51_p3), %v278_v2  ;;  %v284_v5 = vld [vmem:[%s1356_s29 + $0x78] sm:$0xff] (%p51_p3)  ;;  %281 = vst [vmem:[%s210_s30 + $0x18] sm:$0xff] (%p51_p3), %v280_v3  ;;  %v286_v6 = vld [vmem:[%s1356_s29 + $0x90] sm:$0xff] (%p51_p3) }
  0x14   : > { %283 = vst [vmem:[%s210_s30 + $0x20] sm:$0xff] (%p51_p3), %v282_v4  ;;  %285 = vst [vmem:[%s210_s30 + $0x28] sm:$0xff] (%p51_p3), %v284_v5  ;;  %v288_v7 = vld [vmem:[%s1356_s29 + $0xa8] sm:$0xff] (%p51_p3)  ;;  %v290_v8 = vld [vmem:[%s1356_s29 + $0xc0] sm:$0xff] (%p51_p3) }
  0x15   : > { %287 = vst [vmem:[%s210_s30 + $0x30] sm:$0xff] %v286_v6  ;;  %289 = vst [vmem:[%s210_s30 + $0x38] sm:$0xff] %v288_v7  ;;  %v292_v9 = vld [vmem:[%s1356_s29 + $0xd8] sm:$0xff]  ;;  %v294_v10 = vld [vmem:[%s1356_s29 + $0xf0] sm:$0xff] }
  0x16   : > { %291 = vst [vmem:[%s210_s30 + $0x40] sm:$0xff] %v290_v8  ;;  %v296_v11 = vld [vmem:[%s1356_s29 + $0x108] sm:$0xff]  ;;  %293 = vst [vmem:[%s210_s30 + $0x48] sm:$0xff] %v292_v9  ;;  %v298_v12 = vld [vmem:[%s1356_s29 + $0x120] sm:$0xff] }
  0x17   : > { %295 = vst [vmem:[%s210_s30 + $0x50] sm:$0xff] %v294_v10  ;;  %297 = vst [vmem:[%s210_s30 + $0x58] sm:$0xff] %v296_v11  ;;  %v300_v13 = vld [vmem:[%s1356_s29 + $0x138] sm:$0xff]  ;;  %v302_v14 = vld [vmem:[%s1356_s29 + $0x150] sm:$0xff] }
  0x18   : > { %299 = vst [vmem:[%s210_s30 + $0x60] sm:$0xff] %v298_v12  ;;  %301 = vst [vmem:[%s210_s30 + $0x68] sm:$0xff] %v300_v13  ;;  %v304_v15 = vld [vmem:[%s1356_s29 + $0x168] sm:$0xff] }
  0x19   : > { %303 = vst [vmem:[%s210_s30 + $0x70] sm:$0xff] %v302_v14  ;;  %305 = vst [vmem:[%s210_s30 + $0x78] sm:$0xff] %v304_v15 }
  0x1a PF: > { %p1042_p6 = scmp.ge.s32.totalorder %s1285_s19, 1  ;;  %p322_p7 = scmp.lt.s32.totalorder %s1285_s19, 4 }
  0x1c   : > { %p323_p8 = pnand %p1042_p6, %p322_p7 }
  0x1d   : > { %s329_s5 = sand.u32 (!%p323_p8), 1, %s1269_s15   ;;  %s1044_s6 = sshll.u32 (!%p323_p8), %s1277_s17, 5 }
  0x1e   : > { %326 = sbr.rel (%p323_p8) target bundleno = 339 (0x153), region = 70  ;;  %s1043_s7 = sshll.u32 (!%p323_p8), %s329_s5, 7 }
  0x1f   : > { %p379_p9 = scmp.lt.s32.totalorder (!%p323_p8), %s1044_s6, 95  ;;  %s1383_s12 = scalar_lea.vmem (!%p323_p8), [#allocation3], %s1043_s7 }
  0x20   : > { %p1046_p10 = scmp.ne.s32.totalorder (!%p323_p8), %s1277_s17, 0 }
  0x25   : > { %s1563_s6 = smov (!%p379_p9, %s1044_s6), 95  ;;  %412 = sbr.rel (%p1046_p10) target bundleno = 47 (0x2f), region = 78 }
  0x26   : > { %s1045_s8 = sshll.u32 %s1563_s6, 2  ;;  %v1287_v16 = vmov (!%p1046_p10), 0.0  }
  0x27   : > { %s1381_s11 = scalar_lea.vmem %s1552_s1, %s1045_s8  ;;  %413 = vst [vmem:[#allocation2] sm:$0xff] (!%p1046_p10), %v1287_v16  ;;  %414 = vst [vmem:[#allocation2 + $0x8] sm:$0xff] (!%p1046_p10), %v1287_v16 }
  0x28   : > { %415 = vst [vmem:[#allocation2 + $0x10] sm:$0xff] (!%p1046_p10), %v1287_v16  ;;  %416 = vst [vmem:[#allocation2 + $0x18] sm:$0xff] (!%p1046_p10), %v1287_v16 }
  0x29   : > { %417 = vst [vmem:[#allocation2 + $0x20] sm:$0xff] (!%p1046_p10), %v1287_v16  ;;  %418 = vst [vmem:[#allocation2 + $0x28] sm:$0xff] (!%p1046_p10), %v1287_v16 }
  0x2a   : > { %419 = vst [vmem:[#allocation2 + $0x30] sm:$0xff] (!%p1046_p10), %v1287_v16  ;;  %420 = vst [vmem:[#allocation2 + $0x38] sm:$0xff] (!%p1046_p10), %v1287_v16 }
  0x2b   : > { %421 = vst [vmem:[#allocation2 + $0x40] sm:$0xff] (!%p1046_p10), %v1287_v16  ;;  %422 = vst [vmem:[#allocation2 + $0x48] sm:$0xff] (!%p1046_p10), %v1287_v16 }
  0x2c   : > { %423 = vst [vmem:[#allocation2 + $0x50] sm:$0xff] %v1287_v16  ;;  %424 = vst [vmem:[#allocation2 + $0x58] sm:$0xff] %v1287_v16 }
  0x2d   : > { %425 = vst [vmem:[#allocation2 + $0x60] sm:$0xff] %v1287_v16  ;;  %426 = vst [vmem:[#allocation2 + $0x68] sm:$0xff] %v1287_v16 }
  0x2e   : > { %427 = vst [vmem:[#allocation2 + $0x70] sm:$0xff] %v1287_v16  ;;  %428 = vst [vmem:[#allocation2 + $0x78] sm:$0xff] %v1287_v16 }
  0x2f PF: > { %v1207_v17 = vld [vmem:[%s1381_s11 + $0x40] sm:$0xff]   ;;  %v1209_v19 = vld [vmem:[%s1381_s11 + $0x48] sm:$0xff]   ;;  %v1211_v21 = vld [vmem:[%s1381_s11 + $0x50] sm:$0xff]   ;;  %p1079_p11 = scmp.ne.s32.totalorder %s1277_s17, 2 }
  0x30   : > { %v1208_v18 = vld [vmem:[%s1381_s11] sm:$0xff]   ;;  %1086 = vmatprep.subr.bf16.mxu0 %v1207_v17  ;;  %1150 = vmatprep.subr.bf16.mxu1 %v1207_v17  ;;  %v1210_v20 = vld [vmem:[%s1381_s11 + $0x8] sm:$0xff]   ;;  %v1212_v22 = vld [vmem:[%s1381_s11 + $0x10] sm:$0xff]  }
  0x31   : > { %1087 = vmatpush3.bf16.msra.mxu0 %v1208_v18  ;;  %1158 = vmatpush3.bf16.msra.mxu1 %v1208_v18  ;;  %v1213_v23 = vld [vmem:[%s1381_s11 + $0x58] sm:$0xff]   ;;  %v1215_v25 = vld [vmem:[%s1381_s11 + $0x60] sm:$0xff]   ;;  %v1217_v27 = vld [vmem:[%s1381_s11 + $0x68] sm:$0xff]  }
  0x32   : > { %1088 = vmatprep.subr.bf16.mxu0 %v1209_v19  ;;  %1151 = vmatprep.subr.bf16.mxu1 %v1209_v19  ;;  %v1214_v24 = vld [vmem:[%s1381_s11 + $0x18] sm:$0xff]   ;;  %v1216_v26 = vld [vmem:[%s1381_s11 + $0x20] sm:$0xff]   ;;  %v1218_v30 = vld [vmem:[%s1381_s11 + $0x28] sm:$0xff]  }
  0x33   : > { %v1225_v28 = vld [vmem:[%s1383_s12 + $0x4] ss:$8 sps:$4 sm:$0xff]   ;;  %v1219_v31 = vld [vmem:[%s1381_s11 + $0x70] sm:$0xff]   ;;  %v1221_v33 = vld [vmem:[%s1381_s11 + $0x78] sm:$0xff]  }
  0x34   : > { %v1228_v29 = vld [vmem:[%s1383_s12 + $0x44] ss:$8 sps:$4 sm:$0xff]   ;;  %701 = vmatprep.mubr.bf16.mxu0 %v1225_v28  ;;  %v1220_v32 = vld [vmem:[%s1381_s11 + $0x30] sm:$0xff]   ;;  %v1222_v34 = vld [vmem:[%s1381_s11 + $0x38] sm:$0xff]  }
  0x35   : > { %1089 = vmatpush3.bf16.msra.mxu0 %v1210_v20  ;;  %1159 = vmatpush3.bf16.msra.mxu1 %v1210_v20  ;;  %v1223_v35 = vld [vmem:[%s1383_s12] ss:$8 sps:$4 sm:$0xff]   ;;  %v1229_v37 = vld [vmem:[%s1383_s12 + $0x14] ss:$8 sps:$4 sm:$0xff]   ;;  %v1233_v39 = vld [vmem:[%s1383_s12 + $0x10] ss:$8 sps:$4 sm:$0xff]  }
  0x36   : > { %1090 = vmatprep.subr.bf16.mxu0 %v1211_v21  ;;  %1152 = vmatprep.subr.bf16.mxu1 %v1211_v21  ;;  %v1226_v36 = vld [vmem:[%s1383_s12 + $0x40] ss:$8 sps:$4 sm:$0xff]   ;;  %v1231_v38 = vld [vmem:[%s1383_s12 + $0x54] ss:$8 sps:$4 sm:$0xff]   ;;  %v1234_v40 = vld [vmem:[%s1383_s12 + $0x50] ss:$8 sps:$4 sm:$0xff]  }
  0x37   : > { %733 = vmatprep.mubr.bf16.mxu1 %v1228_v29  ;;  %v1235_v41 = vld [vmem:[%s1383_s12 + $0x24] ss:$8 sps:$4 sm:$0xff]   ;;  %v1239_v43 = vld [vmem:[%s1383_s12 + $0x20] ss:$8 sps:$4 sm:$0xff]   ;;  %v1241_v45 = vld [vmem:[%s1383_s12 + $0x34] ss:$8 sps:$4 sm:$0xff]  }
  0x38   : > { %v1237_v42 = vld [vmem:[%s1383_s12 + $0x64] ss:$8 sps:$4 sm:$0xff]   ;;  %v1240_v44 = vld [vmem:[%s1383_s12 + $0x60] ss:$8 sps:$4 sm:$0xff]   ;;  %v1243_v46 = vld [vmem:[%s1383_s12 + $0x74] ss:$8 sps:$4 sm:$0xff]  }
  0x39   : > { %1091 = vmatpush3.bf16.msra.mxu0 %v1212_v22  ;;  %1160 = vmatpush3.bf16.msra.mxu1 %v1212_v22  ;;  %v1245_v47 = vld [vmem:[%s1383_s12 + $0x30] ss:$8 sps:$4 sm:$0xff]   ;;  %v429_v51 = vld [vmem:[#allocation2] sm:$0xff]  ;;  %v430_v59 = vld [vmem:[#allocation2 + $0x8] sm:$0xff] }
  0x3a   : > { %1092 = vmatprep.subr.bf16.mxu0 %v1213_v23  ;;  %1153 = vmatprep.subr.bf16.mxu1 %v1213_v23  ;;  %v1246_v48 = vld [vmem:[%s1383_s12 + $0x70] ss:$8 sps:$4 sm:$0xff]   ;;  %v437_v53 = vld [vmem:[#allocation2 + $0x40] sm:$0xff]  ;;  %v438_v61 = vld [vmem:[#allocation2 + $0x48] sm:$0xff] }
  0x3b   : > { %v431_v7 = vld [vmem:[#allocation2 + $0x10] sm:$0xff]  ;;  %v432_v15 = vld [vmem:[#allocation2 + $0x18] sm:$0xff]  ;;  %v441_v29 = vld [vmem:[#allocation2 + $0x60] sm:$0xff] }
  0x3c   : > { %v439_v9 = vld [vmem:[#allocation2 + $0x50] sm:$0xff]  ;;  %v440_v17 = vld [vmem:[#allocation2 + $0x58] sm:$0xff] }
  0x3d   : > { %1093 = vmatpush3.bf16.msra.mxu0 %v1214_v24  ;;  %1161 = vmatpush3.bf16.msra.mxu1 %v1214_v24 }
  0x3e   : > { %1094 = vmatprep.subr.bf16.mxu0 %v1215_v25  ;;  %1154 = vmatprep.subr.bf16.mxu1 %v1215_v25 }
  0x41   : > { %1095 = vmatpush3.bf16.msra.mxu0 %v1216_v26  ;;  %1162 = vmatpush3.bf16.msra.mxu1 %v1216_v26 }
  0x42   : > { %1096 = vmatprep.subr.bf16.mxu0 %v1217_v27  ;;  %1155 = vmatprep.subr.bf16.mxu1 %v1217_v27  ;;  %v433_v27 = vld [vmem:[#allocation2 + $0x20] sm:$0xff] }
  0x45   : > { %1097 = vmatpush3.bf16.msra.mxu0 %v1218_v30  ;;  %1163 = vmatpush3.bf16.msra.mxu1 %v1218_v30 }
  0x46   : > { %1098 = vmatprep.subr.bf16.mxu0 %v1219_v31  ;;  %1156 = vmatprep.subr.bf16.mxu1 %v1219_v31 }
  0x49   : > { %1099 = vmatpush3.bf16.msra.mxu0 %v1220_v32  ;;  %1164 = vmatpush3.bf16.msra.mxu1 %v1220_v32 }
  0x4a   : > { %1100 = vmatprep.subr.bf16.mxu0 %v1221_v33  ;;  %1157 = vmatprep.subr.bf16.mxu1 %v1221_v33 }
  0x4d   : > { %1101 = vmatpush3.bf16.msra.mxu0 %v1222_v34  ;;  %1165 = vmatpush3.bf16.msra.mxu1 %v1222_v34 }
  0x50   : > { %702 = vmatmul.mubr.bf16.vlgmr.msra.gmra.mrb[0].mxu0 %v1223_v35  ;;  %734 = vmatmul.mubr.bf16.vlgmr.msra.gmra.mrb[0].mxu1 %v1226_v36  ;;  %v434_v35 = vld [vmem:[#allocation2 + $0x28] sm:$0xff] }
  0x51   : > { %709 = vmatprep.mubr.bf16.mxu0 %v1229_v37  ;;  %741 = vmatprep.mubr.bf16.mxu1 %v1231_v38  ;;  %v442_v37 = vld [vmem:[#allocation2 + $0x68] sm:$0xff] }
  0x58   : > { %710 = vmatmul.mubr.bf16.gmra.mrb[4].mxu0 %v1233_v39  ;;  %742 = vmatmul.mubr.bf16.gmra.mrb[4].mxu1 %v1234_v40 }
  0x59   : > { %717 = vmatprep.mubr.bf16.mxu0 %v1235_v41  ;;  %749 = vmatprep.mubr.bf16.mxu1 %v1237_v42 }
  0x60   : > { %718 = vmatmul.mubr.bf16.gmra.mrb[8].mxu0 %v1239_v43  ;;  %750 = vmatmul.mubr.bf16.gmra.mrb[8].mxu1 %v1240_v44 }
  0x61   : > { %725 = vmatprep.mubr.bf16.mxu0 %v1241_v45  ;;  %757 = vmatprep.mubr.bf16.mxu1 %v1243_v46 }
  0x68   : > { %726 = vmatmul.mubr.bf16.gmra.mrb[12].mxu0 %v1245_v47  ;;  %758 = vmatmul.mubr.bf16.gmra.mrb[12].mxu1 %v1246_v48  ;;  %v435_v47 = vld [vmem:[#allocation2 + $0x30] sm:$0xff] }
 0x123   : > { %v1102_v49 = vpop.f32.mrb[0].mxu0  ;;  %v1126_v50 = vpop.f32.mrb[0].mxu1 }
 0x124   : > { %v1103_v52 = vpop.f32.mrb[1].mxu0  ;;  %v1127_v54 = vpop.f32.mrb[1].mxu1 }
 0x125   : > { %v1104_v55 = vadd.f32 %v1103_v52, %v1102_v49  ;;  %v1128_v56 = vadd.f32 %v1127_v54, %v1126_v50  ;;  %v1105_v57 = vpop.f32.mrb[2].mxu0  ;;  %v1129_v58 = vpop.f32.mrb[2].mxu1  ;;  %v443_v49 = vld [vmem:[#allocation2 + $0x70] sm:$0xff] }
 0x126   : > { %v1106_v60 = vpop.f32.mrb[3].mxu0  ;;  %v1130_v62 = vpop.f32.mrb[3].mxu1 }
 0x127   : > { %v766_v63 = vadd.f32 %v1104_v55, %v429_v51  ;;  %v774_v0 = vadd.f32 %v1128_v56, %v437_v53  ;;  %v1107_v1 = vadd.f32 %v1106_v60, %v1105_v57  ;;  %v1131_v2 = vadd.f32 %v1130_v62, %v1129_v58  ;;  %v436_v55 = vld [vmem:[#allocation2 + $0x38] sm:$0xff] }
 0x128   : > { %v444_v57 = vld [vmem:[#allocation2 + $0x78] sm:$0xff] }
 0x129   : > { %782 = vst [vmem:[#allocation2] sm:$0xff] %v766_v63  ;;  %790 = vst [vmem:[#allocation2 + $0x40] sm:$0xff] %v774_v0  ;;  %v767_v3 = vadd.f32 %v1107_v1, %v430_v59  ;;  %v775_v4 = vadd.f32 %v1131_v2, %v438_v61  ;;  %v1422_v2 = vld [vmem:[%s1553_s2] ss:$0 sm:$0xff] (!%p1079_p11) }
 0x12b   : > { %783 = vst [vmem:[#allocation2 + $0x8] sm:$0xff] %v767_v3  ;;  %791 = vst [vmem:[#allocation2 + $0x48] sm:$0xff] %v775_v4  ;;  %v1108_v5 = vpop.f32.mrb[4].mxu0  ;;  %v1132_v6 = vpop.f32.mrb[4].mxu1  ;;  %v841_v3 = vld [vmem:[%s1554_s3] sm:$0xff] (!%p1079_p11) }
 0x12c   : > { %v1109_v8 = vpop.f32.mrb[5].mxu0  ;;  %v1133_v10 = vpop.f32.mrb[5].mxu1 }
 0x12d   : > { %v1110_v11 = vadd.f32 %v1109_v8, %v1108_v5  ;;  %v1134_v12 = vadd.f32 %v1133_v10, %v1132_v6  ;;  %v1111_v13 = vpop.f32.mrb[6].mxu0  ;;  %v1135_v14 = vpop.f32.mrb[6].mxu1  ;;  %v842_v6 = vld [vmem:[%s1554_s3 + $0x8] sm:$0xff] (!%p1079_p11)  ;;  %v843_v10 = vld [vmem:[%s1554_s3 + $0x10] sm:$0xff] (!%p1079_p11) }
 0x12e   : > { %v1112_v16 = vpop.f32.mrb[7].mxu0  ;;  %v1136_v18 = vpop.f32.mrb[7].mxu1 }
 0x12f   : > { %v768_v19 = vadd.f32 %v1110_v11, %v431_v7  ;;  %v776_v20 = vadd.f32 %v1134_v12, %v439_v9  ;;  %v1113_v21 = vadd.f32 %v1112_v16, %v1111_v13  ;;  %v1137_v22 = vadd.f32 %v1136_v18, %v1135_v14  ;;  %v844_v12 = vld [vmem:[%s1554_s3 + $0x18] sm:$0xff] (!%p1079_p11)  ;;  %v845_v16 = vld [vmem:[%s1554_s3 + $0x20] sm:$0xff] (!%p1079_p11) }
 0x130   : > { %v802_v1 = vld [vmem:[#allocation2] sm:$0xff] (!%p1079_p11) }
 0x131   : > { %784 = vst [vmem:[#allocation2 + $0x10] sm:$0xff] %v768_v19  ;;  %792 = vst [vmem:[#allocation2 + $0x50] sm:$0xff] %v776_v20  ;;  %v769_v23 = vadd.f32 %v1113_v21, %v432_v15  ;;  %v777_v24 = vadd.f32 %v1137_v22, %v440_v17  ;;  %v825_v4 = vadd.f32 (!%p1079_p11), %v1422_v2, %v802_v1  ;;  %v846_v22 = vld [vmem:[%s1554_s3 + $0x28] sm:$0xff] (!%p1079_p11) }
 0x132   : > { %v803_v5 = vld [vmem:[#allocation2 + $0x8] sm:$0xff] (!%p1079_p11) }
 0x133   : > { %785 = vst [vmem:[#allocation2 + $0x18] sm:$0xff] %v769_v23  ;;  %793 = vst [vmem:[#allocation2 + $0x58] sm:$0xff] %v777_v24  ;;  %v1114_v25 = vpop.f32.mrb[8].mxu0  ;;  %v1138_v26 = vpop.f32.mrb[8].mxu1  ;;  %v826_v8 = vadd.f32 (!%p1079_p11), %v1422_v2, %v803_v5  ;;  %v857_v13 = vadd.f32 (!%p1079_p11), %v841_v3, %v825_v4  ;;  %v847_v24 = vld [vmem:[%s1554_s3 + $0x30] sm:$0xff] (!%p1079_p11) }
 0x134   : > { %v1115_v28 = vpop.f32.mrb[9].mxu0  ;;  %v1139_v30 = vpop.f32.mrb[9].mxu1 }
 0x135   : > { %v1116_v31 = vadd.f32 %v1115_v28, %v1114_v25  ;;  %v1140_v32 = vadd.f32 %v1139_v30, %v1138_v26  ;;  %v1117_v33 = vpop.f32.mrb[10].mxu0  ;;  %v1141_v34 = vpop.f32.mrb[10].mxu1  ;;  %v858_v18 = vadd.f32 (!%p1079_p11), %v842_v6, %v826_v8  ;;  %v873_v25 = vmax.f32 (!%p1079_p11), %v857_v13, 0.0  ;;  %v810_v30 = vld [vmem:[#allocation2 + $0x40] sm:$0xff] (!%p1079_p11) }
 0x136   : > { %v1118_v36 = vpop.f32.mrb[11].mxu0  ;;  %v1142_v38 = vpop.f32.mrb[11].mxu1 }
 0x137   : > { %v770_v39 = vadd.f32 %v1116_v31, %v433_v27  ;;  %v778_v40 = vadd.f32 %v1140_v32, %v441_v29  ;;  %v1119_v41 = vadd.f32 %v1118_v36, %v1117_v33  ;;  %v1143_v42 = vadd.f32 %v1142_v38, %v1141_v34  ;;  %v848_v29 = vld [vmem:[%s1554_s3 + $0x38] sm:$0xff] (!%p1079_p11)  ;;  %v811_v36 = vld [vmem:[#allocation2 + $0x48] sm:$0xff] (!%p1079_p11)  ;;  %889 = vst [vmem:[%s1555_s4] sm:$0xff] (!%p1079_p11), %v873_v25 }
 0x138   : > { %v804_v7 = vld [vmem:[#allocation2 + $0x10] sm:$0xff] (!%p1079_p11)  ;;  %v874_v31 = vmax.f32 (!%p1079_p11), %v858_v18, 0.0 }
 0x139   : > { %786 = vst [vmem:[#allocation2 + $0x20] sm:$0xff] %v770_v39  ;;  %794 = vst [vmem:[#allocation2 + $0x60] sm:$0xff] %v778_v40  ;;  %v771_v43 = vadd.f32 %v1119_v41, %v434_v35  ;;  %v779_v44 = vadd.f32 %v1143_v42, %v442_v37  ;;  %v827_v9 = vadd.f32 (!%p1079_p11), %v1422_v2, %v804_v7  ;;  %v849_v35 = vld [vmem:[%s1554_s3 + $0x40] sm:$0xff] (!%p1079_p11)  ;;  %v850_v37 = vld [vmem:[%s1554_s3 + $0x48] sm:$0xff] (!%p1079_p11) }
 0x13a   : > { %v805_v11 = vld [vmem:[#allocation2 + $0x18] sm:$0xff] (!%p1079_p11)  ;;  %v833_v41 = vadd.f32 (!%p1079_p11), %v1422_v2, %v810_v30  ;;  %v812_v42 = vld [vmem:[#allocation2 + $0x50] sm:$0xff] (!%p1079_p11)  ;;  %890 = vst [vmem:[%s1555_s4 + $0x8] sm:$0xff] (!%p1079_p11), %v874_v31 }
 0x13b   : > { %787 = vst [vmem:[#allocation2 + $0x28] sm:$0xff] %v771_v43  ;;  %795 = vst [vmem:[#allocation2 + $0x68] sm:$0xff] %v779_v44  ;;  %v1120_v45 = vpop.f32.mrb[12].mxu0  ;;  %v1144_v46 = vpop.f32.mrb[12].mxu1  ;;  %v828_v14 = vadd.f32 (!%p1079_p11), %v1422_v2, %v805_v11  ;;  %v859_v19 = vadd.f32 (!%p1079_p11), %v843_v10, %v827_v9  ;;  %v851_v43 = vld [vmem:[%s1554_s3 + $0x50] sm:$0xff] (!%p1079_p11)  ;;  %v813_v44 = vld [vmem:[#allocation2 + $0x58] sm:$0xff] (!%p1079_p11) }
 0x13c   : > { %v1121_v48 = vpop.f32.mrb[13].mxu0  ;;  %v1145_v50 = vpop.f32.mrb[13].mxu1  ;;  %v856_v10 = vld [vmem:[%s1554_s3 + $0x78] sm:$0xff] (!%p1079_p11) }
 0x13d   : > { %v1122_v51 = vadd.f32 %v1121_v48, %v1120_v45  ;;  %v1146_v52 = vadd.f32 %v1145_v50, %v1144_v46  ;;  %v1123_v53 = vpop.f32.mrb[14].mxu0  ;;  %v1147_v54 = vpop.f32.mrb[14].mxu1  ;;  %801 = sbr.rel (%p1079_p11) target bundleno = 339 (0x153), region = 82  ;;  %v860_v26 = vadd.f32 (!%p1079_p11), %v844_v12, %v828_v14  ;;  %v875_v32 = vmax.f32 (!%p1079_p11), %v859_v19, 0.0 }
 0x13e   : > { %v1124_v56 = vpop.f32.mrb[15].mxu0  ;;  %v1148_v58 = vpop.f32.mrb[15].mxu1  ;;  %v835_v48 = vadd.f32 (!%p1079_p11), %v1422_v2, %v812_v42 }
 0x13f   : > { %v772_v59 = vadd.f32 %v1122_v51, %v435_v47  ;;  %v780_v60 = vadd.f32 %v1146_v52, %v443_v49  ;;  %v1125_v61 = vadd.f32 %v1124_v56, %v1123_v53  ;;  %v1149_v62 = vadd.f32 %v1148_v58, %v1147_v54  ;;  %891 = vst [vmem:[%s1555_s4 + $0x10] sm:$0xff] (!%p1079_p11), %v875_v32  ;;  %v852_v49 = vld [vmem:[%s1554_s3 + $0x58] sm:$0xff] (!%p1079_p11)  ;;  %v853_v51 = vld [vmem:[%s1554_s3 + $0x60] sm:$0xff] (!%p1079_p11) }
 0x140   : > { %v806_v15 = vld [vmem:[#allocation2 + $0x20] sm:$0xff] (!%p1079_p11)  ;;  %v876_v38 = vmax.f32 (!%p1079_p11), %v860_v26, 0.0  ;;  %v834_v47 = vadd.f32 (!%p1079_p11), %v1422_v2, %v811_v36  ;;  %v865_v54 = vadd.f32 (!%p1079_p11), %v849_v35, %v833_v41 }
 0x141   : > { %788 = vst [vmem:[#allocation2 + $0x30] sm:$0xff] %v772_v59  ;;  %796 = vst [vmem:[#allocation2 + $0x70] sm:$0xff] %v780_v60  ;;  %v773_v63 = vadd.f32 %v1125_v61, %v436_v55  ;;  %v781_v0 = vadd.f32 %v1149_v62, %v444_v57  ;;  %v829_v20 = vadd.f32 (!%p1079_p11), %v1422_v2, %v806_v15  ;;  %v814_v50 = vld [vmem:[#allocation2 + $0x60] sm:$0xff] (!%p1079_p11)  ;;  %v854_v57 = vld [vmem:[%s1554_s3 + $0x68] sm:$0xff] (!%p1079_p11) }
 0x142   : > { %v807_v17 = vld [vmem:[#allocation2 + $0x28] sm:$0xff] (!%p1079_p11)  ;;  %892 = vst [vmem:[%s1555_s4 + $0x18] sm:$0xff] (!%p1079_p11), %v876_v38  ;;  %v836_v55 = vadd.f32 (!%p1079_p11), %v1422_v2, %v813_v44  ;;  %v866_v59 = vadd.f32 (!%p1079_p11), %v850_v37, %v834_v47  ;;  %v867_v60 = vadd.f32 (!%p1079_p11), %v851_v43, %v835_v48  ;;  %v837_v61 = vadd.f32 (!%p1079_p11), %v1422_v2, %v814_v50 }
 0x143   : > { %789 = vst [vmem:[#allocation2 + $0x38] sm:$0xff] %v773_v63  ;;  %797 = vst [vmem:[#allocation2 + $0x78] sm:$0xff] %v781_v0  ;;  %v830_v21 = vadd.f32 (!%p1079_p11), %v1422_v2, %v807_v17  ;;  %v861_v33 = vadd.f32 (!%p1079_p11), %v845_v16, %v829_v20  ;;  %v815_v56 = vld [vmem:[#allocation2 + $0x68] sm:$0xff] (!%p1079_p11)  ;;  %v855_v63 = vld [vmem:[%s1554_s3 + $0x70] sm:$0xff] (!%p1079_p11)  ;;  %v881_v3 = vmax.f32 (!%p1079_p11), %v865_v54, 0.0 }
 0x144   : > { %v838_v62 = vadd.f32 %v1422_v2, %v815_v56  ;;  %v868_v4 = vadd.f32 %v852_v49, %v836_v55  ;;  %v882_v6 = vmax.f32 %v866_v59, 0.0  ;;  %v883_v7 = vmax.f32 %v867_v60, 0.0 }
 0x145   : > { %v862_v34 = vadd.f32 %v846_v22, %v830_v21  ;;  %v877_v45 = vmax.f32 %v861_v33, 0.0  ;;  %v869_v8 = vadd.f32 %v853_v51, %v837_v61  ;;  %897 = vst [vmem:[%s1555_s4 + $0x40] sm:$0xff] %v881_v3 }
 0x146   : > { %v870_v9 = vadd.f32 %v854_v57, %v838_v62  ;;  %v884_v11 = vmax.f32 %v868_v4, 0.0  ;;  %898 = vst [vmem:[%s1555_s4 + $0x48] sm:$0xff] %v882_v6  ;;  %899 = vst [vmem:[%s1555_s4 + $0x50] sm:$0xff] %v883_v7 }
 0x147   : > { %v878_v46 = vmax.f32 %v862_v34, 0.0  ;;  %893 = vst [vmem:[%s1555_s4 + $0x20] sm:$0xff] %v877_v45  ;;  %v885_v14 = vmax.f32 %v869_v8, 0.0 }
 0x148   : > { %v808_v23 = vld [vmem:[#allocation2 + $0x30] sm:$0xff]  ;;  %v886_v15 = vmax.f32 %v870_v9, 0.0  ;;  %900 = vst [vmem:[%s1555_s4 + $0x58] sm:$0xff] %v884_v11 }
 0x149   : > { %v831_v27 = vadd.f32 %v1422_v2, %v808_v23  ;;  %v816_v58 = vld [vmem:[#allocation2 + $0x70] sm:$0xff]  ;;  %894 = vst [vmem:[%s1555_s4 + $0x28] sm:$0xff] %v878_v46  ;;  %901 = vst [vmem:[%s1555_s4 + $0x60] sm:$0xff] %v885_v14 }
 0x14a   : > { %v809_v28 = vld [vmem:[#allocation2 + $0x38] sm:$0xff]  ;;  %v839_v5 = vadd.f32 %v1422_v2, %v816_v58  ;;  %902 = vst [vmem:[%s1555_s4 + $0x68] sm:$0xff] %v886_v15 }
 0x14b   : > { %v863_v39 = vadd.f32 %v847_v24, %v831_v27  ;;  %v832_v40 = vadd.f32 %v1422_v2, %v809_v28  ;;  %v817_v0 = vld [vmem:[#allocation2 + $0x78] sm:$0xff] }
 0x14c   : > { %v871_v12 = vadd.f32 %v855_v63, %v839_v5  ;;  %v840_v13 = vadd.f32 %v1422_v2, %v817_v0 }
 0x14d   : > { %v879_v52 = vmax.f32 %v863_v39, 0.0  ;;  %v864_v53 = vadd.f32 %v848_v29, %v832_v40 }
 0x14e   : > { %v887_v16 = vmax.f32 %v871_v12, 0.0  ;;  %v872_v17 = vadd.f32 %v856_v10, %v840_v13 }
 0x14f   : > { %895 = vst [vmem:[%s1555_s4 + $0x30] sm:$0xff] %v879_v52  ;;  %v880_v1 = vmax.f32 %v864_v53, 0.0 }
 0x150   : > { %903 = vst [vmem:[%s1555_s4 + $0x70] sm:$0xff] %v887_v16  ;;  %v888_v2 = vmax.f32 %v872_v17, 0.0 }
 0x151   : > { %896 = vst [vmem:[%s1555_s4 + $0x38] sm:$0xff] %v880_v1 }
 0x152   : > { %904 = vst [vmem:[%s1555_s4 + $0x78] sm:$0xff] %v888_v2 }
 0x153 PF: > { %s14_s19 = sadd.s32 1, %s1285_s19   ;;  %s1556_s15 = smov %s1273_s16 }
 0x154   : > { %p11_p12 = scmp.ge.s32.totalorder %s14_s19, 5   ;;  %s1557_s16 = smov %s1348_s23 }
 0x155   : > { %s1558_s17 = smov %s1281_s18  ;;  %s1559_s18 = smov %s1561_s20 }
 0x156   :  { %13 = sbr.rel (!%p11_p12) target bundleno = 3 (0x3), region = 126 }

// kernel: st_classifier_forward.26
= control target key start
LH: loop header
LB: loop body
LE: loop exit
PB: predicated region body
PF: predicated region fallthrough
CT: control target
= control target key end

     0   :  { %s867_s12 = smov 0   ;;  %s869_s13 = smov 0   ;;  %s973_s0 = inlined_call_operand.vmem [shape: bf16[32,768], index: 0, kind: input, shape index: {}]   ;;  %s974_s1 = inlined_call_operand.vmem [shape: bf16[768,128], index: 1, kind: input, shape index: {}]   ;;  %s975_s2 = inlined_call_operand.vmem [shape: f32[1,128], index: 2, kind: input, shape index: {}]   ;;  %s976_s3 = inlined_call_operand.vmem [shape: f32[32,128], index: 3, kind: output, shape index: {}]  }
   0x1   :  { %s871_s14 = smov 0   ;;  %s873_s15 = smov 0  }
   0x2   :  { %s875_s16 = smov 0  }
   0x3 LB: > { %s25_s17 = sadd.s32 1, %s840_s15  ;;  %p48_p1 = scmp.ne.s32.totalorder %s832_s13, %s828_s12  ;;  %s844_s16 = sphi %s875_s16, %s13_s16   ;;  %s840_s15 = sphi %s873_s15, %s980_s15   ;;  %s836_s14 = sphi %s871_s14, %s979_s14   ;;  %s832_s13 = sphi %s869_s13, %s978_s13   ;;  %s828_s12 = sphi %s867_s12, %s977_s12  }
   0x4   : > { %p26_p0 = scmp.ge.s32.totalorder %s25_s17, 3  ;;  %p49_p2 = scmp.eq.s32.totalorder %s844_s16, 0 }
   0x5   : > { %s41_s19 = sadd.s32 1, %s832_s13  ;;  %p663_p5 = scmp.ge.s32.totalorder %s844_s16, 3 }
   0x6   : > { %s982_s17 = smov (%p26_p0, %s25_s17), 0  ;;  %p50_p3 = por %p49_p2, %p48_p1 }
   0x7   : > { %s37_s18 = ssub.s32 %s840_s15, %s982_s17  ;;  %162 = sbr.rel (%p663_p5) target bundleno = 21 (0x15), region = 20 }
   0x8   : > { %p39_p4 = scmp.eq.s32.totalorder %s37_s18, 0 }
   0xa   : > { %s902_s20 = scalar_select %p39_p4, %s832_s13, %s41_s19  }
   0xe   : > { %165 = sbr.rel (!%p50_p3) target bundleno = 21 (0x15), region = 24  ;;  %s167_s21 = sand.u32 (%p50_p3), 1, %s832_s13  }
   0xf   : > { %s698_s22 = sshll.u32 (%p50_p3), %s840_s15, 3  ;;  %s664_s23 = sshll.u32 (%p50_p3), %s167_s21, 5 }
  0x10   : > { %s175_s26 = scalar_lea.vmem (%p50_p3), %s973_s0, %s698_s22  ;;  %s169_s27 = scalar_lea.vmem (%p50_p3), [#allocation3], %s664_s23 }
  0x11   : > { %v209_v0 = vld [vmem:[%s175_s26] sm:$0xff] (%p50_p3)  ;;  %v211_v1 = vld [vmem:[%s175_s26 + $0x18] sm:$0xff] (%p50_p3)  ;;  %v213_v2 = vld [vmem:[%s175_s26 + $0x30] sm:$0xff] (%p50_p3) }
  0x12   : > { %210 = vst [vmem:[%s169_s27] sm:$0xff] (%p50_p3), %v209_v0  ;;  %212 = vst [vmem:[%s169_s27 + $0x8] sm:$0xff] (%p50_p3), %v211_v1  ;;  %v215_v3 = vld [vmem:[%s175_s26 + $0x48] sm:$0xff] (%p50_p3) }
  0x13   : > { %214 = vst [vmem:[%s169_s27 + $0x10] sm:$0xff] (%p50_p3), %v213_v2  ;;  %216 = vst [vmem:[%s169_s27 + $0x18] sm:$0xff] (%p50_p3), %v215_v3 }
  0x15 PF: > { %p667_p6 = scmp.ge.s32.totalorder %s844_s16, 1  ;;  %p233_p7 = scmp.lt.s32.totalorder %s844_s16, 4 }
  0x17   : > { %p234_p8 = pnand %p667_p6, %p233_p7 }
  0x18   : > { %s240_s28 = sand.u32 (!%p234_p8), 1, %s828_s12   ;;  %s669_s29 = sshll.u32 (!%p234_p8), %s836_s14, 5 }
  0x19   : > { %237 = sbr.rel (%p234_p8) target bundleno = 304 (0x130), region = 66  ;;  %s668_s30 = sshll.u32 (!%p234_p8), %s240_s28, 5 }
  0x1a   : > { %p280_p9 = scmp.lt.s32.totalorder (!%p234_p8), %s669_s29, 95  ;;  %s919_s8 = scalar_lea.vmem (!%p234_p8), [#allocation3], %s668_s30 }
  0x1b   : > { %p671_p10 = scmp.ne.s32.totalorder (!%p234_p8), %s836_s14, 0 }
  0x20   : > { %s984_s29 = smov (!%p280_p9, %s669_s29), 95  ;;  %304 = sbr.rel (%p671_p10) target bundleno = 39 (0x27), region = 74 }
  0x21   : > { %s670_s4 = sshll.u32 %s984_s29, 2  ;;  %v846_v4 = vmov (!%p671_p10), 0.0  }
  0x22   : > { %s917_s7 = scalar_lea.vmem %s974_s1, %s670_s4  ;;  %305 = vst [vmem:[#allocation2] sm:$0xff] (!%p671_p10), %v846_v4  ;;  %306 = vst [vmem:[#allocation2 + $0x8] sm:$0xff] (!%p671_p10), %v846_v4 }
  0x23   : > { %307 = vst [vmem:[#allocation2 + $0x10] sm:$0xff] (!%p671_p10), %v846_v4  ;;  %308 = vst [vmem:[#allocation2 + $0x18] sm:$0xff] (!%p671_p10), %v846_v4 }
  0x27 PF: > { %v784_v5 = vld [vmem:[%s917_s7 + $0x40] sm:$0xff]   ;;  %v786_v7 = vld [vmem:[%s917_s7 + $0x48] sm:$0xff]   ;;  %v788_v9 = vld [vmem:[%s917_s7 + $0x50] sm:$0xff]   ;;  %p692_p11 = scmp.ne.s32.totalorder %s836_s14, 2 }
  0x28   : > { %v785_v6 = vld [vmem:[%s917_s7] sm:$0xff]   ;;  %699 = vmatprep.subr.bf16.mxu0 %v784_v5  ;;  %727 = vmatprep.subr.bf16.mxu1 %v784_v5  ;;  %v787_v8 = vld [vmem:[%s917_s7 + $0x8] sm:$0xff]   ;;  %v789_v10 = vld [vmem:[%s917_s7 + $0x10] sm:$0xff]  }
  0x29   : > { %700 = vmatpush3.bf16.msra.mxu0 %v785_v6  ;;  %735 = vmatpush3.bf16.msra.mxu1 %v785_v6  ;;  %v790_v11 = vld [vmem:[%s917_s7 + $0x58] sm:$0xff]   ;;  %v792_v13 = vld [vmem:[%s917_s7 + $0x60] sm:$0xff]   ;;  %v794_v15 = vld [vmem:[%s917_s7 + $0x68] sm:$0xff]  }
  0x2a   : > { %701 = vmatprep.subr.bf16.mxu0 %v786_v7  ;;  %728 = vmatprep.subr.bf16.mxu1 %v786_v7  ;;  %v791_v12 = vld [vmem:[%s917_s7 + $0x18] sm:$0xff]   ;;  %v793_v14 = vld [vmem:[%s917_s7 + $0x20] sm:$0xff]   ;;  %v795_v18 = vld [vmem:[%s917_s7 + $0x28] sm:$0xff]  }
  0x2b   : > { %v802_v16 = vld [vmem:[%s919_s8 + $0x4] ss:$8 sps:$4 sm:$0xff]   ;;  %v805_v17 = vld [vmem:[%s919_s8 + $0x14] ss:$8 sps:$4 sm:$0xff]   ;;  %v800_v23 = vld [vmem:[%s919_s8] ss:$8 sps:$4 sm:$0xff]  }
  0x2c   : > { %v796_v19 = vld [vmem:[%s917_s7 + $0x70] sm:$0xff]   ;;  %497 = vmatprep.mubr.bf16.mxu0 %v802_v16  ;;  %505 = vmatprep.mubr.bf16.mxu1 %v805_v17  ;;  %v798_v21 = vld [vmem:[%s917_s7 + $0x78] sm:$0xff]   ;;  %v309_v27 = vld [vmem:[#allocation2] sm:$0xff] }
  0x2d   : > { %702 = vmatpush3.bf16.msra.mxu0 %v787_v8  ;;  %736 = vmatpush3.bf16.msra.mxu1 %v787_v8  ;;  %v797_v20 = vld [vmem:[%s917_s7 + $0x30] sm:$0xff]   ;;  %v799_v22 = vld [vmem:[%s917_s7 + $0x38] sm:$0xff]   ;;  %v310_v35 = vld [vmem:[#allocation2 + $0x8] sm:$0xff] }
  0x2e   : > { %703 = vmatprep.subr.bf16.mxu0 %v788_v9  ;;  %729 = vmatprep.subr.bf16.mxu1 %v788_v9  ;;  %v803_v24 = vld [vmem:[%s919_s8 + $0x10] ss:$8 sps:$4 sm:$0xff]   ;;  %v693_v46 = vld [vmem:[%s975_s2] ss:$0 sm:$0xff] (!%p692_p11) }
  0x2f   : > { %v311_v29 = vld [vmem:[#allocation2 + $0x10] sm:$0xff]  ;;  %v312_v37 = vld [vmem:[#allocation2 + $0x18] sm:$0xff] }
  0x31   : > { %704 = vmatpush3.bf16.msra.mxu0 %v789_v10  ;;  %737 = vmatpush3.bf16.msra.mxu1 %v789_v10 }
  0x32   : > { %705 = vmatprep.subr.bf16.mxu0 %v790_v11  ;;  %730 = vmatprep.subr.bf16.mxu1 %v790_v11 }
  0x35   : > { %706 = vmatpush3.bf16.msra.mxu0 %v791_v12  ;;  %738 = vmatpush3.bf16.msra.mxu1 %v791_v12 }
  0x36   : > { %707 = vmatprep.subr.bf16.mxu0 %v792_v13  ;;  %731 = vmatprep.subr.bf16.mxu1 %v792_v13 }
  0x39   : > { %708 = vmatpush3.bf16.msra.mxu0 %v793_v14  ;;  %739 = vmatpush3.bf16.msra.mxu1 %v793_v14 }
  0x3a   : > { %709 = vmatprep.subr.bf16.mxu0 %v794_v15  ;;  %732 = vmatprep.subr.bf16.mxu1 %v794_v15 }
  0x3d   : > { %710 = vmatpush3.bf16.msra.mxu0 %v795_v18  ;;  %740 = vmatpush3.bf16.msra.mxu1 %v795_v18 }
  0x3e   : > { %711 = vmatprep.subr.bf16.mxu0 %v796_v19  ;;  %733 = vmatprep.subr.bf16.mxu1 %v796_v19 }
  0x41   : > { %712 = vmatpush3.bf16.msra.mxu0 %v797_v20  ;;  %741 = vmatpush3.bf16.msra.mxu1 %v797_v20 }
  0x42   : > { %713 = vmatprep.subr.bf16.mxu0 %v798_v21  ;;  %734 = vmatprep.subr.bf16.mxu1 %v798_v21 }
  0x45   : > { %714 = vmatpush3.bf16.msra.mxu0 %v799_v22  ;;  %742 = vmatpush3.bf16.msra.mxu1 %v799_v22 }
  0x48   : > { %498 = vmatmul.mubr.bf16.vlgmr.msra.gmra.mrb[0].mxu0 %v800_v23  ;;  %506 = vmatmul.mubr.bf16.vlgmr.msra.gmra.mrb[0].mxu1 %v803_v24 }
 0x11b   : > { %v715_v25 = vpop.f32.mrb[0].mxu0  ;;  %v721_v26 = vpop.f32.mrb[0].mxu1 }
 0x11c   : > { %v716_v28 = vpop.f32.mrb[1].mxu0  ;;  %v722_v30 = vpop.f32.mrb[1].mxu1 }
 0x11d   : > { %v717_v31 = vadd.f32 %v716_v28, %v715_v25  ;;  %v723_v32 = vadd.f32 %v722_v30, %v721_v26  ;;  %v718_v33 = vpop.f32.mrb[2].mxu0  ;;  %v724_v34 = vpop.f32.mrb[2].mxu1  ;;  %525 = sbr.rel (%p692_p11) target bundleno = 304 (0x130), region = 78 }
 0x11e   : > { %v719_v36 = vpop.f32.mrb[3].mxu0  ;;  %v725_v38 = vpop.f32.mrb[3].mxu1 }
 0x11f   : > { %v514_v39 = vadd.f32 %v717_v31, %v309_v27  ;;  %v516_v40 = vadd.f32 %v723_v32, %v311_v29  ;;  %v720_v41 = vadd.f32 %v719_v36, %v718_v33  ;;  %v726_v42 = vadd.f32 %v725_v38, %v724_v34 }
 0x121   : > { %518 = vst [vmem:[#allocation2] sm:$0xff] %v514_v39  ;;  %520 = vst [vmem:[#allocation2 + $0x10] sm:$0xff] %v516_v40  ;;  %v515_v43 = vadd.f32 %v720_v41, %v310_v35  ;;  %v517_v44 = vadd.f32 %v726_v42, %v312_v37 }
 0x123   : > { %519 = vst [vmem:[#allocation2 + $0x8] sm:$0xff] %v515_v43  ;;  %521 = vst [vmem:[#allocation2 + $0x18] sm:$0xff] %v517_v44 }
 0x128   : > { %v526_v45 = vld [vmem:[#allocation2] sm:$0xff]  ;;  %v528_v50 = vld [vmem:[#allocation2 + $0x10] sm:$0xff] }
 0x129   : > { %v537_v48 = vadd.f32 %v693_v46, %v526_v45  ;;  %v539_v52 = vadd.f32 %v693_v46, %v528_v50 }
 0x12a   : > { %v527_v47 = vld [vmem:[#allocation2 + $0x8] sm:$0xff]  ;;  %v529_v51 = vld [vmem:[#allocation2 + $0x18] sm:$0xff] }
 0x12b   : > { %v538_v49 = vadd.f32 %v693_v46, %v527_v47  ;;  %v540_v53 = vadd.f32 %v693_v46, %v529_v51  ;;  %v541_v54 = vmax.f32 %v537_v48, 0.0  ;;  %v543_v56 = vmax.f32 %v539_v52, 0.0 }
 0x12d   : > { %v542_v55 = vmax.f32 %v538_v49, 0.0  ;;  %v544_v57 = vmax.f32 %v540_v53, 0.0  ;;  %545 = vst [vmem:[%s976_s3] sm:$0xff] %v541_v54  ;;  %547 = vst [vmem:[%s976_s3 + $0x10] sm:$0xff] %v543_v56 }
 0x12f   : > { %546 = vst [vmem:[%s976_s3 + $0x8] sm:$0xff] %v542_v55  ;;  %548 = vst [vmem:[%s976_s3 + $0x18] sm:$0xff] %v544_v57 }
 0x130 PF: > { %s13_s16 = sadd.s32 1, %s844_s16   ;;  %s977_s12 = smov %s832_s13 }
 0x131   : > { %p10_p12 = scmp.ge.s32.totalorder %s13_s16, 5   ;;  %s978_s13 = smov %s902_s20 }
 0x132   : > { %s979_s14 = smov %s840_s15  ;;  %s980_s15 = smov %s982_s17 }
 0x133   :  { %12 = sbr.rel (!%p10_p12) target bundleno = 3 (0x3), region = 119 }

// kernel: st_classifier_forward.27
= control target key start
LH: loop header
LB: loop body
LE: loop exit
PB: predicated region body
PF: predicated region fallthrough
CT: control target
= control target key end

     0   :  { %s306_s1 = inlined_call_operand.vmem [shape: bf16[128,128], index: 1, kind: input, shape index: {}]   ;;  %s307_s0 = inlined_call_operand.vmem [shape: bf16[32,128], index: 0, kind: input, shape index: {}]   ;;  %s308_s2 = inlined_call_operand.vmem [shape: f32[1,128], index: 2, kind: input, shape index: {}]   ;;  %s309_s3 = inlined_call_operand.vmem [shape: f32[32,128], index: 3, kind: output, shape index: {}]  }
   0x1   :  { %v231_v0 = vld [vmem:[%s306_s1] sm:$0xff]   ;;  %v232_v1 = vld [vmem:[%s306_s1 + $0x8] sm:$0xff]   ;;  %v233_v2 = vld [vmem:[%s306_s1 + $0x10] sm:$0xff]  }
   0x2   :  { %211 = vmatprep.subr.bf16.mxu0 %v231_v0  ;;  %v234_v3 = vld [vmem:[%s306_s1 + $0x18] sm:$0xff]   ;;  %v239_v4 = vld [vmem:[%s307_s0] sm:$0xff]   ;;  %v236_v6 = vld [vmem:[%s306_s1 + $0x28] sm:$0xff]  }
   0x3   :  { %212 = vmatpush3.bf16.msra.mxu0 %v231_v0  ;;  %227 = vmatprep.mubr.bf16.mxu0 %v239_v4  ;;  %v235_v5 = vld [vmem:[%s306_s1 + $0x20] sm:$0xff]   ;;  %v237_v7 = vld [vmem:[%s306_s1 + $0x30] sm:$0xff]   ;;  %v238_v8 = vld [vmem:[%s306_s1 + $0x38] sm:$0xff]  }
   0x4   :  { %213 = vmatprep.subr.bf16.mxu0 %v232_v1  ;;  %v240_v9 = vld [vmem:[%s307_s0 + $0x8] sm:$0xff]   ;;  %v200_v10 = vld [vmem:[%s308_s2] ss:$0 sm:$0xff] }
   0x7   :  { %214 = vmatpush3.bf16.msra.mxu0 %v232_v1 }
   0x8   :  { %215 = vmatprep.subr.bf16.mxu0 %v233_v2 }
   0xb   :  { %216 = vmatpush3.bf16.msra.mxu0 %v233_v2 }
   0xc   :  { %217 = vmatprep.subr.bf16.mxu0 %v234_v3 }
   0xf   :  { %218 = vmatpush3.bf16.msra.mxu0 %v234_v3 }
  0x10   :  { %219 = vmatprep.subr.bf16.mxu0 %v235_v5 }
  0x13   :  { %220 = vmatpush3.bf16.msra.mxu0 %v235_v5 }
  0x14   :  { %221 = vmatprep.subr.bf16.mxu0 %v236_v6 }
  0x17   :  { %222 = vmatpush3.bf16.msra.mxu0 %v236_v6 }
  0x18   :  { %223 = vmatprep.subr.bf16.mxu0 %v237_v7 }
  0x1b   :  { %224 = vmatpush3.bf16.msra.mxu0 %v237_v7 }
  0x1c   :  { %225 = vmatprep.subr.bf16.mxu0 %v238_v8 }
  0x1f   :  { %226 = vmatpush3.bf16.msra.mxu0 %v238_v8 }
  0x22   :  { %228 = vmatmul.mubr.bf16.vlgmr.msra.gmra.mrb[0].mxu0 %v240_v9 }
  0xf5   :  { %v229_v11 = vpop.f32.mrb[0].mxu0 }
  0xf6   :  { %v180_v12 = vadd.f32 %v229_v11, %v200_v10  ;;  %v141_v13 = vpop.f32.mrb[1].mxu0 }
  0xf7   :  { %v178_v14 = vadd.f32 %v200_v10, %v141_v13  ;;  %v230_v15 = vpop.f32.mrb[2].mxu0 }
  0xf8   :  { %184 = vst [vmem:[%s309_s3 + $0x10] sm:$0xff] %v180_v12  ;;  %v181_v16 = vadd.f32 %v230_v15, %v200_v10  ;;  %v144_v17 = vpop.f32.mrb[3].mxu0 }
  0xf9   :  { %182 = vst [vmem:[%s309_s3] sm:$0xff] %v178_v14  ;;  %v179_v18 = vadd.f32 %v200_v10, %v144_v17 }
  0xfa   :  { %185 = vst [vmem:[%s309_s3 + $0x18] sm:$0xff] %v181_v16 }
  0xfb   :  { %183 = vst [vmem:[%s309_s3 + $0x8] sm:$0xff] %v179_v18 }

// kernel: st_classifier_forward.29
= control target key start
LH: loop header
LB: loop body
LE: loop exit
PB: predicated region body
PF: predicated region fallthrough
CT: control target
= control target key end

     0   :  { %s867_s12 = smov 0   ;;  %s869_s13 = smov 0   ;;  %s973_s0 = inlined_call_operand.vmem [shape: bf16[32,1280], index: 0, kind: input, shape index: {}]   ;;  %s974_s1 = inlined_call_operand.vmem [shape: bf16[1280,128], index: 1, kind: input, shape index: {}]   ;;  %s975_s2 = inlined_call_operand.vmem [shape: f32[1,128], index: 2, kind: input, shape index: {}]   ;;  %s976_s3 = inlined_call_operand.vmem [shape: f32[32,128], index: 3, kind: output, shape index: {}]  }
   0x1   :  { %s871_s14 = smov 0   ;;  %s873_s15 = smov 0  }
   0x2   :  { %s875_s16 = smov 0  }
   0x3 LB: > { %s25_s17 = sadd.s32 1, %s840_s15  ;;  %p48_p1 = scmp.ne.s32.totalorder %s832_s13, %s828_s12  ;;  %s844_s16 = sphi %s875_s16, %s13_s16   ;;  %s840_s15 = sphi %s873_s15, %s980_s15   ;;  %s836_s14 = sphi %s871_s14, %s979_s14   ;;  %s832_s13 = sphi %s869_s13, %s978_s13   ;;  %s828_s12 = sphi %s867_s12, %s977_s12  }
   0x4   : > { %p26_p0 = scmp.ge.s32.totalorder %s25_s17, 5  ;;  %p49_p2 = scmp.eq.s32.totalorder %s844_s16, 0 }
   0x5   : > { %s41_s19 = sadd.s32 1, %s832_s13  ;;  %p663_p5 = scmp.ge.s32.totalorder %s844_s16, 5 }
   0x6   : > { %s982_s17 = smov (%p26_p0, %s25_s17), 0  ;;  %p50_p3 = por %p49_p2, %p48_p1 }
   0x7   : > { %s37_s18 = ssub.s32 %s840_s15, %s982_s17  ;;  %162 = sbr.rel (%p663_p5) target bundleno = 21 (0x15), region = 20 }
   0x8   : > { %p39_p4 = scmp.eq.s32.totalorder %s37_s18, 0 }
   0xa   : > { %s902_s20 = scalar_select %p39_p4, %s832_s13, %s41_s19  }
   0xe   : > { %165 = sbr.rel (!%p50_p3) target bundleno = 21 (0x15), region = 24  ;;  %s167_s21 = sand.u32 (%p50_p3), 1, %s832_s13  }
   0xf   : > { %s698_s22 = sshll.u32 (%p50_p3), %s840_s15, 3  ;;  %s664_s23 = sshll.u32 (%p50_p3), %s167_s21, 5 }
  0x10   : > { %s175_s26 = scalar_lea.vmem (%p50_p3), %s973_s0, %s698_s22  ;;  %s169_s27 = scalar_lea.vmem (%p50_p3), [#allocation3], %s664_s23 }
  0x11   : > { %v209_v0 = vld [vmem:[%s175_s26] sm:$0xff] (%p50_p3)  ;;  %v211_v1 = vld [vmem:[%s175_s26 + $0x28] sm:$0xff] (%p50_p3)  ;;  %v213_v2 = vld [vmem:[%s175_s26 + $0x50] sm:$0xff] (%p50_p3) }
  0x12   : > { %210 = vst [vmem:[%s169_s27] sm:$0xff] (%p50_p3), %v209_v0  ;;  %212 = vst [vmem:[%s169_s27 + $0x8] sm:$0xff] (%p50_p3), %v211_v1  ;;  %v215_v3 = vld [vmem:[%s175_s26 + $0x78] sm:$0xff] (%p50_p3) }
  0x13   : > { %214 = vst [vmem:[%s169_s27 + $0x10] sm:$0xff] (%p50_p3), %v213_v2  ;;  %216 = vst [vmem:[%s169_s27 + $0x18] sm:$0xff] (%p50_p3), %v215_v3 }
  0x15 PF: > { %p667_p6 = scmp.ge.s32.totalorder %s844_s16, 1  ;;  %p233_p7 = scmp.lt.s32.totalorder %s844_s16, 6 }
  0x17   : > { %p234_p8 = pnand %p667_p6, %p233_p7 }
  0x18   : > { %s240_s28 = sand.u32 (!%p234_p8), 1, %s828_s12   ;;  %s669_s29 = sshll.u32 (!%p234_p8), %s836_s14, 5 }
  0x19   : > { %237 = sbr.rel (%p234_p8) target bundleno = 304 (0x130), region = 66  ;;  %s668_s30 = sshll.u32 (!%p234_p8), %s240_s28, 5 }
  0x1a   : > { %p280_p9 = scmp.lt.s32.totalorder (!%p234_p8), %s669_s29, 159  ;;  %s919_s8 = scalar_lea.vmem (!%p234_p8), [#allocation3], %s668_s30 }
  0x1b   : > { %p671_p10 = scmp.ne.s32.totalorder (!%p234_p8), %s836_s14, 0 }
  0x20   : > { %s984_s29 = smov (!%p280_p9, %s669_s29), 159  ;;  %304 = sbr.rel (%p671_p10) target bundleno = 39 (0x27), region = 74 }
  0x21   : > { %s670_s4 = sshll.u32 %s984_s29, 2  ;;  %v846_v4 = vmov (!%p671_p10), 0.0  }
  0x22   : > { %s917_s7 = scalar_lea.vmem %s974_s1, %s670_s4  ;;  %305 = vst [vmem:[#allocation2] sm:$0xff] (!%p671_p10), %v846_v4  ;;  %306 = vst [vmem:[#allocation2 + $0x8] sm:$0xff] (!%p671_p10), %v846_v4 }
  0x23   : > { %307 = vst [vmem:[#allocation2 + $0x10] sm:$0xff] (!%p671_p10), %v846_v4  ;;  %308 = vst [vmem:[#allocation2 + $0x18] sm:$0xff] (!%p671_p10), %v846_v4 }
  0x27 PF: > { %v784_v5 = vld [vmem:[%s917_s7 + $0x40] sm:$0xff]   ;;  %v786_v7 = vld [vmem:[%s917_s7 + $0x48] sm:$0xff]   ;;  %v788_v9 = vld [vmem:[%s917_s7 + $0x50] sm:$0xff]   ;;  %p692_p11 = scmp.ne.s32.totalorder %s836_s14, 4 }
  0x28   : > { %v785_v6 = vld [vmem:[%s917_s7] sm:$0xff]   ;;  %699 = vmatprep.subr.bf16.mxu0 %v784_v5  ;;  %727 = vmatprep.subr.bf16.mxu1 %v784_v5  ;;  %v787_v8 = vld [vmem:[%s917_s7 + $0x8] sm:$0xff]   ;;  %v789_v10 = vld [vmem:[%s917_s7 + $0x10] sm:$0xff]  }
  0x29   : > { %700 = vmatpush3.bf16.msra.mxu0 %v785_v6  ;;  %735 = vmatpush3.bf16.msra.mxu1 %v785_v6  ;;  %v790_v11 = vld [vmem:[%s917_s7 + $0x58] sm:$0xff]   ;;  %v792_v13 = vld [vmem:[%s917_s7 + $0x60] sm:$0xff]   ;;  %v794_v15 = vld [vmem:[%s917_s7 + $0x68] sm:$0xff]  }
  0x2a   : > { %701 = vmatprep.subr.bf16.mxu0 %v786_v7  ;;  %728 = vmatprep.subr.bf16.mxu1 %v786_v7  ;;  %v791_v12 = vld [vmem:[%s917_s7 + $0x18] sm:$0xff]   ;;  %v793_v14 = vld [vmem:[%s917_s7 + $0x20] sm:$0xff]   ;;  %v795_v18 = vld [vmem:[%s917_s7 + $0x28] sm:$0xff]  }
  0x2b   : > { %v802_v16 = vld [vmem:[%s919_s8 + $0x4] ss:$8 sps:$4 sm:$0xff]   ;;  %v805_v17 = vld [vmem:[%s919_s8 + $0x14] ss:$8 sps:$4 sm:$0xff]   ;;  %v800_v23 = vld [vmem:[%s919_s8] ss:$8 sps:$4 sm:$0xff]  }
  0x2c   : > { %v796_v19 = vld [vmem:[%s917_s7 + $0x70] sm:$0xff]   ;;  %497 = vmatprep.mubr.bf16.mxu0 %v802_v16  ;;  %505 = vmatprep.mubr.bf16.mxu1 %v805_v17  ;;  %v798_v21 = vld [vmem:[%s917_s7 + $0x78] sm:$0xff]   ;;  %v309_v27 = vld [vmem:[#allocation2] sm:$0xff] }
  0x2d   : > { %702 = vmatpush3.bf16.msra.mxu0 %v787_v8  ;;  %736 = vmatpush3.bf16.msra.mxu1 %v787_v8  ;;  %v797_v20 = vld [vmem:[%s917_s7 + $0x30] sm:$0xff]   ;;  %v799_v22 = vld [vmem:[%s917_s7 + $0x38] sm:$0xff]   ;;  %v310_v35 = vld [vmem:[#allocation2 + $0x8] sm:$0xff] }
  0x2e   : > { %703 = vmatprep.subr.bf16.mxu0 %v788_v9  ;;  %729 = vmatprep.subr.bf16.mxu1 %v788_v9  ;;  %v803_v24 = vld [vmem:[%s919_s8 + $0x10] ss:$8 sps:$4 sm:$0xff]   ;;  %v693_v46 = vld [vmem:[%s975_s2] ss:$0 sm:$0xff] (!%p692_p11) }
  0x2f   : > { %v311_v29 = vld [vmem:[#allocation2 + $0x10] sm:$0xff]  ;;  %v312_v37 = vld [vmem:[#allocation2 + $0x18] sm:$0xff] }
  0x31   : > { %704 = vmatpush3.bf16.msra.mxu0 %v789_v10  ;;  %737 = vmatpush3.bf16.msra.mxu1 %v789_v10 }
  0x32   : > { %705 = vmatprep.subr.bf16.mxu0 %v790_v11  ;;  %730 = vmatprep.subr.bf16.mxu1 %v790_v11 }
  0x35   : > { %706 = vmatpush3.bf16.msra.mxu0 %v791_v12  ;;  %738 = vmatpush3.bf16.msra.mxu1 %v791_v12 }
  0x36   : > { %707 = vmatprep.subr.bf16.mxu0 %v792_v13  ;;  %731 = vmatprep.subr.bf16.mxu1 %v792_v13 }
  0x39   : > { %708 = vmatpush3.bf16.msra.mxu0 %v793_v14  ;;  %739 = vmatpush3.bf16.msra.mxu1 %v793_v14 }
  0x3a   : > { %709 = vmatprep.subr.bf16.mxu0 %v794_v15  ;;  %732 = vmatprep.subr.bf16.mxu1 %v794_v15 }
  0x3d   : > { %710 = vmatpush3.bf16.msra.mxu0 %v795_v18  ;;  %740 = vmatpush3.bf16.msra.mxu1 %v795_v18 }
  0x3e   : > { %711 = vmatprep.subr.bf16.mxu0 %v796_v19  ;;  %733 = vmatprep.subr.bf16.mxu1 %v796_v19 }
  0x41   : > { %712 = vmatpush3.bf16.msra.mxu0 %v797_v20  ;;  %741 = vmatpush3.bf16.msra.mxu1 %v797_v20 }
  0x42   : > { %713 = vmatprep.subr.bf16.mxu0 %v798_v21  ;;  %734 = vmatprep.subr.bf16.mxu1 %v798_v21 }
  0x45   : > { %714 = vmatpush3.bf16.msra.mxu0 %v799_v22  ;;  %742 = vmatpush3.bf16.msra.mxu1 %v799_v22 }
  0x48   : > { %498 = vmatmul.mubr.bf16.vlgmr.msra.gmra.mrb[0].mxu0 %v800_v23  ;;  %506 = vmatmul.mubr.bf16.vlgmr.msra.gmra.mrb[0].mxu1 %v803_v24 }
 0x11b   : > { %v715_v25 = vpop.f32.mrb[0].mxu0  ;;  %v721_v26 = vpop.f32.mrb[0].mxu1 }
 0x11c   : > { %v716_v28 = vpop.f32.mrb[1].mxu0  ;;  %v722_v30 = vpop.f32.mrb[1].mxu1 }
 0x11d   : > { %v717_v31 = vadd.f32 %v716_v28, %v715_v25  ;;  %v723_v32 = vadd.f32 %v722_v30, %v721_v26  ;;  %v718_v33 = vpop.f32.mrb[2].mxu0  ;;  %v724_v34 = vpop.f32.mrb[2].mxu1  ;;  %525 = sbr.rel (%p692_p11) target bundleno = 304 (0x130), region = 78 }
 0x11e   : > { %v719_v36 = vpop.f32.mrb[3].mxu0  ;;  %v725_v38 = vpop.f32.mrb[3].mxu1 }
 0x11f   : > { %v514_v39 = vadd.f32 %v717_v31, %v309_v27  ;;  %v516_v40 = vadd.f32 %v723_v32, %v311_v29  ;;  %v720_v41 = vadd.f32 %v719_v36, %v718_v33  ;;  %v726_v42 = vadd.f32 %v725_v38, %v724_v34 }
 0x121   : > { %518 = vst [vmem:[#allocation2] sm:$0xff] %v514_v39  ;;  %520 = vst [vmem:[#allocation2 + $0x10] sm:$0xff] %v516_v40  ;;  %v515_v43 = vadd.f32 %v720_v41, %v310_v35  ;;  %v517_v44 = vadd.f32 %v726_v42, %v312_v37 }
 0x123   : > { %519 = vst [vmem:[#allocation2 + $0x8] sm:$0xff] %v515_v43  ;;  %521 = vst [vmem:[#allocation2 + $0x18] sm:$0xff] %v517_v44 }
 0x128   : > { %v526_v45 = vld [vmem:[#allocation2] sm:$0xff]  ;;  %v528_v50 = vld [vmem:[#allocation2 + $0x10] sm:$0xff] }
 0x129   : > { %v537_v48 = vadd.f32 %v693_v46, %v526_v45  ;;  %v539_v52 = vadd.f32 %v693_v46, %v528_v50 }
 0x12a   : > { %v527_v47 = vld [vmem:[#allocation2 + $0x8] sm:$0xff]  ;;  %v529_v51 = vld [vmem:[#allocation2 + $0x18] sm:$0xff] }
 0x12b   : > { %v538_v49 = vadd.f32 %v693_v46, %v527_v47  ;;  %v540_v53 = vadd.f32 %v693_v46, %v529_v51  ;;  %v541_v54 = vmax.f32 %v537_v48, 0.0  ;;  %v543_v56 = vmax.f32 %v539_v52, 0.0 }
 0x12d   : > { %v542_v55 = vmax.f32 %v538_v49, 0.0  ;;  %v544_v57 = vmax.f32 %v540_v53, 0.0  ;;  %545 = vst [vmem:[%s976_s3] sm:$0xff] %v541_v54  ;;  %547 = vst [vmem:[%s976_s3 + $0x10] sm:$0xff] %v543_v56 }
 0x12f   : > { %546 = vst [vmem:[%s976_s3 + $0x8] sm:$0xff] %v542_v55  ;;  %548 = vst [vmem:[%s976_s3 + $0x18] sm:$0xff] %v544_v57 }
 0x130 PF: > { %s13_s16 = sadd.s32 1, %s844_s16   ;;  %s977_s12 = smov %s832_s13 }
 0x131   : > { %p10_p12 = scmp.ge.s32.totalorder %s13_s16, 7   ;;  %s978_s13 = smov %s902_s20 }
 0x132   : > { %s979_s14 = smov %s840_s15  ;;  %s980_s15 = smov %s982_s17 }
 0x133   :  { %12 = sbr.rel (!%p10_p12) target bundleno = 3 (0x3), region = 119 }

// kernel: st_classifier_forward.28
= control target key start
LH: loop header
LB: loop body
LE: loop exit
PB: predicated region body
PF: predicated region fallthrough
CT: control target
= control target key end

     0   :  { %s959_s15 = smov 0   ;;  %s961_s16 = smov 0   ;;  %s1077_s0 = inlined_call_operand.vmem [shape: bf16[32,1280], index: 0, kind: input, shape index: {}]   ;;  %s1078_s1 = inlined_call_operand.vmem [shape: bf16[1280,128], index: 1, kind: input, shape index: {}]   ;;  %s1079_s2 = inlined_call_operand.vmem [shape: f32[1,128], index: 2, kind: input, shape index: {}]   ;;  %s1080_s3 = inlined_call_operand.vmem [shape: f32[32,128], index: 3, kind: input, shape index: {}]   ;;  %s1081_s4 = inlined_call_operand.vmem [shape: f32[32,128], index: 4, kind: output, shape index: {}]  }
   0x1   :  { %s963_s17 = smov 0   ;;  %s965_s18 = smov 0  }
   0x2   :  { %s967_s19 = smov 0  }
   0x3 LB: > { %s26_s20 = sadd.s32 1, %s927_s18  ;;  %p49_p1 = scmp.ne.s32.totalorder %s919_s16, %s915_s15  ;;  %s931_s19 = sphi %s967_s19, %s14_s19   ;;  %s927_s18 = sphi %s965_s18, %s1085_s18   ;;  %s923_s17 = sphi %s963_s17, %s1084_s17   ;;  %s919_s16 = sphi %s961_s16, %s1083_s16   ;;  %s915_s15 = sphi %s959_s15, %s1082_s15  }
   0x4   : > { %p27_p0 = scmp.ge.s32.totalorder %s26_s20, 5  ;;  %p50_p2 = scmp.eq.s32.totalorder %s931_s19, 0 }
   0x5   : > { %s42_s22 = sadd.s32 1, %s919_s16  ;;  %p750_p5 = scmp.ge.s32.totalorder %s931_s19, 5 }
   0x6   : > { %s1087_s20 = smov (%p27_p0, %s26_s20), 0  ;;  %p51_p3 = por %p50_p2, %p49_p1 }
   0x7   : > { %s38_s21 = ssub.s32 %s927_s18, %s1087_s20  ;;  %203 = sbr.rel (%p750_p5) target bundleno = 21 (0x15), region = 24 }
   0x8   : > { %p40_p4 = scmp.eq.s32.totalorder %s38_s21, 0 }
   0xa   : > { %s994_s23 = scalar_select %p40_p4, %s919_s16, %s42_s22  }
   0xe   : > { %206 = sbr.rel (!%p51_p3) target bundleno = 21 (0x15), region = 28  ;;  %s208_s24 = sand.u32 (%p51_p3), 1, %s919_s16  }
   0xf   : > { %s785_s25 = sshll.u32 (%p51_p3), %s927_s18, 3  ;;  %s751_s26 = sshll.u32 (%p51_p3), %s208_s24, 5 }
  0x10   : > { %s216_s29 = scalar_lea.vmem (%p51_p3), %s1077_s0, %s785_s25  ;;  %s210_s30 = scalar_lea.vmem (%p51_p3), [#allocation3], %s751_s26 }
  0x11   : > { %v250_v0 = vld [vmem:[%s216_s29] sm:$0xff] (%p51_p3)  ;;  %v252_v1 = vld [vmem:[%s216_s29 + $0x28] sm:$0xff] (%p51_p3)  ;;  %v254_v2 = vld [vmem:[%s216_s29 + $0x50] sm:$0xff] (%p51_p3) }
  0x12   : > { %251 = vst [vmem:[%s210_s30] sm:$0xff] (%p51_p3), %v250_v0  ;;  %253 = vst [vmem:[%s210_s30 + $0x8] sm:$0xff] (%p51_p3), %v252_v1  ;;  %v256_v3 = vld [vmem:[%s216_s29 + $0x78] sm:$0xff] (%p51_p3) }
  0x13   : > { %255 = vst [vmem:[%s210_s30 + $0x10] sm:$0xff] (%p51_p3), %v254_v2  ;;  %257 = vst [vmem:[%s210_s30 + $0x18] sm:$0xff] (%p51_p3), %v256_v3 }
  0x15 PF: > { %p754_p6 = scmp.ge.s32.totalorder %s931_s19, 1  ;;  %p274_p7 = scmp.lt.s32.totalorder %s931_s19, 6 }
  0x17   : > { %p275_p8 = pnand %p754_p6, %p274_p7 }
  0x18   : > { %s281_s5 = sand.u32 (!%p275_p8), 1, %s915_s15   ;;  %s756_s6 = sshll.u32 (!%p275_p8), %s923_s17, 5 }
  0x19   : > { %278 = sbr.rel (%p275_p8) target bundleno = 306 (0x132), region = 70  ;;  %s755_s7 = sshll.u32 (!%p275_p8), %s281_s5, 5 }
  0x1a   : > { %p331_p9 = scmp.lt.s32.totalorder (!%p275_p8), %s756_s6, 159  ;;  %s1011_s12 = scalar_lea.vmem (!%p275_p8), [#allocation3], %s755_s7 }
  0x1b   : > { %p758_p10 = scmp.ne.s32.totalorder (!%p275_p8), %s923_s17, 0 }
  0x20   : > { %s1089_s6 = smov (!%p331_p9, %s756_s6), 159  ;;  %364 = sbr.rel (%p758_p10) target bundleno = 39 (0x27), region = 78 }
  0x21   : > { %s757_s8 = sshll.u32 %s1089_s6, 2  ;;  %v933_v4 = vmov (!%p758_p10), 0.0  }
  0x22   : > { %s1009_s11 = scalar_lea.vmem %s1078_s1, %s757_s8  ;;  %365 = vst [vmem:[#allocation2] sm:$0xff] (!%p758_p10), %v933_v4  ;;  %366 = vst [vmem:[#allocation2 + $0x8] sm:$0xff] (!%p758_p10), %v933_v4 }
  0x23   : > { %367 = vst [vmem:[#allocation2 + $0x10] sm:$0xff] (!%p758_p10), %v933_v4  ;;  %368 = vst [vmem:[#allocation2 + $0x18] sm:$0xff] (!%p758_p10), %v933_v4 }
  0x27 PF: > { %v871_v5 = vld [vmem:[%s1009_s11 + $0x40] sm:$0xff]   ;;  %v873_v7 = vld [vmem:[%s1009_s11 + $0x48] sm:$0xff]   ;;  %v875_v9 = vld [vmem:[%s1009_s11 + $0x50] sm:$0xff]   ;;  %p779_p11 = scmp.ne.s32.totalorder %s923_s17, 4 }
  0x28   : > { %v872_v6 = vld [vmem:[%s1009_s11] sm:$0xff]   ;;  %786 = vmatprep.subr.bf16.mxu0 %v871_v5  ;;  %814 = vmatprep.subr.bf16.mxu1 %v871_v5  ;;  %v874_v8 = vld [vmem:[%s1009_s11 + $0x8] sm:$0xff]   ;;  %v876_v10 = vld [vmem:[%s1009_s11 + $0x10] sm:$0xff]  }
  0x29   : > { %787 = vmatpush3.bf16.msra.mxu0 %v872_v6  ;;  %822 = vmatpush3.bf16.msra.mxu1 %v872_v6  ;;  %v877_v11 = vld [vmem:[%s1009_s11 + $0x58] sm:$0xff]   ;;  %v879_v13 = vld [vmem:[%s1009_s11 + $0x60] sm:$0xff]   ;;  %v881_v15 = vld [vmem:[%s1009_s11 + $0x68] sm:$0xff]  }
  0x2a   : > { %788 = vmatprep.subr.bf16.mxu0 %v873_v7  ;;  %815 = vmatprep.subr.bf16.mxu1 %v873_v7  ;;  %v878_v12 = vld [vmem:[%s1009_s11 + $0x18] sm:$0xff]   ;;  %v880_v14 = vld [vmem:[%s1009_s11 + $0x20] sm:$0xff]   ;;  %v882_v18 = vld [vmem:[%s1009_s11 + $0x28] sm:$0xff]  }
  0x2b   : > { %v889_v16 = vld [vmem:[%s1011_s12 + $0x4] ss:$8 sps:$4 sm:$0xff]   ;;  %v892_v17 = vld [vmem:[%s1011_s12 + $0x14] ss:$8 sps:$4 sm:$0xff]   ;;  %v887_v23 = vld [vmem:[%s1011_s12] ss:$8 sps:$4 sm:$0xff]  }
  0x2c   : > { %v883_v19 = vld [vmem:[%s1009_s11 + $0x70] sm:$0xff]   ;;  %557 = vmatprep.mubr.bf16.mxu0 %v889_v16  ;;  %565 = vmatprep.mubr.bf16.mxu1 %v892_v17  ;;  %v885_v21 = vld [vmem:[%s1009_s11 + $0x78] sm:$0xff]   ;;  %v369_v27 = vld [vmem:[#allocation2] sm:$0xff] }
  0x2d   : > { %789 = vmatpush3.bf16.msra.mxu0 %v874_v8  ;;  %823 = vmatpush3.bf16.msra.mxu1 %v874_v8  ;;  %v884_v20 = vld [vmem:[%s1009_s11 + $0x30] sm:$0xff]   ;;  %v886_v22 = vld [vmem:[%s1009_s11 + $0x38] sm:$0xff]   ;;  %v370_v35 = vld [vmem:[#allocation2 + $0x8] sm:$0xff] }
  0x2e   : > { %790 = vmatprep.subr.bf16.mxu0 %v875_v9  ;;  %816 = vmatprep.subr.bf16.mxu1 %v875_v9  ;;  %v890_v24 = vld [vmem:[%s1011_s12 + $0x10] ss:$8 sps:$4 sm:$0xff]   ;;  %v780_v46 = vld [vmem:[%s1079_s2] ss:$0 sm:$0xff] (!%p779_p11)  ;;  %v602_v50 = vld [vmem:[%s1080_s3 + $0x8] sm:$0xff] (!%p779_p11) }
  0x2f   : > { %v371_v29 = vld [vmem:[#allocation2 + $0x10] sm:$0xff]  ;;  %v372_v37 = vld [vmem:[#allocation2 + $0x18] sm:$0xff]  ;;  %v601_v47 = vld [vmem:[%s1080_s3] sm:$0xff] (!%p779_p11) }
  0x30   : > { %v603_v54 = vld [vmem:[%s1080_s3 + $0x10] sm:$0xff] (!%p779_p11)  ;;  %v604_v56 = vld [vmem:[%s1080_s3 + $0x18] sm:$0xff] (!%p779_p11) }
  0x31   : > { %791 = vmatpush3.bf16.msra.mxu0 %v876_v10  ;;  %824 = vmatpush3.bf16.msra.mxu1 %v876_v10 }
  0x32   : > { %792 = vmatprep.subr.bf16.mxu0 %v877_v11  ;;  %817 = vmatprep.subr.bf16.mxu1 %v877_v11 }
  0x35   : > { %793 = vmatpush3.bf16.msra.mxu0 %v878_v12  ;;  %825 = vmatpush3.bf16.msra.mxu1 %v878_v12 }
  0x36   : > { %794 = vmatprep.subr.bf16.mxu0 %v879_v13  ;;  %818 = vmatprep.subr.bf16.mxu1 %v879_v13 }
  0x39   : > { %795 = vmatpush3.bf16.msra.mxu0 %v880_v14  ;;  %826 = vmatpush3.bf16.msra.mxu1 %v880_v14 }
  0x3a   : > { %796 = vmatprep.subr.bf16.mxu0 %v881_v15  ;;  %819 = vmatprep.subr.bf16.mxu1 %v881_v15 }
  0x3d   : > { %797 = vmatpush3.bf16.msra.mxu0 %v882_v18  ;;  %827 = vmatpush3.bf16.msra.mxu1 %v882_v18 }
  0x3e   : > { %798 = vmatprep.subr.bf16.mxu0 %v883_v19  ;;  %820 = vmatprep.subr.bf16.mxu1 %v883_v19 }
  0x41   : > { %799 = vmatpush3.bf16.msra.mxu0 %v884_v20  ;;  %828 = vmatpush3.bf16.msra.mxu1 %v884_v20 }
  0x42   : > { %800 = vmatprep.subr.bf16.mxu0 %v885_v21  ;;  %821 = vmatprep.subr.bf16.mxu1 %v885_v21 }
  0x45   : > { %801 = vmatpush3.bf16.msra.mxu0 %v886_v22  ;;  %829 = vmatpush3.bf16.msra.mxu1 %v886_v22 }
  0x48   : > { %558 = vmatmul.mubr.bf16.vlgmr.msra.gmra.mrb[0].mxu0 %v887_v23  ;;  %566 = vmatmul.mubr.bf16.vlgmr.msra.gmra.mrb[0].mxu1 %v890_v24 }
 0x11b   : > { %v802_v25 = vpop.f32.mrb[0].mxu0  ;;  %v808_v26 = vpop.f32.mrb[0].mxu1 }
 0x11c   : > { %v803_v28 = vpop.f32.mrb[1].mxu0  ;;  %v809_v30 = vpop.f32.mrb[1].mxu1 }
 0x11d   : > { %v804_v31 = vadd.f32 %v803_v28, %v802_v25  ;;  %v810_v32 = vadd.f32 %v809_v30, %v808_v26  ;;  %v805_v33 = vpop.f32.mrb[2].mxu0  ;;  %v811_v34 = vpop.f32.mrb[2].mxu1  ;;  %585 = sbr.rel (%p779_p11) target bundleno = 306 (0x132), region = 82 }
 0x11e   : > { %v806_v36 = vpop.f32.mrb[3].mxu0  ;;  %v812_v38 = vpop.f32.mrb[3].mxu1 }
 0x11f   : > { %v574_v39 = vadd.f32 %v804_v31, %v369_v27  ;;  %v576_v40 = vadd.f32 %v810_v32, %v371_v29  ;;  %v807_v41 = vadd.f32 %v806_v36, %v805_v33  ;;  %v813_v42 = vadd.f32 %v812_v38, %v811_v34 }
 0x121   : > { %578 = vst [vmem:[#allocation2] sm:$0xff] %v574_v39  ;;  %580 = vst [vmem:[#allocation2 + $0x10] sm:$0xff] %v576_v40  ;;  %v575_v43 = vadd.f32 %v807_v41, %v370_v35  ;;  %v577_v44 = vadd.f32 %v813_v42, %v372_v37 }
 0x123   : > { %579 = vst [vmem:[#allocation2 + $0x8] sm:$0xff] %v575_v43  ;;  %581 = vst [vmem:[#allocation2 + $0x18] sm:$0xff] %v577_v44 }
 0x128   : > { %v586_v45 = vld [vmem:[#allocation2] sm:$0xff]  ;;  %v588_v51 = vld [vmem:[#allocation2 + $0x10] sm:$0xff] }
 0x129   : > { %v597_v48 = vadd.f32 %v780_v46, %v586_v45  ;;  %v599_v53 = vadd.f32 %v780_v46, %v588_v51 }
 0x12a   : > { %v587_v49 = vld [vmem:[#allocation2 + $0x8] sm:$0xff]  ;;  %v589_v55 = vld [vmem:[#allocation2 + $0x18] sm:$0xff] }
 0x12b   : > { %v598_v52 = vadd.f32 %v780_v46, %v587_v49  ;;  %v605_v57 = vadd.f32 %v601_v47, %v597_v48  ;;  %v600_v58 = vadd.f32 %v780_v46, %v589_v55  ;;  %v607_v60 = vadd.f32 %v603_v54, %v599_v53 }
 0x12d   : > { %v606_v59 = vadd.f32 %v602_v50, %v598_v52  ;;  %v609_v61 = vmax.f32 %v605_v57, 0.0  ;;  %v608_v62 = vadd.f32 %v604_v56, %v600_v58  ;;  %v611_v0 = vmax.f32 %v607_v60, 0.0 }
 0x12f   : > { %v610_v63 = vmax.f32 %v606_v59, 0.0  ;;  %613 = vst [vmem:[%s1081_s4] sm:$0xff] %v609_v61  ;;  %v612_v1 = vmax.f32 %v608_v62, 0.0  ;;  %615 = vst [vmem:[%s1081_s4 + $0x10] sm:$0xff] %v611_v0 }
 0x131   : > { %614 = vst [vmem:[%s1081_s4 + $0x8] sm:$0xff] %v610_v63  ;;  %616 = vst [vmem:[%s1081_s4 + $0x18] sm:$0xff] %v612_v1 }
 0x132 PF: > { %s14_s19 = sadd.s32 1, %s931_s19   ;;  %s1082_s15 = smov %s919_s16 }
 0x133   : > { %p11_p12 = scmp.ge.s32.totalorder %s14_s19, 7   ;;  %s1083_s16 = smov %s994_s23 }
 0x134   : > { %s1084_s17 = smov %s927_s18  ;;  %s1085_s18 = smov %s1087_s20 }
 0x135   :  { %13 = sbr.rel (!%p11_p12) target bundleno = 3 (0x3), region = 126 }

// kernel: st_classifier_forward.31
= control target key start
LH: loop header
LB: loop body
LE: loop exit
PB: predicated region body
PF: predicated region fallthrough
CT: control target
= control target key end

     0   :  { %s842_s12 = smov 0   ;;  %s844_s13 = smov 0   ;;  %s927_s0 = inlined_call_operand.vmem [shape: bf16[8,1280], index: 0, kind: input, shape index: {}]   ;;  %s928_s1 = inlined_call_operand.vmem [shape: bf16[1280,256], index: 1, kind: input, shape index: {}]   ;;  %s929_s2 = inlined_call_operand.vmem [shape: f32[1,256], index: 2, kind: input, shape index: {}]   ;;  %s930_s3 = inlined_call_operand.vmem [shape: f32[8,256], index: 3, kind: output, shape index: {}]  }
   0x1   :  { %s846_s14 = smov 0  }
   0x2 LB: > { %s25_s15 = sadd.s32 1, %s815_s13  ;;  %p675_p0 = scmp.ge.s32.totalorder %s819_s14, 1  ;;  %s819_s14 = sphi %s846_s14, %s13_s14   ;;  %s815_s13 = sphi %s844_s13, %s932_s13   ;;  %s811_s12 = sphi %s842_s12, %s931_s12  }
   0x3   : > { %p26_p1 = scmp.ge.s32.totalorder %s25_s15, 5  ;;  %p194_p2 = scmp.lt.s32.totalorder %s819_s14, 6 }
   0x5   : > { %s934_s15 = smov (%p26_p1, %s25_s15), 0  ;;  %p195_p3 = pnand %p675_p0, %p194_p2 }
   0x6   : > { %s676_s16 = sshll.u32 (!%p195_p3), %s811_s12, 1  ;;  %s678_s17 = sshll.u32 (!%p195_p3), %s811_s12, 5 }
   0x7   : > { %198 = sbr.rel (%p195_p3) target bundleno = 317 (0x13d), region = 32  ;;  %p243_p4 = scmp.lt.s32.totalorder (!%p195_p3), %s676_s16, 9 }
   0x8   : > { %p252_p5 = scmp.lt.s32.totalorder (!%p195_p3), %s678_s17, 159  ;;  %p681_p6 = scmp.ne.s32.totalorder (!%p195_p3), %s811_s12, 0 }
   0xe   : > { %s936_s16 = smov (!%p243_p4, %s676_s16), 9  ;;  %s938_s17 = smov (!%p252_p5, %s678_s17), 159 }
   0xf   : > { %s677_s18 = sshll.u32 %s936_s16, 2  ;;  %s721_s22 = sshll.u32 %s938_s17, 3  ;;  %v821_v0 = vmov (!%p681_p6), 0.0  }
  0x10   : > { %s867_s21 = scalar_lea.vmem %s927_s0, %s677_s18  ;;  %s872_s25 = scalar_lea.vmem %s928_s1, %s721_s22  ;;  %281 = vst [vmem:[#allocation2] sm:$0xff] (!%p681_p6), %v821_v0  ;;  %282 = vst [vmem:[#allocation2 + $0x8] sm:$0xff] (!%p681_p6), %v821_v0 }
  0x11   : > { %280 = sbr.rel (%p681_p6) target bundleno = 24 (0x18), region = 36 }
  0x18 PF: > { %v747_v1 = vld [vmem:[%s872_s25 + $0x4] ss:$8 sps:$4 sm:$0xff]   ;;  %v749_v2 = vld [vmem:[%s872_s25] ss:$8 sps:$4 sm:$0xff]   ;;  %v750_v3 = vld [vmem:[%s872_s25 + $0x14] ss:$8 sps:$4 sm:$0xff]  }
  0x19   : > { %485 = vmatprep.subr.bf16.mxu0 %v747_v1  ;;  %v752_v4 = vld [vmem:[%s872_s25 + $0x10] ss:$8 sps:$4 sm:$0xff]   ;;  %v753_v5 = vld [vmem:[%s872_s25 + $0x24] ss:$8 sps:$4 sm:$0xff]   ;;  %v755_v6 = vld [vmem:[%s872_s25 + $0x20] ss:$8 sps:$4 sm:$0xff]  }
  0x1a   : > { %486 = vmatpush1.bf16.msra.mxu0 %v749_v2  ;;  %v756_v7 = vld [vmem:[%s872_s25 + $0x34] ss:$8 sps:$4 sm:$0xff]   ;;  %v758_v8 = vld [vmem:[%s872_s25 + $0x30] ss:$8 sps:$4 sm:$0xff]   ;;  %v759_v9 = vld [vmem:[%s872_s25 + $0x44] ss:$8 sps:$4 sm:$0xff]  }
  0x1b   : > { %487 = vmatprep.subr.bf16.mxu0 %v750_v3  ;;  %v761_v10 = vld [vmem:[%s872_s25 + $0x40] ss:$8 sps:$4 sm:$0xff]   ;;  %v762_v11 = vld [vmem:[%s872_s25 + $0x54] ss:$8 sps:$4 sm:$0xff]   ;;  %v764_v12 = vld [vmem:[%s872_s25 + $0x50] ss:$8 sps:$4 sm:$0xff]  }
  0x1c   : > { %v765_v13 = vld [vmem:[%s872_s25 + $0x64] ss:$8 sps:$4 sm:$0xff]   ;;  %v767_v16 = vld [vmem:[%s872_s25 + $0x60] ss:$8 sps:$4 sm:$0xff]   ;;  %v768_v17 = vld [vmem:[%s872_s25 + $0x74] ss:$8 sps:$4 sm:$0xff]  }
  0x1d   : > { %v285_v14 = vld [vmem:[%s867_s21] sm:$0xff]  ;;  %v770_v18 = vld [vmem:[%s872_s25 + $0x70] ss:$8 sps:$4 sm:$0xff]   ;;  %v774_v21 = vld [vmem:[%s872_s25 + $0x94] ss:$8 sps:$4 sm:$0xff]   ;;  %p716_p7 = scmp.ne.s32.totalorder %s811_s12, 4 }
  0x1e   : > { %488 = vmatpush1.bf16.msra.mxu0 %v752_v4  ;;  %v683_v15 = vcombine.high %v285_v14, %v285_v14  ;;  %v771_v19 = vld [vmem:[%s872_s25 + $0x84] ss:$8 sps:$4 sm:$0xff]   ;;  %v773_v20 = vld [vmem:[%s872_s25 + $0x80] ss:$8 sps:$4 sm:$0xff]   ;;  %v776_v22 = vld [vmem:[%s872_s25 + $0x90] ss:$8 sps:$4 sm:$0xff]   ;;  %v682_v35 = vcombine.low %v285_v14, %v285_v14  ;;  %v538_v44 = vlaneseq (!%p716_p7) }
  0x1f   : > { %489 = vmatprep.subr.bf16.mxu0 %v753_v5  ;;  %v777_v23 = vld [vmem:[%s872_s25 + $0xa4] ss:$8 sps:$4 sm:$0xff]   ;;  %v779_v24 = vld [vmem:[%s872_s25 + $0xa0] ss:$8 sps:$4 sm:$0xff]   ;;  %v780_v25 = vld [vmem:[%s872_s25 + $0xb4] ss:$8 sps:$4 sm:$0xff]  }
  0x20   : > { %517 = vmatprep.mubr.bf16.mxu0 %v683_v15  ;;  %v782_v26 = vld [vmem:[%s872_s25 + $0xb0] ss:$8 sps:$4 sm:$0xff]   ;;  %v783_v27 = vld [vmem:[%s872_s25 + $0xc4] ss:$8 sps:$4 sm:$0xff]   ;;  %v785_v28 = vld [vmem:[%s872_s25 + $0xc0] ss:$8 sps:$4 sm:$0xff]  }
  0x21   : > { %v786_v29 = vld [vmem:[%s872_s25 + $0xd4] ss:$8 sps:$4 sm:$0xff]   ;;  %v788_v30 = vld [vmem:[%s872_s25 + $0xd0] ss:$8 sps:$4 sm:$0xff]   ;;  %v789_v31 = vld [vmem:[%s872_s25 + $0xe4] ss:$8 sps:$4 sm:$0xff]  }
  0x22   : > { %490 = vmatpush1.bf16.msra.mxu0 %v755_v6  ;;  %v791_v32 = vld [vmem:[%s872_s25 + $0xe0] ss:$8 sps:$4 sm:$0xff]   ;;  %v792_v33 = vld [vmem:[%s872_s25 + $0xf4] ss:$8 sps:$4 sm:$0xff]   ;;  %v794_v34 = vld [vmem:[%s872_s25 + $0xf0] ss:$8 sps:$4 sm:$0xff]  }
  0x23   : > { %491 = vmatprep.subr.bf16.mxu0 %v756_v7  ;;  %v283_v36 = vld [vmem:[#allocation2] sm:$0xff]  ;;  %v284_v37 = vld [vmem:[#allocation2 + $0x8] sm:$0xff]  ;;  %v539_v45 = vshrl.u32 (!%p716_p7), %v538_v44, 7 }
  0x24   : > { %v536_v46 = vld [vmem:[%s929_s2] sm:$0x3] (!%p716_p7) }
  0x25   : > { %v540_v47 = vsub.s32 (!%p716_p7), 0, %v539_v45  ;;  %v544_v48 = vsub.s32 (!%p716_p7), 1, %v539_v45 }
  0x26   : > { %492 = vmatpush1.bf16.msra.mxu0 %v758_v8 }
  0x27   : > { %493 = vmatprep.subr.bf16.mxu0 %v759_v9  ;;  %v541_v51 = vrot.slane (!%p716_p7), %v536_v46, %v540_v47  ;;  %v545_v52 = vrot.slane (!%p716_p7), %v536_v46, %v544_v48 }
  0x2a   : > { %494 = vmatpush1.bf16.msra.mxu0 %v761_v10 }
  0x2b   : > { %495 = vmatprep.subr.bf16.mxu0 %v762_v11 }
  0x2e   : > { %496 = vmatpush1.bf16.msra.mxu0 %v764_v12 }
  0x2f   : > { %497 = vmatprep.subr.bf16.mxu0 %v765_v13 }
  0x32   : > { %498 = vmatpush1.bf16.msra.mxu0 %v767_v16 }
  0x33   : > { %499 = vmatprep.subr.bf16.mxu0 %v768_v17 }
  0x36   : > { %500 = vmatpush1.bf16.msra.mxu0 %v770_v18 }
  0x37   : > { %501 = vmatprep.subr.bf16.mxu0 %v771_v19 }
  0x3a   : > { %502 = vmatpush1.bf16.msra.mxu0 %v773_v20 }
  0x3b   : > { %503 = vmatprep.subr.bf16.mxu0 %v774_v21 }
  0x3e   : > { %504 = vmatpush1.bf16.msra.mxu0 %v776_v22 }
  0x3f   : > { %505 = vmatprep.subr.bf16.mxu0 %v777_v23 }
  0x42   : > { %506 = vmatpush1.bf16.msra.mxu0 %v779_v24 }
  0x43   : > { %507 = vmatprep.subr.bf16.mxu0 %v780_v25 }
  0x46   : > { %508 = vmatpush1.bf16.msra.mxu0 %v782_v26 }
  0x47   : > { %509 = vmatprep.subr.bf16.mxu0 %v783_v27 }
  0x4a   : > { %510 = vmatpush1.bf16.msra.mxu0 %v785_v28 }
  0x4b   : > { %511 = vmatprep.subr.bf16.mxu0 %v786_v29 }
  0x4e   : > { %512 = vmatpush1.bf16.msra.mxu0 %v788_v30 }
  0x4f   : > { %513 = vmatprep.subr.bf16.mxu0 %v789_v31 }
  0x52   : > { %514 = vmatpush1.bf16.msra.mxu0 %v791_v32 }
  0x53   : > { %515 = vmatprep.subr.bf16.mxu0 %v792_v33 }
  0x56   : > { %516 = vmatpush1.bf16.msra.mxu0 %v794_v34 }
  0x59   : > { %518 = vmatmul.mubr.bf16.vlgmr.msra.gmra.mrb[0].mxu0 %v682_v35 }
 0x12a   : > { %533 = sbr.rel (%p716_p7) target bundleno = 317 (0x13d), region = 40 }
 0x12c   : > { %v519_v38 = vpop.f32.mrb[0].mxu0 }
 0x12d   : > { %v526_v39 = vadd.f32 %v519_v38, %v283_v36  ;;  %v521_v40 = vpop.f32.mrb[1].mxu0 }
 0x12e   : > { %v527_v41 = vadd.f32 %v521_v40, %v284_v37  ;;  %v523_v42 = vpop.f32.mrb[2].mxu0 }
 0x12f   : > { %528 = vst [vmem:[#allocation2] sm:$0xff] %v526_v39  ;;  %v524_v43 = vpop.f32.mrb[3].mxu0 }
 0x130   : > { %529 = vst [vmem:[#allocation2 + $0x8] sm:$0xff] %v527_v41 }
 0x136   : > { %v534_v49 = vld [vmem:[#allocation2] sm:$0xff] }
 0x137   : > { %v535_v50 = vld [vmem:[#allocation2 + $0x8] sm:$0xff]  ;;  %v548_v53 = vadd.f32 %v541_v51, %v534_v49 }
 0x138   : > { %v549_v54 = vadd.f32 %v545_v52, %v535_v50 }
 0x139   : > { %v550_v55 = vmax.f32 %v548_v53, 0.0 }
 0x13a   : > { %v551_v56 = vmax.f32 %v549_v54, 0.0 }
 0x13b   : > { %552 = vst [vmem:[%s930_s3] sm:$0xff] %v550_v55 }
 0x13c   : > { %553 = vst [vmem:[%s930_s3 + $0x8] sm:$0xff] %v551_v56 }
 0x13d PF: > { %s13_s14 = sadd.s32 1, %s819_s14   ;;  %s931_s12 = smov %s815_s13 }
 0x13e   : > { %p10_p8 = scmp.ge.s32.totalorder %s13_s14, 7   ;;  %s932_s13 = smov %s934_s15 }
 0x140   :  { %12 = sbr.rel (!%p10_p8) target bundleno = 2 (0x2), region = 76 }

// kernel: st_classifier_forward.32
= control target key start
LH: loop header
LB: loop body
LE: loop exit
PB: predicated region body
PF: predicated region fallthrough
CT: control target
= control target key end

     0   :  { %v231_v1 = vmov 0   ;;  %v172_v18 = vlaneseq  ;;  %s312_s1 = inlined_call_operand.vmem [shape: bf16[128,256], index: 1, kind: input, shape index: {}]   ;;  %s313_s0 = inlined_call_operand.vmem [shape: bf16[8,128], index: 0, kind: input, shape index: {}]   ;;  %s314_s2 = inlined_call_operand.vmem [shape: f32[1,256], index: 2, kind: input, shape index: {}]   ;;  %s315_s3 = inlined_call_operand.vmem [shape: f32[8,256], index: 3, kind: output, shape index: {}]  }
   0x1   :  { %v207_v0 = vld [vmem:[%s312_s1 + $0x4] ss:$8 sps:$4 sm:$0xff]   ;;  %152 = vmatprep.mubr.bf16.mxu0 %v231_v1  ;;  %v209_v2 = vld [vmem:[%s312_s1] ss:$8 sps:$4 sm:$0xff]   ;;  %v210_v3 = vld [vmem:[%s312_s1 + $0x14] ss:$8 sps:$4 sm:$0xff]  }
   0x2   :  { %120 = vmatprep.subr.bf16.mxu0 %v207_v0  ;;  %v212_v4 = vld [vmem:[%s312_s1 + $0x10] ss:$8 sps:$4 sm:$0xff]   ;;  %v213_v5 = vld [vmem:[%s312_s1 + $0x24] ss:$8 sps:$4 sm:$0xff]   ;;  %v215_v6 = vld [vmem:[%s312_s1 + $0x20] ss:$8 sps:$4 sm:$0xff]  }
   0x3   :  { %121 = vmatpush1.bf16.msra.mxu0 %v209_v2  ;;  %v216_v7 = vld [vmem:[%s312_s1 + $0x34] ss:$8 sps:$4 sm:$0xff]   ;;  %v218_v8 = vld [vmem:[%s312_s1 + $0x30] ss:$8 sps:$4 sm:$0xff]   ;;  %v219_v9 = vld [vmem:[%s312_s1 + $0x44] ss:$8 sps:$4 sm:$0xff]  }
   0x4   :  { %122 = vmatprep.subr.bf16.mxu0 %v210_v3  ;;  %v221_v10 = vld [vmem:[%s312_s1 + $0x40] ss:$8 sps:$4 sm:$0xff]   ;;  %v222_v11 = vld [vmem:[%s312_s1 + $0x54] ss:$8 sps:$4 sm:$0xff]   ;;  %v224_v12 = vld [vmem:[%s312_s1 + $0x50] ss:$8 sps:$4 sm:$0xff]  }
   0x5   :  { %v225_v13 = vld [vmem:[%s312_s1 + $0x64] ss:$8 sps:$4 sm:$0xff]   ;;  %v227_v14 = vld [vmem:[%s312_s1 + $0x60] ss:$8 sps:$4 sm:$0xff]   ;;  %v228_v15 = vld [vmem:[%s312_s1 + $0x74] ss:$8 sps:$4 sm:$0xff]  }
   0x6   :  { %v230_v16 = vld [vmem:[%s312_s1 + $0x70] ss:$8 sps:$4 sm:$0xff]   ;;  %v23_v17 = vld [vmem:[%s313_s0] sm:$0xf]  ;;  %v173_v19 = vshrl.u32 %v172_v18, 7 }
   0x7   :  { %123 = vmatpush1.bf16.msra.mxu0 %v212_v4  ;;  %v170_v21 = vld [vmem:[%s314_s2] sm:$0x3] }
   0x8   :  { %124 = vmatprep.subr.bf16.mxu0 %v213_v5  ;;  %v174_v20 = vsub.s32 0, %v173_v19  ;;  %v178_v22 = vsub.s32 1, %v173_v19 }
   0xa   :  { %v175_v23 = vrot.slane %v170_v21, %v174_v20  ;;  %v179_v24 = vrot.slane %v170_v21, %v178_v22 }
   0xb   :  { %125 = vmatpush1.bf16.msra.mxu0 %v215_v6 }
   0xc   :  { %126 = vmatprep.subr.bf16.mxu0 %v216_v7 }
   0xf   :  { %127 = vmatpush1.bf16.msra.mxu0 %v218_v8 }
  0x10   :  { %128 = vmatprep.subr.bf16.mxu0 %v219_v9 }
  0x13   :  { %129 = vmatpush1.bf16.msra.mxu0 %v221_v10 }
  0x14   :  { %130 = vmatprep.subr.bf16.mxu0 %v222_v11 }
  0x17   :  { %131 = vmatpush1.bf16.msra.mxu0 %v224_v12 }
  0x18   :  { %132 = vmatprep.subr.bf16.mxu0 %v225_v13 }
  0x1b   :  { %133 = vmatpush1.bf16.msra.mxu0 %v227_v14 }
  0x1c   :  { %134 = vmatprep.subr.bf16.mxu0 %v228_v15 }
  0x1f   :  { %135 = vmatpush1.bf16.msra.mxu0 %v230_v16 }
  0x22   :  { %153 = vmatmul.mubr.bf16.vlgmr.msra.gmra.mrb[0].mxu0 %v23_v17 }
  0xf5   :  { %v154_v25 = vpop.f32.mrb[0].mxu0 }
  0xf6   :  { %v182_v26 = vadd.f32 %v175_v23, %v154_v25  ;;  %v156_v27 = vpop.f32.mrb[1].mxu0 }
  0xf7   :  { %v183_v28 = vadd.f32 %v179_v24, %v156_v27  ;;  %v158_v29 = vpop.f32.mrb[2].mxu0 }
  0xf8   :  { %184 = vst [vmem:[%s315_s3] sm:$0xff] %v182_v26  ;;  %v159_v30 = vpop.f32.mrb[3].mxu0 }
  0xf9   :  { %185 = vst [vmem:[%s315_s3 + $0x8] sm:$0xff] %v183_v28 }

// kernel: st_classifier_forward.33
= control target key start
LH: loop header
LB: loop body
LE: loop exit
PB: predicated region body
PF: predicated region fallthrough
CT: control target
= control target key end

     0   :  { %s936_s15 = smov 0   ;;  %s938_s16 = smov 0   ;;  %s1027_s0 = inlined_call_operand.vmem [shape: bf16[8,2304], index: 0, kind: input, shape index: {}]   ;;  %s1028_s1 = inlined_call_operand.vmem [shape: bf16[2304,256], index: 1, kind: input, shape index: {}]   ;;  %s1029_s2 = inlined_call_operand.vmem [shape: f32[1,256], index: 2, kind: input, shape index: {}]   ;;  %s1030_s3 = inlined_call_operand.vmem [shape: f32[8,256], index: 3, kind: input, shape index: {}]   ;;  %s1031_s4 = inlined_call_operand.vmem [shape: f32[8,256], index: 4, kind: output, shape index: {}]  }
   0x1   :  { %s940_s17 = smov 0  }
   0x2 LB: > { %s26_s18 = sadd.s32 1, %s904_s16  ;;  %p764_p0 = scmp.ge.s32.totalorder %s908_s17, 1  ;;  %s908_s17 = sphi %s940_s17, %s14_s17   ;;  %s904_s16 = sphi %s938_s16, %s1033_s16   ;;  %s900_s15 = sphi %s936_s15, %s1032_s15  }
   0x3   : > { %p27_p1 = scmp.ge.s32.totalorder %s26_s18, 9  ;;  %p236_p2 = scmp.lt.s32.totalorder %s908_s17, 10 }
   0x5   : > { %s1035_s18 = smov (%p27_p1, %s26_s18), 0  ;;  %p237_p3 = pnand %p764_p0, %p236_p2 }
   0x6   : > { %s765_s19 = sshll.u32 (!%p237_p3), %s900_s15, 1  ;;  %s767_s20 = sshll.u32 (!%p237_p3), %s900_s15, 5 }
   0x7   : > { %240 = sbr.rel (%p237_p3) target bundleno = 319 (0x13f), region = 36  ;;  %p296_p4 = scmp.lt.s32.totalorder (!%p237_p3), %s765_s19, 17 }
   0x8   : > { %p305_p5 = scmp.lt.s32.totalorder (!%p237_p3), %s767_s20, 287  ;;  %p770_p6 = scmp.ne.s32.totalorder (!%p237_p3), %s900_s15, 0 }
   0xe   : > { %s1037_s19 = smov (!%p296_p4, %s765_s19), 17  ;;  %s1039_s20 = smov (!%p305_p5, %s767_s20), 287 }
   0xf   : > { %s766_s21 = sshll.u32 %s1037_s19, 2  ;;  %s810_s25 = sshll.u32 %s1039_s20, 3  ;;  %v910_v0 = vmov (!%p770_p6), 0.0  }
  0x10   : > { %s961_s24 = scalar_lea.vmem %s1027_s0, %s766_s21  ;;  %s966_s28 = scalar_lea.vmem %s1028_s1, %s810_s25  ;;  %344 = vst [vmem:[#allocation2] sm:$0xff] (!%p770_p6), %v910_v0  ;;  %345 = vst [vmem:[#allocation2 + $0x8] sm:$0xff] (!%p770_p6), %v910_v0 }
  0x11   : > { %343 = sbr.rel (%p770_p6) target bundleno = 24 (0x18), region = 40 }
  0x18 PF: > { %v836_v1 = vld [vmem:[%s966_s28 + $0x4] ss:$8 sps:$4 sm:$0xff]   ;;  %v838_v2 = vld [vmem:[%s966_s28] ss:$8 sps:$4 sm:$0xff]   ;;  %v839_v3 = vld [vmem:[%s966_s28 + $0x14] ss:$8 sps:$4 sm:$0xff]  }
  0x19   : > { %548 = vmatprep.subr.bf16.mxu0 %v836_v1  ;;  %v841_v4 = vld [vmem:[%s966_s28 + $0x10] ss:$8 sps:$4 sm:$0xff]   ;;  %v842_v5 = vld [vmem:[%s966_s28 + $0x24] ss:$8 sps:$4 sm:$0xff]   ;;  %v844_v6 = vld [vmem:[%s966_s28 + $0x20] ss:$8 sps:$4 sm:$0xff]  }
  0x1a   : > { %549 = vmatpush1.bf16.msra.mxu0 %v838_v2  ;;  %v845_v7 = vld [vmem:[%s966_s28 + $0x34] ss:$8 sps:$4 sm:$0xff]   ;;  %v847_v8 = vld [vmem:[%s966_s28 + $0x30] ss:$8 sps:$4 sm:$0xff]   ;;  %v848_v9 = vld [vmem:[%s966_s28 + $0x44] ss:$8 sps:$4 sm:$0xff]  }
  0x1b   : > { %550 = vmatprep.subr.bf16.mxu0 %v839_v3  ;;  %v850_v10 = vld [vmem:[%s966_s28 + $0x40] ss:$8 sps:$4 sm:$0xff]   ;;  %v851_v11 = vld [vmem:[%s966_s28 + $0x54] ss:$8 sps:$4 sm:$0xff]   ;;  %v853_v12 = vld [vmem:[%s966_s28 + $0x50] ss:$8 sps:$4 sm:$0xff]  }
  0x1c   : > { %v854_v13 = vld [vmem:[%s966_s28 + $0x64] ss:$8 sps:$4 sm:$0xff]   ;;  %v856_v16 = vld [vmem:[%s966_s28 + $0x60] ss:$8 sps:$4 sm:$0xff]   ;;  %v857_v17 = vld [vmem:[%s966_s28 + $0x74] ss:$8 sps:$4 sm:$0xff]  }
  0x1d   : > { %v348_v14 = vld [vmem:[%s961_s24] sm:$0xff]  ;;  %v859_v18 = vld [vmem:[%s966_s28 + $0x70] ss:$8 sps:$4 sm:$0xff]   ;;  %v863_v21 = vld [vmem:[%s966_s28 + $0x94] ss:$8 sps:$4 sm:$0xff]   ;;  %p805_p7 = scmp.ne.s32.totalorder %s900_s15, 8 }
  0x1e   : > { %551 = vmatpush1.bf16.msra.mxu0 %v841_v4  ;;  %v772_v15 = vcombine.high %v348_v14, %v348_v14  ;;  %v860_v19 = vld [vmem:[%s966_s28 + $0x84] ss:$8 sps:$4 sm:$0xff]   ;;  %v862_v20 = vld [vmem:[%s966_s28 + $0x80] ss:$8 sps:$4 sm:$0xff]   ;;  %v865_v22 = vld [vmem:[%s966_s28 + $0x90] ss:$8 sps:$4 sm:$0xff]   ;;  %v771_v35 = vcombine.low %v348_v14, %v348_v14  ;;  %v601_v44 = vlaneseq (!%p805_p7) }
  0x1f   : > { %552 = vmatprep.subr.bf16.mxu0 %v842_v5  ;;  %v866_v23 = vld [vmem:[%s966_s28 + $0xa4] ss:$8 sps:$4 sm:$0xff]   ;;  %v868_v24 = vld [vmem:[%s966_s28 + $0xa0] ss:$8 sps:$4 sm:$0xff]   ;;  %v869_v25 = vld [vmem:[%s966_s28 + $0xb4] ss:$8 sps:$4 sm:$0xff]  }
  0x20   : > { %580 = vmatprep.mubr.bf16.mxu0 %v772_v15  ;;  %v871_v26 = vld [vmem:[%s966_s28 + $0xb0] ss:$8 sps:$4 sm:$0xff]   ;;  %v872_v27 = vld [vmem:[%s966_s28 + $0xc4] ss:$8 sps:$4 sm:$0xff]   ;;  %v874_v28 = vld [vmem:[%s966_s28 + $0xc0] ss:$8 sps:$4 sm:$0xff]  }
  0x21   : > { %v875_v29 = vld [vmem:[%s966_s28 + $0xd4] ss:$8 sps:$4 sm:$0xff]   ;;  %v877_v30 = vld [vmem:[%s966_s28 + $0xd0] ss:$8 sps:$4 sm:$0xff]   ;;  %v878_v31 = vld [vmem:[%s966_s28 + $0xe4] ss:$8 sps:$4 sm:$0xff]  }
  0x22   : > { %553 = vmatpush1.bf16.msra.mxu0 %v844_v6  ;;  %v880_v32 = vld [vmem:[%s966_s28 + $0xe0] ss:$8 sps:$4 sm:$0xff]   ;;  %v881_v33 = vld [vmem:[%s966_s28 + $0xf4] ss:$8 sps:$4 sm:$0xff]   ;;  %v883_v34 = vld [vmem:[%s966_s28 + $0xf0] ss:$8 sps:$4 sm:$0xff]  }
  0x23   : > { %554 = vmatprep.subr.bf16.mxu0 %v845_v7  ;;  %v346_v36 = vld [vmem:[#allocation2] sm:$0xff]  ;;  %v347_v37 = vld [vmem:[#allocation2 + $0x8] sm:$0xff]  ;;  %v602_v45 = vshrl.u32 (!%p805_p7), %v601_v44, 7 }
  0x24   : > { %v599_v46 = vld [vmem:[%s1029_s2] sm:$0x3] (!%p805_p7)  ;;  %v614_v54 = vld [vmem:[%s1030_s3 + $0x8] sm:$0xff] (!%p805_p7) }
  0x25   : > { %v603_v47 = vsub.s32 (!%p805_p7), 0, %v602_v45  ;;  %v607_v48 = vsub.s32 (!%p805_p7), 1, %v602_v45  ;;  %v613_v53 = vld [vmem:[%s1030_s3] sm:$0xff] (!%p805_p7) }
  0x26   : > { %555 = vmatpush1.bf16.msra.mxu0 %v847_v8 }
  0x27   : > { %556 = vmatprep.subr.bf16.mxu0 %v848_v9  ;;  %v604_v51 = vrot.slane (!%p805_p7), %v599_v46, %v603_v47  ;;  %v608_v52 = vrot.slane (!%p805_p7), %v599_v46, %v607_v48 }
  0x2a   : > { %557 = vmatpush1.bf16.msra.mxu0 %v850_v10 }
  0x2b   : > { %558 = vmatprep.subr.bf16.mxu0 %v851_v11 }
  0x2e   : > { %559 = vmatpush1.bf16.msra.mxu0 %v853_v12 }
  0x2f   : > { %560 = vmatprep.subr.bf16.mxu0 %v854_v13 }
  0x32   : > { %561 = vmatpush1.bf16.msra.mxu0 %v856_v16 }
  0x33   : > { %562 = vmatprep.subr.bf16.mxu0 %v857_v17 }
  0x36   : > { %563 = vmatpush1.bf16.msra.mxu0 %v859_v18 }
  0x37   : > { %564 = vmatprep.subr.bf16.mxu0 %v860_v19 }
  0x3a   : > { %565 = vmatpush1.bf16.msra.mxu0 %v862_v20 }
  0x3b   : > { %566 = vmatprep.subr.bf16.mxu0 %v863_v21 }
  0x3e   : > { %567 = vmatpush1.bf16.msra.mxu0 %v865_v22 }
  0x3f   : > { %568 = vmatprep.subr.bf16.mxu0 %v866_v23 }
  0x42   : > { %569 = vmatpush1.bf16.msra.mxu0 %v868_v24 }
  0x43   : > { %570 = vmatprep.subr.bf16.mxu0 %v869_v25 }
  0x46   : > { %571 = vmatpush1.bf16.msra.mxu0 %v871_v26 }
  0x47   : > { %572 = vmatprep.subr.bf16.mxu0 %v872_v27 }
  0x4a   : > { %573 = vmatpush1.bf16.msra.mxu0 %v874_v28 }
  0x4b   : > { %574 = vmatprep.subr.bf16.mxu0 %v875_v29 }
  0x4e   : > { %575 = vmatpush1.bf16.msra.mxu0 %v877_v30 }
  0x4f   : > { %576 = vmatprep.subr.bf16.mxu0 %v878_v31 }
  0x52   : > { %577 = vmatpush1.bf16.msra.mxu0 %v880_v32 }
  0x53   : > { %578 = vmatprep.subr.bf16.mxu0 %v881_v33 }
  0x56   : > { %579 = vmatpush1.bf16.msra.mxu0 %v883_v34 }
  0x59   : > { %581 = vmatmul.mubr.bf16.vlgmr.msra.gmra.mrb[0].mxu0 %v771_v35 }
 0x12a   : > { %596 = sbr.rel (%p805_p7) target bundleno = 319 (0x13f), region = 44 }
 0x12c   : > { %v582_v38 = vpop.f32.mrb[0].mxu0 }
 0x12d   : > { %v589_v39 = vadd.f32 %v582_v38, %v346_v36  ;;  %v584_v40 = vpop.f32.mrb[1].mxu0 }
 0x12e   : > { %v590_v41 = vadd.f32 %v584_v40, %v347_v37  ;;  %v586_v42 = vpop.f32.mrb[2].mxu0 }
 0x12f   : > { %591 = vst [vmem:[#allocation2] sm:$0xff] %v589_v39  ;;  %v587_v43 = vpop.f32.mrb[3].mxu0 }
 0x130   : > { %592 = vst [vmem:[#allocation2 + $0x8] sm:$0xff] %v590_v41 }
 0x136   : > { %v597_v49 = vld [vmem:[#allocation2] sm:$0xff] }
 0x137   : > { %v598_v50 = vld [vmem:[#allocation2 + $0x8] sm:$0xff]  ;;  %v611_v55 = vadd.f32 %v604_v51, %v597_v49 }
 0x138   : > { %v612_v56 = vadd.f32 %v608_v52, %v598_v50 }
 0x139   : > { %v615_v57 = vadd.f32 %v613_v53, %v611_v55 }
 0x13a   : > { %v616_v58 = vadd.f32 %v614_v54, %v612_v56 }
 0x13b   : > { %v617_v59 = vmax.f32 %v615_v57, 0.0 }
 0x13c   : > { %v618_v60 = vmax.f32 %v616_v58, 0.0 }
 0x13d   : > { %619 = vst [vmem:[%s1031_s4] sm:$0xff] %v617_v59 }
 0x13e   : > { %620 = vst [vmem:[%s1031_s4 + $0x8] sm:$0xff] %v618_v60 }
 0x13f PF: > { %s14_s17 = sadd.s32 1, %s908_s17   ;;  %s1032_s15 = smov %s904_s16 }
 0x140   : > { %p11_p8 = scmp.ge.s32.totalorder %s14_s17, 11   ;;  %s1033_s16 = smov %s1035_s18 }
 0x142   :  { %13 = sbr.rel (!%p11_p8) target bundleno = 2 (0x2), region = 83 }

// kernel: st_classifier_forward.34
= control target key start
LH: loop header
LB: loop body
LE: loop exit
PB: predicated region body
PF: predicated region fallthrough
CT: control target
= control target key end

     0   :  { %s842_s12 = smov 0   ;;  %s844_s13 = smov 0   ;;  %s927_s0 = inlined_call_operand.vmem [shape: bf16[8,2304], index: 0, kind: input, shape index: {}]   ;;  %s928_s1 = inlined_call_operand.vmem [shape: bf16[2304,256], index: 1, kind: input, shape index: {}]   ;;  %s929_s2 = inlined_call_operand.vmem [shape: f32[1,256], index: 2, kind: input, shape index: {}]   ;;  %s930_s3 = inlined_call_operand.vmem [shape: f32[8,256], index: 3, kind: output, shape index: {}]  }
   0x1   :  { %s846_s14 = smov 0  }
   0x2 LB: > { %s25_s15 = sadd.s32 1, %s815_s13  ;;  %p675_p0 = scmp.ge.s32.totalorder %s819_s14, 1  ;;  %s819_s14 = sphi %s846_s14, %s13_s14   ;;  %s815_s13 = sphi %s844_s13, %s932_s13   ;;  %s811_s12 = sphi %s842_s12, %s931_s12  }
   0x3   : > { %p26_p1 = scmp.ge.s32.totalorder %s25_s15, 9  ;;  %p194_p2 = scmp.lt.s32.totalorder %s819_s14, 10 }
   0x5   : > { %s934_s15 = smov (%p26_p1, %s25_s15), 0  ;;  %p195_p3 = pnand %p675_p0, %p194_p2 }
   0x6   : > { %s676_s16 = sshll.u32 (!%p195_p3), %s811_s12, 1  ;;  %s678_s17 = sshll.u32 (!%p195_p3), %s811_s12, 5 }
   0x7   : > { %198 = sbr.rel (%p195_p3) target bundleno = 317 (0x13d), region = 32  ;;  %p243_p4 = scmp.lt.s32.totalorder (!%p195_p3), %s676_s16, 17 }
   0x8   : > { %p252_p5 = scmp.lt.s32.totalorder (!%p195_p3), %s678_s17, 287  ;;  %p681_p6 = scmp.ne.s32.totalorder (!%p195_p3), %s811_s12, 0 }
   0xe   : > { %s936_s16 = smov (!%p243_p4, %s676_s16), 17  ;;  %s938_s17 = smov (!%p252_p5, %s678_s17), 287 }
   0xf   : > { %s677_s18 = sshll.u32 %s936_s16, 2  ;;  %s721_s22 = sshll.u32 %s938_s17, 3  ;;  %v821_v0 = vmov (!%p681_p6), 0.0  }
  0x10   : > { %s867_s21 = scalar_lea.vmem %s927_s0, %s677_s18  ;;  %s872_s25 = scalar_lea.vmem %s928_s1, %s721_s22  ;;  %281 = vst [vmem:[#allocation2] sm:$0xff] (!%p681_p6), %v821_v0  ;;  %282 = vst [vmem:[#allocation2 + $0x8] sm:$0xff] (!%p681_p6), %v821_v0 }
  0x11   : > { %280 = sbr.rel (%p681_p6) target bundleno = 24 (0x18), region = 36 }
  0x18 PF: > { %v747_v1 = vld [vmem:[%s872_s25 + $0x4] ss:$8 sps:$4 sm:$0xff]   ;;  %v749_v2 = vld [vmem:[%s872_s25] ss:$8 sps:$4 sm:$0xff]   ;;  %v750_v3 = vld [vmem:[%s872_s25 + $0x14] ss:$8 sps:$4 sm:$0xff]  }
  0x19   : > { %485 = vmatprep.subr.bf16.mxu0 %v747_v1  ;;  %v752_v4 = vld [vmem:[%s872_s25 + $0x10] ss:$8 sps:$4 sm:$0xff]   ;;  %v753_v5 = vld [vmem:[%s872_s25 + $0x24] ss:$8 sps:$4 sm:$0xff]   ;;  %v755_v6 = vld [vmem:[%s872_s25 + $0x20] ss:$8 sps:$4 sm:$0xff]  }
  0x1a   : > { %486 = vmatpush1.bf16.msra.mxu0 %v749_v2  ;;  %v756_v7 = vld [vmem:[%s872_s25 + $0x34] ss:$8 sps:$4 sm:$0xff]   ;;  %v758_v8 = vld [vmem:[%s872_s25 + $0x30] ss:$8 sps:$4 sm:$0xff]   ;;  %v759_v9 = vld [vmem:[%s872_s25 + $0x44] ss:$8 sps:$4 sm:$0xff]  }
  0x1b   : > { %487 = vmatprep.subr.bf16.mxu0 %v750_v3  ;;  %v761_v10 = vld [vmem:[%s872_s25 + $0x40] ss:$8 sps:$4 sm:$0xff]   ;;  %v762_v11 = vld [vmem:[%s872_s25 + $0x54] ss:$8 sps:$4 sm:$0xff]   ;;  %v764_v12 = vld [vmem:[%s872_s25 + $0x50] ss:$8 sps:$4 sm:$0xff]  }
  0x1c   : > { %v765_v13 = vld [vmem:[%s872_s25 + $0x64] ss:$8 sps:$4 sm:$0xff]   ;;  %v767_v16 = vld [vmem:[%s872_s25 + $0x60] ss:$8 sps:$4 sm:$0xff]   ;;  %v768_v17 = vld [vmem:[%s872_s25 + $0x74] ss:$8 sps:$4 sm:$0xff]  }
  0x1d   : > { %v285_v14 = vld [vmem:[%s867_s21] sm:$0xff]  ;;  %v770_v18 = vld [vmem:[%s872_s25 + $0x70] ss:$8 sps:$4 sm:$0xff]   ;;  %v774_v21 = vld [vmem:[%s872_s25 + $0x94] ss:$8 sps:$4 sm:$0xff]   ;;  %p716_p7 = scmp.ne.s32.totalorder %s811_s12, 8 }
  0x1e   : > { %488 = vmatpush1.bf16.msra.mxu0 %v752_v4  ;;  %v683_v15 = vcombine.high %v285_v14, %v285_v14  ;;  %v771_v19 = vld [vmem:[%s872_s25 + $0x84] ss:$8 sps:$4 sm:$0xff]   ;;  %v773_v20 = vld [vmem:[%s872_s25 + $0x80] ss:$8 sps:$4 sm:$0xff]   ;;  %v776_v22 = vld [vmem:[%s872_s25 + $0x90] ss:$8 sps:$4 sm:$0xff]   ;;  %v682_v35 = vcombine.low %v285_v14, %v285_v14  ;;  %v538_v44 = vlaneseq (!%p716_p7) }
  0x1f   : > { %489 = vmatprep.subr.bf16.mxu0 %v753_v5  ;;  %v777_v23 = vld [vmem:[%s872_s25 + $0xa4] ss:$8 sps:$4 sm:$0xff]   ;;  %v779_v24 = vld [vmem:[%s872_s25 + $0xa0] ss:$8 sps:$4 sm:$0xff]   ;;  %v780_v25 = vld [vmem:[%s872_s25 + $0xb4] ss:$8 sps:$4 sm:$0xff]  }
  0x20   : > { %517 = vmatprep.mubr.bf16.mxu0 %v683_v15  ;;  %v782_v26 = vld [vmem:[%s872_s25 + $0xb0] ss:$8 sps:$4 sm:$0xff]   ;;  %v783_v27 = vld [vmem:[%s872_s25 + $0xc4] ss:$8 sps:$4 sm:$0xff]   ;;  %v785_v28 = vld [vmem:[%s872_s25 + $0xc0] ss:$8 sps:$4 sm:$0xff]  }
  0x21   : > { %v786_v29 = vld [vmem:[%s872_s25 + $0xd4] ss:$8 sps:$4 sm:$0xff]   ;;  %v788_v30 = vld [vmem:[%s872_s25 + $0xd0] ss:$8 sps:$4 sm:$0xff]   ;;  %v789_v31 = vld [vmem:[%s872_s25 + $0xe4] ss:$8 sps:$4 sm:$0xff]  }
  0x22   : > { %490 = vmatpush1.bf16.msra.mxu0 %v755_v6  ;;  %v791_v32 = vld [vmem:[%s872_s25 + $0xe0] ss:$8 sps:$4 sm:$0xff]   ;;  %v792_v33 = vld [vmem:[%s872_s25 + $0xf4] ss:$8 sps:$4 sm:$0xff]   ;;  %v794_v34 = vld [vmem:[%s872_s25 + $0xf0] ss:$8 sps:$4 sm:$0xff]  }
  0x23   : > { %491 = vmatprep.subr.bf16.mxu0 %v756_v7  ;;  %v283_v36 = vld [vmem:[#allocation2] sm:$0xff]  ;;  %v284_v37 = vld [vmem:[#allocation2 + $0x8] sm:$0xff]  ;;  %v539_v45 = vshrl.u32 (!%p716_p7), %v538_v44, 7 }
  0x24   : > { %v536_v46 = vld [vmem:[%s929_s2] sm:$0x3] (!%p716_p7) }
  0x25   : > { %v540_v47 = vsub.s32 (!%p716_p7), 0, %v539_v45  ;;  %v544_v48 = vsub.s32 (!%p716_p7), 1, %v539_v45 }
  0x26   : > { %492 = vmatpush1.bf16.msra.mxu0 %v758_v8 }
  0x27   : > { %493 = vmatprep.subr.bf16.mxu0 %v759_v9  ;;  %v541_v51 = vrot.slane (!%p716_p7), %v536_v46, %v540_v47  ;;  %v545_v52 = vrot.slane (!%p716_p7), %v536_v46, %v544_v48 }
  0x2a   : > { %494 = vmatpush1.bf16.msra.mxu0 %v761_v10 }
  0x2b   : > { %495 = vmatprep.subr.bf16.mxu0 %v762_v11 }
  0x2e   : > { %496 = vmatpush1.bf16.msra.mxu0 %v764_v12 }
  0x2f   : > { %497 = vmatprep.subr.bf16.mxu0 %v765_v13 }
  0x32   : > { %498 = vmatpush1.bf16.msra.mxu0 %v767_v16 }
  0x33   : > { %499 = vmatprep.subr.bf16.mxu0 %v768_v17 }
  0x36   : > { %500 = vmatpush1.bf16.msra.mxu0 %v770_v18 }
  0x37   : > { %501 = vmatprep.subr.bf16.mxu0 %v771_v19 }
  0x3a   : > { %502 = vmatpush1.bf16.msra.mxu0 %v773_v20 }
  0x3b   : > { %503 = vmatprep.subr.bf16.mxu0 %v774_v21 }
  0x3e   : > { %504 = vmatpush1.bf16.msra.mxu0 %v776_v22 }
  0x3f   : > { %505 = vmatprep.subr.bf16.mxu0 %v777_v23 }
  0x42   : > { %506 = vmatpush1.bf16.msra.mxu0 %v779_v24 }
  0x43   : > { %507 = vmatprep.subr.bf16.mxu0 %v780_v25 }
  0x46   : > { %508 = vmatpush1.bf16.msra.mxu0 %v782_v26 }
  0x47   : > { %509 = vmatprep.subr.bf16.mxu0 %v783_v27 }
  0x4a   : > { %510 = vmatpush1.bf16.msra.mxu0 %v785_v28 }
  0x4b   : > { %511 = vmatprep.subr.bf16.mxu0 %v786_v29 }
  0x4e   : > { %512 = vmatpush1.bf16.msra.mxu0 %v788_v30 }
  0x4f   : > { %513 = vmatprep.subr.bf16.mxu0 %v789_v31 }
  0x52   : > { %514 = vmatpush1.bf16.msra.mxu0 %v791_v32 }
  0x53   : > { %515 = vmatprep.subr.bf16.mxu0 %v792_v33 }
  0x56   : > { %516 = vmatpush1.bf16.msra.mxu0 %v794_v34 }
  0x59   : > { %518 = vmatmul.mubr.bf16.vlgmr.msra.gmra.mrb[0].mxu0 %v682_v35 }
 0x12a   : > { %533 = sbr.rel (%p716_p7) target bundleno = 317 (0x13d), region = 40 }
 0x12c   : > { %v519_v38 = vpop.f32.mrb[0].mxu0 }
 0x12d   : > { %v526_v39 = vadd.f32 %v519_v38, %v283_v36  ;;  %v521_v40 = vpop.f32.mrb[1].mxu0 }
 0x12e   : > { %v527_v41 = vadd.f32 %v521_v40, %v284_v37  ;;  %v523_v42 = vpop.f32.mrb[2].mxu0 }
 0x12f   : > { %528 = vst [vmem:[#allocation2] sm:$0xff] %v526_v39  ;;  %v524_v43 = vpop.f32.mrb[3].mxu0 }
 0x130   : > { %529 = vst [vmem:[#allocation2 + $0x8] sm:$0xff] %v527_v41 }
 0x136   : > { %v534_v49 = vld [vmem:[#allocation2] sm:$0xff] }
 0x137   : > { %v535_v50 = vld [vmem:[#allocation2 + $0x8] sm:$0xff]  ;;  %v548_v53 = vadd.f32 %v541_v51, %v534_v49 }
 0x138   : > { %v549_v54 = vadd.f32 %v545_v52, %v535_v50 }
 0x139   : > { %v550_v55 = vmax.f32 %v548_v53, 0.0 }
 0x13a   : > { %v551_v56 = vmax.f32 %v549_v54, 0.0 }
 0x13b   : > { %552 = vst [vmem:[%s930_s3] sm:$0xff] %v550_v55 }
 0x13c   : > { %553 = vst [vmem:[%s930_s3 + $0x8] sm:$0xff] %v551_v56 }
 0x13d PF: > { %s13_s14 = sadd.s32 1, %s819_s14   ;;  %s931_s12 = smov %s815_s13 }
 0x13e   : > { %p10_p8 = scmp.ge.s32.totalorder %s13_s14, 11   ;;  %s932_s13 = smov %s934_s15 }
 0x140   :  { %12 = sbr.rel (!%p10_p8) target bundleno = 2 (0x2), region = 76 }

// kernel: st_classifier_forward.36
= control target key start
LH: loop header
LB: loop body
LE: loop exit
PB: predicated region body
PF: predicated region fallthrough
CT: control target
= control target key end

     0   :  { %s1061_s12 = smov 0   ;;  %s1063_s13 = smov 0   ;;  %s1276_s0 = inlined_call_operand.vmem [shape: bf16[8,2304], index: 0, kind: input, shape index: {}]   ;;  %s1277_s1 = inlined_call_operand.vmem [shape: bf16[2304,512], index: 1, kind: input, shape index: {}]   ;;  %s1278_s2 = inlined_call_operand.vmem [shape: f32[1,512], index: 2, kind: input, shape index: {}]   ;;  %s1279_s3 = inlined_call_operand.vmem [shape: f32[8,512], index: 3, kind: output, shape index: {}]  }
   0x1   :  { %s1065_s14 = smov 0   ;;  %s1067_s15 = smov 0  }
   0x2   :  { %s1069_s16 = smov 0   ;;  %s1071_s17 = smov 0  }
   0x3   :  { %s1073_s18 = smov 0  }
   0x4 LB: > { %s25_s19 = sadd.s32 1, %s1030_s16  ;;  %s28_s20 = sadd.s32 1, %s1034_s17  ;;  %s1038_s18 = sphi %s1073_s18, %s13_s18   ;;  %s1034_s17 = sphi %s1071_s17, %s1285_s17   ;;  %s1030_s16 = sphi %s1069_s16, %s1284_s16   ;;  %s1026_s15 = sphi %s1067_s15, %s1283_s15   ;;  %s1022_s14 = sphi %s1065_s14, %s1282_s14   ;;  %s1018_s13 = sphi %s1063_s13, %s1281_s13   ;;  %s1014_s12 = sphi %s1061_s12, %s1280_s12  }
   0x5   : > { %p26_p0 = scmp.ge.s32.totalorder %s25_s19, 9  ;;  %p76_p1 = scmp.ne.s32.totalorder %s1018_s13, %s1014_s12 }
   0x6   : > { %p77_p2 = scmp.eq.s32.totalorder %s1038_s18, 0  ;;  %s69_s24 = sadd.s32 1, %s1018_s13 }
   0x7   : > { %s1287_s19 = smov (%p26_p0, %s25_s19), 0  ;;  %s1289_s20 = smov (!%p26_p0, %s28_s20), %s1034_s17 }
   0x8   : > { %p78_p3 = por %p77_p2, %p76_p1  ;;  %p30_p4 = scmp.ge.s32.totalorder %s1289_s20, 2 }
   0x9   : > { %s64_s21 = ssub.s32 %s1030_s16, %s1287_s19  ;;  %p825_p6 = scmp.ge.s32.totalorder %s1038_s18, 18 }
   0xa   : > { %s1291_s20 = smov (%p30_p4, %s1289_s20), 0 }
   0xb   : > { %s65_s22 = ssub.s32 %s1034_s17, %s1291_s20  ;;  %156 = sbr.rel (%p825_p6) target bundleno = 41 (0x29), region = 16 }
   0xc   : > { %s66_s23 = sor.u32 %s65_s22, %s64_s21 }
   0xd   : > { %p67_p5 = scmp.eq.s32.totalorder %s66_s23, 0 }
   0xf   : > { %s1112_s25 = scalar_select %p67_p5, %s1018_s13, %s69_s24  }
  0x12   : > { %172 = sbr.rel (!%p78_p3) target bundleno = 41 (0x29), region = 24  ;;  %s174_s26 = sand.u32 (%p78_p3), 1, %s1018_s13  }
  0x13   : > { %s828_s27 = sshll.u32 (%p78_p3), %s1034_s17, 1  ;;  %s826_s28 = sshll.u32 (%p78_p3), %s174_s26, 8 }
  0x14   : > { %s876_s29 = sshll.u32 (%p78_p3), %s1030_s16, 7  ;;  %s1126_s8 = scalar_lea.vmem (%p78_p3), [#allocation3], %s826_s28 }
  0x15   : > { %s180_s30 = sadd.s32 (%p78_p3), %s876_s29, %s828_s27 }
  0x16   : > { %s830_s4 = sshll.u32 (%p78_p3), %s180_s30, 2 }
  0x17   : > { %s1121_s7 = scalar_lea.vmem (%p78_p3), %s1277_s1, %s830_s4 }
  0x18   : > { %v272_v0 = vld [vmem:[%s1121_s7] sm:$0xff] (%p78_p3)  ;;  %v274_v1 = vld [vmem:[%s1121_s7 + $0x10] sm:$0xff] (%p78_p3) }
  0x19   : > { %v276_v2 = vld [vmem:[%s1121_s7 + $0x20] sm:$0xff]  ;;  %273 = vst [vmem:[%s1126_s8] sm:$0xff] %v272_v0  ;;  %275 = vst [vmem:[%s1126_s8 + $0x8] sm:$0xff] %v274_v1  ;;  %v278_v3 = vld [vmem:[%s1121_s7 + $0x30] sm:$0xff] }
  0x1a   : > { %277 = vst [vmem:[%s1126_s8 + $0x10] sm:$0xff] %v276_v2  ;;  %v280_v4 = vld [vmem:[%s1121_s7 + $0x40] sm:$0xff]  ;;  %v282_v5 = vld [vmem:[%s1121_s7 + $0x50] sm:$0xff]  ;;  %279 = vst [vmem:[%s1126_s8 + $0x18] sm:$0xff] %v278_v3 }
  0x1b   : > { %281 = vst [vmem:[%s1126_s8 + $0x20] sm:$0xff] %v280_v4  ;;  %283 = vst [vmem:[%s1126_s8 + $0x28] sm:$0xff] %v282_v5  ;;  %v284_v6 = vld [vmem:[%s1121_s7 + $0x60] sm:$0xff]  ;;  %v286_v7 = vld [vmem:[%s1121_s7 + $0x70] sm:$0xff] }
  0x1c   : > { %v288_v8 = vld [vmem:[%s1121_s7 + $0x80] sm:$0xff]  ;;  %285 = vst [vmem:[%s1126_s8 + $0x30] sm:$0xff] %v284_v6  ;;  %287 = vst [vmem:[%s1126_s8 + $0x38] sm:$0xff] %v286_v7  ;;  %v290_v9 = vld [vmem:[%s1121_s7 + $0x90] sm:$0xff] }
  0x1d   : > { %289 = vst [vmem:[%s1126_s8 + $0x40] sm:$0xff] %v288_v8  ;;  %v292_v10 = vld [vmem:[%s1121_s7 + $0xa0] sm:$0xff]  ;;  %v294_v11 = vld [vmem:[%s1121_s7 + $0xb0] sm:$0xff]  ;;  %291 = vst [vmem:[%s1126_s8 + $0x48] sm:$0xff] %v290_v9 }
  0x1e   : > { %293 = vst [vmem:[%s1126_s8 + $0x50] sm:$0xff] %v292_v10  ;;  %295 = vst [vmem:[%s1126_s8 + $0x58] sm:$0xff] %v294_v11  ;;  %v296_v12 = vld [vmem:[%s1121_s7 + $0xc0] sm:$0xff]  ;;  %v298_v13 = vld [vmem:[%s1121_s7 + $0xd0] sm:$0xff] }
  0x1f   : > { %v300_v14 = vld [vmem:[%s1121_s7 + $0xe0] sm:$0xff]  ;;  %297 = vst [vmem:[%s1126_s8 + $0x60] sm:$0xff] %v296_v12  ;;  %299 = vst [vmem:[%s1126_s8 + $0x68] sm:$0xff] %v298_v13  ;;  %v302_v15 = vld [vmem:[%s1121_s7 + $0xf0] sm:$0xff] }
  0x20   : > { %301 = vst [vmem:[%s1126_s8 + $0x70] sm:$0xff] %v300_v14  ;;  %v304_v16 = vld [vmem:[%s1121_s7 + $0x100] sm:$0xff]  ;;  %v306_v17 = vld [vmem:[%s1121_s7 + $0x110] sm:$0xff]  ;;  %303 = vst [vmem:[%s1126_s8 + $0x78] sm:$0xff] %v302_v15 }
  0x21   : > { %305 = vst [vmem:[%s1126_s8 + $0x80] sm:$0xff] %v304_v16  ;;  %307 = vst [vmem:[%s1126_s8 + $0x88] sm:$0xff] %v306_v17  ;;  %v308_v18 = vld [vmem:[%s1121_s7 + $0x120] sm:$0xff]  ;;  %v310_v19 = vld [vmem:[%s1121_s7 + $0x130] sm:$0xff] }
  0x22   : > { %v312_v20 = vld [vmem:[%s1121_s7 + $0x140] sm:$0xff]  ;;  %309 = vst [vmem:[%s1126_s8 + $0x90] sm:$0xff] %v308_v18  ;;  %311 = vst [vmem:[%s1126_s8 + $0x98] sm:$0xff] %v310_v19  ;;  %v314_v21 = vld [vmem:[%s1121_s7 + $0x150] sm:$0xff] }
  0x23   : > { %313 = vst [vmem:[%s1126_s8 + $0xa0] sm:$0xff] %v312_v20  ;;  %v316_v22 = vld [vmem:[%s1121_s7 + $0x160] sm:$0xff]  ;;  %v318_v23 = vld [vmem:[%s1121_s7 + $0x170] sm:$0xff]  ;;  %315 = vst [vmem:[%s1126_s8 + $0xa8] sm:$0xff] %v314_v21 }
  0x24   : > { %317 = vst [vmem:[%s1126_s8 + $0xb0] sm:$0xff] %v316_v22  ;;  %319 = vst [vmem:[%s1126_s8 + $0xb8] sm:$0xff] %v318_v23  ;;  %v320_v24 = vld [vmem:[%s1121_s7 + $0x180] sm:$0xff]  ;;  %v322_v25 = vld [vmem:[%s1121_s7 + $0x190] sm:$0xff] }
  0x25   : > { %v324_v26 = vld [vmem:[%s1121_s7 + $0x1a0] sm:$0xff]  ;;  %321 = vst [vmem:[%s1126_s8 + $0xc0] sm:$0xff] %v320_v24  ;;  %323 = vst [vmem:[%s1126_s8 + $0xc8] sm:$0xff] %v322_v25  ;;  %v326_v27 = vld [vmem:[%s1121_s7 + $0x1b0] sm:$0xff] }
  0x26   : > { %325 = vst [vmem:[%s1126_s8 + $0xd0] sm:$0xff] %v324_v26  ;;  %v328_v28 = vld [vmem:[%s1121_s7 + $0x1c0] sm:$0xff]  ;;  %v330_v29 = vld [vmem:[%s1121_s7 + $0x1d0] sm:$0xff]  ;;  %327 = vst [vmem:[%s1126_s8 + $0xd8] sm:$0xff] %v326_v27 }
  0x27   : > { %329 = vst [vmem:[%s1126_s8 + $0xe0] sm:$0xff] %v328_v28  ;;  %331 = vst [vmem:[%s1126_s8 + $0xe8] sm:$0xff] %v330_v29  ;;  %v332_v30 = vld [vmem:[%s1121_s7 + $0x1e0] sm:$0xff]  ;;  %v334_v31 = vld [vmem:[%s1121_s7 + $0x1f0] sm:$0xff] }
  0x28   : > { %333 = vst [vmem:[%s1126_s8 + $0xf0] sm:$0xff] %v332_v30  ;;  %335 = vst [vmem:[%s1126_s8 + $0xf8] sm:$0xff] %v334_v31 }
  0x29 PF: > { %p831_p7 = scmp.ge.s32.totalorder %s1038_s18, 1  ;;  %p348_p8 = scmp.lt.s32.totalorder %s1038_s18, 19 }
  0x2b   : > { %p349_p9 = pnand %p831_p7, %p348_p8 }
  0x2c   : > { %s355_s9 = sand.u32 (!%p349_p9), 1, %s1014_s12   ;;  %s833_s10 = sshll.u32 (!%p349_p9), %s1022_s14, 1 }
  0x2d   : > { %352 = sbr.rel (%p349_p9) target bundleno = 355 (0x163), region = 66  ;;  %s832_s11 = sshll.u32 (!%p349_p9), %s355_s9, 8 }
  0x2e   : > { %p398_p10 = scmp.lt.s32.totalorder (!%p349_p9), %s833_s10, 17  ;;  %s835_s21 = sshll.u32 (!%p349_p9), %s1026_s15, 1 }
  0x2f   : > { %p408_p11 = scmp.lt.s32.totalorder (!%p349_p9), %s835_s21, 3  ;;  %s1211_s5 = scalar_lea.vmem (!%p349_p9), [#allocation3], %s832_s11 }
  0x30   : > { %p838_p12 = scmp.ne.s32.totalorder (!%p349_p9), %s1022_s14, 0 }
  0x34   : > { %s1293_s10 = smov (!%p398_p10, %s833_s10), 17  ;;  %s1295_s21 = smov (!%p408_p11, %s835_s21), 3 }
  0x35   : > { %s834_s22 = sshll.u32 %s1293_s10, 2  ;;  %s410_s12 = scalar_lea.vmem %s1278_s2, %s1295_s21  ;;  %v1040_v32 = vmov (!%p838_p12), 0.0  }
  0x36   : > { %s1197_s26 = scalar_lea.vmem %s1276_s0, %s834_s22  ;;  %s837_s29 = sshll.u32 %s1295_s21, 3  ;;  %426 = vst [vmem:[#allocation2] sm:$0xff] (!%p838_p12), %v1040_v32  ;;  %427 = vst [vmem:[#allocation2 + $0x8] sm:$0xff] (!%p838_p12), %v1040_v32 }
  0x37   : > { %s1209_s15 = scalar_lea.vmem %s1279_s3, %s837_s29  ;;  %425 = sbr.rel (%p838_p12) target bundleno = 62 (0x3e), region = 74 }
  0x3e PF: > { %v934_v33 = vld [vmem:[%s1211_s5 + $0x4] ss:$8 sps:$4 sm:$0xff]   ;;  %v936_v34 = vld [vmem:[%s1211_s5] ss:$8 sps:$4 sm:$0xff]   ;;  %v937_v35 = vld [vmem:[%s1211_s5 + $0x14] ss:$8 sps:$4 sm:$0xff]  }
  0x3f   : > { %630 = vmatprep.subr.bf16.mxu0 %v934_v33  ;;  %v939_v36 = vld [vmem:[%s1211_s5 + $0x10] ss:$8 sps:$4 sm:$0xff]   ;;  %v940_v37 = vld [vmem:[%s1211_s5 + $0x24] ss:$8 sps:$4 sm:$0xff]   ;;  %v942_v38 = vld [vmem:[%s1211_s5 + $0x20] ss:$8 sps:$4 sm:$0xff]  }
  0x40   : > { %631 = vmatpush1.bf16.msra.mxu0 %v936_v34  ;;  %v943_v39 = vld [vmem:[%s1211_s5 + $0x34] ss:$8 sps:$4 sm:$0xff]   ;;  %v945_v40 = vld [vmem:[%s1211_s5 + $0x30] ss:$8 sps:$4 sm:$0xff]   ;;  %v946_v41 = vld [vmem:[%s1211_s5 + $0x44] ss:$8 sps:$4 sm:$0xff]  }
  0x41   : > { %632 = vmatprep.subr.bf16.mxu0 %v937_v35  ;;  %v948_v42 = vld [vmem:[%s1211_s5 + $0x40] ss:$8 sps:$4 sm:$0xff]   ;;  %v949_v43 = vld [vmem:[%s1211_s5 + $0x54] ss:$8 sps:$4 sm:$0xff]   ;;  %v951_v44 = vld [vmem:[%s1211_s5 + $0x50] ss:$8 sps:$4 sm:$0xff]  }
  0x42   : > { %v952_v45 = vld [vmem:[%s1211_s5 + $0x64] ss:$8 sps:$4 sm:$0xff]   ;;  %v430_v46 = vld [vmem:[%s1197_s26] sm:$0xff]  ;;  %v954_v48 = vld [vmem:[%s1211_s5 + $0x60] ss:$8 sps:$4 sm:$0xff]   ;;  %p873_p13 = scmp.ne.s32.totalorder %s1022_s14, 8 }
  0x43   : > { %v840_v47 = vcombine.high %v430_v46, %v430_v46  ;;  %v955_v49 = vld [vmem:[%s1211_s5 + $0x74] ss:$8 sps:$4 sm:$0xff]   ;;  %v957_v50 = vld [vmem:[%s1211_s5 + $0x70] ss:$8 sps:$4 sm:$0xff]   ;;  %v958_v51 = vld [vmem:[%s1211_s5 + $0x84] ss:$8 sps:$4 sm:$0xff]   ;;  %v839_v3 = vcombine.low %v430_v46, %v430_v46  ;;  %v683_v12 = vlaneseq (!%p873_p13) }
  0x44   : > { %633 = vmatpush1.bf16.msra.mxu0 %v939_v36  ;;  %v960_v52 = vld [vmem:[%s1211_s5 + $0x80] ss:$8 sps:$4 sm:$0xff]   ;;  %v961_v53 = vld [vmem:[%s1211_s5 + $0x94] ss:$8 sps:$4 sm:$0xff]   ;;  %v963_v54 = vld [vmem:[%s1211_s5 + $0x90] ss:$8 sps:$4 sm:$0xff]  }
  0x45   : > { %634 = vmatprep.subr.bf16.mxu0 %v940_v37  ;;  %662 = vmatprep.mubr.bf16.mxu0 %v840_v47  ;;  %v964_v55 = vld [vmem:[%s1211_s5 + $0xa4] ss:$8 sps:$4 sm:$0xff]   ;;  %v966_v56 = vld [vmem:[%s1211_s5 + $0xa0] ss:$8 sps:$4 sm:$0xff]   ;;  %v967_v57 = vld [vmem:[%s1211_s5 + $0xb4] ss:$8 sps:$4 sm:$0xff]  }
  0x46   : > { %v969_v58 = vld [vmem:[%s1211_s5 + $0xb0] ss:$8 sps:$4 sm:$0xff]   ;;  %v970_v59 = vld [vmem:[%s1211_s5 + $0xc4] ss:$8 sps:$4 sm:$0xff]   ;;  %v972_v60 = vld [vmem:[%s1211_s5 + $0xc0] ss:$8 sps:$4 sm:$0xff]  }
  0x47   : > { %v973_v61 = vld [vmem:[%s1211_s5 + $0xd4] ss:$8 sps:$4 sm:$0xff]   ;;  %v975_v62 = vld [vmem:[%s1211_s5 + $0xd0] ss:$8 sps:$4 sm:$0xff]   ;;  %v976_v63 = vld [vmem:[%s1211_s5 + $0xe4] ss:$8 sps:$4 sm:$0xff]  }
  0x48   : > { %635 = vmatpush1.bf16.msra.mxu0 %v942_v38  ;;  %v978_v0 = vld [vmem:[%s1211_s5 + $0xe0] ss:$8 sps:$4 sm:$0xff]   ;;  %v979_v1 = vld [vmem:[%s1211_s5 + $0xf4] ss:$8 sps:$4 sm:$0xff]   ;;  %v981_v2 = vld [vmem:[%s1211_s5 + $0xf0] ss:$8 sps:$4 sm:$0xff]  }
  0x49   : > { %636 = vmatprep.subr.bf16.mxu0 %v943_v39  ;;  %v428_v4 = vld [vmem:[#allocation2] sm:$0xff]  ;;  %v429_v5 = vld [vmem:[#allocation2 + $0x8] sm:$0xff]  ;;  %v684_v13 = vshrl.u32 (!%p873_p13), %v683_v12, 7 }
  0x4a   : > { %v681_v14 = vld [vmem:[%s410_s12] sm:$0x3] (!%p873_p13) }
  0x4b   : > { %v685_v15 = vsub.s32 (!%p873_p13), 0, %v684_v13  ;;  %v689_v16 = vsub.s32 (!%p873_p13), 1, %v684_v13 }
  0x4c   : > { %637 = vmatpush1.bf16.msra.mxu0 %v945_v40 }
  0x4d   : > { %638 = vmatprep.subr.bf16.mxu0 %v946_v41  ;;  %v686_v19 = vrot.slane (!%p873_p13), %v681_v14, %v685_v15  ;;  %v690_v20 = vrot.slane (!%p873_p13), %v681_v14, %v689_v16 }
  0x50   : > { %639 = vmatpush1.bf16.msra.mxu0 %v948_v42 }
  0x51   : > { %640 = vmatprep.subr.bf16.mxu0 %v949_v43 }
  0x54   : > { %641 = vmatpush1.bf16.msra.mxu0 %v951_v44 }
  0x55   : > { %642 = vmatprep.subr.bf16.mxu0 %v952_v45 }
  0x58   : > { %643 = vmatpush1.bf16.msra.mxu0 %v954_v48 }
  0x59   : > { %644 = vmatprep.subr.bf16.mxu0 %v955_v49 }
  0x5c   : > { %645 = vmatpush1.bf16.msra.mxu0 %v957_v50 }
  0x5d   : > { %646 = vmatprep.subr.bf16.mxu0 %v958_v51 }
  0x60   : > { %647 = vmatpush1.bf16.msra.mxu0 %v960_v52 }
  0x61   : > { %648 = vmatprep.subr.bf16.mxu0 %v961_v53 }
  0x64   : > { %649 = vmatpush1.bf16.msra.mxu0 %v963_v54 }
  0x65   : > { %650 = vmatprep.subr.bf16.mxu0 %v964_v55 }
  0x68   : > { %651 = vmatpush1.bf16.msra.mxu0 %v966_v56 }
  0x69   : > { %652 = vmatprep.subr.bf16.mxu0 %v967_v57 }
  0x6c   : > { %653 = vmatpush1.bf16.msra.mxu0 %v969_v58 }
  0x6d   : > { %654 = vmatprep.subr.bf16.mxu0 %v970_v59 }
  0x70   : > { %655 = vmatpush1.bf16.msra.mxu0 %v972_v60 }
  0x71   : > { %656 = vmatprep.subr.bf16.mxu0 %v973_v61 }
  0x74   : > { %657 = vmatpush1.bf16.msra.mxu0 %v975_v62 }
  0x75   : > { %658 = vmatprep.subr.bf16.mxu0 %v976_v63 }
  0x78   : > { %659 = vmatpush1.bf16.msra.mxu0 %v978_v0 }
  0x79   : > { %660 = vmatprep.subr.bf16.mxu0 %v979_v1 }
  0x7c   : > { %661 = vmatpush1.bf16.msra.mxu0 %v981_v2 }
  0x7f   : > { %663 = vmatmul.mubr.bf16.vlgmr.msra.gmra.mrb[0].mxu0 %v839_v3 }
 0x150   : > { %678 = sbr.rel (%p873_p13) target bundleno = 355 (0x163), region = 78 }
 0x152   : > { %v664_v6 = vpop.f32.mrb[0].mxu0 }
 0x153   : > { %v671_v7 = vadd.f32 %v664_v6, %v428_v4  ;;  %v666_v8 = vpop.f32.mrb[1].mxu0 }
 0x154   : > { %v672_v9 = vadd.f32 %v666_v8, %v429_v5  ;;  %v668_v10 = vpop.f32.mrb[2].mxu0 }
 0x155   : > { %673 = vst [vmem:[#allocation2] sm:$0xff] %v671_v7  ;;  %v669_v11 = vpop.f32.mrb[3].mxu0 }
 0x156   : > { %674 = vst [vmem:[#allocation2 + $0x8] sm:$0xff] %v672_v9 }
 0x15c   : > { %v679_v17 = vld [vmem:[#allocation2] sm:$0xff] }
 0x15d   : > { %v680_v18 = vld [vmem:[#allocation2 + $0x8] sm:$0xff]  ;;  %v693_v21 = vadd.f32 %v686_v19, %v679_v17 }
 0x15e   : > { %v694_v22 = vadd.f32 %v690_v20, %v680_v18 }
 0x15f   : > { %v695_v23 = vmax.f32 %v693_v21, 0.0 }
 0x160   : > { %v696_v24 = vmax.f32 %v694_v22, 0.0 }
 0x161   : > { %697 = vst [vmem:[%s1209_s15] sm:$0xff] %v695_v23 }
 0x162   : > { %698 = vst [vmem:[%s1209_s15 + $0x8] sm:$0xff] %v696_v24 }
 0x163 PF: > { %s13_s18 = sadd.s32 1, %s1038_s18   ;;  %s1280_s12 = smov %s1018_s13 }
 0x164   : > { %p10_p0 = scmp.ge.s32.totalorder %s13_s18, 20   ;;  %s1281_s13 = smov %s1112_s25 }
 0x165   : > { %s1282_s14 = smov %s1030_s16  ;;  %s1283_s15 = smov %s1034_s17 }
 0x166   : > { %s1284_s16 = smov %s1287_s19  ;;  %s1285_s17 = smov %s1291_s20 }
 0x167   :  { %12 = sbr.rel (!%p10_p0) target bundleno = 4 (0x4), region = 119 }

// kernel: st_classifier_forward.37
= control target key start
LH: loop header
LB: loop body
LE: loop exit
PB: predicated region body
PF: predicated region fallthrough
CT: control target
= control target key end

     0   :  { %s1019_s12 = smov 0   ;;  %s1021_s13 = smov 0   ;;  %s1198_s0 = inlined_call_operand.vmem [shape: bf16[8,256], index: 0, kind: input, shape index: {}]   ;;  %s1199_s1 = inlined_call_operand.vmem [shape: bf16[256,512], index: 1, kind: input, shape index: {}]   ;;  %s1200_s2 = inlined_call_operand.vmem [shape: f32[1,512], index: 2, kind: input, shape index: {}]   ;;  %s1201_s3 = inlined_call_operand.vmem [shape: f32[8,512], index: 3, kind: output, shape index: {}]  }
   0x1   :  { %s1023_s14 = smov 0   ;;  %s1025_s15 = smov 0  }
   0x2   :  { %s1027_s16 = smov 0  }
   0x3 LB: > { %s28_s17 = sadd.s32 1, %s993_s15  ;;  %p76_p1 = scmp.ne.s32.totalorder %s985_s13, %s981_s12  ;;  %s997_s16 = sphi %s1027_s16, %s13_s16   ;;  %s993_s15 = sphi %s1025_s15, %s1205_s15   ;;  %s989_s14 = sphi %s1023_s14, %s1204_s14   ;;  %s985_s13 = sphi %s1021_s13, %s1203_s13   ;;  %s981_s12 = sphi %s1019_s12, %s1202_s12  }
   0x4   : > { %p30_p0 = scmp.ge.s32.totalorder %s28_s17, 2  ;;  %p77_p2 = scmp.eq.s32.totalorder %s997_s16, 0 }
   0x5   : > { %s69_s19 = sadd.s32 1, %s985_s13  ;;  %p823_p5 = scmp.ge.s32.totalorder %s997_s16, 2 }
   0x6   : > { %s1207_s17 = smov (%p30_p0, %s28_s17), 0  ;;  %p78_p3 = por %p77_p2, %p76_p1 }
   0x7   : > { %s65_s18 = ssub.s32 %s993_s15, %s1207_s17  ;;  %169 = sbr.rel (%p823_p5) target bundleno = 34 (0x22), region = 20 }
   0x8   : > { %p67_p4 = scmp.eq.s32.totalorder %s65_s18, 0 }
   0xa   : > { %s1054_s20 = scalar_select %p67_p4, %s985_s13, %s69_s19  }
   0xe   : > { %172 = sbr.rel (!%p78_p3) target bundleno = 34 (0x22), region = 24  ;;  %s174_s21 = sand.u32 (%p78_p3), 1, %s985_s13  }
   0xf   : > { %s868_s22 = sshll.u32 (%p78_p3), %s993_s15, 3  ;;  %s824_s23 = sshll.u32 (%p78_p3), %s174_s21, 8 }
  0x10   : > { %s1062_s26 = scalar_lea.vmem (%p78_p3), %s1199_s1, %s868_s22  ;;  %s1067_s27 = scalar_lea.vmem (%p78_p3), [#allocation3], %s824_s23 }
  0x11   : > { %v272_v0 = vld [vmem:[%s1062_s26] sm:$0xff] (%p78_p3)  ;;  %v274_v1 = vld [vmem:[%s1062_s26 + $0x10] sm:$0xff] (%p78_p3) }
  0x12   : > { %v276_v2 = vld [vmem:[%s1062_s26 + $0x20] sm:$0xff] (%p78_p3)  ;;  %273 = vst [vmem:[%s1067_s27] sm:$0xff] (%p78_p3), %v272_v0  ;;  %275 = vst [vmem:[%s1067_s27 + $0x8] sm:$0xff] (%p78_p3), %v274_v1  ;;  %v278_v3 = vld [vmem:[%s1062_s26 + $0x30] sm:$0xff] (%p78_p3) }
  0x13   : > { %277 = vst [vmem:[%s1067_s27 + $0x10] sm:$0xff] (%p78_p3), %v276_v2  ;;  %v280_v4 = vld [vmem:[%s1062_s26 + $0x40] sm:$0xff] (%p78_p3)  ;;  %v282_v5 = vld [vmem:[%s1062_s26 + $0x50] sm:$0xff] (%p78_p3)  ;;  %279 = vst [vmem:[%s1067_s27 + $0x18] sm:$0xff] (%p78_p3), %v278_v3 }
  0x14   : > { %281 = vst [vmem:[%s1067_s27 + $0x20] sm:$0xff] (%p78_p3), %v280_v4  ;;  %283 = vst [vmem:[%s1067_s27 + $0x28] sm:$0xff] (%p78_p3), %v282_v5  ;;  %v284_v6 = vld [vmem:[%s1062_s26 + $0x60] sm:$0xff] (%p78_p3)  ;;  %v286_v7 = vld [vmem:[%s1062_s26 + $0x70] sm:$0xff] (%p78_p3) }
  0x15   : > { %v288_v8 = vld [vmem:[%s1062_s26 + $0x80] sm:$0xff]  ;;  %285 = vst [vmem:[%s1067_s27 + $0x30] sm:$0xff] %v284_v6  ;;  %287 = vst [vmem:[%s1067_s27 + $0x38] sm:$0xff] %v286_v7  ;;  %v290_v9 = vld [vmem:[%s1062_s26 + $0x90] sm:$0xff] }
  0x16   : > { %289 = vst [vmem:[%s1067_s27 + $0x40] sm:$0xff] %v288_v8  ;;  %v292_v10 = vld [vmem:[%s1062_s26 + $0xa0] sm:$0xff]  ;;  %v294_v11 = vld [vmem:[%s1062_s26 + $0xb0] sm:$0xff]  ;;  %291 = vst [vmem:[%s1067_s27 + $0x48] sm:$0xff] %v290_v9 }
  0x17   : > { %293 = vst [vmem:[%s1067_s27 + $0x50] sm:$0xff] %v292_v10  ;;  %295 = vst [vmem:[%s1067_s27 + $0x58] sm:$0xff] %v294_v11  ;;  %v296_v12 = vld [vmem:[%s1062_s26 + $0xc0] sm:$0xff]  ;;  %v298_v13 = vld [vmem:[%s1062_s26 + $0xd0] sm:$0xff] }
  0x18   : > { %v300_v14 = vld [vmem:[%s1062_s26 + $0xe0] sm:$0xff]  ;;  %297 = vst [vmem:[%s1067_s27 + $0x60] sm:$0xff] %v296_v12  ;;  %299 = vst [vmem:[%s1067_s27 + $0x68] sm:$0xff] %v298_v13  ;;  %v302_v15 = vld [vmem:[%s1062_s26 + $0xf0] sm:$0xff] }
  0x19   : > { %301 = vst [vmem:[%s1067_s27 + $0x70] sm:$0xff] %v300_v14  ;;  %v304_v16 = vld [vmem:[%s1062_s26 + $0x100] sm:$0xff]  ;;  %v306_v17 = vld [vmem:[%s1062_s26 + $0x110] sm:$0xff]  ;;  %303 = vst [vmem:[%s1067_s27 + $0x78] sm:$0xff] %v302_v15 }
  0x1a   : > { %305 = vst [vmem:[%s1067_s27 + $0x80] sm:$0xff] %v304_v16  ;;  %307 = vst [vmem:[%s1067_s27 + $0x88] sm:$0xff] %v306_v17  ;;  %v308_v18 = vld [vmem:[%s1062_s26 + $0x120] sm:$0xff]  ;;  %v310_v19 = vld [vmem:[%s1062_s26 + $0x130] sm:$0xff] }
  0x1b   : > { %v312_v20 = vld [vmem:[%s1062_s26 + $0x140] sm:$0xff]  ;;  %309 = vst [vmem:[%s1067_s27 + $0x90] sm:$0xff] %v308_v18  ;;  %311 = vst [vmem:[%s1067_s27 + $0x98] sm:$0xff] %v310_v19  ;;  %v314_v21 = vld [vmem:[%s1062_s26 + $0x150] sm:$0xff] }
  0x1c   : > { %313 = vst [vmem:[%s1067_s27 + $0xa0] sm:$0xff] %v312_v20  ;;  %v316_v22 = vld [vmem:[%s1062_s26 + $0x160] sm:$0xff]  ;;  %v318_v23 = vld [vmem:[%s1062_s26 + $0x170] sm:$0xff]  ;;  %315 = vst [vmem:[%s1067_s27 + $0xa8] sm:$0xff] %v314_v21 }
  0x1d   : > { %317 = vst [vmem:[%s1067_s27 + $0xb0] sm:$0xff] %v316_v22  ;;  %319 = vst [vmem:[%s1067_s27 + $0xb8] sm:$0xff] %v318_v23  ;;  %v320_v24 = vld [vmem:[%s1062_s26 + $0x180] sm:$0xff]  ;;  %v322_v25 = vld [vmem:[%s1062_s26 + $0x190] sm:$0xff] }
  0x1e   : > { %v324_v26 = vld [vmem:[%s1062_s26 + $0x1a0] sm:$0xff]  ;;  %321 = vst [vmem:[%s1067_s27 + $0xc0] sm:$0xff] %v320_v24  ;;  %323 = vst [vmem:[%s1067_s27 + $0xc8] sm:$0xff] %v322_v25  ;;  %v326_v27 = vld [vmem:[%s1062_s26 + $0x1b0] sm:$0xff] }
  0x1f   : > { %325 = vst [vmem:[%s1067_s27 + $0xd0] sm:$0xff] %v324_v26  ;;  %v328_v28 = vld [vmem:[%s1062_s26 + $0x1c0] sm:$0xff]  ;;  %v330_v29 = vld [vmem:[%s1062_s26 + $0x1d0] sm:$0xff]  ;;  %327 = vst [vmem:[%s1067_s27 + $0xd8] sm:$0xff] %v326_v27 }
  0x20   : > { %329 = vst [vmem:[%s1067_s27 + $0xe0] sm:$0xff] %v328_v28  ;;  %331 = vst [vmem:[%s1067_s27 + $0xe8] sm:$0xff] %v330_v29  ;;  %v332_v30 = vld [vmem:[%s1062_s26 + $0x1e0] sm:$0xff]  ;;  %v334_v31 = vld [vmem:[%s1062_s26 + $0x1f0] sm:$0xff] }
  0x21   : > { %333 = vst [vmem:[%s1067_s27 + $0xf0] sm:$0xff] %v332_v30  ;;  %335 = vst [vmem:[%s1067_s27 + $0xf8] sm:$0xff] %v334_v31 }
  0x22 PF: > { %p827_p6 = scmp.ge.s32.totalorder %s997_s16, 1  ;;  %p348_p7 = scmp.lt.s32.totalorder %s997_s16, 3 }
  0x24   : > { %p349_p8 = pnand %p827_p6, %p348_p7 }
  0x25   : > { %s355_s28 = sand.u32 (!%p349_p8), 1, %s981_s12   ;;  %v1136_v32 = vld [vmem:[%s1198_s0] sm:$0xff] (!%p349_p8)  ;;  %s829_s6 = sshll.u32 (!%p349_p8), %s989_s14, 1  ;;  %v682_v3 = vlaneseq (!%p349_p8) }
  0x26   : > { %352 = sbr.rel (%p349_p8) target bundleno = 321 (0x141), region = 66  ;;  %s828_s4 = sshll.u32 (!%p349_p8), %s355_s28, 8  ;;  %v833_v33 = vcombine.high (!%p349_p8), %v1136_v32, %v1136_v32  ;;  %v832_v2 = vcombine.low (!%p349_p8), %v1136_v32, %v1136_v32 }
  0x27   : > { %s1140_s5 = scalar_lea.vmem (!%p349_p8), [#allocation3], %s828_s4  ;;  %p408_p9 = scmp.lt.s32.totalorder (!%p349_p8), %s829_s6, 3  ;;  %v683_v4 = vshrl.u32 (!%p349_p8), %v682_v3, 7 }
  0x28   : > { %v909_v34 = vld [vmem:[%s1140_s5 + $0x4] ss:$8 sps:$4 sm:$0xff] (!%p349_p8)   ;;  %662 = vmatprep.mubr.bf16.mxu0 (!%p349_p8), %v833_v33  ;;  %v911_v35 = vld [vmem:[%s1140_s5] ss:$8 sps:$4 sm:$0xff] (!%p349_p8)   ;;  %v912_v36 = vld [vmem:[%s1140_s5 + $0x14] ss:$8 sps:$4 sm:$0xff] (!%p349_p8)  }
  0x29   : > { %630 = vmatprep.subr.bf16.mxu0 (!%p349_p8), %v909_v34  ;;  %v914_v37 = vld [vmem:[%s1140_s5 + $0x10] ss:$8 sps:$4 sm:$0xff] (!%p349_p8)   ;;  %v915_v38 = vld [vmem:[%s1140_s5 + $0x24] ss:$8 sps:$4 sm:$0xff] (!%p349_p8)   ;;  %v917_v39 = vld [vmem:[%s1140_s5 + $0x20] ss:$8 sps:$4 sm:$0xff] (!%p349_p8)  }
  0x2a   : > { %631 = vmatpush1.bf16.msra.mxu0 (!%p349_p8), %v911_v35  ;;  %v918_v40 = vld [vmem:[%s1140_s5 + $0x34] ss:$8 sps:$4 sm:$0xff] (!%p349_p8)   ;;  %v920_v41 = vld [vmem:[%s1140_s5 + $0x30] ss:$8 sps:$4 sm:$0xff] (!%p349_p8)   ;;  %v921_v42 = vld [vmem:[%s1140_s5 + $0x44] ss:$8 sps:$4 sm:$0xff] (!%p349_p8)  }
  0x2b   : > { %632 = vmatprep.subr.bf16.mxu0 (!%p349_p8), %v912_v36  ;;  %v923_v43 = vld [vmem:[%s1140_s5 + $0x40] ss:$8 sps:$4 sm:$0xff] (!%p349_p8)   ;;  %v924_v44 = vld [vmem:[%s1140_s5 + $0x54] ss:$8 sps:$4 sm:$0xff] (!%p349_p8)   ;;  %v926_v45 = vld [vmem:[%s1140_s5 + $0x50] ss:$8 sps:$4 sm:$0xff] (!%p349_p8)  }
  0x2c   : > { %v927_v46 = vld [vmem:[%s1140_s5 + $0x64] ss:$8 sps:$4 sm:$0xff] (!%p349_p8)   ;;  %v929_v47 = vld [vmem:[%s1140_s5 + $0x60] ss:$8 sps:$4 sm:$0xff] (!%p349_p8)   ;;  %v930_v48 = vld [vmem:[%s1140_s5 + $0x74] ss:$8 sps:$4 sm:$0xff] (!%p349_p8)  }
  0x2d   : > { %v932_v49 = vld [vmem:[%s1140_s5 + $0x70] ss:$8 sps:$4 sm:$0xff]   ;;  %v933_v50 = vld [vmem:[%s1140_s5 + $0x84] ss:$8 sps:$4 sm:$0xff]   ;;  %v935_v51 = vld [vmem:[%s1140_s5 + $0x80] ss:$8 sps:$4 sm:$0xff]  }
  0x2e   : > { %633 = vmatpush1.bf16.msra.mxu0 %v914_v37  ;;  %v936_v52 = vld [vmem:[%s1140_s5 + $0x94] ss:$8 sps:$4 sm:$0xff]   ;;  %v938_v53 = vld [vmem:[%s1140_s5 + $0x90] ss:$8 sps:$4 sm:$0xff]   ;;  %v939_v54 = vld [vmem:[%s1140_s5 + $0xa4] ss:$8 sps:$4 sm:$0xff]  }
  0x2f   : > { %634 = vmatprep.subr.bf16.mxu0 %v915_v38  ;;  %v941_v55 = vld [vmem:[%s1140_s5 + $0xa0] ss:$8 sps:$4 sm:$0xff]   ;;  %v942_v56 = vld [vmem:[%s1140_s5 + $0xb4] ss:$8 sps:$4 sm:$0xff]   ;;  %v944_v57 = vld [vmem:[%s1140_s5 + $0xb0] ss:$8 sps:$4 sm:$0xff]  }
  0x30   : > { %v945_v58 = vld [vmem:[%s1140_s5 + $0xc4] ss:$8 sps:$4 sm:$0xff]   ;;  %v947_v59 = vld [vmem:[%s1140_s5 + $0xc0] ss:$8 sps:$4 sm:$0xff]   ;;  %v948_v60 = vld [vmem:[%s1140_s5 + $0xd4] ss:$8 sps:$4 sm:$0xff]  }
  0x31   : > { %v950_v61 = vld [vmem:[%s1140_s5 + $0xd0] ss:$8 sps:$4 sm:$0xff]   ;;  %v951_v62 = vld [vmem:[%s1140_s5 + $0xe4] ss:$8 sps:$4 sm:$0xff]   ;;  %v953_v63 = vld [vmem:[%s1140_s5 + $0xe0] ss:$8 sps:$4 sm:$0xff]  }
  0x32   : > { %635 = vmatpush1.bf16.msra.mxu0 %v917_v39  ;;  %v954_v0 = vld [vmem:[%s1140_s5 + $0xf4] ss:$8 sps:$4 sm:$0xff]   ;;  %v956_v1 = vld [vmem:[%s1140_s5 + $0xf0] ss:$8 sps:$4 sm:$0xff]   ;;  %s1209_s6 = smov (!%p408_p9, %s829_s6), 3  ;;  %v684_v5 = vsub.s32 0, %v683_v4 }
  0x33   : > { %636 = vmatprep.subr.bf16.mxu0 %v918_v40  ;;  %s410_s9 = scalar_lea.vmem %s1200_s2, %s1209_s6  ;;  %v688_v7 = vsub.s32 1, %v683_v4  ;;  %s831_s10 = sshll.u32 %s1209_s6, 3 }
  0x34   : > { %v680_v6 = vld [vmem:[%s410_s9] sm:$0x3]  ;;  %s420_s18 = scalar_lea.vmem %s1201_s3, %s831_s10 }
  0x35   : > { %v685_v8 = vrot.slane %v680_v6, %v684_v5  ;;  %v689_v9 = vrot.slane %v680_v6, %v688_v7 }
  0x36   : > { %637 = vmatpush1.bf16.msra.mxu0 %v920_v41 }
  0x37   : > { %638 = vmatprep.subr.bf16.mxu0 %v921_v42 }
  0x3a   : > { %639 = vmatpush1.bf16.msra.mxu0 %v923_v43 }
  0x3b   : > { %640 = vmatprep.subr.bf16.mxu0 %v924_v44 }
  0x3e   : > { %641 = vmatpush1.bf16.msra.mxu0 %v926_v45 }
  0x3f   : > { %642 = vmatprep.subr.bf16.mxu0 %v927_v46 }
  0x42   : > { %643 = vmatpush1.bf16.msra.mxu0 %v929_v47 }
  0x43   : > { %644 = vmatprep.subr.bf16.mxu0 %v930_v48 }
  0x46   : > { %645 = vmatpush1.bf16.msra.mxu0 %v932_v49 }
  0x47   : > { %646 = vmatprep.subr.bf16.mxu0 %v933_v50 }
  0x4a   : > { %647 = vmatpush1.bf16.msra.mxu0 %v935_v51 }
  0x4b   : > { %648 = vmatprep.subr.bf16.mxu0 %v936_v52 }
  0x4e   : > { %649 = vmatpush1.bf16.msra.mxu0 %v938_v53 }
  0x4f   : > { %650 = vmatprep.subr.bf16.mxu0 %v939_v54 }
  0x52   : > { %651 = vmatpush1.bf16.msra.mxu0 %v941_v55 }
  0x53   : > { %652 = vmatprep.subr.bf16.mxu0 %v942_v56 }
  0x56   : > { %653 = vmatpush1.bf16.msra.mxu0 %v944_v57 }
  0x57   : > { %654 = vmatprep.subr.bf16.mxu0 %v945_v58 }
  0x5a   : > { %655 = vmatpush1.bf16.msra.mxu0 %v947_v59 }
  0x5b   : > { %656 = vmatprep.subr.bf16.mxu0 %v948_v60 }
  0x5e   : > { %657 = vmatpush1.bf16.msra.mxu0 %v950_v61 }
  0x5f   : > { %658 = vmatprep.subr.bf16.mxu0 %v951_v62 }
  0x62   : > { %659 = vmatpush1.bf16.msra.mxu0 %v953_v63 }
  0x63   : > { %660 = vmatprep.subr.bf16.mxu0 %v954_v0 }
  0x66   : > { %661 = vmatpush1.bf16.msra.mxu0 %v956_v1 }
  0x69   : > { %663 = vmatmul.mubr.bf16.vlgmr.msra.gmra.mrb[0].mxu0 %v832_v2 }
 0x13c   : > { %v664_v10 = vpop.f32.mrb[0].mxu0 }
 0x13d   : > { %v692_v11 = vadd.f32 %v685_v8, %v664_v10  ;;  %v666_v12 = vpop.f32.mrb[1].mxu0 }
 0x13e   : > { %v693_v13 = vadd.f32 %v689_v9, %v666_v12  ;;  %v668_v14 = vpop.f32.mrb[2].mxu0 }
 0x13f   : > { %694 = vst [vmem:[%s420_s18] sm:$0xff] %v692_v11  ;;  %v669_v15 = vpop.f32.mrb[3].mxu0 }
 0x140   : > { %695 = vst [vmem:[%s420_s18 + $0x8] sm:$0xff] %v693_v13 }
 0x141 PF: > { %s13_s16 = sadd.s32 1, %s997_s16   ;;  %s1202_s12 = smov %s985_s13 }
 0x142   : > { %p10_p10 = scmp.ge.s32.totalorder %s13_s16, 4   ;;  %s1203_s13 = smov %s1054_s20 }
 0x143   : > { %s1204_s14 = smov %s993_s15  ;;  %s1205_s15 = smov %s1207_s17 }
 0x144   :  { %12 = sbr.rel (!%p10_p10) target bundleno = 3 (0x3), region = 119 }

// kernel: st_classifier_forward.38
= control target key start
LH: loop header
LB: loop body
LE: loop exit
PB: predicated region body
PF: predicated region fallthrough
CT: control target
= control target key end

     0   :  { %s1606_s15 = smov 0   ;;  %s1608_s16 = smov 0   ;;  %s1925_s0 = inlined_call_operand.vmem [shape: bf16[8,4608], index: 0, kind: input, shape index: {}]   ;;  %s1926_s1 = inlined_call_operand.vmem [shape: bf16[4608,512], index: 1, kind: input, shape index: {}]   ;;  %s1927_s2 = inlined_call_operand.vmem [shape: f32[1,512], index: 2, kind: input, shape index: {}]   ;;  %s1928_s3 = inlined_call_operand.vmem [shape: f32[8,512], index: 3, kind: input, shape index: {}]   ;;  %s1929_s4 = inlined_call_operand.vmem [shape: f32[8,512], index: 4, kind: output, shape index: {}]  }
   0x1   :  { %s1610_s17 = smov 0   ;;  %s1612_s18 = smov 0  }
   0x2   :  { %s1614_s19 = smov 0   ;;  %s1616_s20 = smov 0  }
   0x3   :  { %s1618_s21 = smov 0  }
   0x4 LB: > { %s26_s22 = sadd.s32 1, %s1570_s19  ;;  %s29_s23 = sadd.s32 1, %s1574_s20  ;;  %s1578_s21 = sphi %s1618_s21, %s14_s21   ;;  %s1574_s20 = sphi %s1616_s20, %s1935_s20   ;;  %s1570_s19 = sphi %s1614_s19, %s1934_s19   ;;  %s1566_s18 = sphi %s1612_s18, %s1933_s18   ;;  %s1562_s17 = sphi %s1610_s17, %s1932_s17   ;;  %s1558_s16 = sphi %s1608_s16, %s1931_s16   ;;  %s1554_s15 = sphi %s1606_s15, %s1930_s15  }
   0x5   : > { %p27_p0 = scmp.ge.s32.totalorder %s26_s22, 9  ;;  %p77_p1 = scmp.ne.s32.totalorder %s1558_s16, %s1554_s15 }
   0x6   : > { %p78_p2 = scmp.eq.s32.totalorder %s1578_s21, 0  ;;  %s70_s27 = sadd.s32 1, %s1558_s16 }
   0x7   : > { %s1937_s22 = smov (%p27_p0, %s26_s22), 0  ;;  %s1939_s23 = smov (!%p27_p0, %s29_s23), %s1574_s20 }
   0x8   : > { %p79_p3 = por %p78_p2, %p77_p1  ;;  %p31_p4 = scmp.ge.s32.totalorder %s1939_s23, 2 }
   0x9   : > { %s65_s24 = ssub.s32 %s1570_s19, %s1937_s22  ;;  %p1279_p6 = scmp.ge.s32.totalorder %s1578_s21, 18 }
   0xa   : > { %s1941_s23 = smov (%p31_p4, %s1939_s23), 0 }
   0xb   : > { %s66_s25 = ssub.s32 %s1574_s20, %s1941_s23  ;;  %185 = sbr.rel (%p1279_p6) target bundleno = 57 (0x39), region = 16 }
   0xc   : > { %s67_s26 = sor.u32 %s66_s25, %s65_s24 }
   0xd   : > { %p68_p5 = scmp.eq.s32.totalorder %s67_s26, 0 }
   0xf   : > { %s1657_s28 = scalar_select %p68_p5, %s1558_s16, %s70_s27  }
  0x12   : > { %201 = sbr.rel (!%p79_p3) target bundleno = 57 (0x39), region = 24  ;;  %s203_s29 = sand.u32 (%p79_p3), 1, %s1558_s16  }
  0x13   : > { %s1282_s30 = sshll.u32 (%p79_p3), %s1574_s20, 1  ;;  %s1280_s5 = sshll.u32 (%p79_p3), %s203_s29, 9 }
  0x14   : > { %s1366_s6 = sshll.u32 (%p79_p3), %s1570_s19, 8  ;;  %s1671_s12 = scalar_lea.vmem (%p79_p3), [#allocation3], %s1280_s5 }
  0x15   : > { %s209_s7 = sadd.s32 (%p79_p3), %s1366_s6, %s1282_s30 }
  0x16   : > { %s1284_s8 = sshll.u32 (%p79_p3), %s209_s7, 2 }
  0x17   : > { %s1666_s11 = scalar_lea.vmem (%p79_p3), %s1926_s1, %s1284_s8 }
  0x18   : > { %v365_v0 = vld [vmem:[%s1666_s11] sm:$0xff] (%p79_p3)  ;;  %v367_v1 = vld [vmem:[%s1666_s11 + $0x10] sm:$0xff] (%p79_p3) }
  0x19   : > { %v369_v2 = vld [vmem:[%s1666_s11 + $0x20] sm:$0xff]  ;;  %366 = vst [vmem:[%s1671_s12] sm:$0xff] %v365_v0  ;;  %368 = vst [vmem:[%s1671_s12 + $0x8] sm:$0xff] %v367_v1  ;;  %v371_v3 = vld [vmem:[%s1666_s11 + $0x30] sm:$0xff] }
  0x1a   : > { %370 = vst [vmem:[%s1671_s12 + $0x10] sm:$0xff] %v369_v2  ;;  %v373_v4 = vld [vmem:[%s1666_s11 + $0x40] sm:$0xff]  ;;  %v375_v5 = vld [vmem:[%s1666_s11 + $0x50] sm:$0xff]  ;;  %372 = vst [vmem:[%s1671_s12 + $0x18] sm:$0xff] %v371_v3 }
  0x1b   : > { %374 = vst [vmem:[%s1671_s12 + $0x20] sm:$0xff] %v373_v4  ;;  %376 = vst [vmem:[%s1671_s12 + $0x28] sm:$0xff] %v375_v5  ;;  %v377_v6 = vld [vmem:[%s1666_s11 + $0x60] sm:$0xff]  ;;  %v379_v7 = vld [vmem:[%s1666_s11 + $0x70] sm:$0xff] }
  0x1c   : > { %v381_v8 = vld [vmem:[%s1666_s11 + $0x80] sm:$0xff]  ;;  %378 = vst [vmem:[%s1671_s12 + $0x30] sm:$0xff] %v377_v6  ;;  %380 = vst [vmem:[%s1671_s12 + $0x38] sm:$0xff] %v379_v7  ;;  %v383_v9 = vld [vmem:[%s1666_s11 + $0x90] sm:$0xff] }
  0x1d   : > { %382 = vst [vmem:[%s1671_s12 + $0x40] sm:$0xff] %v381_v8  ;;  %v385_v10 = vld [vmem:[%s1666_s11 + $0xa0] sm:$0xff]  ;;  %v387_v11 = vld [vmem:[%s1666_s11 + $0xb0] sm:$0xff]  ;;  %384 = vst [vmem:[%s1671_s12 + $0x48] sm:$0xff] %v383_v9 }
  0x1e   : > { %386 = vst [vmem:[%s1671_s12 + $0x50] sm:$0xff] %v385_v10  ;;  %388 = vst [vmem:[%s1671_s12 + $0x58] sm:$0xff] %v387_v11  ;;  %v389_v12 = vld [vmem:[%s1666_s11 + $0xc0] sm:$0xff]  ;;  %v391_v13 = vld [vmem:[%s1666_s11 + $0xd0] sm:$0xff] }
  0x1f   : > { %v393_v14 = vld [vmem:[%s1666_s11 + $0xe0] sm:$0xff]  ;;  %390 = vst [vmem:[%s1671_s12 + $0x60] sm:$0xff] %v389_v12  ;;  %392 = vst [vmem:[%s1671_s12 + $0x68] sm:$0xff] %v391_v13  ;;  %v395_v15 = vld [vmem:[%s1666_s11 + $0xf0] sm:$0xff] }
  0x20   : > { %394 = vst [vmem:[%s1671_s12 + $0x70] sm:$0xff] %v393_v14  ;;  %v397_v16 = vld [vmem:[%s1666_s11 + $0x100] sm:$0xff]  ;;  %v399_v17 = vld [vmem:[%s1666_s11 + $0x110] sm:$0xff]  ;;  %396 = vst [vmem:[%s1671_s12 + $0x78] sm:$0xff] %v395_v15 }
  0x21   : > { %398 = vst [vmem:[%s1671_s12 + $0x80] sm:$0xff] %v397_v16  ;;  %400 = vst [vmem:[%s1671_s12 + $0x88] sm:$0xff] %v399_v17  ;;  %v401_v18 = vld [vmem:[%s1666_s11 + $0x120] sm:$0xff]  ;;  %v403_v19 = vld [vmem:[%s1666_s11 + $0x130] sm:$0xff] }
  0x22   : > { %v405_v20 = vld [vmem:[%s1666_s11 + $0x140] sm:$0xff]  ;;  %402 = vst [vmem:[%s1671_s12 + $0x90] sm:$0xff] %v401_v18  ;;  %404 = vst [vmem:[%s1671_s12 + $0x98] sm:$0xff] %v403_v19  ;;  %v407_v21 = vld [vmem:[%s1666_s11 + $0x150] sm:$0xff] }
  0x23   : > { %406 = vst [vmem:[%s1671_s12 + $0xa0] sm:$0xff] %v405_v20  ;;  %v409_v22 = vld [vmem:[%s1666_s11 + $0x160] sm:$0xff]  ;;  %v411_v23 = vld [vmem:[%s1666_s11 + $0x170] sm:$0xff]  ;;  %408 = vst [vmem:[%s1671_s12 + $0xa8] sm:$0xff] %v407_v21 }
  0x24   : > { %410 = vst [vmem:[%s1671_s12 + $0xb0] sm:$0xff] %v409_v22  ;;  %412 = vst [vmem:[%s1671_s12 + $0xb8] sm:$0xff] %v411_v23  ;;  %v413_v24 = vld [vmem:[%s1666_s11 + $0x180] sm:$0xff]  ;;  %v415_v25 = vld [vmem:[%s1666_s11 + $0x190] sm:$0xff] }
  0x25   : > { %v417_v26 = vld [vmem:[%s1666_s11 + $0x1a0] sm:$0xff]  ;;  %414 = vst [vmem:[%s1671_s12 + $0xc0] sm:$0xff] %v413_v24  ;;  %416 = vst [vmem:[%s1671_s12 + $0xc8] sm:$0xff] %v415_v25  ;;  %v419_v27 = vld [vmem:[%s1666_s11 + $0x1b0] sm:$0xff] }
  0x26   : > { %418 = vst [vmem:[%s1671_s12 + $0xd0] sm:$0xff] %v417_v26  ;;  %v421_v28 = vld [vmem:[%s1666_s11 + $0x1c0] sm:$0xff]  ;;  %v423_v29 = vld [vmem:[%s1666_s11 + $0x1d0] sm:$0xff]  ;;  %420 = vst [vmem:[%s1671_s12 + $0xd8] sm:$0xff] %v419_v27 }
  0x27   : > { %422 = vst [vmem:[%s1671_s12 + $0xe0] sm:$0xff] %v421_v28  ;;  %424 = vst [vmem:[%s1671_s12 + $0xe8] sm:$0xff] %v423_v29  ;;  %v425_v30 = vld [vmem:[%s1666_s11 + $0x1e0] sm:$0xff]  ;;  %v427_v31 = vld [vmem:[%s1666_s11 + $0x1f0] sm:$0xff] }
  0x28   : > { %v429_v32 = vld [vmem:[%s1666_s11 + $0x200] sm:$0xff]  ;;  %426 = vst [vmem:[%s1671_s12 + $0xf0] sm:$0xff] %v425_v30  ;;  %428 = vst [vmem:[%s1671_s12 + $0xf8] sm:$0xff] %v427_v31  ;;  %v431_v33 = vld [vmem:[%s1666_s11 + $0x210] sm:$0xff] }
  0x29   : > { %430 = vst [vmem:[%s1671_s12 + $0x100] sm:$0xff] %v429_v32  ;;  %v433_v34 = vld [vmem:[%s1666_s11 + $0x220] sm:$0xff]  ;;  %v435_v35 = vld [vmem:[%s1666_s11 + $0x230] sm:$0xff]  ;;  %432 = vst [vmem:[%s1671_s12 + $0x108] sm:$0xff] %v431_v33 }
  0x2a   : > { %434 = vst [vmem:[%s1671_s12 + $0x110] sm:$0xff] %v433_v34  ;;  %436 = vst [vmem:[%s1671_s12 + $0x118] sm:$0xff] %v435_v35  ;;  %v437_v36 = vld [vmem:[%s1666_s11 + $0x240] sm:$0xff]  ;;  %v439_v37 = vld [vmem:[%s1666_s11 + $0x250] sm:$0xff] }
  0x2b   : > { %v441_v38 = vld [vmem:[%s1666_s11 + $0x260] sm:$0xff]  ;;  %438 = vst [vmem:[%s1671_s12 + $0x120] sm:$0xff] %v437_v36  ;;  %440 = vst [vmem:[%s1671_s12 + $0x128] sm:$0xff] %v439_v37  ;;  %v443_v39 = vld [vmem:[%s1666_s11 + $0x270] sm:$0xff] }
  0x2c   : > { %442 = vst [vmem:[%s1671_s12 + $0x130] sm:$0xff] %v441_v38  ;;  %v445_v40 = vld [vmem:[%s1666_s11 + $0x280] sm:$0xff]  ;;  %v447_v41 = vld [vmem:[%s1666_s11 + $0x290] sm:$0xff]  ;;  %444 = vst [vmem:[%s1671_s12 + $0x138] sm:$0xff] %v443_v39 }
  0x2d   : > { %446 = vst [vmem:[%s1671_s12 + $0x140] sm:$0xff] %v445_v40  ;;  %448 = vst [vmem:[%s1671_s12 + $0x148] sm:$0xff] %v447_v41  ;;  %v449_v42 = vld [vmem:[%s1666_s11 + $0x2a0] sm:$0xff]  ;;  %v451_v43 = vld [vmem:[%s1666_s11 + $0x2b0] sm:$0xff] }
  0x2e   : > { %v453_v44 = vld [vmem:[%s1666_s11 + $0x2c0] sm:$0xff]  ;;  %450 = vst [vmem:[%s1671_s12 + $0x150] sm:$0xff] %v449_v42  ;;  %452 = vst [vmem:[%s1671_s12 + $0x158] sm:$0xff] %v451_v43  ;;  %v455_v45 = vld [vmem:[%s1666_s11 + $0x2d0] sm:$0xff] }
  0x2f   : > { %454 = vst [vmem:[%s1671_s12 + $0x160] sm:$0xff] %v453_v44  ;;  %v457_v46 = vld [vmem:[%s1666_s11 + $0x2e0] sm:$0xff]  ;;  %v459_v47 = vld [vmem:[%s1666_s11 + $0x2f0] sm:$0xff]  ;;  %456 = vst [vmem:[%s1671_s12 + $0x168] sm:$0xff] %v455_v45 }
  0x30   : > { %458 = vst [vmem:[%s1671_s12 + $0x170] sm:$0xff] %v457_v46  ;;  %460 = vst [vmem:[%s1671_s12 + $0x178] sm:$0xff] %v459_v47  ;;  %v461_v48 = vld [vmem:[%s1666_s11 + $0x300] sm:$0xff]  ;;  %v463_v49 = vld [vmem:[%s1666_s11 + $0x310] sm:$0xff] }
  0x31   : > { %v465_v50 = vld [vmem:[%s1666_s11 + $0x320] sm:$0xff]  ;;  %462 = vst [vmem:[%s1671_s12 + $0x180] sm:$0xff] %v461_v48  ;;  %464 = vst [vmem:[%s1671_s12 + $0x188] sm:$0xff] %v463_v49  ;;  %v467_v51 = vld [vmem:[%s1666_s11 + $0x330] sm:$0xff] }
  0x32   : > { %466 = vst [vmem:[%s1671_s12 + $0x190] sm:$0xff] %v465_v50  ;;  %v469_v52 = vld [vmem:[%s1666_s11 + $0x340] sm:$0xff]  ;;  %v471_v53 = vld [vmem:[%s1666_s11 + $0x350] sm:$0xff]  ;;  %468 = vst [vmem:[%s1671_s12 + $0x198] sm:$0xff] %v467_v51 }
  0x33   : > { %470 = vst [vmem:[%s1671_s12 + $0x1a0] sm:$0xff] %v469_v52  ;;  %472 = vst [vmem:[%s1671_s12 + $0x1a8] sm:$0xff] %v471_v53  ;;  %v473_v54 = vld [vmem:[%s1666_s11 + $0x360] sm:$0xff]  ;;  %v475_v55 = vld [vmem:[%s1666_s11 + $0x370] sm:$0xff] }
  0x34   : > { %v477_v56 = vld [vmem:[%s1666_s11 + $0x380] sm:$0xff]  ;;  %474 = vst [vmem:[%s1671_s12 + $0x1b0] sm:$0xff] %v473_v54  ;;  %476 = vst [vmem:[%s1671_s12 + $0x1b8] sm:$0xff] %v475_v55  ;;  %v479_v57 = vld [vmem:[%s1666_s11 + $0x390] sm:$0xff] }
  0x35   : > { %478 = vst [vmem:[%s1671_s12 + $0x1c0] sm:$0xff] %v477_v56  ;;  %v481_v58 = vld [vmem:[%s1666_s11 + $0x3a0] sm:$0xff]  ;;  %v483_v59 = vld [vmem:[%s1666_s11 + $0x3b0] sm:$0xff]  ;;  %480 = vst [vmem:[%s1671_s12 + $0x1c8] sm:$0xff] %v479_v57 }
  0x36   : > { %482 = vst [vmem:[%s1671_s12 + $0x1d0] sm:$0xff] %v481_v58  ;;  %484 = vst [vmem:[%s1671_s12 + $0x1d8] sm:$0xff] %v483_v59  ;;  %v485_v60 = vld [vmem:[%s1666_s11 + $0x3c0] sm:$0xff]  ;;  %v487_v61 = vld [vmem:[%s1666_s11 + $0x3d0] sm:$0xff] }
  0x37   : > { %v489_v62 = vld [vmem:[%s1666_s11 + $0x3e0] sm:$0xff]  ;;  %486 = vst [vmem:[%s1671_s12 + $0x1e0] sm:$0xff] %v485_v60  ;;  %488 = vst [vmem:[%s1671_s12 + $0x1e8] sm:$0xff] %v487_v61  ;;  %v491_v63 = vld [vmem:[%s1666_s11 + $0x3f0] sm:$0xff] }
  0x38   : > { %490 = vst [vmem:[%s1671_s12 + $0x1f0] sm:$0xff] %v489_v62  ;;  %492 = vst [vmem:[%s1671_s12 + $0x1f8] sm:$0xff] %v491_v63 }
  0x39 PF: > { %p1285_p7 = scmp.ge.s32.totalorder %s1578_s21, 1  ;;  %p518_p8 = scmp.lt.s32.totalorder %s1578_s21, 19 }
  0x3b   : > { %p519_p9 = pnand %p1285_p7, %p518_p8 }
  0x3c   : > { %s525_s13 = sand.u32 (!%p519_p9), 1, %s1554_s15   ;;  %s1287_s14 = sshll.u32 (!%p519_p9), %s1562_s17, 2 }
  0x3d   : > { %522 = sbr.rel (%p519_p9) target bundleno = 377 (0x179), region = 70  ;;  %s1286_s24 = sshll.u32 (!%p519_p9), %s525_s13, 9 }
  0x3e   : > { %p579_p10 = scmp.lt.s32.totalorder (!%p519_p9), %s1287_s14, 35  ;;  %s1289_s25 = sshll.u32 (!%p519_p9), %s1566_s18, 1 }
  0x3f   : > { %p589_p11 = scmp.lt.s32.totalorder (!%p519_p9), %s1289_s25, 3  ;;  %s1825_s13 = scalar_lea.vmem (!%p519_p9), [#allocation3], %s1286_s24 }
  0x40   : > { %p1294_p12 = scmp.ne.s32.totalorder (!%p519_p9), %s1562_s17, 0 }
  0x44   : > { %s1943_s14 = smov (!%p579_p10, %s1287_s14), 35  ;;  %s1945_s25 = smov (!%p589_p11, %s1289_s25), 3 }
  0x45   : > { %s1288_s26 = sshll.u32 %s1943_s14, 2  ;;  %s591_s15 = scalar_lea.vmem %s1927_s2, %s1945_s25  ;;  %v1580_v0 = vmov (!%p1294_p12), 0.0  }
  0x46   : > { %s1806_s30 = scalar_lea.vmem %s1925_s0, %s1288_s26  ;;  %s1291_s7 = sshll.u32 %s1945_s25, 3  ;;  %617 = vst [vmem:[#allocation2] sm:$0xff] (!%p1294_p12), %v1580_v0  ;;  %618 = vst [vmem:[#allocation2 + $0x8] sm:$0xff] (!%p1294_p12), %v1580_v0 }
  0x47   : > { %s1818_s18 = scalar_lea.vmem %s1928_s3, %s1291_s7  ;;  %s1823_s12 = scalar_lea.vmem %s1929_s4, %s1291_s7 }
  0x48   : > { %616 = sbr.rel (%p1294_p12) target bundleno = 79 (0x4f), region = 78 }
  0x4f PF: > { %v1424_v1 = vld [vmem:[%s1825_s13 + $0x4] ss:$8 sps:$4 sm:$0xff]   ;;  %v1428_v3 = vld [vmem:[%s1825_s13] ss:$8 sps:$4 sm:$0xff]   ;;  %v1430_v5 = vld [vmem:[%s1825_s13 + $0x14] ss:$8 sps:$4 sm:$0xff]  }
  0x50   : > { %v1426_v2 = vld [vmem:[%s1825_s13 + $0x104] ss:$8 sps:$4 sm:$0xff]   ;;  %1021 = vmatprep.subr.bf16.mxu0 %v1424_v1  ;;  %v1429_v4 = vld [vmem:[%s1825_s13 + $0x100] ss:$8 sps:$4 sm:$0xff]   ;;  %v1432_v6 = vld [vmem:[%s1825_s13 + $0x114] ss:$8 sps:$4 sm:$0xff]  }
  0x51   : > { %1062 = vmatprep.subr.bf16.mxu1 %v1426_v2  ;;  %1022 = vmatpush1.bf16.msra.mxu0 %v1428_v3  ;;  %v1434_v7 = vld [vmem:[%s1825_s13 + $0x10] ss:$8 sps:$4 sm:$0xff]   ;;  %v1436_v9 = vld [vmem:[%s1825_s13 + $0x24] ss:$8 sps:$4 sm:$0xff]   ;;  %v1440_v11 = vld [vmem:[%s1825_s13 + $0x20] ss:$8 sps:$4 sm:$0xff]  }
  0x52   : > { %1063 = vmatpush1.bf16.msra.mxu1 %v1429_v4  ;;  %1023 = vmatprep.subr.bf16.mxu0 %v1430_v5  ;;  %v1435_v8 = vld [vmem:[%s1825_s13 + $0x110] ss:$8 sps:$4 sm:$0xff]   ;;  %v1438_v10 = vld [vmem:[%s1825_s13 + $0x124] ss:$8 sps:$4 sm:$0xff]   ;;  %v1441_v12 = vld [vmem:[%s1825_s13 + $0x120] ss:$8 sps:$4 sm:$0xff]  }
  0x53   : > { %1064 = vmatprep.subr.bf16.mxu1 %v1432_v6  ;;  %v1442_v13 = vld [vmem:[%s1825_s13 + $0x34] ss:$8 sps:$4 sm:$0xff]   ;;  %v1446_v15 = vld [vmem:[%s1825_s13 + $0x30] ss:$8 sps:$4 sm:$0xff]   ;;  %v1448_v17 = vld [vmem:[%s1825_s13 + $0x44] ss:$8 sps:$4 sm:$0xff]  }
  0x54   : > { %v1444_v14 = vld [vmem:[%s1825_s13 + $0x134] ss:$8 sps:$4 sm:$0xff]   ;;  %v1447_v16 = vld [vmem:[%s1825_s13 + $0x130] ss:$8 sps:$4 sm:$0xff]   ;;  %v1450_v18 = vld [vmem:[%s1825_s13 + $0x144] ss:$8 sps:$4 sm:$0xff]  }
  0x55   : > { %1024 = vmatpush1.bf16.msra.mxu0 %v1434_v7  ;;  %v1452_v19 = vld [vmem:[%s1825_s13 + $0x40] ss:$8 sps:$4 sm:$0xff]   ;;  %v1454_v21 = vld [vmem:[%s1825_s13 + $0x54] ss:$8 sps:$4 sm:$0xff]   ;;  %v1458_v23 = vld [vmem:[%s1825_s13 + $0x50] ss:$8 sps:$4 sm:$0xff]  }
  0x56   : > { %1065 = vmatpush1.bf16.msra.mxu1 %v1435_v8  ;;  %1025 = vmatprep.subr.bf16.mxu0 %v1436_v9  ;;  %v1453_v20 = vld [vmem:[%s1825_s13 + $0x140] ss:$8 sps:$4 sm:$0xff]   ;;  %v1456_v22 = vld [vmem:[%s1825_s13 + $0x154] ss:$8 sps:$4 sm:$0xff]   ;;  %v1459_v24 = vld [vmem:[%s1825_s13 + $0x150] ss:$8 sps:$4 sm:$0xff]  }
  0x57   : > { %1066 = vmatprep.subr.bf16.mxu1 %v1438_v10  ;;  %v1460_v25 = vld [vmem:[%s1825_s13 + $0x64] ss:$8 sps:$4 sm:$0xff]   ;;  %v1464_v27 = vld [vmem:[%s1825_s13 + $0x60] ss:$8 sps:$4 sm:$0xff]   ;;  %v1466_v29 = vld [vmem:[%s1825_s13 + $0x74] ss:$8 sps:$4 sm:$0xff]  }
  0x58   : > { %v1462_v26 = vld [vmem:[%s1825_s13 + $0x164] ss:$8 sps:$4 sm:$0xff]   ;;  %v1465_v28 = vld [vmem:[%s1825_s13 + $0x160] ss:$8 sps:$4 sm:$0xff]   ;;  %v1468_v30 = vld [vmem:[%s1825_s13 + $0x174] ss:$8 sps:$4 sm:$0xff]  }
  0x59   : > { %1026 = vmatpush1.bf16.msra.mxu0 %v1440_v11  ;;  %v1470_v31 = vld [vmem:[%s1825_s13 + $0x70] ss:$8 sps:$4 sm:$0xff]   ;;  %v1472_v33 = vld [vmem:[%s1825_s13 + $0x84] ss:$8 sps:$4 sm:$0xff]   ;;  %v1476_v35 = vld [vmem:[%s1825_s13 + $0x80] ss:$8 sps:$4 sm:$0xff]  }
  0x5a   : > { %1067 = vmatpush1.bf16.msra.mxu1 %v1441_v12  ;;  %1027 = vmatprep.subr.bf16.mxu0 %v1442_v13  ;;  %v1471_v32 = vld [vmem:[%s1825_s13 + $0x170] ss:$8 sps:$4 sm:$0xff]   ;;  %v1474_v34 = vld [vmem:[%s1825_s13 + $0x184] ss:$8 sps:$4 sm:$0xff]   ;;  %v1477_v36 = vld [vmem:[%s1825_s13 + $0x180] ss:$8 sps:$4 sm:$0xff]  }
  0x5b   : > { %1068 = vmatprep.subr.bf16.mxu1 %v1444_v14  ;;  %v1478_v37 = vld [vmem:[%s1825_s13 + $0x94] ss:$8 sps:$4 sm:$0xff]   ;;  %v1482_v39 = vld [vmem:[%s1825_s13 + $0x90] ss:$8 sps:$4 sm:$0xff]   ;;  %v1484_v41 = vld [vmem:[%s1825_s13 + $0xa4] ss:$8 sps:$4 sm:$0xff]  }
  0x5c   : > { %v1480_v38 = vld [vmem:[%s1825_s13 + $0x194] ss:$8 sps:$4 sm:$0xff]   ;;  %v1483_v40 = vld [vmem:[%s1825_s13 + $0x190] ss:$8 sps:$4 sm:$0xff]   ;;  %v1486_v42 = vld [vmem:[%s1825_s13 + $0x1a4] ss:$8 sps:$4 sm:$0xff]  }
  0x5d   : > { %1028 = vmatpush1.bf16.msra.mxu0 %v1446_v15  ;;  %v1488_v43 = vld [vmem:[%s1825_s13 + $0xa0] ss:$8 sps:$4 sm:$0xff]   ;;  %v1490_v45 = vld [vmem:[%s1825_s13 + $0xb4] ss:$8 sps:$4 sm:$0xff]   ;;  %v1494_v50 = vld [vmem:[%s1825_s13 + $0xb0] ss:$8 sps:$4 sm:$0xff]  }
  0x5e   : > { %1069 = vmatpush1.bf16.msra.mxu1 %v1447_v16  ;;  %1029 = vmatprep.subr.bf16.mxu0 %v1448_v17  ;;  %v1489_v44 = vld [vmem:[%s1825_s13 + $0x1a0] ss:$8 sps:$4 sm:$0xff]   ;;  %v1492_v46 = vld [vmem:[%s1825_s13 + $0x1b4] ss:$8 sps:$4 sm:$0xff]   ;;  %v1495_v51 = vld [vmem:[%s1825_s13 + $0x1b0] ss:$8 sps:$4 sm:$0xff]  }
  0x5f   : > { %1070 = vmatprep.subr.bf16.mxu1 %v1450_v18  ;;  %v621_v47 = vld [vmem:[%s1806_s30] sm:$0xff]  ;;  %v622_v49 = vld [vmem:[%s1806_s30 + $0x8] sm:$0xff]  ;;  %v1496_v53 = vld [vmem:[%s1825_s13 + $0xc4] ss:$8 sps:$4 sm:$0xff]   ;;  %p1363_p13 = scmp.ne.s32.totalorder %s1562_s17, 8 }
  0x60   : > { %v1296_v48 = vcombine.high %v621_v47, %v621_v47  ;;  %v1298_v52 = vcombine.high %v622_v49, %v622_v49  ;;  %v1498_v54 = vld [vmem:[%s1825_s13 + $0x1c4] ss:$8 sps:$4 sm:$0xff]   ;;  %v1500_v55 = vld [vmem:[%s1825_s13 + $0xc0] ss:$8 sps:$4 sm:$0xff]   ;;  %v1502_v57 = vld [vmem:[%s1825_s13 + $0xd4] ss:$8 sps:$4 sm:$0xff]   ;;  %v1295_v5 = vcombine.low %v621_v47, %v621_v47  ;;  %v1297_v6 = vcombine.low %v622_v49, %v622_v49 }
  0x61   : > { %1030 = vmatpush1.bf16.msra.mxu0 %v1452_v19  ;;  %v1501_v56 = vld [vmem:[%s1825_s13 + $0x1c0] ss:$8 sps:$4 sm:$0xff]   ;;  %v1504_v58 = vld [vmem:[%s1825_s13 + $0x1d4] ss:$8 sps:$4 sm:$0xff]   ;;  %v1506_v59 = vld [vmem:[%s1825_s13 + $0xd0] ss:$8 sps:$4 sm:$0xff]  }
  0x62   : > { %1071 = vmatpush1.bf16.msra.mxu1 %v1453_v20  ;;  %1031 = vmatprep.subr.bf16.mxu0 %v1454_v21  ;;  %v1507_v60 = vld [vmem:[%s1825_s13 + $0x1d0] ss:$8 sps:$4 sm:$0xff]   ;;  %v1508_v61 = vld [vmem:[%s1825_s13 + $0xe4] ss:$8 sps:$4 sm:$0xff]   ;;  %v1512_v63 = vld [vmem:[%s1825_s13 + $0xe0] ss:$8 sps:$4 sm:$0xff]   ;;  %v1115_v21 = vlaneseq (!%p1363_p13) }
  0x63   : > { %1072 = vmatprep.subr.bf16.mxu1 %v1456_v22  ;;  %1053 = vmatprep.mubr.bf16.mxu0 %v1296_v48  ;;  %v1510_v62 = vld [vmem:[%s1825_s13 + $0x1e4] ss:$8 sps:$4 sm:$0xff]   ;;  %v1513_v0 = vld [vmem:[%s1825_s13 + $0x1e0] ss:$8 sps:$4 sm:$0xff]   ;;  %v1514_v1 = vld [vmem:[%s1825_s13 + $0xf4] ss:$8 sps:$4 sm:$0xff]  }
  0x64   : > { %1094 = vmatprep.mubr.bf16.mxu1 %v1298_v52  ;;  %v1516_v2 = vld [vmem:[%s1825_s13 + $0x1f4] ss:$8 sps:$4 sm:$0xff]   ;;  %v1518_v3 = vld [vmem:[%s1825_s13 + $0xf0] ss:$8 sps:$4 sm:$0xff]   ;;  %v1116_v22 = vshrl.u32 (!%p1363_p13), %v1115_v21, 7 }
  0x65   : > { %1032 = vmatpush1.bf16.msra.mxu0 %v1458_v23  ;;  %v1519_v4 = vld [vmem:[%s1825_s13 + $0x1f0] ss:$8 sps:$4 sm:$0xff]  }
  0x66   : > { %1073 = vmatpush1.bf16.msra.mxu1 %v1459_v24  ;;  %1033 = vmatprep.subr.bf16.mxu0 %v1460_v25  ;;  %v619_v8 = vld [vmem:[#allocation2] sm:$0xff]  ;;  %v620_v12 = vld [vmem:[#allocation2 + $0x8] sm:$0xff]  ;;  %v1117_v24 = vsub.s32 (!%p1363_p13), 0, %v1116_v22  ;;  %v1121_v25 = vsub.s32 (!%p1363_p13), 1, %v1116_v22 }
  0x67   : > { %1074 = vmatprep.subr.bf16.mxu1 %v1462_v26  ;;  %v1113_v23 = vld [vmem:[%s591_s15] sm:$0x3] (!%p1363_p13) }
  0x69   : > { %1034 = vmatpush1.bf16.msra.mxu0 %v1464_v27 }
  0x6a   : > { %1075 = vmatpush1.bf16.msra.mxu1 %v1465_v28  ;;  %1035 = vmatprep.subr.bf16.mxu0 %v1466_v29  ;;  %v1118_v28 = vrot.slane (!%p1363_p13), %v1113_v23, %v1117_v24  ;;  %v1122_v29 = vrot.slane (!%p1363_p13), %v1113_v23, %v1121_v25 }
  0x6b   : > { %1076 = vmatprep.subr.bf16.mxu1 %v1468_v30  ;;  %v1127_v30 = vld [vmem:[%s1818_s18] sm:$0xff] (!%p1363_p13) }
  0x6d   : > { %1036 = vmatpush1.bf16.msra.mxu0 %v1470_v31  ;;  %v1128_v31 = vld [vmem:[%s1818_s18 + $0x8] sm:$0xff] (!%p1363_p13) }
  0x6e   : > { %1077 = vmatpush1.bf16.msra.mxu1 %v1471_v32  ;;  %1037 = vmatprep.subr.bf16.mxu0 %v1472_v33 }
  0x6f   : > { %1078 = vmatprep.subr.bf16.mxu1 %v1474_v34 }
  0x71   : > { %1038 = vmatpush1.bf16.msra.mxu0 %v1476_v35 }
  0x72   : > { %1079 = vmatpush1.bf16.msra.mxu1 %v1477_v36  ;;  %1039 = vmatprep.subr.bf16.mxu0 %v1478_v37 }
  0x73   : > { %1080 = vmatprep.subr.bf16.mxu1 %v1480_v38 }
  0x75   : > { %1040 = vmatpush1.bf16.msra.mxu0 %v1482_v39 }
  0x76   : > { %1081 = vmatpush1.bf16.msra.mxu1 %v1483_v40  ;;  %1041 = vmatprep.subr.bf16.mxu0 %v1484_v41 }
  0x77   : > { %1082 = vmatprep.subr.bf16.mxu1 %v1486_v42 }
  0x79   : > { %1042 = vmatpush1.bf16.msra.mxu0 %v1488_v43 }
  0x7a   : > { %1083 = vmatpush1.bf16.msra.mxu1 %v1489_v44  ;;  %1043 = vmatprep.subr.bf16.mxu0 %v1490_v45 }
  0x7b   : > { %1084 = vmatprep.subr.bf16.mxu1 %v1492_v46 }
  0x7d   : > { %1044 = vmatpush1.bf16.msra.mxu0 %v1494_v50 }
  0x7e   : > { %1085 = vmatpush1.bf16.msra.mxu1 %v1495_v51  ;;  %1045 = vmatprep.subr.bf16.mxu0 %v1496_v53 }
  0x7f   : > { %1086 = vmatprep.subr.bf16.mxu1 %v1498_v54 }
  0x81   : > { %1046 = vmatpush1.bf16.msra.mxu0 %v1500_v55 }
  0x82   : > { %1087 = vmatpush1.bf16.msra.mxu1 %v1501_v56  ;;  %1047 = vmatprep.subr.bf16.mxu0 %v1502_v57 }
  0x83   : > { %1088 = vmatprep.subr.bf16.mxu1 %v1504_v58 }
  0x85   : > { %1048 = vmatpush1.bf16.msra.mxu0 %v1506_v59 }
  0x86   : > { %1089 = vmatpush1.bf16.msra.mxu1 %v1507_v60  ;;  %1049 = vmatprep.subr.bf16.mxu0 %v1508_v61 }
  0x87   : > { %1090 = vmatprep.subr.bf16.mxu1 %v1510_v62 }
  0x89   : > { %1050 = vmatpush1.bf16.msra.mxu0 %v1512_v63 }
  0x8a   : > { %1091 = vmatpush1.bf16.msra.mxu1 %v1513_v0  ;;  %1051 = vmatprep.subr.bf16.mxu0 %v1514_v1 }
  0x8b   : > { %1092 = vmatprep.subr.bf16.mxu1 %v1516_v2 }
  0x8d   : > { %1052 = vmatpush1.bf16.msra.mxu0 %v1518_v3 }
  0x8e   : > { %1093 = vmatpush1.bf16.msra.mxu1 %v1519_v4 }
  0x90   : > { %1054 = vmatmul.mubr.bf16.vlgmr.msra.gmra.mrb[0].mxu0 %v1295_v5 }
  0x91   : > { %1095 = vmatmul.mubr.bf16.vlgmr.msra.gmra.mrb[0].mxu1 %v1297_v6 }
 0x163   : > { %v1055_v7 = vpop.f32.mrb[0].mxu0 }
 0x164   : > { %v1096_v9 = vpop.f32.mrb[0].mxu1  ;;  %v1057_v11 = vpop.f32.mrb[1].mxu0  ;;  %1110 = sbr.rel (%p1363_p13) target bundleno = 377 (0x179), region = 82 }
 0x165   : > { %v1097_v10 = vadd.f32 %v1096_v9, %v1055_v7  ;;  %v1098_v13 = vpop.f32.mrb[1].mxu1  ;;  %v1059_v15 = vpop.f32.mrb[2].mxu0 }
 0x166   : > { %v1099_v14 = vadd.f32 %v1098_v13, %v1057_v11  ;;  %v1100_v16 = vpop.f32.mrb[2].mxu1  ;;  %v1060_v18 = vpop.f32.mrb[3].mxu0 }
 0x167   : > { %v1103_v17 = vadd.f32 %v1097_v10, %v619_v8  ;;  %v1101_v19 = vpop.f32.mrb[3].mxu1 }
 0x168   : > { %v1104_v20 = vadd.f32 %v1099_v14, %v620_v12 }
 0x169   : > { %1105 = vst [vmem:[#allocation2] sm:$0xff] %v1103_v17 }
 0x16a   : > { %1106 = vst [vmem:[#allocation2 + $0x8] sm:$0xff] %v1104_v20 }
 0x170   : > { %v1111_v26 = vld [vmem:[#allocation2] sm:$0xff] }
 0x171   : > { %v1112_v27 = vld [vmem:[#allocation2 + $0x8] sm:$0xff]  ;;  %v1125_v32 = vadd.f32 %v1118_v28, %v1111_v26 }
 0x172   : > { %v1126_v33 = vadd.f32 %v1122_v29, %v1112_v27 }
 0x173   : > { %v1129_v34 = vadd.f32 %v1127_v30, %v1125_v32 }
 0x174   : > { %v1130_v35 = vadd.f32 %v1128_v31, %v1126_v33 }
 0x175   : > { %v1131_v36 = vmax.f32 %v1129_v34, 0.0 }
 0x176   : > { %v1132_v37 = vmax.f32 %v1130_v35, 0.0 }
 0x177   : > { %1133 = vst [vmem:[%s1823_s12] sm:$0xff] %v1131_v36 }
 0x178   : > { %1134 = vst [vmem:[%s1823_s12 + $0x8] sm:$0xff] %v1132_v37 }
 0x179 PF: > { %s14_s21 = sadd.s32 1, %s1578_s21   ;;  %s1930_s15 = smov %s1558_s16 }
 0x17a   : > { %p11_p0 = scmp.ge.s32.totalorder %s14_s21, 20   ;;  %s1931_s16 = smov %s1657_s28 }
 0x17b   : > { %s1932_s17 = smov %s1570_s19  ;;  %s1933_s18 = smov %s1574_s20 }
 0x17c   : > { %s1934_s19 = smov %s1937_s22  ;;  %s1935_s20 = smov %s1941_s23 }
 0x17d   :  { %13 = sbr.rel (!%p11_p0) target bundleno = 4 (0x4), region = 126 }

// kernel: st_classifier_forward.39
= control target key start
LH: loop header
LB: loop body
LE: loop exit
PB: predicated region body
PF: predicated region fallthrough
CT: control target
= control target key end

     0   :  { %s1514_s12 = smov 0   ;;  %s1516_s13 = smov 0   ;;  %s1826_s0 = inlined_call_operand.vmem [shape: bf16[8,4608], index: 0, kind: input, shape index: {}]   ;;  %s1827_s1 = inlined_call_operand.vmem [shape: bf16[4608,512], index: 1, kind: input, shape index: {}]   ;;  %s1828_s2 = inlined_call_operand.vmem [shape: f32[1,512], index: 2, kind: input, shape index: {}]   ;;  %s1829_s3 = inlined_call_operand.vmem [shape: f32[8,512], index: 3, kind: output, shape index: {}]  }
   0x1   :  { %s1518_s14 = smov 0   ;;  %s1520_s15 = smov 0  }
   0x2   :  { %s1522_s16 = smov 0   ;;  %s1524_s17 = smov 0  }
   0x3   :  { %s1526_s18 = smov 0  }
   0x4 LB: > { %s25_s19 = sadd.s32 1, %s1483_s16  ;;  %s28_s20 = sadd.s32 1, %s1487_s17  ;;  %s1491_s18 = sphi %s1526_s18, %s13_s18   ;;  %s1487_s17 = sphi %s1524_s17, %s1835_s17   ;;  %s1483_s16 = sphi %s1522_s16, %s1834_s16   ;;  %s1479_s15 = sphi %s1520_s15, %s1833_s15   ;;  %s1475_s14 = sphi %s1518_s14, %s1832_s14   ;;  %s1471_s13 = sphi %s1516_s13, %s1831_s13   ;;  %s1467_s12 = sphi %s1514_s12, %s1830_s12  }
   0x5   : > { %p26_p0 = scmp.ge.s32.totalorder %s25_s19, 9  ;;  %p76_p1 = scmp.ne.s32.totalorder %s1471_s13, %s1467_s12 }
   0x6   : > { %p77_p2 = scmp.eq.s32.totalorder %s1491_s18, 0  ;;  %s69_s24 = sadd.s32 1, %s1471_s13 }
   0x7   : > { %s1837_s19 = smov (%p26_p0, %s25_s19), 0  ;;  %s1839_s20 = smov (!%p26_p0, %s28_s20), %s1487_s17 }
   0x8   : > { %p78_p3 = por %p77_p2, %p76_p1  ;;  %p30_p4 = scmp.ge.s32.totalorder %s1839_s20, 2 }
   0x9   : > { %s64_s21 = ssub.s32 %s1483_s16, %s1837_s19  ;;  %p1194_p6 = scmp.ge.s32.totalorder %s1491_s18, 18 }
   0xa   : > { %s1841_s20 = smov (%p30_p4, %s1839_s20), 0 }
   0xb   : > { %s65_s22 = ssub.s32 %s1487_s17, %s1841_s20  ;;  %156 = sbr.rel (%p1194_p6) target bundleno = 57 (0x39), region = 16 }
   0xc   : > { %s66_s23 = sor.u32 %s65_s22, %s64_s21 }
   0xd   : > { %p67_p5 = scmp.eq.s32.totalorder %s66_s23, 0 }
   0xf   : > { %s1565_s25 = scalar_select %p67_p5, %s1471_s13, %s69_s24  }
  0x12   : > { %172 = sbr.rel (!%p78_p3) target bundleno = 57 (0x39), region = 24  ;;  %s174_s26 = sand.u32 (%p78_p3), 1, %s1471_s13  }
  0x13   : > { %s1197_s27 = sshll.u32 (%p78_p3), %s1487_s17, 1  ;;  %s1195_s28 = sshll.u32 (%p78_p3), %s174_s26, 9 }
  0x14   : > { %s1279_s29 = sshll.u32 (%p78_p3), %s1483_s16, 8  ;;  %s1579_s8 = scalar_lea.vmem (%p78_p3), [#allocation3], %s1195_s28 }
  0x15   : > { %s180_s30 = sadd.s32 (%p78_p3), %s1279_s29, %s1197_s27 }
  0x16   : > { %s1199_s4 = sshll.u32 (%p78_p3), %s180_s30, 2 }
  0x17   : > { %s1574_s7 = scalar_lea.vmem (%p78_p3), %s1827_s1, %s1199_s4 }
  0x18   : > { %v336_v0 = vld [vmem:[%s1574_s7] sm:$0xff] (%p78_p3)  ;;  %v338_v1 = vld [vmem:[%s1574_s7 + $0x10] sm:$0xff] (%p78_p3) }
  0x19   : > { %v340_v2 = vld [vmem:[%s1574_s7 + $0x20] sm:$0xff]  ;;  %337 = vst [vmem:[%s1579_s8] sm:$0xff] %v336_v0  ;;  %339 = vst [vmem:[%s1579_s8 + $0x8] sm:$0xff] %v338_v1  ;;  %v342_v3 = vld [vmem:[%s1574_s7 + $0x30] sm:$0xff] }
  0x1a   : > { %341 = vst [vmem:[%s1579_s8 + $0x10] sm:$0xff] %v340_v2  ;;  %v344_v4 = vld [vmem:[%s1574_s7 + $0x40] sm:$0xff]  ;;  %v346_v5 = vld [vmem:[%s1574_s7 + $0x50] sm:$0xff]  ;;  %343 = vst [vmem:[%s1579_s8 + $0x18] sm:$0xff] %v342_v3 }
  0x1b   : > { %345 = vst [vmem:[%s1579_s8 + $0x20] sm:$0xff] %v344_v4  ;;  %347 = vst [vmem:[%s1579_s8 + $0x28] sm:$0xff] %v346_v5  ;;  %v348_v6 = vld [vmem:[%s1574_s7 + $0x60] sm:$0xff]  ;;  %v350_v7 = vld [vmem:[%s1574_s7 + $0x70] sm:$0xff] }
  0x1c   : > { %v352_v8 = vld [vmem:[%s1574_s7 + $0x80] sm:$0xff]  ;;  %349 = vst [vmem:[%s1579_s8 + $0x30] sm:$0xff] %v348_v6  ;;  %351 = vst [vmem:[%s1579_s8 + $0x38] sm:$0xff] %v350_v7  ;;  %v354_v9 = vld [vmem:[%s1574_s7 + $0x90] sm:$0xff] }
  0x1d   : > { %353 = vst [vmem:[%s1579_s8 + $0x40] sm:$0xff] %v352_v8  ;;  %v356_v10 = vld [vmem:[%s1574_s7 + $0xa0] sm:$0xff]  ;;  %v358_v11 = vld [vmem:[%s1574_s7 + $0xb0] sm:$0xff]  ;;  %355 = vst [vmem:[%s1579_s8 + $0x48] sm:$0xff] %v354_v9 }
  0x1e   : > { %357 = vst [vmem:[%s1579_s8 + $0x50] sm:$0xff] %v356_v10  ;;  %359 = vst [vmem:[%s1579_s8 + $0x58] sm:$0xff] %v358_v11  ;;  %v360_v12 = vld [vmem:[%s1574_s7 + $0xc0] sm:$0xff]  ;;  %v362_v13 = vld [vmem:[%s1574_s7 + $0xd0] sm:$0xff] }
  0x1f   : > { %v364_v14 = vld [vmem:[%s1574_s7 + $0xe0] sm:$0xff]  ;;  %361 = vst [vmem:[%s1579_s8 + $0x60] sm:$0xff] %v360_v12  ;;  %363 = vst [vmem:[%s1579_s8 + $0x68] sm:$0xff] %v362_v13  ;;  %v366_v15 = vld [vmem:[%s1574_s7 + $0xf0] sm:$0xff] }
  0x20   : > { %365 = vst [vmem:[%s1579_s8 + $0x70] sm:$0xff] %v364_v14  ;;  %v368_v16 = vld [vmem:[%s1574_s7 + $0x100] sm:$0xff]  ;;  %v370_v17 = vld [vmem:[%s1574_s7 + $0x110] sm:$0xff]  ;;  %367 = vst [vmem:[%s1579_s8 + $0x78] sm:$0xff] %v366_v15 }
  0x21   : > { %369 = vst [vmem:[%s1579_s8 + $0x80] sm:$0xff] %v368_v16  ;;  %371 = vst [vmem:[%s1579_s8 + $0x88] sm:$0xff] %v370_v17  ;;  %v372_v18 = vld [vmem:[%s1574_s7 + $0x120] sm:$0xff]  ;;  %v374_v19 = vld [vmem:[%s1574_s7 + $0x130] sm:$0xff] }
  0x22   : > { %v376_v20 = vld [vmem:[%s1574_s7 + $0x140] sm:$0xff]  ;;  %373 = vst [vmem:[%s1579_s8 + $0x90] sm:$0xff] %v372_v18  ;;  %375 = vst [vmem:[%s1579_s8 + $0x98] sm:$0xff] %v374_v19  ;;  %v378_v21 = vld [vmem:[%s1574_s7 + $0x150] sm:$0xff] }
  0x23   : > { %377 = vst [vmem:[%s1579_s8 + $0xa0] sm:$0xff] %v376_v20  ;;  %v380_v22 = vld [vmem:[%s1574_s7 + $0x160] sm:$0xff]  ;;  %v382_v23 = vld [vmem:[%s1574_s7 + $0x170] sm:$0xff]  ;;  %379 = vst [vmem:[%s1579_s8 + $0xa8] sm:$0xff] %v378_v21 }
  0x24   : > { %381 = vst [vmem:[%s1579_s8 + $0xb0] sm:$0xff] %v380_v22  ;;  %383 = vst [vmem:[%s1579_s8 + $0xb8] sm:$0xff] %v382_v23  ;;  %v384_v24 = vld [vmem:[%s1574_s7 + $0x180] sm:$0xff]  ;;  %v386_v25 = vld [vmem:[%s1574_s7 + $0x190] sm:$0xff] }
  0x25   : > { %v388_v26 = vld [vmem:[%s1574_s7 + $0x1a0] sm:$0xff]  ;;  %385 = vst [vmem:[%s1579_s8 + $0xc0] sm:$0xff] %v384_v24  ;;  %387 = vst [vmem:[%s1579_s8 + $0xc8] sm:$0xff] %v386_v25  ;;  %v390_v27 = vld [vmem:[%s1574_s7 + $0x1b0] sm:$0xff] }
  0x26   : > { %389 = vst [vmem:[%s1579_s8 + $0xd0] sm:$0xff] %v388_v26  ;;  %v392_v28 = vld [vmem:[%s1574_s7 + $0x1c0] sm:$0xff]  ;;  %v394_v29 = vld [vmem:[%s1574_s7 + $0x1d0] sm:$0xff]  ;;  %391 = vst [vmem:[%s1579_s8 + $0xd8] sm:$0xff] %v390_v27 }
  0x27   : > { %393 = vst [vmem:[%s1579_s8 + $0xe0] sm:$0xff] %v392_v28  ;;  %395 = vst [vmem:[%s1579_s8 + $0xe8] sm:$0xff] %v394_v29  ;;  %v396_v30 = vld [vmem:[%s1574_s7 + $0x1e0] sm:$0xff]  ;;  %v398_v31 = vld [vmem:[%s1574_s7 + $0x1f0] sm:$0xff] }
  0x28   : > { %v400_v32 = vld [vmem:[%s1574_s7 + $0x200] sm:$0xff]  ;;  %397 = vst [vmem:[%s1579_s8 + $0xf0] sm:$0xff] %v396_v30  ;;  %399 = vst [vmem:[%s1579_s8 + $0xf8] sm:$0xff] %v398_v31  ;;  %v402_v33 = vld [vmem:[%s1574_s7 + $0x210] sm:$0xff] }
  0x29   : > { %401 = vst [vmem:[%s1579_s8 + $0x100] sm:$0xff] %v400_v32  ;;  %v404_v34 = vld [vmem:[%s1574_s7 + $0x220] sm:$0xff]  ;;  %v406_v35 = vld [vmem:[%s1574_s7 + $0x230] sm:$0xff]  ;;  %403 = vst [vmem:[%s1579_s8 + $0x108] sm:$0xff] %v402_v33 }
  0x2a   : > { %405 = vst [vmem:[%s1579_s8 + $0x110] sm:$0xff] %v404_v34  ;;  %407 = vst [vmem:[%s1579_s8 + $0x118] sm:$0xff] %v406_v35  ;;  %v408_v36 = vld [vmem:[%s1574_s7 + $0x240] sm:$0xff]  ;;  %v410_v37 = vld [vmem:[%s1574_s7 + $0x250] sm:$0xff] }
  0x2b   : > { %v412_v38 = vld [vmem:[%s1574_s7 + $0x260] sm:$0xff]  ;;  %409 = vst [vmem:[%s1579_s8 + $0x120] sm:$0xff] %v408_v36  ;;  %411 = vst [vmem:[%s1579_s8 + $0x128] sm:$0xff] %v410_v37  ;;  %v414_v39 = vld [vmem:[%s1574_s7 + $0x270] sm:$0xff] }
  0x2c   : > { %413 = vst [vmem:[%s1579_s8 + $0x130] sm:$0xff] %v412_v38  ;;  %v416_v40 = vld [vmem:[%s1574_s7 + $0x280] sm:$0xff]  ;;  %v418_v41 = vld [vmem:[%s1574_s7 + $0x290] sm:$0xff]  ;;  %415 = vst [vmem:[%s1579_s8 + $0x138] sm:$0xff] %v414_v39 }
  0x2d   : > { %417 = vst [vmem:[%s1579_s8 + $0x140] sm:$0xff] %v416_v40  ;;  %419 = vst [vmem:[%s1579_s8 + $0x148] sm:$0xff] %v418_v41  ;;  %v420_v42 = vld [vmem:[%s1574_s7 + $0x2a0] sm:$0xff]  ;;  %v422_v43 = vld [vmem:[%s1574_s7 + $0x2b0] sm:$0xff] }
  0x2e   : > { %v424_v44 = vld [vmem:[%s1574_s7 + $0x2c0] sm:$0xff]  ;;  %421 = vst [vmem:[%s1579_s8 + $0x150] sm:$0xff] %v420_v42  ;;  %423 = vst [vmem:[%s1579_s8 + $0x158] sm:$0xff] %v422_v43  ;;  %v426_v45 = vld [vmem:[%s1574_s7 + $0x2d0] sm:$0xff] }
  0x2f   : > { %425 = vst [vmem:[%s1579_s8 + $0x160] sm:$0xff] %v424_v44  ;;  %v428_v46 = vld [vmem:[%s1574_s7 + $0x2e0] sm:$0xff]  ;;  %v430_v47 = vld [vmem:[%s1574_s7 + $0x2f0] sm:$0xff]  ;;  %427 = vst [vmem:[%s1579_s8 + $0x168] sm:$0xff] %v426_v45 }
  0x30   : > { %429 = vst [vmem:[%s1579_s8 + $0x170] sm:$0xff] %v428_v46  ;;  %431 = vst [vmem:[%s1579_s8 + $0x178] sm:$0xff] %v430_v47  ;;  %v432_v48 = vld [vmem:[%s1574_s7 + $0x300] sm:$0xff]  ;;  %v434_v49 = vld [vmem:[%s1574_s7 + $0x310] sm:$0xff] }
  0x31   : > { %v436_v50 = vld [vmem:[%s1574_s7 + $0x320] sm:$0xff]  ;;  %433 = vst [vmem:[%s1579_s8 + $0x180] sm:$0xff] %v432_v48  ;;  %435 = vst [vmem:[%s1579_s8 + $0x188] sm:$0xff] %v434_v49  ;;  %v438_v51 = vld [vmem:[%s1574_s7 + $0x330] sm:$0xff] }
  0x32   : > { %437 = vst [vmem:[%s1579_s8 + $0x190] sm:$0xff] %v436_v50  ;;  %v440_v52 = vld [vmem:[%s1574_s7 + $0x340] sm:$0xff]  ;;  %v442_v53 = vld [vmem:[%s1574_s7 + $0x350] sm:$0xff]  ;;  %439 = vst [vmem:[%s1579_s8 + $0x198] sm:$0xff] %v438_v51 }
  0x33   : > { %441 = vst [vmem:[%s1579_s8 + $0x1a0] sm:$0xff] %v440_v52  ;;  %443 = vst [vmem:[%s1579_s8 + $0x1a8] sm:$0xff] %v442_v53  ;;  %v444_v54 = vld [vmem:[%s1574_s7 + $0x360] sm:$0xff]  ;;  %v446_v55 = vld [vmem:[%s1574_s7 + $0x370] sm:$0xff] }
  0x34   : > { %v448_v56 = vld [vmem:[%s1574_s7 + $0x380] sm:$0xff]  ;;  %445 = vst [vmem:[%s1579_s8 + $0x1b0] sm:$0xff] %v444_v54  ;;  %447 = vst [vmem:[%s1579_s8 + $0x1b8] sm:$0xff] %v446_v55  ;;  %v450_v57 = vld [vmem:[%s1574_s7 + $0x390] sm:$0xff] }
  0x35   : > { %449 = vst [vmem:[%s1579_s8 + $0x1c0] sm:$0xff] %v448_v56  ;;  %v452_v58 = vld [vmem:[%s1574_s7 + $0x3a0] sm:$0xff]  ;;  %v454_v59 = vld [vmem:[%s1574_s7 + $0x3b0] sm:$0xff]  ;;  %451 = vst [vmem:[%s1579_s8 + $0x1c8] sm:$0xff] %v450_v57 }
  0x36   : > { %453 = vst [vmem:[%s1579_s8 + $0x1d0] sm:$0xff] %v452_v58  ;;  %455 = vst [vmem:[%s1579_s8 + $0x1d8] sm:$0xff] %v454_v59  ;;  %v456_v60 = vld [vmem:[%s1574_s7 + $0x3c0] sm:$0xff]  ;;  %v458_v61 = vld [vmem:[%s1574_s7 + $0x3d0] sm:$0xff] }
  0x37   : > { %v460_v62 = vld [vmem:[%s1574_s7 + $0x3e0] sm:$0xff]  ;;  %457 = vst [vmem:[%s1579_s8 + $0x1e0] sm:$0xff] %v456_v60  ;;  %459 = vst [vmem:[%s1579_s8 + $0x1e8] sm:$0xff] %v458_v61  ;;  %v462_v63 = vld [vmem:[%s1574_s7 + $0x3f0] sm:$0xff] }
  0x38   : > { %461 = vst [vmem:[%s1579_s8 + $0x1f0] sm:$0xff] %v460_v62  ;;  %463 = vst [vmem:[%s1579_s8 + $0x1f8] sm:$0xff] %v462_v63 }
  0x39 PF: > { %p1200_p7 = scmp.ge.s32.totalorder %s1491_s18, 1  ;;  %p476_p8 = scmp.lt.s32.totalorder %s1491_s18, 19 }
  0x3b   : > { %p477_p9 = pnand %p1200_p7, %p476_p8 }
  0x3c   : > { %s483_s9 = sand.u32 (!%p477_p9), 1, %s1467_s12   ;;  %s1202_s10 = sshll.u32 (!%p477_p9), %s1475_s14, 2 }
  0x3d   : > { %480 = sbr.rel (%p477_p9) target bundleno = 374 (0x176), region = 66  ;;  %s1201_s11 = sshll.u32 (!%p477_p9), %s483_s9, 9 }
  0x3e   : > { %p526_p10 = scmp.lt.s32.totalorder (!%p477_p9), %s1202_s10, 35  ;;  %s1204_s21 = sshll.u32 (!%p477_p9), %s1479_s15, 1 }
  0x3f   : > { %p536_p11 = scmp.lt.s32.totalorder (!%p477_p9), %s1204_s21, 3  ;;  %s1728_s5 = scalar_lea.vmem (!%p477_p9), [#allocation3], %s1201_s11 }
  0x40   : > { %p1207_p12 = scmp.ne.s32.totalorder (!%p477_p9), %s1475_s14, 0 }
  0x44   : > { %s1843_s10 = smov (!%p526_p10, %s1202_s10), 35  ;;  %s1845_s21 = smov (!%p536_p11, %s1204_s21), 3 }
  0x45   : > { %s1203_s22 = sshll.u32 %s1843_s10, 2  ;;  %s538_s12 = scalar_lea.vmem %s1828_s2, %s1845_s21  ;;  %v1493_v0 = vmov (!%p1207_p12), 0.0  }
  0x46   : > { %s1714_s26 = scalar_lea.vmem %s1826_s0, %s1203_s22  ;;  %s1206_s29 = sshll.u32 %s1845_s21, 3  ;;  %554 = vst [vmem:[#allocation2] sm:$0xff] (!%p1207_p12), %v1493_v0  ;;  %555 = vst [vmem:[#allocation2 + $0x8] sm:$0xff] (!%p1207_p12), %v1493_v0 }
  0x47   : > { %s1726_s15 = scalar_lea.vmem %s1829_s3, %s1206_s29  ;;  %553 = sbr.rel (%p1207_p12) target bundleno = 78 (0x4e), region = 74 }
  0x4e PF: > { %v1337_v1 = vld [vmem:[%s1728_s5 + $0x4] ss:$8 sps:$4 sm:$0xff]   ;;  %v1341_v3 = vld [vmem:[%s1728_s5] ss:$8 sps:$4 sm:$0xff]   ;;  %v1343_v5 = vld [vmem:[%s1728_s5 + $0x14] ss:$8 sps:$4 sm:$0xff]  }
  0x4f   : > { %v1339_v2 = vld [vmem:[%s1728_s5 + $0x104] ss:$8 sps:$4 sm:$0xff]   ;;  %958 = vmatprep.subr.bf16.mxu0 %v1337_v1  ;;  %v1342_v4 = vld [vmem:[%s1728_s5 + $0x100] ss:$8 sps:$4 sm:$0xff]   ;;  %v1345_v6 = vld [vmem:[%s1728_s5 + $0x114] ss:$8 sps:$4 sm:$0xff]  }
  0x50   : > { %999 = vmatprep.subr.bf16.mxu1 %v1339_v2  ;;  %959 = vmatpush1.bf16.msra.mxu0 %v1341_v3  ;;  %v1347_v7 = vld [vmem:[%s1728_s5 + $0x10] ss:$8 sps:$4 sm:$0xff]   ;;  %v1349_v9 = vld [vmem:[%s1728_s5 + $0x24] ss:$8 sps:$4 sm:$0xff]   ;;  %v1353_v11 = vld [vmem:[%s1728_s5 + $0x20] ss:$8 sps:$4 sm:$0xff]  }
  0x51   : > { %1000 = vmatpush1.bf16.msra.mxu1 %v1342_v4  ;;  %960 = vmatprep.subr.bf16.mxu0 %v1343_v5  ;;  %v1348_v8 = vld [vmem:[%s1728_s5 + $0x110] ss:$8 sps:$4 sm:$0xff]   ;;  %v1351_v10 = vld [vmem:[%s1728_s5 + $0x124] ss:$8 sps:$4 sm:$0xff]   ;;  %v1354_v12 = vld [vmem:[%s1728_s5 + $0x120] ss:$8 sps:$4 sm:$0xff]  }
  0x52   : > { %1001 = vmatprep.subr.bf16.mxu1 %v1345_v6  ;;  %v1355_v13 = vld [vmem:[%s1728_s5 + $0x34] ss:$8 sps:$4 sm:$0xff]   ;;  %v1359_v15 = vld [vmem:[%s1728_s5 + $0x30] ss:$8 sps:$4 sm:$0xff]   ;;  %v1361_v17 = vld [vmem:[%s1728_s5 + $0x44] ss:$8 sps:$4 sm:$0xff]  }
  0x53   : > { %v1357_v14 = vld [vmem:[%s1728_s5 + $0x134] ss:$8 sps:$4 sm:$0xff]   ;;  %v1360_v16 = vld [vmem:[%s1728_s5 + $0x130] ss:$8 sps:$4 sm:$0xff]   ;;  %v1363_v18 = vld [vmem:[%s1728_s5 + $0x144] ss:$8 sps:$4 sm:$0xff]  }
  0x54   : > { %961 = vmatpush1.bf16.msra.mxu0 %v1347_v7  ;;  %v1365_v19 = vld [vmem:[%s1728_s5 + $0x40] ss:$8 sps:$4 sm:$0xff]   ;;  %v1367_v21 = vld [vmem:[%s1728_s5 + $0x54] ss:$8 sps:$4 sm:$0xff]   ;;  %v1371_v23 = vld [vmem:[%s1728_s5 + $0x50] ss:$8 sps:$4 sm:$0xff]  }
  0x55   : > { %1002 = vmatpush1.bf16.msra.mxu1 %v1348_v8  ;;  %962 = vmatprep.subr.bf16.mxu0 %v1349_v9  ;;  %v1366_v20 = vld [vmem:[%s1728_s5 + $0x140] ss:$8 sps:$4 sm:$0xff]   ;;  %v1369_v22 = vld [vmem:[%s1728_s5 + $0x154] ss:$8 sps:$4 sm:$0xff]   ;;  %v1372_v24 = vld [vmem:[%s1728_s5 + $0x150] ss:$8 sps:$4 sm:$0xff]  }
  0x56   : > { %1003 = vmatprep.subr.bf16.mxu1 %v1351_v10  ;;  %v1373_v25 = vld [vmem:[%s1728_s5 + $0x64] ss:$8 sps:$4 sm:$0xff]   ;;  %v1377_v27 = vld [vmem:[%s1728_s5 + $0x60] ss:$8 sps:$4 sm:$0xff]   ;;  %v1379_v29 = vld [vmem:[%s1728_s5 + $0x74] ss:$8 sps:$4 sm:$0xff]  }
  0x57   : > { %v1375_v26 = vld [vmem:[%s1728_s5 + $0x164] ss:$8 sps:$4 sm:$0xff]   ;;  %v1378_v28 = vld [vmem:[%s1728_s5 + $0x160] ss:$8 sps:$4 sm:$0xff]   ;;  %v1381_v30 = vld [vmem:[%s1728_s5 + $0x174] ss:$8 sps:$4 sm:$0xff]  }
  0x58   : > { %963 = vmatpush1.bf16.msra.mxu0 %v1353_v11  ;;  %v1383_v31 = vld [vmem:[%s1728_s5 + $0x70] ss:$8 sps:$4 sm:$0xff]   ;;  %v1385_v33 = vld [vmem:[%s1728_s5 + $0x84] ss:$8 sps:$4 sm:$0xff]   ;;  %v1389_v35 = vld [vmem:[%s1728_s5 + $0x80] ss:$8 sps:$4 sm:$0xff]  }
  0x59   : > { %1004 = vmatpush1.bf16.msra.mxu1 %v1354_v12  ;;  %964 = vmatprep.subr.bf16.mxu0 %v1355_v13  ;;  %v1384_v32 = vld [vmem:[%s1728_s5 + $0x170] ss:$8 sps:$4 sm:$0xff]   ;;  %v1387_v34 = vld [vmem:[%s1728_s5 + $0x184] ss:$8 sps:$4 sm:$0xff]   ;;  %v1390_v36 = vld [vmem:[%s1728_s5 + $0x180] ss:$8 sps:$4 sm:$0xff]  }
  0x5a   : > { %1005 = vmatprep.subr.bf16.mxu1 %v1357_v14  ;;  %v1391_v37 = vld [vmem:[%s1728_s5 + $0x94] ss:$8 sps:$4 sm:$0xff]   ;;  %v1395_v39 = vld [vmem:[%s1728_s5 + $0x90] ss:$8 sps:$4 sm:$0xff]   ;;  %v1397_v41 = vld [vmem:[%s1728_s5 + $0xa4] ss:$8 sps:$4 sm:$0xff]  }
  0x5b   : > { %v1393_v38 = vld [vmem:[%s1728_s5 + $0x194] ss:$8 sps:$4 sm:$0xff]   ;;  %v1396_v40 = vld [vmem:[%s1728_s5 + $0x190] ss:$8 sps:$4 sm:$0xff]   ;;  %v1399_v42 = vld [vmem:[%s1728_s5 + $0x1a4] ss:$8 sps:$4 sm:$0xff]  }
  0x5c   : > { %965 = vmatpush1.bf16.msra.mxu0 %v1359_v15  ;;  %v1401_v43 = vld [vmem:[%s1728_s5 + $0xa0] ss:$8 sps:$4 sm:$0xff]   ;;  %v1403_v45 = vld [vmem:[%s1728_s5 + $0xb4] ss:$8 sps:$4 sm:$0xff]   ;;  %v1407_v50 = vld [vmem:[%s1728_s5 + $0xb0] ss:$8 sps:$4 sm:$0xff]  }
  0x5d   : > { %1006 = vmatpush1.bf16.msra.mxu1 %v1360_v16  ;;  %966 = vmatprep.subr.bf16.mxu0 %v1361_v17  ;;  %v1402_v44 = vld [vmem:[%s1728_s5 + $0x1a0] ss:$8 sps:$4 sm:$0xff]   ;;  %v1405_v46 = vld [vmem:[%s1728_s5 + $0x1b4] ss:$8 sps:$4 sm:$0xff]   ;;  %v1408_v51 = vld [vmem:[%s1728_s5 + $0x1b0] ss:$8 sps:$4 sm:$0xff]  }
  0x5e   : > { %1007 = vmatprep.subr.bf16.mxu1 %v1363_v18  ;;  %v558_v47 = vld [vmem:[%s1714_s26] sm:$0xff]  ;;  %v559_v49 = vld [vmem:[%s1714_s26 + $0x8] sm:$0xff]  ;;  %v1409_v53 = vld [vmem:[%s1728_s5 + $0xc4] ss:$8 sps:$4 sm:$0xff]   ;;  %p1276_p13 = scmp.ne.s32.totalorder %s1475_s14, 8 }
  0x5f   : > { %v1209_v48 = vcombine.high %v558_v47, %v558_v47  ;;  %v1211_v52 = vcombine.high %v559_v49, %v559_v49  ;;  %v1411_v54 = vld [vmem:[%s1728_s5 + $0x1c4] ss:$8 sps:$4 sm:$0xff]   ;;  %v1413_v55 = vld [vmem:[%s1728_s5 + $0xc0] ss:$8 sps:$4 sm:$0xff]   ;;  %v1415_v57 = vld [vmem:[%s1728_s5 + $0xd4] ss:$8 sps:$4 sm:$0xff]   ;;  %v1208_v5 = vcombine.low %v558_v47, %v558_v47  ;;  %v1210_v6 = vcombine.low %v559_v49, %v559_v49 }
  0x60   : > { %967 = vmatpush1.bf16.msra.mxu0 %v1365_v19  ;;  %v1414_v56 = vld [vmem:[%s1728_s5 + $0x1c0] ss:$8 sps:$4 sm:$0xff]   ;;  %v1417_v58 = vld [vmem:[%s1728_s5 + $0x1d4] ss:$8 sps:$4 sm:$0xff]   ;;  %v1419_v59 = vld [vmem:[%s1728_s5 + $0xd0] ss:$8 sps:$4 sm:$0xff]  }
  0x61   : > { %1008 = vmatpush1.bf16.msra.mxu1 %v1366_v20  ;;  %968 = vmatprep.subr.bf16.mxu0 %v1367_v21  ;;  %v1420_v60 = vld [vmem:[%s1728_s5 + $0x1d0] ss:$8 sps:$4 sm:$0xff]   ;;  %v1421_v61 = vld [vmem:[%s1728_s5 + $0xe4] ss:$8 sps:$4 sm:$0xff]   ;;  %v1425_v63 = vld [vmem:[%s1728_s5 + $0xe0] ss:$8 sps:$4 sm:$0xff]   ;;  %v1052_v21 = vlaneseq (!%p1276_p13) }
  0x62   : > { %1009 = vmatprep.subr.bf16.mxu1 %v1369_v22  ;;  %990 = vmatprep.mubr.bf16.mxu0 %v1209_v48  ;;  %v1423_v62 = vld [vmem:[%s1728_s5 + $0x1e4] ss:$8 sps:$4 sm:$0xff]   ;;  %v1426_v0 = vld [vmem:[%s1728_s5 + $0x1e0] ss:$8 sps:$4 sm:$0xff]   ;;  %v1427_v1 = vld [vmem:[%s1728_s5 + $0xf4] ss:$8 sps:$4 sm:$0xff]  }
  0x63   : > { %1031 = vmatprep.mubr.bf16.mxu1 %v1211_v52  ;;  %v1429_v2 = vld [vmem:[%s1728_s5 + $0x1f4] ss:$8 sps:$4 sm:$0xff]   ;;  %v1431_v3 = vld [vmem:[%s1728_s5 + $0xf0] ss:$8 sps:$4 sm:$0xff]   ;;  %v1053_v22 = vshrl.u32 (!%p1276_p13), %v1052_v21, 7 }
  0x64   : > { %969 = vmatpush1.bf16.msra.mxu0 %v1371_v23  ;;  %v1432_v4 = vld [vmem:[%s1728_s5 + $0x1f0] ss:$8 sps:$4 sm:$0xff]  }
  0x65   : > { %1010 = vmatpush1.bf16.msra.mxu1 %v1372_v24  ;;  %970 = vmatprep.subr.bf16.mxu0 %v1373_v25  ;;  %v556_v8 = vld [vmem:[#allocation2] sm:$0xff]  ;;  %v557_v12 = vld [vmem:[#allocation2 + $0x8] sm:$0xff]  ;;  %v1054_v24 = vsub.s32 (!%p1276_p13), 0, %v1053_v22  ;;  %v1058_v25 = vsub.s32 (!%p1276_p13), 1, %v1053_v22 }
  0x66   : > { %1011 = vmatprep.subr.bf16.mxu1 %v1375_v26  ;;  %v1050_v23 = vld [vmem:[%s538_s12] sm:$0x3] (!%p1276_p13) }
  0x68   : > { %971 = vmatpush1.bf16.msra.mxu0 %v1377_v27 }
  0x69   : > { %1012 = vmatpush1.bf16.msra.mxu1 %v1378_v28  ;;  %972 = vmatprep.subr.bf16.mxu0 %v1379_v29  ;;  %v1055_v28 = vrot.slane (!%p1276_p13), %v1050_v23, %v1054_v24  ;;  %v1059_v29 = vrot.slane (!%p1276_p13), %v1050_v23, %v1058_v25 }
  0x6a   : > { %1013 = vmatprep.subr.bf16.mxu1 %v1381_v30 }
  0x6c   : > { %973 = vmatpush1.bf16.msra.mxu0 %v1383_v31 }
  0x6d   : > { %1014 = vmatpush1.bf16.msra.mxu1 %v1384_v32  ;;  %974 = vmatprep.subr.bf16.mxu0 %v1385_v33 }
  0x6e   : > { %1015 = vmatprep.subr.bf16.mxu1 %v1387_v34 }
  0x70   : > { %975 = vmatpush1.bf16.msra.mxu0 %v1389_v35 }
  0x71   : > { %1016 = vmatpush1.bf16.msra.mxu1 %v1390_v36  ;;  %976 = vmatprep.subr.bf16.mxu0 %v1391_v37 }
  0x72   : > { %1017 = vmatprep.subr.bf16.mxu1 %v1393_v38 }
  0x74   : > { %977 = vmatpush1.bf16.msra.mxu0 %v1395_v39 }
  0x75   : > { %1018 = vmatpush1.bf16.msra.mxu1 %v1396_v40  ;;  %978 = vmatprep.subr.bf16.mxu0 %v1397_v41 }
  0x76   : > { %1019 = vmatprep.subr.bf16.mxu1 %v1399_v42 }
  0x78   : > { %979 = vmatpush1.bf16.msra.mxu0 %v1401_v43 }
  0x79   : > { %1020 = vmatpush1.bf16.msra.mxu1 %v1402_v44  ;;  %980 = vmatprep.subr.bf16.mxu0 %v1403_v45 }
  0x7a   : > { %1021 = vmatprep.subr.bf16.mxu1 %v1405_v46 }
  0x7c   : > { %981 = vmatpush1.bf16.msra.mxu0 %v1407_v50 }
  0x7d   : > { %1022 = vmatpush1.bf16.msra.mxu1 %v1408_v51  ;;  %982 = vmatprep.subr.bf16.mxu0 %v1409_v53 }
  0x7e   : > { %1023 = vmatprep.subr.bf16.mxu1 %v1411_v54 }
  0x80   : > { %983 = vmatpush1.bf16.msra.mxu0 %v1413_v55 }
  0x81   : > { %1024 = vmatpush1.bf16.msra.mxu1 %v1414_v56  ;;  %984 = vmatprep.subr.bf16.mxu0 %v1415_v57 }
  0x82   : > { %1025 = vmatprep.subr.bf16.mxu1 %v1417_v58 }
  0x84   : > { %985 = vmatpush1.bf16.msra.mxu0 %v1419_v59 }
  0x85   : > { %1026 = vmatpush1.bf16.msra.mxu1 %v1420_v60  ;;  %986 = vmatprep.subr.bf16.mxu0 %v1421_v61 }
  0x86   : > { %1027 = vmatprep.subr.bf16.mxu1 %v1423_v62 }
  0x88   : > { %987 = vmatpush1.bf16.msra.mxu0 %v1425_v63 }
  0x89   : > { %1028 = vmatpush1.bf16.msra.mxu1 %v1426_v0  ;;  %988 = vmatprep.subr.bf16.mxu0 %v1427_v1 }
  0x8a   : > { %1029 = vmatprep.subr.bf16.mxu1 %v1429_v2 }
  0x8c   : > { %989 = vmatpush1.bf16.msra.mxu0 %v1431_v3 }
  0x8d   : > { %1030 = vmatpush1.bf16.msra.mxu1 %v1432_v4 }
  0x8f   : > { %991 = vmatmul.mubr.bf16.vlgmr.msra.gmra.mrb[0].mxu0 %v1208_v5 }
  0x90   : > { %1032 = vmatmul.mubr.bf16.vlgmr.msra.gmra.mrb[0].mxu1 %v1210_v6 }
 0x162   : > { %v992_v7 = vpop.f32.mrb[0].mxu0 }
 0x163   : > { %v1033_v9 = vpop.f32.mrb[0].mxu1  ;;  %v994_v11 = vpop.f32.mrb[1].mxu0  ;;  %1047 = sbr.rel (%p1276_p13) target bundleno = 374 (0x176), region = 78 }
 0x164   : > { %v1034_v10 = vadd.f32 %v1033_v9, %v992_v7  ;;  %v1035_v13 = vpop.f32.mrb[1].mxu1  ;;  %v996_v15 = vpop.f32.mrb[2].mxu0 }
 0x165   : > { %v1036_v14 = vadd.f32 %v1035_v13, %v994_v11  ;;  %v1037_v16 = vpop.f32.mrb[2].mxu1  ;;  %v997_v18 = vpop.f32.mrb[3].mxu0 }
 0x166   : > { %v1040_v17 = vadd.f32 %v1034_v10, %v556_v8  ;;  %v1038_v19 = vpop.f32.mrb[3].mxu1 }
 0x167   : > { %v1041_v20 = vadd.f32 %v1036_v14, %v557_v12 }
 0x168   : > { %1042 = vst [vmem:[#allocation2] sm:$0xff] %v1040_v17 }
 0x169   : > { %1043 = vst [vmem:[#allocation2 + $0x8] sm:$0xff] %v1041_v20 }
 0x16f   : > { %v1048_v26 = vld [vmem:[#allocation2] sm:$0xff] }
 0x170   : > { %v1049_v27 = vld [vmem:[#allocation2 + $0x8] sm:$0xff]  ;;  %v1062_v30 = vadd.f32 %v1055_v28, %v1048_v26 }
 0x171   : > { %v1063_v31 = vadd.f32 %v1059_v29, %v1049_v27 }
 0x172   : > { %v1064_v32 = vmax.f32 %v1062_v30, 0.0 }
 0x173   : > { %v1065_v33 = vmax.f32 %v1063_v31, 0.0 }
 0x174   : > { %1066 = vst [vmem:[%s1726_s15] sm:$0xff] %v1064_v32 }
 0x175   : > { %1067 = vst [vmem:[%s1726_s15 + $0x8] sm:$0xff] %v1065_v33 }
 0x176 PF: > { %s13_s18 = sadd.s32 1, %s1491_s18   ;;  %s1830_s12 = smov %s1471_s13 }
 0x177   : > { %p10_p0 = scmp.ge.s32.totalorder %s13_s18, 20   ;;  %s1831_s13 = smov %s1565_s25 }
 0x178   : > { %s1832_s14 = smov %s1483_s16  ;;  %s1833_s15 = smov %s1487_s17 }
 0x179   : > { %s1834_s16 = smov %s1837_s19  ;;  %s1835_s17 = smov %s1841_s20 }
 0x17a   :  { %12 = sbr.rel (!%p10_p0) target bundleno = 4 (0x4), region = 119 }

// kernel: st_classifier_forward.41
= control target key start
LH: loop header
LB: loop body
LE: loop exit
PB: predicated region body
PF: predicated region fallthrough
CT: control target
= control target key end

     0   :  { %v845_v39 = vmov 0.0   ;;  %vm846_vm0 = vmmov 0   ;;  %s1067_s1 = inlined_call_operand.vmem [shape: bf16[512,128], index: 1, kind: input, shape index: {}]   ;;  %s1068_s0 = inlined_call_operand.vmem [shape: bf16[8,512], index: 0, kind: input, shape index: {}]   ;;  %s1069_s3 = inlined_call_operand.vmem [shape: bf16[128,128], index: 3, kind: input, shape index: {}]   ;;  %s1070_s5 = inlined_call_operand.vmem [shape: bf16[128,128], index: 5, kind: input, shape index: {}]   ;;  %s1071_s2 = inlined_call_operand.vmem [shape: f32[1,128], index: 2, kind: input, shape index: {}]   ;;  %s1072_s4 = inlined_call_operand.vmem [shape: f32[1,128], index: 4, kind: input, shape index: {}]   ;;  %s1073_s6 = inlined_call_operand.vmem [shape: f32[1,128], index: 6, kind: input, shape index: {}]   ;;  %s1074_s7 = inlined_call_operand.vmem [shape: f32[8,128], index: 7, kind: output, shape index: {}]  }
   0x1   :  { %v789_v0 = vld [vmem:[%s1067_s1 + $0x40] sm:$0xff]   ;;  %v793_v4 = vld [vmem:[%s1067_s1 + $0x48] sm:$0xff]   ;;  %v797_v8 = vld [vmem:[%s1067_s1 + $0x50] sm:$0xff]  }
   0x2   :  { %v790_v1 = vld [vmem:[%s1067_s1 + $0xc0] sm:$0xff]   ;;  %685 = vmatprep.subr.bf16.mxu0 %v789_v0  ;;  %v794_v5 = vld [vmem:[%s1067_s1 + $0xc8] sm:$0xff]   ;;  %v798_v9 = vld [vmem:[%s1067_s1 + $0xd0] sm:$0xff]  }
   0x3   :  { %v791_v2 = vld [vmem:[%s1067_s1] sm:$0xff]   ;;  %707 = vmatprep.subr.bf16.mxu1 %v790_v1  ;;  %v795_v6 = vld [vmem:[%s1067_s1 + $0x8] sm:$0xff]   ;;  %v799_v10 = vld [vmem:[%s1067_s1 + $0x10] sm:$0xff]  }
   0x4   :  { %v792_v3 = vld [vmem:[%s1067_s1 + $0x80] sm:$0xff]   ;;  %686 = vmatpush3.bf16.msra.mxu0 %v791_v2  ;;  %v796_v7 = vld [vmem:[%s1067_s1 + $0x88] sm:$0xff]   ;;  %v800_v11 = vld [vmem:[%s1067_s1 + $0x90] sm:$0xff]  }
   0x5   :  { %708 = vmatpush3.bf16.msra.mxu1 %v792_v3  ;;  %687 = vmatprep.subr.bf16.mxu0 %v793_v4  ;;  %v801_v12 = vld [vmem:[%s1067_s1 + $0x58] sm:$0xff]   ;;  %v805_v16 = vld [vmem:[%s1067_s1 + $0x60] sm:$0xff]   ;;  %v809_v20 = vld [vmem:[%s1067_s1 + $0x68] sm:$0xff]  }
   0x6   :  { %709 = vmatprep.subr.bf16.mxu1 %v794_v5  ;;  %v802_v13 = vld [vmem:[%s1067_s1 + $0xd8] sm:$0xff]   ;;  %v806_v17 = vld [vmem:[%s1067_s1 + $0xe0] sm:$0xff]   ;;  %v810_v21 = vld [vmem:[%s1067_s1 + $0xe8] sm:$0xff]  }
   0x7   :  { %v803_v14 = vld [vmem:[%s1067_s1 + $0x18] sm:$0xff]   ;;  %v807_v18 = vld [vmem:[%s1067_s1 + $0x20] sm:$0xff]   ;;  %v811_v22 = vld [vmem:[%s1067_s1 + $0x28] sm:$0xff]  }
   0x8   :  { %688 = vmatpush3.bf16.msra.mxu0 %v795_v6  ;;  %v804_v15 = vld [vmem:[%s1067_s1 + $0x98] sm:$0xff]   ;;  %v808_v19 = vld [vmem:[%s1067_s1 + $0xa0] sm:$0xff]   ;;  %v812_v23 = vld [vmem:[%s1067_s1 + $0xa8] sm:$0xff]  }
   0x9   :  { %710 = vmatpush3.bf16.msra.mxu1 %v796_v7  ;;  %689 = vmatprep.subr.bf16.mxu0 %v797_v8  ;;  %v813_v24 = vld [vmem:[%s1067_s1 + $0x70] sm:$0xff]   ;;  %v817_v28 = vld [vmem:[%s1067_s1 + $0x78] sm:$0xff]   ;;  %v27_v32 = vld [vmem:[%s1068_s0] sm:$0xff] }
   0xa   :  { %711 = vmatprep.subr.bf16.mxu1 %v798_v9  ;;  %v814_v25 = vld [vmem:[%s1067_s1 + $0xf0] sm:$0xff]   ;;  %v818_v29 = vld [vmem:[%s1067_s1 + $0xf8] sm:$0xff]   ;;  %v28_v33 = vld [vmem:[%s1068_s0 + $0x8] sm:$0xff]  ;;  %v631_v34 = vcombine.low %v27_v32, %v27_v32  ;;  %v632_v35 = vcombine.high %v27_v32, %v27_v32 }
   0xb   :  { %v815_v26 = vld [vmem:[%s1067_s1 + $0x30] sm:$0xff]   ;;  %v819_v30 = vld [vmem:[%s1067_s1 + $0x38] sm:$0xff]   ;;  %v633_v36 = vcombine.low %v28_v33, %v28_v33  ;;  %v634_v37 = vcombine.high %v28_v33, %v28_v33  ;;  %v825_v38 = vld [vmem:[%s1069_s3] sm:$0xff]  }
   0xc   :  { %690 = vmatpush3.bf16.msra.mxu0 %v799_v10  ;;  %v816_v27 = vld [vmem:[%s1067_s1 + $0xb0] sm:$0xff]   ;;  %v820_v31 = vld [vmem:[%s1067_s1 + $0xb8] sm:$0xff]   ;;  %338 = vmatprep.mubr.bf16.mxu0 %v632_v35  ;;  %v826_v40 = vld [vmem:[%s1069_s3 + $0x8] sm:$0xff]  }
   0xd   :  { %712 = vmatpush3.bf16.msra.mxu1 %v800_v11  ;;  %691 = vmatprep.subr.bf16.mxu0 %v801_v12  ;;  %v827_v41 = vld [vmem:[%s1069_s3 + $0x10] sm:$0xff]   ;;  %v828_v42 = vld [vmem:[%s1069_s3 + $0x18] sm:$0xff]   ;;  %v829_v43 = vld [vmem:[%s1069_s3 + $0x20] sm:$0xff]  }
   0xe   :  { %713 = vmatprep.subr.bf16.mxu1 %v802_v13  ;;  %378 = vmatprep.mubr.bf16.mxu1 %v634_v37  ;;  %v830_v44 = vld [vmem:[%s1069_s3 + $0x28] sm:$0xff]   ;;  %v831_v45 = vld [vmem:[%s1069_s3 + $0x30] sm:$0xff]   ;;  %v832_v46 = vld [vmem:[%s1069_s3 + $0x38] sm:$0xff]  }
   0xf   :  { %v833_v47 = vld [vmem:[%s1070_s5] sm:$0xff]   ;;  %v834_v48 = vld [vmem:[%s1070_s5 + $0x8] sm:$0xff]   ;;  %v835_v49 = vld [vmem:[%s1070_s5 + $0x10] sm:$0xff]  }
  0x10   :  { %692 = vmatpush3.bf16.msra.mxu0 %v803_v14  ;;  %v836_v50 = vld [vmem:[%s1070_s5 + $0x18] sm:$0xff]   ;;  %v837_v51 = vld [vmem:[%s1070_s5 + $0x20] sm:$0xff]   ;;  %v838_v52 = vld [vmem:[%s1070_s5 + $0x28] sm:$0xff]   ;;  %v612_v14 = vlaneseq }
  0x11   :  { %714 = vmatpush3.bf16.msra.mxu1 %v804_v15  ;;  %693 = vmatprep.subr.bf16.mxu0 %v805_v16  ;;  %v630_v55 = vld [vmem:[%s1071_s2] ss:$0 sm:$0xff]  ;;  %v839_v4 = vld [vmem:[%s1070_s5 + $0x30] sm:$0xff]   ;;  %v840_v5 = vld [vmem:[%s1070_s5 + $0x38] sm:$0xff]  }
  0x12   :  { %715 = vmatprep.subr.bf16.mxu1 %v806_v17  ;;  %v667_v6 = vld [vmem:[%s1072_s4] ss:$0 sm:$0xff]  ;;  %v613_v15 = vand.u32 127, %v612_v14 }
  0x13   :  { %v676_v16 = vld [vmem:[%s1073_s6] ss:$0 sm:$0xff] }
  0x14   :  { %694 = vmatpush3.bf16.msra.mxu0 %v807_v18  ;;  %vm614_vm1 = vcmp.lt.s32.totalorder %v613_v15, 10 }
  0x15   :  { %716 = vmatpush3.bf16.msra.mxu1 %v808_v19  ;;  %695 = vmatprep.subr.bf16.mxu0 %v809_v20 }
  0x16   :  { %717 = vmatprep.subr.bf16.mxu1 %v810_v21 }
  0x18   :  { %696 = vmatpush3.bf16.msra.mxu0 %v811_v22 }
  0x19   :  { %718 = vmatpush3.bf16.msra.mxu1 %v812_v23  ;;  %697 = vmatprep.subr.bf16.mxu0 %v813_v24 }
  0x1a   :  { %719 = vmatprep.subr.bf16.mxu1 %v814_v25 }
  0x1c   :  { %698 = vmatpush3.bf16.msra.mxu0 %v815_v26 }
  0x1d   :  { %720 = vmatpush3.bf16.msra.mxu1 %v816_v27  ;;  %699 = vmatprep.subr.bf16.mxu0 %v817_v28 }
  0x1e   :  { %721 = vmatprep.subr.bf16.mxu1 %v818_v29 }
  0x20   :  { %700 = vmatpush3.bf16.msra.mxu0 %v819_v30 }
  0x21   :  { %722 = vmatpush3.bf16.msra.mxu1 %v820_v31  ;;  %747 = vmatprep.subr.bf16.mxu0 %v845_v39 }
  0x22   :  { %767 = vmatprep.subr.bf16.mxu1 %v845_v39 }
  0x23   :  { %339 = vmatmul.mubr.bf16.vlgmr.msra.gmra.mrb[0].mxu0 %v631_v34 }
  0x24   :  { %379 = vmatmul.mubr.bf16.vlgmr.msra.gmra.mrb[0].mxu1 %v633_v36  ;;  %748 = vmatpush3.bf16.msra.mxu0 %v825_v38 }
  0x25   :  { %749 = vmatprep.subr.bf16.mxu0 %v845_v39  ;;  %763 = vmatprep.mubr.msk.bf16.mxu0 %vm846_vm0, %v845_v39 }
  0x26   :  { %783 = vmatprep.mubr.msk.bf16.mxu1 %vm846_vm0, %v845_v39  ;;  %768 = vmatpush3.bf16.msra.mxu1 %v833_v47 }
  0x27   :  { %769 = vmatprep.subr.bf16.mxu1 %v845_v39 }
  0x28   :  { %750 = vmatpush3.bf16.msra.mxu0 %v826_v40 }
  0x29   :  { %751 = vmatprep.subr.bf16.mxu0 %v845_v39 }
  0x2a   :  { %770 = vmatpush3.bf16.msra.mxu1 %v834_v48 }
  0x2b   :  { %771 = vmatprep.subr.bf16.mxu1 %v845_v39 }
  0x2c   :  { %752 = vmatpush3.bf16.msra.mxu0 %v827_v41 }
  0x2d   :  { %753 = vmatprep.subr.bf16.mxu0 %v845_v39 }
  0x2e   :  { %772 = vmatpush3.bf16.msra.mxu1 %v835_v49 }
  0x2f   :  { %773 = vmatprep.subr.bf16.mxu1 %v845_v39 }
  0x30   :  { %754 = vmatpush3.bf16.msra.mxu0 %v828_v42 }
  0x31   :  { %755 = vmatprep.subr.bf16.mxu0 %v845_v39 }
  0x32   :  { %774 = vmatpush3.bf16.msra.mxu1 %v836_v50 }
  0x33   :  { %775 = vmatprep.subr.bf16.mxu1 %v845_v39 }
  0x34   :  { %756 = vmatpush3.bf16.msra.mxu0 %v829_v43 }
  0x35   :  { %757 = vmatprep.subr.bf16.mxu0 %v845_v39 }
  0x36   :  { %776 = vmatpush3.bf16.msra.mxu1 %v837_v51 }
  0x37   :  { %777 = vmatprep.subr.bf16.mxu1 %v845_v39 }
  0x38   :  { %758 = vmatpush3.bf16.msra.mxu0 %v830_v44 }
  0x39   :  { %759 = vmatprep.subr.bf16.mxu0 %v845_v39 }
  0x3a   :  { %778 = vmatpush3.bf16.msra.mxu1 %v838_v52 }
  0x3b   :  { %779 = vmatprep.subr.bf16.mxu1 %v845_v39 }
  0x3c   :  { %760 = vmatpush3.bf16.msra.mxu0 %v831_v45 }
  0x3d   :  { %761 = vmatprep.subr.bf16.mxu0 %v845_v39 }
  0x3e   :  { %780 = vmatpush3.bf16.msra.mxu1 %v839_v4 }
  0x3f   :  { %781 = vmatprep.subr.bf16.mxu1 %v845_v39 }
  0x40   :  { %762 = vmatpush3.bf16.msra.mxu0 %v832_v46 }
  0x42   :  { %782 = vmatpush3.bf16.msra.mxu1 %v840_v5 }
  0xf6   :  { %v701_v53 = vpop.f32.mrb[0].mxu0 }
  0xf7   :  { %v723_v54 = vpop.f32.mrb[0].mxu1  ;;  %v702_v56 = vpop.f32.mrb[1].mxu0 }
  0xf8   :  { %v724_v57 = vpop.f32.mrb[1].mxu1  ;;  %v703_v58 = vadd.f32 %v702_v56, %v701_v53  ;;  %v704_v60 = vpop.f32.mrb[2].mxu0 }
  0xf9   :  { %v725_v59 = vadd.f32 %v724_v57, %v723_v54  ;;  %v726_v61 = vpop.f32.mrb[2].mxu1  ;;  %v705_v62 = vpop.f32.mrb[3].mxu0 }
  0xfa   :  { %v727_v63 = vpop.f32.mrb[3].mxu1  ;;  %v341_v0 = vadd.f32 %v703_v58, %v630_v55 }
  0xfc   :  { %v381_v1 = vadd.f32 %v725_v59, %v341_v0 }
  0xfe   :  { %v386_v2 = vmax.f32 %v381_v1, 0.0 }
 0x100   :  { %v387_v3 = vpack.c.bf16 %v386_v2, %v386_v2 }
 0x102   :  { %764 = vmatmul.mubr.bf16.vlgmr.msra.gmra.mrb[4].mxu0 %v387_v3 }
 0x1d5   :  { %v493_v7 = vpop.f32.mrb[4].mxu0 }
 0x1d6   :  { %v494_v8 = vadd.f32 %v667_v6, %v493_v7  ;;  %v765_v9 = vpop.f32.mrb[5].mxu0 }
 0x1d7   :  { %v496_v10 = vpop.f32.mrb[6].mxu0 }
 0x1d8   :  { %v499_v11 = vmax.f32 %v494_v8, 0.0  ;;  %v766_v12 = vpop.f32.mrb[7].mxu0 }
 0x1da   :  { %v500_v13 = vpack.c.bf16 %v499_v11, %v499_v11 }
 0x1dc   :  { %784 = vmatmul.mubr.bf16.vlgmr.msra.gmra.mrb[4].mxu1 %v500_v13 }
 0x2af   :  { %v606_v17 = vpop.f32.mrb[4].mxu1 }
 0x2b0   :  { %v607_v18 = vadd.f32 %v676_v16, %v606_v17  ;;  %v785_v19 = vpop.f32.mrb[5].mxu1 }
 0x2b1   :  { %v609_v20 = vpop.f32.mrb[6].mxu1 }
 0x2b2   :  { %v786_v21 = vpop.f32.mrb[7].mxu1  ;;  %v615_v22 = vsel %vm614_vm1, %v607_v18, -1e+30 }
 0x2b3   :  { %616 = vmax.xlane.f32.xlu0 %v615_v22 }
 0x340   :  { %v617_v23 = vpop.xlane.xlu0 %616 }
 0x341   :  { %v618_v24 = vsub.f32 %v615_v22, %v617_v23 }
 0x343   :  { %v619_v25 = vmul.f32 1.442695, %v618_v24 }
 0x345   :  { %841 = vpow2.f32 %v619_v25 }
 0x34f   :  { %v842_v26 = vpop.eup %841 }
 0x350   :  { %621 = vadd.xlane.f32.xlu0 %v842_v26 }
 0x3dd   :  { %v622_v27 = vpop.xlane.xlu0 %621 }
 0x3de   :  { %843 = vrcp.f32 %v622_v27 }
 0x3e8   :  { %v844_v28 = vpop.eup %843 }
 0x3e9   :  { %v624_v29 = vmul.f32 %v844_v28, %v842_v26 }
 0x3eb   :  { %625 = vst [vmem:[%s1074_s7] sm:$0xff] %v624_v29 }

</bundles_post_ra>
